<compile_context>
chip_gen: v6e
topology: v6e:2x2x1
jax: 0.10.0
libtpu: 0.0.40
codegen_flags: <defaults>
</compile_context>

<pallas_src>
import functools

import jax
import jax.numpy as jnp
from jax.experimental import pallas as pl
from jax.experimental.pallas import tpu as pltpu

# Keep reference (XLA) matmuls in full f32 so the comparison against the
# Mosaic f32 matmuls is tight.
jax.config.update("jax_default_matmul_precision", "float32")

# Small, module-consistent hyperparameters (original: 512/64/64/8/2048).
D_MODEL = 32
D_K = 8
D_V = 8
H = 4
D_FF = 64
LN_EPS = 1e-5


# --------------------------- in-kernel helpers ---------------------------

def _layer_norm(x, gamma, beta):
    mu = jnp.mean(x, axis=-1, keepdims=True)
    var = jnp.mean((x - mu) ** 2, axis=-1, keepdims=True)
    return (x - mu) * jax.lax.rsqrt(var + LN_EPS) * gamma + beta


def _dot(a, b):
    return jnp.dot(a, b, preferred_element_type=jnp.float32)


def _bmm_nt(a, b):
    # (B, M, K) x (B, N, K) -> (B, M, N)   (batched, contraction over last dims)
    return jax.lax.dot_general(a, b, (((2,), (2,)), ((0,), (0,))),
                               preferred_element_type=jnp.float32)


def _bmm(a, b):
    # (B, M, K) x (B, K, N) -> (B, M, N)
    return jax.lax.dot_general(a, b, (((2,), (1,)), ((0,), (0,))),
                               preferred_element_type=jnp.float32)


def _attention(q2, k2, v2, wo, bo, *, b, nq, nk, h, d_k, d_v):
    """softmax(Q K^T / sqrt(d_k)) V over h heads, then the fc_o projection.

    q2: (b*nq, h*d_k)   k2: (b*nk, h*d_k)   v2: (b*nk, h*d_v)
    wo: (h*d_v, d_o)    bo: (1, d_o)
    """
    d_o = wo.shape[1]
    # Leading-dim splits only (lane dim untouched) -> layout-preserving.
    q3 = q2.reshape(b, nq, h * d_k)
    k3 = k2.reshape(b, nk, h * d_k)
    v3 = v2.reshape(b, nk, h * d_v)
    scale = 1.0 / (float(d_k) ** 0.5)
    out = jnp.zeros((b * nq, d_o), jnp.float32)
    for hi in range(h):                               # static unrolled head loop
        qh = q3[:, :, hi * d_k:(hi + 1) * d_k]
        kh = k3[:, :, hi * d_k:(hi + 1) * d_k]
        vh = v3[:, :, hi * d_v:(hi + 1) * d_v]
        s = _bmm_nt(qh, kh) * scale                   # (b, nq, nk)
        # TODO(synk): mask_self_att / mask_enc_att are None in this config; an
        # additive -inf mask would be applied to `s` here if provided.
        s = s - jnp.max(s, axis=-1, keepdims=True)
        p = jnp.exp(s)
        p = p * pl.reciprocal(jnp.sum(p, axis=-1, keepdims=True), approx=True)
        oh = _bmm(p, vh)                              # (b, nq, d_v)
        # Accumulate the output projection head-by-head (no lane concat).
        out = out + _dot(oh.reshape(b * nq, d_v), wo[hi * d_v:(hi + 1) * d_v, :])
    return out + bo


# ------------------------------- kernel ----------------------------------

def _decoder_layer_kernel(oq_ref, enc_ref, pos_ref, pe_ref,
                          watt_ref, batt_ref, ln_ref, wf1_ref, wf2_ref, bff_ref,
                          out_ref, *, b, nq, nk, h, d_k, d_v):
    hdk = h * d_k
    hdv = h * d_v

    oq = oq_ref[...]        # (b*nq, d)
    enc = enc_ref[...]      # (b*nk, d)
    pos = pos_ref[...]      # (b*nk, d)
    pe = pe_ref[...]        # (b*nq, d)
    ln = ln_ref[...]        # (10, d): [gm1,bm1, gl1,bl1, gm2,bm2, gl2,bl2, gf,bf]
    bff = bff_ref[...]      # (1, d_ff + d)

    w1 = watt_ref[0]        # (d, 4d) = [Wq|Wk|Wv|Wo]  self-attention
    b1 = batt_ref[0]        # (1, 4d)
    w2 = watt_ref[1]        # encoder attention
    b2 = batt_ref[1]

    # ---- self attention block ----
    q_in = oq + pe
    # Q and K share q_in -> fused projection; V projects object_query.
    qk = _dot(q_in, w1[:, :2 * hdk]) + b1[:, :2 * hdk]
    v1 = _dot(oq, w1[:, 2 * hdk:2 * hdk + hdv]) + b1[:, 2 * hdk:2 * hdk + hdv]
    a1 = _attention(qk[:, :hdk], qk[:, hdk:2 * hdk], v1,
                    w1[:, 2 * hdk + hdv:], b1[:, 2 * hdk + hdv:],
                    b=b, nq=nq, nk=nq, h=h, d_k=d_k, d_v=d_v)
    mha1 = _layer_norm(q_in + a1, ln[0:1], ln[1:2])   # LN inside MultiHeadAttention
    s = _layer_norm(oq + mha1, ln[2:3], ln[3:4])      # decoder lnorm1
    s2 = s + pe

    # ---- encoder attention block ----
    k_in = enc + pos
    q2p = _dot(s2, w2[:, :hdk]) + b2[:, :hdk]
    k2p = _dot(k_in, w2[:, hdk:2 * hdk]) + b2[:, hdk:2 * hdk]
    v2p = _dot(enc, w2[:, 2 * hdk:2 * hdk + hdv]) + b2[:, 2 * hdk:2 * hdk + hdv]
    a2 = _attention(q2p, k2p, v2p,
                    w2[:, 2 * hdk + hdv:], b2[:, 2 * hdk + hdv:],
                    b=b, nq=nq, nk=nk, h=h, d_k=d_k, d_v=d_v)
    mha2 = _layer_norm(s2 + a2, ln[4:5], ln[5:6])     # LN inside MultiHeadAttention
    e = _layer_norm(s2 + mha2, ln[6:7], ln[7:8])      # decoder lnorm2

    # ---- position-wise feed forward ----
    d_ff = wf1_ref.shape[1]
    hdn = jnp.maximum(_dot(e, wf1_ref[...]) + bff[:, :d_ff], 0.0)
    ff = _dot(hdn, wf2_ref[...]) + bff[:, d_ff:]
    y = _layer_norm(e + ff, ln[8:9], ln[9:10])

    out_ref[...] = y.astype(out_ref.dtype)


# ------------------------------ wrapper -----------------------------------

@jax.jit
def decoder_layer_box(object_query, enc_output, pos, pos_emb, packed):
    B, NQ, D = object_query.shape
    NK = enc_output.shape[1]
    w_att, b_att, ln, wf1, wf2, b_ff = packed
    kernel = functools.partial(_decoder_layer_kernel, b=B, nq=NQ, nk=NK,
                               h=H, d_k=D_K, d_v=D_V)
    vmem = pl.BlockSpec(memory_space=pltpu.MemorySpace.VMEM)

    out2 = pl.pallas_call(
        kernel,
        out_shape=jax.ShapeDtypeStruct((B * NQ, D), object_query.dtype),
        in_specs=[vmem] * 10,
        out_specs=vmem,
    )(object_query.reshape(B * NQ, D),
      enc_output.reshape(B * NK, D),
      pos.reshape(B * NK, D),
      pos_emb.reshape(B * NQ, D),
      w_att, b_att, ln, wf1, wf2, b_ff)
    return out2.reshape(B, NQ, D)


# --------------------------- parameter handling ----------------------------

def init_params(key):
    """Returns the 30 'PyTorch-layout' parameters used by the reference."""
    def lin(k, din, dout):
        k1, k2 = jax.random.split(k)
        w = jax.random.normal(k1, (din, dout), jnp.float32) / jnp.sqrt(float(din))
        b = 0.02 * jax.random.normal(k2, (1, dout), jnp.float32)
        return w, b

    def ln(k, d):
        k1, k2 = jax.random.split(k)
        g = 1.0 + 0.1 * jax.random.normal(k1, (1, d), jnp.float32)
        b = 0.1 * jax.random.normal(k2, (1, d), jnp.float32)
        return g, b

    keys = jax.random.split(key, 16)
    params = []
    mha_dims = [(D_MODEL, H * D_K), (D_MODEL, H * D_K),
                (D_MODEL, H * D_V), (H * D_V, D_MODEL)]
    for i, (din, dout) in enumerate(mha_dims):        # self-att fc_q/fc_k/fc_v/fc_o
        params += list(lin(keys[i], din, dout))
    params += list(ln(keys[4], D_MODEL))              # MHA1 layer_norm
    params += list(ln(keys[5], D_MODEL))              # decoder lnorm1
    for i, (din, dout) in enumerate(mha_dims):        # enc-att fc_q/fc_k/fc_v/fc_o
        params += list(lin(keys[6 + i], din, dout))
    params += list(ln(keys[10], D_MODEL))             # MHA2 layer_norm
    params += list(ln(keys[11], D_MODEL))             # decoder lnorm2
    params += list(lin(keys[12], D_MODEL, D_FF))      # PWFF fc1
    params += list(lin(keys[13], D_FF, D_MODEL))      # PWFF fc2
    params += list(ln(keys[14], D_MODEL))             # PWFF layer_norm
    return params


def pack_params(params):
    """Host-side packing of the 30 params into 6 arrays for the kernel."""
    (wq1, bq1, wk1, bk1, wv1, bv1, wo1, bo1, gm1, bm1,
     gl1, bl1,
     wq2, bq2, wk2, bk2, wv2, bv2, wo2, bo2, gm2, bm2,
     gl2, bl2,
     wf1, bf1, wf2, bf2, gf, betaf) = params
    w_att = jnp.stack([jnp.concatenate([wq1, wk1, wv1, wo1], axis=1),
                       jnp.concatenate([wq2, wk2, wv2, wo2], axis=1)])   # (2,32,128)
    b_att = jnp.stack([jnp.concatenate([bq1, bk1, bv1, bo1], axis=1),
                       jnp.concatenate([bq2, bk2, bv2, bo2], axis=1)])   # (2,1,128)
    ln = jnp.concatenate([gm1, bm1, gl1, bl1, gm2, bm2, gl2, bl2, gf, betaf],
                         axis=0)                                         # (10,32)
    b_ff = jnp.concatenate([bf1, bf2], axis=1)                           # (1,96)
    return (w_att, b_att, ln, wf1, wf2, b_ff)


# ---------------------------- pure-JAX reference ---------------------------

def reference(object_query, enc_output, pos, pos_emb, params):
    (wq1, bq1, wk1, bk1, wv1, bv1, wo1, bo1, gm1, bm1,
     gl1, bl1,
     wq2, bq2, wk2, bk2, wv2, bv2, wo2, bo2, gm2, bm2,
     gl2, bl2,
     wf1, bf1, wf2, bf2, gf, betaf) = params

    def ln(x, g, b):
        mu = jnp.mean(x, -1, keepdims=True)
        var = jnp.mean((x - mu) ** 2, -1, keepdims=True)
        return (x - mu) / jnp.sqrt(var + LN_EPS) * g + b

    def sdpa(qi, ki, vi, wq, bq, wk, bk, wv, bv, wo, bo):
        B, nq, _ = qi.shape
        nk = ki.shape[1]
        q = (qi @ wq + bq).reshape(B, nq, H, D_K).transpose(0, 2, 1, 3)
        k = (ki @ wk + bk).reshape(B, nk, H, D_K).transpose(0, 2, 3, 1)
        v = (vi @ wv + bv).reshape(B, nk, H, D_V).transpose(0, 2, 1, 3)
        att = jax.nn.softmax((q @ k) / (float(D_K) ** 0.5), axis=-1)
        o = (att @ v).transpose(0, 2, 1, 3).reshape(B, nq, H * D_V)
        return o @ wo + bo

    qk = object_query + pos_emb
    a1 = sdpa(qk, qk, object_query, wq1, bq1, wk1, bk1, wv1, bv1, wo1, bo1)
    mha1 = ln(qk + a1, gm1, bm1)
    s = ln(object_query + mha1, gl1, bl1)
    s2 = s + pos_emb
    a2 = sdpa(s2, enc_output + pos, enc_output,
              wq2, bq2, wk2, bk2, wv2, bv2, wo2, bo2)
    mha2 = ln(s2 + a2, gm2, bm2)
    e = ln(s2 + mha2, gl2, bl2)
    ff = jnp.maximum(e @ wf1 + bf1, 0.0) @ wf2 + bf2
    return ln(e + ff, gf, betaf)


# --------------------------------- main ------------------------------------

if __name__ == "__main__":
    key = jax.random.PRNGKey(0)
    kp, k1, k2, k3, k4 = jax.random.split(key, 5)
    params = init_params(kp)
    packed = pack_params(params)

    B, NQ, NK = 2, 8, 16
    object_query = jax.random.normal(k1, (B, NQ, D_MODEL), jnp.float32)
    enc_output = jax.random.normal(k2, (B, NK, D_MODEL), jnp.float32)
    pos = jax.random.normal(k3, (B, NK, D_MODEL), jnp.float32)
    pos_emb = jax.random.normal(k4, (B, NQ, D_MODEL), jnp.float32)

    out = decoder_layer_box(object_query, enc_output, pos, pos_emb, packed)
    out = jax.block_until_ready(out)

    ref = reference(object_query, enc_output, pos, pos_emb, params)
    max_err = float(jnp.max(jnp.abs(out - ref)))
    # 2e-3 tolerance covers the approximate (EUP) softmax reciprocal; all other
    # math is f32 and matches the reference to ~1e-6.
    assert jnp.allclose(out, ref, atol=2e-3, rtol=2e-3), f"max_err={max_err}"
    print("KERNEL_OK")
</pallas_src>

<mosaic_0001>
module attributes {stable_mosaic.version = 11 : i64} {
  func.func @_decoder_layer_kernel(%arg0: memref<16x32xf32, #tpu.memory_space<vmem>>, %arg1: memref<32x32xf32, #tpu.memory_space<vmem>>, %arg2: memref<32x32xf32, #tpu.memory_space<vmem>>, %arg3: memref<16x32xf32, #tpu.memory_space<vmem>>, %arg4: memref<2x32x128xf32, #tpu.memory_space<vmem>>, %arg5: memref<2x1x128xf32, #tpu.memory_space<vmem>>, %arg6: memref<10x32xf32, #tpu.memory_space<vmem>>, %arg7: memref<32x64xf32, #tpu.memory_space<vmem>>, %arg8: memref<64x32xf32, #tpu.memory_space<vmem>>, %arg9: memref<1x96xf32, #tpu.memory_space<vmem>>, %arg10: memref<16x32xf32, #tpu.memory_space<vmem>>) attributes {dimension_semantics = [], scalar_prefetch = 0 : i64, scratch_operands = 0 : i64, tpu.core_type = #tpu.core_type<tc>} {
    %c0 = arith.constant 0 : index
    %c0_0 = arith.constant 0 : index
    %0 = vector.load %arg0[%c0, %c0_0] : memref<16x32xf32, #tpu.memory_space<vmem>>, vector<16x32xf32>
    %c0_1 = arith.constant 0 : index
    %c0_2 = arith.constant 0 : index
    %1 = vector.load %arg1[%c0_1, %c0_2] : memref<32x32xf32, #tpu.memory_space<vmem>>, vector<32x32xf32>
    %c0_3 = arith.constant 0 : index
    %c0_4 = arith.constant 0 : index
    %2 = vector.load %arg2[%c0_3, %c0_4] : memref<32x32xf32, #tpu.memory_space<vmem>>, vector<32x32xf32>
    %c0_5 = arith.constant 0 : index
    %c0_6 = arith.constant 0 : index
    %3 = vector.load %arg3[%c0_5, %c0_6] : memref<16x32xf32, #tpu.memory_space<vmem>>, vector<16x32xf32>
    %c0_7 = arith.constant 0 : index
    %c0_8 = arith.constant 0 : index
    %4 = vector.load %arg6[%c0_7, %c0_8] : memref<10x32xf32, #tpu.memory_space<vmem>>, vector<10x32xf32>
    %c0_9 = arith.constant 0 : index
    %c0_10 = arith.constant 0 : index
    %5 = vector.load %arg9[%c0_9, %c0_10] : memref<1x96xf32, #tpu.memory_space<vmem>>, vector<1x96xf32>
    %c0_11 = arith.constant 0 : index
    %c0_12 = arith.constant 0 : index
    %c0_13 = arith.constant 0 : index
    %6 = vector.load %arg4[%c0_11, %c0_12, %c0_13] : memref<2x32x128xf32, #tpu.memory_space<vmem>>, vector<1x32x128xf32>
    %7 = vector.shape_cast %6 : vector<1x32x128xf32> to vector<32x128xf32>
    %c0_14 = arith.constant 0 : index
    %c0_15 = arith.constant 0 : index
    %c0_16 = arith.constant 0 : index
    %8 = vector.load %arg5[%c0_14, %c0_15, %c0_16] : memref<2x1x128xf32, #tpu.memory_space<vmem>>, vector<1x1x128xf32>
    %9 = vector.shape_cast %8 : vector<1x1x128xf32> to vector<1x128xf32>
    %c1 = arith.constant 1 : index
    %c0_17 = arith.constant 0 : index
    %c0_18 = arith.constant 0 : index
    %10 = vector.load %arg4[%c1, %c0_17, %c0_18] : memref<2x32x128xf32, #tpu.memory_space<vmem>>, vector<1x32x128xf32>
    %11 = vector.shape_cast %10 : vector<1x32x128xf32> to vector<32x128xf32>
    %c1_19 = arith.constant 1 : index
    %c0_20 = arith.constant 0 : index
    %c0_21 = arith.constant 0 : index
    %12 = vector.load %arg5[%c1_19, %c0_20, %c0_21] : memref<2x1x128xf32, #tpu.memory_space<vmem>>, vector<1x1x128xf32>
    %13 = vector.shape_cast %12 : vector<1x1x128xf32> to vector<1x128xf32>
    %14 = arith.addf %0, %3 : vector<16x32xf32>
    %15 = vector.extract_strided_slice %7 {offsets = [0, 0], sizes = [32, 64], strides = [1, 1]} : vector<32x128xf32> to vector<32x64xf32>
    %cst = arith.constant dense<0.000000e+00> : vector<16x64xf32>
    %16 = tpu.matmul %14, %15, %cst {dimension_numbers = #tpu.dot_dimension_numbers<[1], [0], [0], [1], [0, 0, 1, 1], [], []>, precision = #tpu.contract_precision<fp32>} : vector<16x32xf32>, vector<32x64xf32>, vector<16x64xf32> -> vector<16x64xf32>
    %17 = vector.extract_strided_slice %9 {offsets = [0, 0], sizes = [1, 64], strides = [1, 1]} : vector<1x128xf32> to vector<1x64xf32>
    %18 = vector.broadcast %17 : vector<1x64xf32> to vector<16x64xf32>
    %19 = arith.addf %16, %18 : vector<16x64xf32>
    %20 = vector.extract_strided_slice %7 {offsets = [0, 64], sizes = [32, 32], strides = [1, 1]} : vector<32x128xf32> to vector<32x32xf32>
    %cst_22 = arith.constant dense<0.000000e+00> : vector<16x32xf32>
    %21 = tpu.matmul %0, %20, %cst_22 {dimension_numbers = #tpu.dot_dimension_numbers<[1], [0], [0], [1], [0, 0, 1, 1], [], []>, precision = #tpu.contract_precision<fp32>} : vector<16x32xf32>, vector<32x32xf32>, vector<16x32xf32> -> vector<16x32xf32>
    %22 = vector.extract_strided_slice %9 {offsets = [0, 64], sizes = [1, 32], strides = [1, 1]} : vector<1x128xf32> to vector<1x32xf32>
    %23 = vector.broadcast %22 : vector<1x32xf32> to vector<16x32xf32>
    %24 = arith.addf %21, %23 : vector<16x32xf32>
    %25 = vector.extract_strided_slice %19 {offsets = [0, 0], sizes = [16, 32], strides = [1, 1]} : vector<16x64xf32> to vector<16x32xf32>
    %26 = vector.extract_strided_slice %19 {offsets = [0, 32], sizes = [16, 32], strides = [1, 1]} : vector<16x64xf32> to vector<16x32xf32>
    %27 = vector.extract_strided_slice %7 {offsets = [0, 96], sizes = [32, 32], strides = [1, 1]} : vector<32x128xf32> to vector<32x32xf32>
    %28 = vector.extract_strided_slice %9 {offsets = [0, 96], sizes = [1, 32], strides = [1, 1]} : vector<1x128xf32> to vector<1x32xf32>
    %29 = vector.shape_cast %25 : vector<16x32xf32> to vector<2x8x32xf32>
    %30 = vector.shape_cast %26 : vector<16x32xf32> to vector<2x8x32xf32>
    %31 = vector.shape_cast %24 : vector<16x32xf32> to vector<2x8x32xf32>
    %cst_23 = arith.constant 0.000000e+00 : f32
    %32 = vector.broadcast %cst_23 : f32 to vector<16x32xf32>
    %33 = vector.extract_strided_slice %29 {offsets = [0, 0, 0], sizes = [2, 8, 8], strides = [1, 1, 1]} : vector<2x8x32xf32> to vector<2x8x8xf32>
    %34 = vector.extract_strided_slice %30 {offsets = [0, 0, 0], sizes = [2, 8, 8], strides = [1, 1, 1]} : vector<2x8x32xf32> to vector<2x8x8xf32>
    %35 = vector.extract_strided_slice %31 {offsets = [0, 0, 0], sizes = [2, 8, 8], strides = [1, 1, 1]} : vector<2x8x32xf32> to vector<2x8x8xf32>
    %cst_24 = arith.constant dense<0.000000e+00> : vector<2x8x8xf32>
    %36 = tpu.matmul %33, %34, %cst_24 {dimension_numbers = #tpu.dot_dimension_numbers<[2], [2], [1], [1], [0, 0, 0, 1, 1, 1], [0], [0]>, precision = #tpu.contract_precision<fp32>} : vector<2x8x8xf32>, vector<2x8x8xf32>, vector<2x8x8xf32> -> vector<2x8x8xf32>
    %cst_25 = arith.constant 0.353553385 : f32
    %37 = vector.broadcast %cst_25 : f32 to vector<2x8x8xf32>
    %38 = arith.mulf %36, %37 : vector<2x8x8xf32>
    %cst_26 = arith.constant dense<0xFF800000> : vector<2x8xf32>
    %39 = vector.multi_reduction <maximumf>, %38, %cst_26 [2] : vector<2x8x8xf32> to vector<2x8xf32>
    %40 = vector.shape_cast %39 : vector<2x8xf32> to vector<2x8x1xf32>
    %41 = vector.broadcast %40 : vector<2x8x1xf32> to vector<2x8x8xf32>
    %42 = arith.subf %38, %41 : vector<2x8x8xf32>
    %43 = math.exp %42 : vector<2x8x8xf32>
    %cst_27 = arith.constant dense<0.000000e+00> : vector<2x8xf32>
    %44 = vector.multi_reduction <add>, %43, %cst_27 [2] : vector<2x8x8xf32> to vector<2x8xf32>
    %45 = vector.shape_cast %44 : vector<2x8xf32> to vector<2x8x1xf32>
    %46 = tpu.reciprocal %45 {approx = true} : vector<2x8x1xf32> -> vector<2x8x1xf32>
    %47 = vector.broadcast %46 : vector<2x8x1xf32> to vector<2x8x8xf32>
    %48 = arith.mulf %43, %47 : vector<2x8x8xf32>
    %cst_28 = arith.constant dense<0.000000e+00> : vector<2x8x8xf32>
    %49 = tpu.matmul %48, %35, %cst_28 {dimension_numbers = #tpu.dot_dimension_numbers<[2], [1], [1], [2], [0, 0, 0, 1, 1, 2], [0], [0]>, precision = #tpu.contract_precision<fp32>} : vector<2x8x8xf32>, vector<2x8x8xf32>, vector<2x8x8xf32> -> vector<2x8x8xf32>
    %50 = vector.shape_cast %49 : vector<2x8x8xf32> to vector<16x8xf32>
    %51 = vector.extract_strided_slice %27 {offsets = [0, 0], sizes = [8, 32], strides = [1, 1]} : vector<32x32xf32> to vector<8x32xf32>
    %cst_29 = arith.constant dense<0.000000e+00> : vector<16x32xf32>
    %52 = tpu.matmul %50, %51, %cst_29 {dimension_numbers = #tpu.dot_dimension_numbers<[1], [0], [0], [1], [0, 0, 1, 1], [], []>, precision = #tpu.contract_precision<fp32>} : vector<16x8xf32>, vector<8x32xf32>, vector<16x32xf32> -> vector<16x32xf32>
    %53 = arith.addf %32, %52 : vector<16x32xf32>
    %54 = vector.extract_strided_slice %29 {offsets = [0, 0, 8], sizes = [2, 8, 8], strides = [1, 1, 1]} : vector<2x8x32xf32> to vector<2x8x8xf32>
    %55 = vector.extract_strided_slice %30 {offsets = [0, 0, 8], sizes = [2, 8, 8], strides = [1, 1, 1]} : vector<2x8x32xf32> to vector<2x8x8xf32>
    %56 = vector.extract_strided_slice %31 {offsets = [0, 0, 8], sizes = [2, 8, 8], strides = [1, 1, 1]} : vector<2x8x32xf32> to vector<2x8x8xf32>
    %cst_30 = arith.constant dense<0.000000e+00> : vector<2x8x8xf32>
    %57 = tpu.matmul %54, %55, %cst_30 {dimension_numbers = #tpu.dot_dimension_numbers<[2], [2], [1], [1], [0, 0, 0, 1, 1, 1], [0], [0]>, precision = #tpu.contract_precision<fp32>} : vector<2x8x8xf32>, vector<2x8x8xf32>, vector<2x8x8xf32> -> vector<2x8x8xf32>
    %cst_31 = arith.constant 0.353553385 : f32
    %58 = vector.broadcast %cst_31 : f32 to vector<2x8x8xf32>
    %59 = arith.mulf %57, %58 : vector<2x8x8xf32>
    %cst_32 = arith.constant dense<0xFF800000> : vector<2x8xf32>
    %60 = vector.multi_reduction <maximumf>, %59, %cst_32 [2] : vector<2x8x8xf32> to vector<2x8xf32>
    %61 = vector.shape_cast %60 : vector<2x8xf32> to vector<2x8x1xf32>
    %62 = vector.broadcast %61 : vector<2x8x1xf32> to vector<2x8x8xf32>
    %63 = arith.subf %59, %62 : vector<2x8x8xf32>
    %64 = math.exp %63 : vector<2x8x8xf32>
    %cst_33 = arith.constant dense<0.000000e+00> : vector<2x8xf32>
    %65 = vector.multi_reduction <add>, %64, %cst_33 [2] : vector<2x8x8xf32> to vector<2x8xf32>
    %66 = vector.shape_cast %65 : vector<2x8xf32> to vector<2x8x1xf32>
    %67 = tpu.reciprocal %66 {approx = true} : vector<2x8x1xf32> -> vector<2x8x1xf32>
    %68 = vector.broadcast %67 : vector<2x8x1xf32> to vector<2x8x8xf32>
    %69 = arith.mulf %64, %68 : vector<2x8x8xf32>
    %cst_34 = arith.constant dense<0.000000e+00> : vector<2x8x8xf32>
    %70 = tpu.matmul %69, %56, %cst_34 {dimension_numbers = #tpu.dot_dimension_numbers<[2], [1], [1], [2], [0, 0, 0, 1, 1, 2], [0], [0]>, precision = #tpu.contract_precision<fp32>} : vector<2x8x8xf32>, vector<2x8x8xf32>, vector<2x8x8xf32> -> vector<2x8x8xf32>
    %71 = vector.shape_cast %70 : vector<2x8x8xf32> to vector<16x8xf32>
    %72 = vector.extract_strided_slice %27 {offsets = [8, 0], sizes = [8, 32], strides = [1, 1]} : vector<32x32xf32> to vector<8x32xf32>
    %cst_35 = arith.constant dense<0.000000e+00> : vector<16x32xf32>
    %73 = tpu.matmul %71, %72, %cst_35 {dimension_numbers = #tpu.dot_dimension_numbers<[1], [0], [0], [1], [0, 0, 1, 1], [], []>, precision = #tpu.contract_precision<fp32>} : vector<16x8xf32>, vector<8x32xf32>, vector<16x32xf32> -> vector<16x32xf32>
    %74 = arith.addf %53, %73 : vector<16x32xf32>
    %75 = vector.extract_strided_slice %29 {offsets = [0, 0, 16], sizes = [2, 8, 8], strides = [1, 1, 1]} : vector<2x8x32xf32> to vector<2x8x8xf32>
    %76 = vector.extract_strided_slice %30 {offsets = [0, 0, 16], sizes = [2, 8, 8], strides = [1, 1, 1]} : vector<2x8x32xf32> to vector<2x8x8xf32>
    %77 = vector.extract_strided_slice %31 {offsets = [0, 0, 16], sizes = [2, 8, 8], strides = [1, 1, 1]} : vector<2x8x32xf32> to vector<2x8x8xf32>
    %cst_36 = arith.constant dense<0.000000e+00> : vector<2x8x8xf32>
    %78 = tpu.matmul %75, %76, %cst_36 {dimension_numbers = #tpu.dot_dimension_numbers<[2], [2], [1], [1], [0, 0, 0, 1, 1, 1], [0], [0]>, precision = #tpu.contract_precision<fp32>} : vector<2x8x8xf32>, vector<2x8x8xf32>, vector<2x8x8xf32> -> vector<2x8x8xf32>
    %cst_37 = arith.constant 0.353553385 : f32
    %79 = vector.broadcast %cst_37 : f32 to vector<2x8x8xf32>
    %80 = arith.mulf %78, %79 : vector<2x8x8xf32>
    %cst_38 = arith.constant dense<0xFF800000> : vector<2x8xf32>
    %81 = vector.multi_reduction <maximumf>, %80, %cst_38 [2] : vector<2x8x8xf32> to vector<2x8xf32>
    %82 = vector.shape_cast %81 : vector<2x8xf32> to vector<2x8x1xf32>
    %83 = vector.broadcast %82 : vector<2x8x1xf32> to vector<2x8x8xf32>
    %84 = arith.subf %80, %83 : vector<2x8x8xf32>
    %85 = math.exp %84 : vector<2x8x8xf32>
    %cst_39 = arith.constant dense<0.000000e+00> : vector<2x8xf32>
    %86 = vector.multi_reduction <add>, %85, %cst_39 [2] : vector<2x8x8xf32> to vector<2x8xf32>
    %87 = vector.shape_cast %86 : vector<2x8xf32> to vector<2x8x1xf32>
    %88 = tpu.reciprocal %87 {approx = true} : vector<2x8x1xf32> -> vector<2x8x1xf32>
    %89 = vector.broadcast %88 : vector<2x8x1xf32> to vector<2x8x8xf32>
    %90 = arith.mulf %85, %89 : vector<2x8x8xf32>
    %cst_40 = arith.constant dense<0.000000e+00> : vector<2x8x8xf32>
    %91 = tpu.matmul %90, %77, %cst_40 {dimension_numbers = #tpu.dot_dimension_numbers<[2], [1], [1], [2], [0, 0, 0, 1, 1, 2], [0], [0]>, precision = #tpu.contract_precision<fp32>} : vector<2x8x8xf32>, vector<2x8x8xf32>, vector<2x8x8xf32> -> vector<2x8x8xf32>
    %92 = vector.shape_cast %91 : vector<2x8x8xf32> to vector<16x8xf32>
    %93 = vector.extract_strided_slice %27 {offsets = [16, 0], sizes = [8, 32], strides = [1, 1]} : vector<32x32xf32> to vector<8x32xf32>
    %cst_41 = arith.constant dense<0.000000e+00> : vector<16x32xf32>
    %94 = tpu.matmul %92, %93, %cst_41 {dimension_numbers = #tpu.dot_dimension_numbers<[1], [0], [0], [1], [0, 0, 1, 1], [], []>, precision = #tpu.contract_precision<fp32>} : vector<16x8xf32>, vector<8x32xf32>, vector<16x32xf32> -> vector<16x32xf32>
    %95 = arith.addf %74, %94 : vector<16x32xf32>
    %96 = vector.extract_strided_slice %29 {offsets = [0, 0, 24], sizes = [2, 8, 8], strides = [1, 1, 1]} : vector<2x8x32xf32> to vector<2x8x8xf32>
    %97 = vector.extract_strided_slice %30 {offsets = [0, 0, 24], sizes = [2, 8, 8], strides = [1, 1, 1]} : vector<2x8x32xf32> to vector<2x8x8xf32>
    %98 = vector.extract_strided_slice %31 {offsets = [0, 0, 24], sizes = [2, 8, 8], strides = [1, 1, 1]} : vector<2x8x32xf32> to vector<2x8x8xf32>
    %cst_42 = arith.constant dense<0.000000e+00> : vector<2x8x8xf32>
    %99 = tpu.matmul %96, %97, %cst_42 {dimension_numbers = #tpu.dot_dimension_numbers<[2], [2], [1], [1], [0, 0, 0, 1, 1, 1], [0], [0]>, precision = #tpu.contract_precision<fp32>} : vector<2x8x8xf32>, vector<2x8x8xf32>, vector<2x8x8xf32> -> vector<2x8x8xf32>
    %cst_43 = arith.constant 0.353553385 : f32
    %100 = vector.broadcast %cst_43 : f32 to vector<2x8x8xf32>
    %101 = arith.mulf %99, %100 : vector<2x8x8xf32>
    %cst_44 = arith.constant dense<0xFF800000> : vector<2x8xf32>
    %102 = vector.multi_reduction <maximumf>, %101, %cst_44 [2] : vector<2x8x8xf32> to vector<2x8xf32>
    %103 = vector.shape_cast %102 : vector<2x8xf32> to vector<2x8x1xf32>
    %104 = vector.broadcast %103 : vector<2x8x1xf32> to vector<2x8x8xf32>
    %105 = arith.subf %101, %104 : vector<2x8x8xf32>
    %106 = math.exp %105 : vector<2x8x8xf32>
    %cst_45 = arith.constant dense<0.000000e+00> : vector<2x8xf32>
    %107 = vector.multi_reduction <add>, %106, %cst_45 [2] : vector<2x8x8xf32> to vector<2x8xf32>
    %108 = vector.shape_cast %107 : vector<2x8xf32> to vector<2x8x1xf32>
    %109 = tpu.reciprocal %108 {approx = true} : vector<2x8x1xf32> -> vector<2x8x1xf32>
    %110 = vector.broadcast %109 : vector<2x8x1xf32> to vector<2x8x8xf32>
    %111 = arith.mulf %106, %110 : vector<2x8x8xf32>
    %cst_46 = arith.constant dense<0.000000e+00> : vector<2x8x8xf32>
    %112 = tpu.matmul %111, %98, %cst_46 {dimension_numbers = #tpu.dot_dimension_numbers<[2], [1], [1], [2], [0, 0, 0, 1, 1, 2], [0], [0]>, precision = #tpu.contract_precision<fp32>} : vector<2x8x8xf32>, vector<2x8x8xf32>, vector<2x8x8xf32> -> vector<2x8x8xf32>
    %113 = vector.shape_cast %112 : vector<2x8x8xf32> to vector<16x8xf32>
    %114 = vector.extract_strided_slice %27 {offsets = [24, 0], sizes = [8, 32], strides = [1, 1]} : vector<32x32xf32> to vector<8x32xf32>
    %cst_47 = arith.constant dense<0.000000e+00> : vector<16x32xf32>
    %115 = tpu.matmul %113, %114, %cst_47 {dimension_numbers = #tpu.dot_dimension_numbers<[1], [0], [0], [1], [0, 0, 1, 1], [], []>, precision = #tpu.contract_precision<fp32>} : vector<16x8xf32>, vector<8x32xf32>, vector<16x32xf32> -> vector<16x32xf32>
    %116 = arith.addf %95, %115 : vector<16x32xf32>
    %117 = vector.broadcast %28 : vector<1x32xf32> to vector<16x32xf32>
    %118 = arith.addf %116, %117 : vector<16x32xf32>
    %119 = arith.addf %14, %118 : vector<16x32xf32>
    %120 = vector.extract_strided_slice %4 {offsets = [0, 0], sizes = [1, 32], strides = [1, 1]} : vector<10x32xf32> to vector<1x32xf32>
    %121 = vector.extract_strided_slice %4 {offsets = [1, 0], sizes = [1, 32], strides = [1, 1]} : vector<10x32xf32> to vector<1x32xf32>
    %cst_48 = arith.constant dense<0.000000e+00> : vector<16xf32>
    %122 = vector.multi_reduction <add>, %119, %cst_48 [1] : vector<16x32xf32> to vector<16xf32>
    %123 = vector.shape_cast %122 : vector<16xf32> to vector<16x1xf32>
    %cst_49 = arith.constant 3.200000e+01 : f32
    %124 = vector.broadcast %cst_49 : f32 to vector<16x1xf32>
    %125 = arith.divf %123, %124 : vector<16x1xf32>
    %126 = vector.broadcast %125 : vector<16x1xf32> to vector<16x32xf32>
    %127 = arith.subf %119, %126 : vector<16x32xf32>
    %128 = arith.mulf %127, %127 : vector<16x32xf32>
    %cst_50 = arith.constant dense<0.000000e+00> : vector<16xf32>
    %129 = vector.multi_reduction <add>, %128, %cst_50 [1] : vector<16x32xf32> to vector<16xf32>
    %130 = vector.shape_cast %129 : vector<16xf32> to vector<16x1xf32>
    %cst_51 = arith.constant 3.200000e+01 : f32
    %131 = vector.broadcast %cst_51 : f32 to vector<16x1xf32>
    %132 = arith.divf %130, %131 : vector<16x1xf32>
    %133 = vector.broadcast %125 : vector<16x1xf32> to vector<16x32xf32>
    %134 = arith.subf %119, %133 : vector<16x32xf32>
    %cst_52 = arith.constant 9.99999974E-6 : f32
    %135 = vector.broadcast %cst_52 : f32 to vector<16x1xf32>
    %136 = arith.addf %132, %135 : vector<16x1xf32>
    %137 = math.rsqrt %136 : vector<16x1xf32>
    %138 = vector.broadcast %137 : vector<16x1xf32> to vector<16x32xf32>
    %139 = arith.mulf %134, %138 : vector<16x32xf32>
    %140 = vector.broadcast %120 : vector<1x32xf32> to vector<16x32xf32>
    %141 = arith.mulf %139, %140 : vector<16x32xf32>
    %142 = vector.broadcast %121 : vector<1x32xf32> to vector<16x32xf32>
    %143 = arith.addf %141, %142 : vector<16x32xf32>
    %144 = arith.addf %0, %143 : vector<16x32xf32>
    %145 = vector.extract_strided_slice %4 {offsets = [2, 0], sizes = [1, 32], strides = [1, 1]} : vector<10x32xf32> to vector<1x32xf32>
    %146 = vector.extract_strided_slice %4 {offsets = [3, 0], sizes = [1, 32], strides = [1, 1]} : vector<10x32xf32> to vector<1x32xf32>
    %cst_53 = arith.constant dense<0.000000e+00> : vector<16xf32>
    %147 = vector.multi_reduction <add>, %144, %cst_53 [1] : vector<16x32xf32> to vector<16xf32>
    %148 = vector.shape_cast %147 : vector<16xf32> to vector<16x1xf32>
    %cst_54 = arith.constant 3.200000e+01 : f32
    %149 = vector.broadcast %cst_54 : f32 to vector<16x1xf32>
    %150 = arith.divf %148, %149 : vector<16x1xf32>
    %151 = vector.broadcast %150 : vector<16x1xf32> to vector<16x32xf32>
    %152 = arith.subf %144, %151 : vector<16x32xf32>
    %153 = arith.mulf %152, %152 : vector<16x32xf32>
    %cst_55 = arith.constant dense<0.000000e+00> : vector<16xf32>
    %154 = vector.multi_reduction <add>, %153, %cst_55 [1] : vector<16x32xf32> to vector<16xf32>
    %155 = vector.shape_cast %154 : vector<16xf32> to vector<16x1xf32>
    %cst_56 = arith.constant 3.200000e+01 : f32
    %156 = vector.broadcast %cst_56 : f32 to vector<16x1xf32>
    %157 = arith.divf %155, %156 : vector<16x1xf32>
    %158 = vector.broadcast %150 : vector<16x1xf32> to vector<16x32xf32>
    %159 = arith.subf %144, %158 : vector<16x32xf32>
    %cst_57 = arith.constant 9.99999974E-6 : f32
    %160 = vector.broadcast %cst_57 : f32 to vector<16x1xf32>
    %161 = arith.addf %157, %160 : vector<16x1xf32>
    %162 = math.rsqrt %161 : vector<16x1xf32>
    %163 = vector.broadcast %162 : vector<16x1xf32> to vector<16x32xf32>
    %164 = arith.mulf %159, %163 : vector<16x32xf32>
    %165 = vector.broadcast %145 : vector<1x32xf32> to vector<16x32xf32>
    %166 = arith.mulf %164, %165 : vector<16x32xf32>
    %167 = vector.broadcast %146 : vector<1x32xf32> to vector<16x32xf32>
    %168 = arith.addf %166, %167 : vector<16x32xf32>
    %169 = arith.addf %168, %3 : vector<16x32xf32>
    %170 = arith.addf %1, %2 : vector<32x32xf32>
    %171 = vector.extract_strided_slice %11 {offsets = [0, 0], sizes = [32, 32], strides = [1, 1]} : vector<32x128xf32> to vector<32x32xf32>
    %cst_58 = arith.constant dense<0.000000e+00> : vector<16x32xf32>
    %172 = tpu.matmul %169, %171, %cst_58 {dimension_numbers = #tpu.dot_dimension_numbers<[1], [0], [0], [1], [0, 0, 1, 1], [], []>, precision = #tpu.contract_precision<fp32>} : vector<16x32xf32>, vector<32x32xf32>, vector<16x32xf32> -> vector<16x32xf32>
    %173 = vector.extract_strided_slice %13 {offsets = [0, 0], sizes = [1, 32], strides = [1, 1]} : vector<1x128xf32> to vector<1x32xf32>
    %174 = vector.broadcast %173 : vector<1x32xf32> to vector<16x32xf32>
    %175 = arith.addf %172, %174 : vector<16x32xf32>
    %176 = vector.extract_strided_slice %11 {offsets = [0, 32], sizes = [32, 32], strides = [1, 1]} : vector<32x128xf32> to vector<32x32xf32>
    %cst_59 = arith.constant dense<0.000000e+00> : vector<32x32xf32>
    %177 = tpu.matmul %170, %176, %cst_59 {dimension_numbers = #tpu.dot_dimension_numbers<[1], [0], [0], [1], [0, 0, 1, 1], [], []>, precision = #tpu.contract_precision<fp32>} : vector<32x32xf32>, vector<32x32xf32>, vector<32x32xf32> -> vector<32x32xf32>
    %178 = vector.extract_strided_slice %13 {offsets = [0, 32], sizes = [1, 32], strides = [1, 1]} : vector<1x128xf32> to vector<1x32xf32>
    %179 = vector.broadcast %178 : vector<1x32xf32> to vector<32x32xf32>
    %180 = arith.addf %177, %179 : vector<32x32xf32>
    %181 = vector.extract_strided_slice %11 {offsets = [0, 64], sizes = [32, 32], strides = [1, 1]} : vector<32x128xf32> to vector<32x32xf32>
    %cst_60 = arith.constant dense<0.000000e+00> : vector<32x32xf32>
    %182 = tpu.matmul %1, %181, %cst_60 {dimension_numbers = #tpu.dot_dimension_numbers<[1], [0], [0], [1], [0, 0, 1, 1], [], []>, precision = #tpu.contract_precision<fp32>} : vector<32x32xf32>, vector<32x32xf32>, vector<32x32xf32> -> vector<32x32xf32>
    %183 = vector.extract_strided_slice %13 {offsets = [0, 64], sizes = [1, 32], strides = [1, 1]} : vector<1x128xf32> to vector<1x32xf32>
    %184 = vector.broadcast %183 : vector<1x32xf32> to vector<32x32xf32>
    %185 = arith.addf %182, %184 : vector<32x32xf32>
    %186 = vector.extract_strided_slice %11 {offsets = [0, 96], sizes = [32, 32], strides = [1, 1]} : vector<32x128xf32> to vector<32x32xf32>
    %187 = vector.extract_strided_slice %13 {offsets = [0, 96], sizes = [1, 32], strides = [1, 1]} : vector<1x128xf32> to vector<1x32xf32>
    %188 = vector.shape_cast %175 : vector<16x32xf32> to vector<2x8x32xf32>
    %189 = vector.shape_cast %180 : vector<32x32xf32> to vector<2x16x32xf32>
    %190 = vector.shape_cast %185 : vector<32x32xf32> to vector<2x16x32xf32>
    %cst_61 = arith.constant 0.000000e+00 : f32
    %191 = vector.broadcast %cst_61 : f32 to vector<16x32xf32>
    %192 = vector.extract_strided_slice %188 {offsets = [0, 0, 0], sizes = [2, 8, 8], strides = [1, 1, 1]} : vector<2x8x32xf32> to vector<2x8x8xf32>
    %193 = vector.extract_strided_slice %189 {offsets = [0, 0, 0], sizes = [2, 16, 8], strides = [1, 1, 1]} : vector<2x16x32xf32> to vector<2x16x8xf32>
    %194 = vector.extract_strided_slice %190 {offsets = [0, 0, 0], sizes = [2, 16, 8], strides = [1, 1, 1]} : vector<2x16x32xf32> to vector<2x16x8xf32>
    %cst_62 = arith.constant dense<0.000000e+00> : vector<2x8x16xf32>
    %195 = tpu.matmul %192, %193, %cst_62 {dimension_numbers = #tpu.dot_dimension_numbers<[2], [2], [1], [1], [0, 0, 0, 1, 1, 1], [0], [0]>, precision = #tpu.contract_precision<fp32>} : vector<2x8x8xf32>, vector<2x16x8xf32>, vector<2x8x16xf32> -> vector<2x8x16xf32>
    %cst_63 = arith.constant 0.353553385 : f32
    %196 = vector.broadcast %cst_63 : f32 to vector<2x8x16xf32>
    %197 = arith.mulf %195, %196 : vector<2x8x16xf32>
    %cst_64 = arith.constant dense<0xFF800000> : vector<2x8xf32>
    %198 = vector.multi_reduction <maximumf>, %197, %cst_64 [2] : vector<2x8x16xf32> to vector<2x8xf32>
    %199 = vector.shape_cast %198 : vector<2x8xf32> to vector<2x8x1xf32>
    %200 = vector.broadcast %199 : vector<2x8x1xf32> to vector<2x8x16xf32>
    %201 = arith.subf %197, %200 : vector<2x8x16xf32>
    %202 = math.exp %201 : vector<2x8x16xf32>
    %cst_65 = arith.constant dense<0.000000e+00> : vector<2x8xf32>
    %203 = vector.multi_reduction <add>, %202, %cst_65 [2] : vector<2x8x16xf32> to vector<2x8xf32>
    %204 = vector.shape_cast %203 : vector<2x8xf32> to vector<2x8x1xf32>
    %205 = tpu.reciprocal %204 {approx = true} : vector<2x8x1xf32> -> vector<2x8x1xf32>
    %206 = vector.broadcast %205 : vector<2x8x1xf32> to vector<2x8x16xf32>
    %207 = arith.mulf %202, %206 : vector<2x8x16xf32>
    %cst_66 = arith.constant dense<0.000000e+00> : vector<2x8x8xf32>
    %208 = tpu.matmul %207, %194, %cst_66 {dimension_numbers = #tpu.dot_dimension_numbers<[2], [1], [1], [2], [0, 0, 0, 1, 1, 2], [0], [0]>, precision = #tpu.contract_precision<fp32>} : vector<2x8x16xf32>, vector<2x16x8xf32>, vector<2x8x8xf32> -> vector<2x8x8xf32>
    %209 = vector.shape_cast %208 : vector<2x8x8xf32> to vector<16x8xf32>
    %210 = vector.extract_strided_slice %186 {offsets = [0, 0], sizes = [8, 32], strides = [1, 1]} : vector<32x32xf32> to vector<8x32xf32>
    %cst_67 = arith.constant dense<0.000000e+00> : vector<16x32xf32>
    %211 = tpu.matmul %209, %210, %cst_67 {dimension_numbers = #tpu.dot_dimension_numbers<[1], [0], [0], [1], [0, 0, 1, 1], [], []>, precision = #tpu.contract_precision<fp32>} : vector<16x8xf32>, vector<8x32xf32>, vector<16x32xf32> -> vector<16x32xf32>
    %212 = arith.addf %191, %211 : vector<16x32xf32>
    %213 = vector.extract_strided_slice %188 {offsets = [0, 0, 8], sizes = [2, 8, 8], strides = [1, 1, 1]} : vector<2x8x32xf32> to vector<2x8x8xf32>
    %214 = vector.extract_strided_slice %189 {offsets = [0, 0, 8], sizes = [2, 16, 8], strides = [1, 1, 1]} : vector<2x16x32xf32> to vector<2x16x8xf32>
    %215 = vector.extract_strided_slice %190 {offsets = [0, 0, 8], sizes = [2, 16, 8], strides = [1, 1, 1]} : vector<2x16x32xf32> to vector<2x16x8xf32>
    %cst_68 = arith.constant dense<0.000000e+00> : vector<2x8x16xf32>
    %216 = tpu.matmul %213, %214, %cst_68 {dimension_numbers = #tpu.dot_dimension_numbers<[2], [2], [1], [1], [0, 0, 0, 1, 1, 1], [0], [0]>, precision = #tpu.contract_precision<fp32>} : vector<2x8x8xf32>, vector<2x16x8xf32>, vector<2x8x16xf32> -> vector<2x8x16xf32>
    %cst_69 = arith.constant 0.353553385 : f32
    %217 = vector.broadcast %cst_69 : f32 to vector<2x8x16xf32>
    %218 = arith.mulf %216, %217 : vector<2x8x16xf32>
    %cst_70 = arith.constant dense<0xFF800000> : vector<2x8xf32>
    %219 = vector.multi_reduction <maximumf>, %218, %cst_70 [2] : vector<2x8x16xf32> to vector<2x8xf32>
    %220 = vector.shape_cast %219 : vector<2x8xf32> to vector<2x8x1xf32>
    %221 = vector.broadcast %220 : vector<2x8x1xf32> to vector<2x8x16xf32>
    %222 = arith.subf %218, %221 : vector<2x8x16xf32>
    %223 = math.exp %222 : vector<2x8x16xf32>
    %cst_71 = arith.constant dense<0.000000e+00> : vector<2x8xf32>
    %224 = vector.multi_reduction <add>, %223, %cst_71 [2] : vector<2x8x16xf32> to vector<2x8xf32>
    %225 = vector.shape_cast %224 : vector<2x8xf32> to vector<2x8x1xf32>
    %226 = tpu.reciprocal %225 {approx = true} : vector<2x8x1xf32> -> vector<2x8x1xf32>
    %227 = vector.broadcast %226 : vector<2x8x1xf32> to vector<2x8x16xf32>
    %228 = arith.mulf %223, %227 : vector<2x8x16xf32>
    %cst_72 = arith.constant dense<0.000000e+00> : vector<2x8x8xf32>
    %229 = tpu.matmul %228, %215, %cst_72 {dimension_numbers = #tpu.dot_dimension_numbers<[2], [1], [1], [2], [0, 0, 0, 1, 1, 2], [0], [0]>, precision = #tpu.contract_precision<fp32>} : vector<2x8x16xf32>, vector<2x16x8xf32>, vector<2x8x8xf32> -> vector<2x8x8xf32>
    %230 = vector.shape_cast %229 : vector<2x8x8xf32> to vector<16x8xf32>
    %231 = vector.extract_strided_slice %186 {offsets = [8, 0], sizes = [8, 32], strides = [1, 1]} : vector<32x32xf32> to vector<8x32xf32>
    %cst_73 = arith.constant dense<0.000000e+00> : vector<16x32xf32>
    %232 = tpu.matmul %230, %231, %cst_73 {dimension_numbers = #tpu.dot_dimension_numbers<[1], [0], [0], [1], [0, 0, 1, 1], [], []>, precision = #tpu.contract_precision<fp32>} : vector<16x8xf32>, vector<8x32xf32>, vector<16x32xf32> -> vector<16x32xf32>
    %233 = arith.addf %212, %232 : vector<16x32xf32>
    %234 = vector.extract_strided_slice %188 {offsets = [0, 0, 16], sizes = [2, 8, 8], strides = [1, 1, 1]} : vector<2x8x32xf32> to vector<2x8x8xf32>
    %235 = vector.extract_strided_slice %189 {offsets = [0, 0, 16], sizes = [2, 16, 8], strides = [1, 1, 1]} : vector<2x16x32xf32> to vector<2x16x8xf32>
    %236 = vector.extract_strided_slice %190 {offsets = [0, 0, 16], sizes = [2, 16, 8], strides = [1, 1, 1]} : vector<2x16x32xf32> to vector<2x16x8xf32>
    %cst_74 = arith.constant dense<0.000000e+00> : vector<2x8x16xf32>
    %237 = tpu.matmul %234, %235, %cst_74 {dimension_numbers = #tpu.dot_dimension_numbers<[2], [2], [1], [1], [0, 0, 0, 1, 1, 1], [0], [0]>, precision = #tpu.contract_precision<fp32>} : vector<2x8x8xf32>, vector<2x16x8xf32>, vector<2x8x16xf32> -> vector<2x8x16xf32>
    %cst_75 = arith.constant 0.353553385 : f32
    %238 = vector.broadcast %cst_75 : f32 to vector<2x8x16xf32>
    %239 = arith.mulf %237, %238 : vector<2x8x16xf32>
    %cst_76 = arith.constant dense<0xFF800000> : vector<2x8xf32>
    %240 = vector.multi_reduction <maximumf>, %239, %cst_76 [2] : vector<2x8x16xf32> to vector<2x8xf32>
    %241 = vector.shape_cast %240 : vector<2x8xf32> to vector<2x8x1xf32>
    %242 = vector.broadcast %241 : vector<2x8x1xf32> to vector<2x8x16xf32>
    %243 = arith.subf %239, %242 : vector<2x8x16xf32>
    %244 = math.exp %243 : vector<2x8x16xf32>
    %cst_77 = arith.constant dense<0.000000e+00> : vector<2x8xf32>
    %245 = vector.multi_reduction <add>, %244, %cst_77 [2] : vector<2x8x16xf32> to vector<2x8xf32>
    %246 = vector.shape_cast %245 : vector<2x8xf32> to vector<2x8x1xf32>
    %247 = tpu.reciprocal %246 {approx = true} : vector<2x8x1xf32> -> vector<2x8x1xf32>
    %248 = vector.broadcast %247 : vector<2x8x1xf32> to vector<2x8x16xf32>
    %249 = arith.mulf %244, %248 : vector<2x8x16xf32>
    %cst_78 = arith.constant dense<0.000000e+00> : vector<2x8x8xf32>
    %250 = tpu.matmul %249, %236, %cst_78 {dimension_numbers = #tpu.dot_dimension_numbers<[2], [1], [1], [2], [0, 0, 0, 1, 1, 2], [0], [0]>, precision = #tpu.contract_precision<fp32>} : vector<2x8x16xf32>, vector<2x16x8xf32>, vector<2x8x8xf32> -> vector<2x8x8xf32>
    %251 = vector.shape_cast %250 : vector<2x8x8xf32> to vector<16x8xf32>
    %252 = vector.extract_strided_slice %186 {offsets = [16, 0], sizes = [8, 32], strides = [1, 1]} : vector<32x32xf32> to vector<8x32xf32>
    %cst_79 = arith.constant dense<0.000000e+00> : vector<16x32xf32>
    %253 = tpu.matmul %251, %252, %cst_79 {dimension_numbers = #tpu.dot_dimension_numbers<[1], [0], [0], [1], [0, 0, 1, 1], [], []>, precision = #tpu.contract_precision<fp32>} : vector<16x8xf32>, vector<8x32xf32>, vector<16x32xf32> -> vector<16x32xf32>
    %254 = arith.addf %233, %253 : vector<16x32xf32>
    %255 = vector.extract_strided_slice %188 {offsets = [0, 0, 24], sizes = [2, 8, 8], strides = [1, 1, 1]} : vector<2x8x32xf32> to vector<2x8x8xf32>
    %256 = vector.extract_strided_slice %189 {offsets = [0, 0, 24], sizes = [2, 16, 8], strides = [1, 1, 1]} : vector<2x16x32xf32> to vector<2x16x8xf32>
    %257 = vector.extract_strided_slice %190 {offsets = [0, 0, 24], sizes = [2, 16, 8], strides = [1, 1, 1]} : vector<2x16x32xf32> to vector<2x16x8xf32>
    %cst_80 = arith.constant dense<0.000000e+00> : vector<2x8x16xf32>
    %258 = tpu.matmul %255, %256, %cst_80 {dimension_numbers = #tpu.dot_dimension_numbers<[2], [2], [1], [1], [0, 0, 0, 1, 1, 1], [0], [0]>, precision = #tpu.contract_precision<fp32>} : vector<2x8x8xf32>, vector<2x16x8xf32>, vector<2x8x16xf32> -> vector<2x8x16xf32>
    %cst_81 = arith.constant 0.353553385 : f32
    %259 = vector.broadcast %cst_81 : f32 to vector<2x8x16xf32>
    %260 = arith.mulf %258, %259 : vector<2x8x16xf32>
    %cst_82 = arith.constant dense<0xFF800000> : vector<2x8xf32>
    %261 = vector.multi_reduction <maximumf>, %260, %cst_82 [2] : vector<2x8x16xf32> to vector<2x8xf32>
    %262 = vector.shape_cast %261 : vector<2x8xf32> to vector<2x8x1xf32>
    %263 = vector.broadcast %262 : vector<2x8x1xf32> to vector<2x8x16xf32>
    %264 = arith.subf %260, %263 : vector<2x8x16xf32>
    %265 = math.exp %264 : vector<2x8x16xf32>
    %cst_83 = arith.constant dense<0.000000e+00> : vector<2x8xf32>
    %266 = vector.multi_reduction <add>, %265, %cst_83 [2] : vector<2x8x16xf32> to vector<2x8xf32>
    %267 = vector.shape_cast %266 : vector<2x8xf32> to vector<2x8x1xf32>
    %268 = tpu.reciprocal %267 {approx = true} : vector<2x8x1xf32> -> vector<2x8x1xf32>
    %269 = vector.broadcast %268 : vector<2x8x1xf32> to vector<2x8x16xf32>
    %270 = arith.mulf %265, %269 : vector<2x8x16xf32>
    %cst_84 = arith.constant dense<0.000000e+00> : vector<2x8x8xf32>
    %271 = tpu.matmul %270, %257, %cst_84 {dimension_numbers = #tpu.dot_dimension_numbers<[2], [1], [1], [2], [0, 0, 0, 1, 1, 2], [0], [0]>, precision = #tpu.contract_precision<fp32>} : vector<2x8x16xf32>, vector<2x16x8xf32>, vector<2x8x8xf32> -> vector<2x8x8xf32>
    %272 = vector.shape_cast %271 : vector<2x8x8xf32> to vector<16x8xf32>
    %273 = vector.extract_strided_slice %186 {offsets = [24, 0], sizes = [8, 32], strides = [1, 1]} : vector<32x32xf32> to vector<8x32xf32>
    %cst_85 = arith.constant dense<0.000000e+00> : vector<16x32xf32>
    %274 = tpu.matmul %272, %273, %cst_85 {dimension_numbers = #tpu.dot_dimension_numbers<[1], [0], [0], [1], [0, 0, 1, 1], [], []>, precision = #tpu.contract_precision<fp32>} : vector<16x8xf32>, vector<8x32xf32>, vector<16x32xf32> -> vector<16x32xf32>
    %275 = arith.addf %254, %274 : vector<16x32xf32>
    %276 = vector.broadcast %187 : vector<1x32xf32> to vector<16x32xf32>
    %277 = arith.addf %275, %276 : vector<16x32xf32>
    %278 = arith.addf %169, %277 : vector<16x32xf32>
    %279 = vector.extract_strided_slice %4 {offsets = [4, 0], sizes = [1, 32], strides = [1, 1]} : vector<10x32xf32> to vector<1x32xf32>
    %280 = vector.extract_strided_slice %4 {offsets = [5, 0], sizes = [1, 32], strides = [1, 1]} : vector<10x32xf32> to vector<1x32xf32>
    %cst_86 = arith.constant dense<0.000000e+00> : vector<16xf32>
    %281 = vector.multi_reduction <add>, %278, %cst_86 [1] : vector<16x32xf32> to vector<16xf32>
    %282 = vector.shape_cast %281 : vector<16xf32> to vector<16x1xf32>
    %cst_87 = arith.constant 3.200000e+01 : f32
    %283 = vector.broadcast %cst_87 : f32 to vector<16x1xf32>
    %284 = arith.divf %282, %283 : vector<16x1xf32>
    %285 = vector.broadcast %284 : vector<16x1xf32> to vector<16x32xf32>
    %286 = arith.subf %278, %285 : vector<16x32xf32>
    %287 = arith.mulf %286, %286 : vector<16x32xf32>
    %cst_88 = arith.constant dense<0.000000e+00> : vector<16xf32>
    %288 = vector.multi_reduction <add>, %287, %cst_88 [1] : vector<16x32xf32> to vector<16xf32>
    %289 = vector.shape_cast %288 : vector<16xf32> to vector<16x1xf32>
    %cst_89 = arith.constant 3.200000e+01 : f32
    %290 = vector.broadcast %cst_89 : f32 to vector<16x1xf32>
    %291 = arith.divf %289, %290 : vector<16x1xf32>
    %292 = vector.broadcast %284 : vector<16x1xf32> to vector<16x32xf32>
    %293 = arith.subf %278, %292 : vector<16x32xf32>
    %cst_90 = arith.constant 9.99999974E-6 : f32
    %294 = vector.broadcast %cst_90 : f32 to vector<16x1xf32>
    %295 = arith.addf %291, %294 : vector<16x1xf32>
    %296 = math.rsqrt %295 : vector<16x1xf32>
    %297 = vector.broadcast %296 : vector<16x1xf32> to vector<16x32xf32>
    %298 = arith.mulf %293, %297 : vector<16x32xf32>
    %299 = vector.broadcast %279 : vector<1x32xf32> to vector<16x32xf32>
    %300 = arith.mulf %298, %299 : vector<16x32xf32>
    %301 = vector.broadcast %280 : vector<1x32xf32> to vector<16x32xf32>
    %302 = arith.addf %300, %301 : vector<16x32xf32>
    %303 = arith.addf %169, %302 : vector<16x32xf32>
    %304 = vector.extract_strided_slice %4 {offsets = [6, 0], sizes = [1, 32], strides = [1, 1]} : vector<10x32xf32> to vector<1x32xf32>
    %305 = vector.extract_strided_slice %4 {offsets = [7, 0], sizes = [1, 32], strides = [1, 1]} : vector<10x32xf32> to vector<1x32xf32>
    %cst_91 = arith.constant dense<0.000000e+00> : vector<16xf32>
    %306 = vector.multi_reduction <add>, %303, %cst_91 [1] : vector<16x32xf32> to vector<16xf32>
    %307 = vector.shape_cast %306 : vector<16xf32> to vector<16x1xf32>
    %cst_92 = arith.constant 3.200000e+01 : f32
    %308 = vector.broadcast %cst_92 : f32 to vector<16x1xf32>
    %309 = arith.divf %307, %308 : vector<16x1xf32>
    %310 = vector.broadcast %309 : vector<16x1xf32> to vector<16x32xf32>
    %311 = arith.subf %303, %310 : vector<16x32xf32>
    %312 = arith.mulf %311, %311 : vector<16x32xf32>
    %cst_93 = arith.constant dense<0.000000e+00> : vector<16xf32>
    %313 = vector.multi_reduction <add>, %312, %cst_93 [1] : vector<16x32xf32> to vector<16xf32>
    %314 = vector.shape_cast %313 : vector<16xf32> to vector<16x1xf32>
    %cst_94 = arith.constant 3.200000e+01 : f32
    %315 = vector.broadcast %cst_94 : f32 to vector<16x1xf32>
    %316 = arith.divf %314, %315 : vector<16x1xf32>
    %317 = vector.broadcast %309 : vector<16x1xf32> to vector<16x32xf32>
    %318 = arith.subf %303, %317 : vector<16x32xf32>
    %cst_95 = arith.constant 9.99999974E-6 : f32
    %319 = vector.broadcast %cst_95 : f32 to vector<16x1xf32>
    %320 = arith.addf %316, %319 : vector<16x1xf32>
    %321 = math.rsqrt %320 : vector<16x1xf32>
    %322 = vector.broadcast %321 : vector<16x1xf32> to vector<16x32xf32>
    %323 = arith.mulf %318, %322 : vector<16x32xf32>
    %324 = vector.broadcast %304 : vector<1x32xf32> to vector<16x32xf32>
    %325 = arith.mulf %323, %324 : vector<16x32xf32>
    %326 = vector.broadcast %305 : vector<1x32xf32> to vector<16x32xf32>
    %327 = arith.addf %325, %326 : vector<16x32xf32>
    %c0_96 = arith.constant 0 : index
    %c0_97 = arith.constant 0 : index
    %328 = vector.load %arg7[%c0_96, %c0_97] : memref<32x64xf32, #tpu.memory_space<vmem>>, vector<32x64xf32>
    %cst_98 = arith.constant dense<0.000000e+00> : vector<16x64xf32>
    %329 = tpu.matmul %327, %328, %cst_98 {dimension_numbers = #tpu.dot_dimension_numbers<[1], [0], [0], [1], [0, 0, 1, 1], [], []>, precision = #tpu.contract_precision<fp32>} : vector<16x32xf32>, vector<32x64xf32>, vector<16x64xf32> -> vector<16x64xf32>
    %330 = vector.extract_strided_slice %5 {offsets = [0, 0], sizes = [1, 64], strides = [1, 1]} : vector<1x96xf32> to vector<1x64xf32>
    %331 = vector.broadcast %330 : vector<1x64xf32> to vector<16x64xf32>
    %332 = arith.addf %329, %331 : vector<16x64xf32>
    %cst_99 = arith.constant 0.000000e+00 : f32
    %333 = vector.broadcast %cst_99 : f32 to vector<16x64xf32>
    %334 = arith.maximumf %332, %333 : vector<16x64xf32>
    %c0_100 = arith.constant 0 : index
    %c0_101 = arith.constant 0 : index
    %335 = vector.load %arg8[%c0_100, %c0_101] : memref<64x32xf32, #tpu.memory_space<vmem>>, vector<64x32xf32>
    %cst_102 = arith.constant dense<0.000000e+00> : vector<16x32xf32>
    %336 = tpu.matmul %334, %335, %cst_102 {dimension_numbers = #tpu.dot_dimension_numbers<[1], [0], [0], [1], [0, 0, 1, 1], [], []>, precision = #tpu.contract_precision<fp32>} : vector<16x64xf32>, vector<64x32xf32>, vector<16x32xf32> -> vector<16x32xf32>
    %337 = vector.extract_strided_slice %5 {offsets = [0, 64], sizes = [1, 32], strides = [1, 1]} : vector<1x96xf32> to vector<1x32xf32>
    %338 = vector.broadcast %337 : vector<1x32xf32> to vector<16x32xf32>
    %339 = arith.addf %336, %338 : vector<16x32xf32>
    %340 = arith.addf %327, %339 : vector<16x32xf32>
    %341 = vector.extract_strided_slice %4 {offsets = [8, 0], sizes = [1, 32], strides = [1, 1]} : vector<10x32xf32> to vector<1x32xf32>
    %342 = vector.extract_strided_slice %4 {offsets = [9, 0], sizes = [1, 32], strides = [1, 1]} : vector<10x32xf32> to vector<1x32xf32>
    %cst_103 = arith.constant dense<0.000000e+00> : vector<16xf32>
    %343 = vector.multi_reduction <add>, %340, %cst_103 [1] : vector<16x32xf32> to vector<16xf32>
    %344 = vector.shape_cast %343 : vector<16xf32> to vector<16x1xf32>
    %cst_104 = arith.constant 3.200000e+01 : f32
    %345 = vector.broadcast %cst_104 : f32 to vector<16x1xf32>
    %346 = arith.divf %344, %345 : vector<16x1xf32>
    %347 = vector.broadcast %346 : vector<16x1xf32> to vector<16x32xf32>
    %348 = arith.subf %340, %347 : vector<16x32xf32>
    %349 = arith.mulf %348, %348 : vector<16x32xf32>
    %cst_105 = arith.constant dense<0.000000e+00> : vector<16xf32>
    %350 = vector.multi_reduction <add>, %349, %cst_105 [1] : vector<16x32xf32> to vector<16xf32>
    %351 = vector.shape_cast %350 : vector<16xf32> to vector<16x1xf32>
    %cst_106 = arith.constant 3.200000e+01 : f32
    %352 = vector.broadcast %cst_106 : f32 to vector<16x1xf32>
    %353 = arith.divf %351, %352 : vector<16x1xf32>
    %354 = vector.broadcast %346 : vector<16x1xf32> to vector<16x32xf32>
    %355 = arith.subf %340, %354 : vector<16x32xf32>
    %cst_107 = arith.constant 9.99999974E-6 : f32
    %356 = vector.broadcast %cst_107 : f32 to vector<16x1xf32>
    %357 = arith.addf %353, %356 : vector<16x1xf32>
    %358 = math.rsqrt %357 : vector<16x1xf32>
    %359 = vector.broadcast %358 : vector<16x1xf32> to vector<16x32xf32>
    %360 = arith.mulf %355, %359 : vector<16x32xf32>
    %361 = vector.broadcast %341 : vector<1x32xf32> to vector<16x32xf32>
    %362 = arith.mulf %360, %361 : vector<16x32xf32>
    %363 = vector.broadcast %342 : vector<1x32xf32> to vector<16x32xf32>
    %364 = arith.addf %362, %363 : vector<16x32xf32>
    %c0_108 = arith.constant 0 : index
    %c0_109 = arith.constant 0 : index
    %365 = vector.load %arg10[%c0_108, %c0_109] : memref<16x32xf32, #tpu.memory_space<vmem>>, vector<16x32xf32>
    tpu.vector_store %arg10[%c0_108, %c0_109], %364 {strides = array<i32>} : memref<16x32xf32, #tpu.memory_space<vmem>>, vector<16x32xf32>,
    return
  }
}

</mosaic_0001>

<bundles_post_ra>
// kernel: decoder_layer_box.1
= control target key start
LH: loop header
LB: loop body
LE: loop exit
PB: predicated region body
PF: predicated region fallthrough
CT: control target
= control target key end

     0   :  { %15 = vsyncpa [#allocation3], 0  ;;  %s29252_s0 = inlined_call_operand.hbm [shape: f32[16,32], index: 0, kind: input, shape index: {}]   ;;  %s29253_s1 = inlined_call_operand.vmem [shape: f32[32,32], index: 1, kind: input, shape index: {}]   ;;  %s29254_s2 = inlined_call_operand.hbm [shape: f32[32,32], index: 2, kind: input, shape index: {}]   ;;  %s29255_s3 = inlined_call_operand.hbm [shape: f32[16,32], index: 3, kind: input, shape index: {}]   ;;  %s29256_s4 = inlined_call_operand.vmem [shape: f32[2,32,128], index: 4, kind: input, shape index: {}]   ;;  %s29257_s5 = inlined_call_operand.hbm [shape: f32[2,1,128], index: 5, kind: input, shape index: {}]   ;;  %s29258_s6 = inlined_call_operand.vmem [shape: f32[10,32], index: 6, kind: input, shape index: {}]   ;;  %s29259_s7 = inlined_call_operand.hbm [shape: f32[32,64], index: 7, kind: input, shape index: {}]   ;;  %s29260_s8 = inlined_call_operand.vmem [shape: f32[64,32], index: 8, kind: input, shape index: {}]   ;;  %s29261_s9 = inlined_call_operand.vmem [shape: f32[1,96], index: 9, kind: input, shape index: {}]   ;;  %s29262_s10 = inlined_call_operand.hbm [shape: f32[16,32], index: 10, kind: output, shape index: {}]  }
   0x1   :  { %16 = vsyncpa [#allocation6], 0 }
   0x2   :  { %17 = vsyncpa [#allocation9], 0 }
   0x3   :  { %18 = vsyncpa [#allocation4], 0  ;;  %s26479_s13 = smov [#allocation5]   ;;  %s26480_s15 = smov [#allocation8]  }
   0x4   :  { %s38_s14 = sshll.u32 %s26479_s13, 4  ;;  %s64_s16 = sshll.u32 %s26480_s15, 4  ;;  %s39_s14 = int_to_ptr.vmem [resolvable:$true] %s38_s14  ;;  %s65_s16 = int_to_ptr.vmem [resolvable:$true] %s64_s16 }
   0x5   :  { %s26359_s17 = scalar_lea.vmem %s39_s14, 512  ;;  %p26364_p1 = scmp.lt.s32.totalorder %s39_s14, %s39_s14 }
   0x6   :  { %p26360_p0 = scmp.ne.s32.totalorder %s39_s14, %s26359_s17  ;;  %p26365_p2 = scmp.lt.s32.totalorder %s26359_s17, %s26359_s17 }
   0x8   :  { %p26366_p3 = por %p26365_p2, %p26364_p1 }
   0xa   :  { %p26367_p4 = pnand %p26366_p3, %p26360_p0 }
   0xc   :  { %26370 = shalt.err (!%p26367_p4)
}
   0xd   :  { %s26481_s18 = smov 128   ;;  %s26482_s19 = smov 8  }
   0xe   :  { %44 = dma.hbm_to_vmem [thread:$0]  %s29254_s2, 512, %s39_s14, [#allocation6], %s26481_s18, %s26481_s18, %s26482_s19  }
   0xf   :  { %s26379_s22 = scalar_lea.vmem %s65_s16, 32  ;;  %p26384_p6 = scmp.lt.s32.totalorder %s65_s16, %s65_s16 }
  0x10   :  { %p26380_p5 = scmp.ne.s32.totalorder %s65_s16, %s26379_s22  ;;  %p26385_p7 = scmp.lt.s32.totalorder %s26379_s22, %s26379_s22 }
  0x12   :  { %p26386_p8 = por %p26385_p7, %p26384_p6 }
  0x14   :  { %p26387_p9 = pnand %p26386_p8, %p26380_p5 }
  0x16   :  { %26390 = shalt.err (!%p26387_p9)
}
  0x17   :  { %s26483_s23 = smov 16   ;;  %s26484_s24 = smov 1  }
  0x18   :  { %70 = dma.hbm_to_vmem [thread:$0]  %s29257_s5, 32, %s65_s16, [#allocation9], %s26483_s23, %s26483_s23, %s26484_s24  }
  0x19   :  { %s26485_s27 = smov [#allocation2]   ;;  %s26486_s29 = smov [#allocation7]  }
  0x1a   :  { %s24_s28 = sshll.u32 %s26485_s27, 4  ;;  %s50_s30 = sshll.u32 %s26486_s29, 4  ;;  %s25_s28 = int_to_ptr.vmem [resolvable:$true] %s24_s28  ;;  %s51_s30 = int_to_ptr.vmem [resolvable:$true] %s50_s30 }
  0x1b   :  { %s26399_s2 = scalar_lea.vmem %s25_s28, 256  ;;  %p26404_p11 = scmp.lt.s32.totalorder %s25_s28, %s25_s28 }
  0x1c   :  { %p26400_p10 = scmp.ne.s32.totalorder %s25_s28, %s26399_s2  ;;  %p26405_p12 = scmp.lt.s32.totalorder %s26399_s2, %s26399_s2 }
  0x1e   :  { %p26406_p13 = por %p26405_p12, %p26404_p11 }
  0x20   :  { %p26407_p0 = pnand %p26406_p13, %p26400_p10 }
  0x22   :  { %26410 = shalt.err (!%p26407_p0)
}
  0x23   :  { %30 = dma.hbm_to_vmem [thread:$0]  %s29252_s0, 256, %s25_s28, [#allocation3], %s26481_s18, %s26481_s18, %s26482_s19  }
  0x24   :  { %s26419_s5 = scalar_lea.vmem %s51_s30, 256  ;;  %p26424_p2 = scmp.lt.s32.totalorder %s51_s30, %s51_s30 }
  0x25   :  { %p26420_p1 = scmp.ne.s32.totalorder %s51_s30, %s26419_s5  ;;  %p26425_p3 = scmp.lt.s32.totalorder %s26419_s5, %s26419_s5 }
  0x27   :  { %p26426_p4 = por %p26425_p3, %p26424_p2 }
  0x29   :  { %p26427_p5 = pnand %p26426_p4, %p26420_p1 }
  0x2b   :  { %26430 = shalt.err (!%p26427_p5)
}
  0x2c   :  { %56 = dma.hbm_to_vmem [thread:$0]  %s29255_s3, 256, %s51_s30, [#allocation6], %s26481_s18, %s26481_s18, %s26482_s19  }
  0x2d   :  { %s26487_s15 = smov [#allocation10]  }
  0x2e   :  { %s78_s16 = sshll.u32 %s26487_s15, 4  ;;  %s79_s16 = int_to_ptr.vmem [resolvable:$true] %s78_s16 }
  0x2f   :  { %s26439_s17 = scalar_lea.vmem %s79_s16, 512  ;;  %p26444_p7 = scmp.lt.s32.totalorder %s79_s16, %s79_s16 }
  0x30   :  { %p26440_p6 = scmp.ne.s32.totalorder %s79_s16, %s26439_s17  ;;  %p26445_p8 = scmp.lt.s32.totalorder %s26439_s17, %s26439_s17 }
  0x32   :  { %p26446_p9 = por %p26445_p8, %p26444_p7 }
  0x34   :  { %p26447_p10 = pnand %p26446_p9, %p26440_p6 }
  0x36   :  { %26450 = shalt.err (!%p26447_p10)
}
  0x37   :  { %84 = dma.hbm_to_vmem [thread:$0]  %s29259_s7, 512, %s79_s16, [#allocation9], %s26481_s18, %s26481_s18, %s26482_s19  }
  0x38   :  { %26471 = dma.done.wait [#allocation3], 256  }
  0x39   :  { %26472 = vsyncadd [#allocation3], 4294967040 }
  0x3a   :  { %26473 = dma.done.wait [#allocation6], 768  }
  0x3b   :  { %26474 = vsyncadd [#allocation6], 4294966528 }
  0x3c   :  { %26475 = dma.done.wait [#allocation9], 544  }
  0x3d   :  { %26476 = vsyncadd [#allocation9], 4294966752  ;;  %v122_v0 = vld [vmem:[%s29256_s4 + $0x18] sm:$0xff]  ;;  %v121_v1 = vld [vmem:[%s29256_s4 + $0x10] sm:$0xff]  ;;  %vm139_vm0 = vcmask 261120   ;;  %s26488_s27 = smov 64  }
  0x3e   :  { %v120_v2 = vld [vmem:[%s29256_s4 + $0x8] sm:$0xff]  ;;  %v26591_v3 = vand.u32 4294901760, %v122_v0  ;;  %v26593_v4 = vand.u32 4294901760, %v121_v1  ;;  %v119_v6 = vld [vmem:[%s29256_s4] sm:$0xff]  ;;  %v114_v8 = vld [vmem:[#allocation7] sm:$0xff]  ;;  %684 = vrot.lane.b32.xlu0 %v122_v0, %s26488_s27  ;;  %vm26490_vm1 = vmmov 0  }
  0x3f   :  { %v26595_v5 = vand.u32 4294901760, %v120_v2  ;;  %v26600_v7 = vld [vmem:[#allocation2] sm:$0xff]  ;;  %680 = vrot.lane.b32.xlu1 %v120_v2, %s26488_s27  ;;  %v26604_v9 = vand.u32 4294901760, %v119_v6  ;;  %v26609_v11 = vld [vmem:[#allocation2 + $0x8] sm:$0xff]  ;;  %v115_v12 = vld [vmem:[#allocation7 + $0x8] sm:$0xff]  ;;  %s26491_s28 = smov 96  }
  0x40   :  { %v26607_v10 = vadd.f32 %v114_v8, %v26600_v7  ;;  %24292 = vmatprep.subr.mxu0 %v26591_v3  ;;  %v261_v13 = vsub.f32 %v122_v0, %v26591_v3  ;;  %v268_v14 = vsub.f32 %v121_v1, %v26593_v4  ;;  %v26615_v15 = vadd.f32 %v115_v12, %v26609_v11  ;;  %s26492_s29 = smov 120   ;;  %s26493_s30 = smov 88  }
  0x41   :  { %v275_v16 = vsub.f32 %v120_v2, %v26595_v5  ;;  %24293 = vmatpush3.msra.mxu0 %v26591_v3  ;;  %v282_v18 = vsub.f32 %v119_v6, %v26604_v9  ;;  %v694_v42 = vsel %vm139_vm0, %v26600_v7, 0  ;;  %v697_v43 = vsel %vm139_vm0, %v26609_v11, 0  ;;  %s26494_s12 = smov 32   ;;  %s26495_s5 = smov 112  }
  0x42   :  { %v141_v17 = vsel %vm139_vm0, %v26607_v10, 0  ;;  %24294 = vmatprep.subr.mxu0 %v26593_v4  ;;  %v262_v19 = vand.u32 4294901760, %v261_v13  ;;  %v269_v20 = vand.u32 4294901760, %v268_v14  ;;  %v144_v22 = vsel %vm139_vm0, %v26615_v15, 0  ;;  %682 = vrot.lane.b32.xlu0 %v121_v1, %s26488_s27  ;;  %s26496_s15 = smov 80   ;;  %s26497_s16 = smov 72  }
  0x43   :  { %v26623_v21 = vand.u32 4294901760, %v141_v17  ;;  %24295 = vmatpush3.msra.mxu0 %v26593_v4  ;;  %v26629_v23 = vand.u32 4294901760, %v144_v22  ;;  %v276_v24 = vand.u32 4294901760, %v275_v16  ;;  %v283_v25 = vand.u32 4294901760, %v282_v18  ;;  %678 = vrot.lane.b32.xlu1 %v119_v6, %s26488_s27  ;;  %s26498_s20 = smov 104   ;;  %s26499_s24 = smov [#allocation11]  }
  0x44   :  { %24296 = vmatprep.subr.mxu0 %v26595_v5  ;;  %v263_v26 = vsub.f32 %v261_v13, %v262_v19  ;;  %v270_v27 = vsub.f32 %v268_v14, %v269_v20  ;;  %v26664_v44 = vand.u32 4294901760, %v694_v42  ;;  %v26666_v45 = vand.u32 4294901760, %v697_v43 }
  0x45   :  { %v216_v28 = vsub.f32 %v141_v17, %v26623_v21  ;;  %24311 = vmatprep.mubr.f32.mxu1 %v26623_v21  ;;  %24297 = vmatpush3.msra.mxu0 %v26595_v5  ;;  %v226_v29 = vsub.f32 %v144_v22, %v26629_v23  ;;  %v277_v30 = vsub.f32 %v275_v16, %v276_v24  ;;  %v26721_v17 = vld [vmem:[#allocation8] ss:$0 sm:$0xff]  ;;  %vm1230_vm2 = vcmask 64512  }
  0x46   :  { %v264_v31 = vand.u32 4294901760, %v263_v26  ;;  %24298 = vmatprep.subr.mxu0 %v26604_v9  ;;  %v271_v32 = vand.u32 4294901760, %v270_v27  ;;  %v284_v34 = vsub.f32 %v282_v18, %v283_v25  ;;  %v769_v46 = vsub.f32 %v694_v42, %v26664_v44 }
  0x47   :  { %v217_v33 = vand.u32 4294901760, %v216_v28  ;;  %24299 = vmatpush3.msra.mxu0 %v26604_v9  ;;  %v227_v35 = vand.u32 4294901760, %v226_v29  ;;  %v278_v37 = vand.u32 4294901760, %v277_v30  ;;  %v26671_v47 = vsub.f32 %v697_v43, %v26666_v45 }
  0x48   :  { %24303 = vmatprep.subr.mxu1 %v264_v31  ;;  %24314 = vmatprep.subr.mxu0 %v261_v13  ;;  %v285_v40 = vand.u32 4294901760, %v284_v34  ;;  %v770_v48 = vand.u32 4294901760, %v769_v46  ;;  %v26489_v30 = vmov 0.0   ;;  %vm13418_vm3 = vcmask 130048  }
  0x49   :  { %v218_v36 = vsub.f32 %v216_v28, %v217_v33  ;;  %24304 = vmatpush3.msra.mxu1 %v264_v31  ;;  %v228_v38 = vsub.f32 %v226_v29, %v227_v35  ;;  %v780_v54 = vand.u32 4294901760, %v26671_v47  ;;  %vm22713_vm4 = vcmask 523264  }
  0x4a   :  { %24305 = vmatprep.subr.mxu1 %v271_v32  ;;  %v771_v51 = vsub.f32 %v769_v46, %v770_v48 }
  0x4b   :  { %v219_v39 = vand.u32 4294901760, %v218_v36  ;;  %24306 = vmatpush3.msra.mxu1 %v271_v32  ;;  %v229_v41 = vand.u32 4294901760, %v228_v38  ;;  %v781_v63 = vsub.f32 %v26671_v47, %v780_v54 }
  0x4c   :  { %24307 = vmatprep.subr.mxu1 %v278_v37  ;;  %v772_v55 = vand.u32 4294901760, %v771_v51 }
  0x4d   :  { %24300 = vmatprep.mubr.f32.mxu0 %v219_v39  ;;  %24308 = vmatpush3.msra.mxu1 %v278_v37  ;;  %v782_v7 = vand.u32 4294901760, %v781_v63 }
  0x4e   :  { %24301 = vmatmul.mubr.f32.vlgmr.msra.gmra.mxu0 %v229_v41  ;;  %24309 = vmatprep.subr.mxu1 %v285_v40 }
  0x4f   :  { %24315 = vmatpush3.msra.mxu0 %v261_v13  ;;  %24310 = vmatpush3.msra.mxu1 %v285_v40 }
  0x50   :  { %24316 = vmatprep.subr.mxu0 %v268_v14  ;;  %24312 = vmatmul.mubr.f32.vlgmr.msra.gmra.mxu1 %v26629_v23 }
  0x51   :  { %24317 = vmatpush3.msra.mxu0 %v268_v14  ;;  %24325 = vmatprep.subr.mxu1 %v26591_v3 }
  0x52   :  { %24318 = vmatprep.subr.mxu0 %v275_v16  ;;  %24326 = vmatpush3.msra.mxu1 %v26591_v3 }
  0x53   :  { %24319 = vmatpush3.msra.mxu0 %v275_v16  ;;  %24322 = vmatprep.mubr.f32.mxu0 %v216_v28 }
  0x54   :  { %24320 = vmatprep.subr.mxu0 %v282_v18  ;;  %24327 = vmatprep.subr.mxu1 %v26593_v4 }
  0x55   :  { %24321 = vmatpush3.msra.mxu0 %v282_v18  ;;  %24328 = vmatpush3.msra.mxu1 %v26593_v4 }
  0x56   :  { %24323 = vmatmul.mubr.f32.vlgmr.msra.gmra.mxu0 %v226_v29  ;;  %24336 = vmatprep.subr.mxu0 %v262_v19 }
  0x57   :  { %24329 = vmatprep.subr.mxu1 %v26595_v5  ;;  %24337 = vmatpush3.msra.mxu0 %v262_v19 }
  0x58   :  { %24330 = vmatpush3.msra.mxu1 %v26595_v5  ;;  %24338 = vmatprep.subr.mxu0 %v269_v20 }
  0x59   :  { %24331 = vmatprep.subr.mxu1 %v26604_v9  ;;  %24339 = vmatpush3.msra.mxu0 %v269_v20 }
  0x5a   :  { %24332 = vmatpush3.msra.mxu1 %v26604_v9  ;;  %24333 = vmatprep.mubr.f32.mxu1 %v217_v33 }
  0x5b   :  { %24340 = vmatprep.subr.mxu0 %v276_v24  ;;  %24334 = vmatmul.mubr.f32.vlgmr.msra.gmra.mxu1 %v227_v35 }
  0x5c   :  { %24341 = vmatpush3.msra.mxu0 %v276_v24  ;;  %24347 = vmatprep.subr.mxu1 %v26591_v3 }
  0x5d   :  { %24342 = vmatprep.subr.mxu0 %v283_v25  ;;  %24348 = vmatpush3.msra.mxu1 %v26591_v3 }
  0x5e   :  { %24343 = vmatpush3.msra.mxu0 %v283_v25  ;;  %24344 = vmatprep.mubr.f32.mxu0 %v26623_v21 }
  0x5f   :  { %24349 = vmatprep.subr.mxu1 %v26593_v4  ;;  %24345 = vmatmul.mubr.f32.vlgmr.msra.gmra.mxu0 %v26629_v23 }
  0x60   :  { %24350 = vmatpush3.msra.mxu1 %v26593_v4  ;;  %24355 = vmatprep.mubr.f32.mxu1 %v26623_v21 }
  0x61   :  { %24351 = vmatprep.subr.mxu1 %v26595_v5  ;;  %24366 = vmatprep.mubr.f32.mxu0 %v772_v55 }
  0x62   :  { %24352 = vmatpush3.msra.mxu1 %v26595_v5 }
  0x63   :  { %24353 = vmatprep.subr.mxu1 %v26604_v9 }
  0x64   :  { %24354 = vmatpush3.msra.mxu1 %v26604_v9 }
  0x65   :  { %24356 = vmatmul.mubr.f32.vlgmr.msra.gmra.mxu1 %v26629_v23 }
  0x66   :  { %24377 = vmatprep.mubr.f32.mxu1 %v26664_v44 }
  0xb0   :  { %v685_v49 = vpop.permute.xlu0 %684 }
  0xb1   :  { %v681_v50 = vpop.permute.xlu1 %680  ;;  %v26673_v52 = vand.u32 4294901760, %v685_v49 }
  0xb2   :  { %v26675_v53 = vand.u32 4294901760, %v681_v50 }
  0xb3   :  { %v814_v56 = vsub.f32 %v685_v49, %v26673_v52  ;;  %24358 = vmatprep.subr.mxu0 %v26673_v52 }
  0xb4   :  { %v828_v57 = vsub.f32 %v681_v50, %v26675_v53  ;;  %v683_v58 = vpop.permute.xlu0 %682  ;;  %24359 = vmatpush3.msra.mxu0 %v26673_v52 }
  0xb5   :  { %v26682_v59 = vand.u32 4294901760, %v683_v58  ;;  %v679_v60 = vpop.permute.xlu1 %678  ;;  %v815_v61 = vand.u32 4294901760, %v814_v56 }
  0xb6   :  { %v829_v62 = vand.u32 4294901760, %v828_v57  ;;  %v26687_v0 = vand.u32 4294901760, %v679_v60 }
  0xb7   :  { %v821_v1 = vsub.f32 %v683_v58, %v26682_v59  ;;  %v816_v2 = vsub.f32 %v814_v56, %v815_v61  ;;  %24360 = vmatprep.subr.mxu0 %v26682_v59 }
  0xb8   :  { %v835_v3 = vsub.f32 %v679_v60, %v26687_v0  ;;  %24361 = vmatpush3.msra.mxu0 %v26682_v59  ;;  %v830_v6 = vsub.f32 %v828_v57, %v829_v62 }
  0xb9   :  { %v817_v4 = vand.u32 4294901760, %v816_v2  ;;  %v822_v5 = vand.u32 4294901760, %v821_v1  ;;  %24362 = vmatprep.subr.mxu0 %v26675_v53 }
  0xba   :  { %v836_v8 = vand.u32 4294901760, %v835_v3  ;;  %24363 = vmatpush3.msra.mxu0 %v26675_v53  ;;  %v831_v13 = vand.u32 4294901760, %v830_v6 }
  0xbb   :  { %24369 = vmatprep.subr.mxu1 %v817_v4  ;;  %v823_v9 = vsub.f32 %v821_v1, %v822_v5  ;;  %24364 = vmatprep.subr.mxu0 %v26687_v0 }
  0xbc   :  { %24370 = vmatpush3.msra.mxu1 %v817_v4  ;;  %v837_v11 = vsub.f32 %v835_v3, %v836_v8  ;;  %24365 = vmatpush3.msra.mxu0 %v26687_v0 }
  0xbd   :  { %v824_v12 = vand.u32 4294901760, %v823_v9  ;;  %24380 = vmatprep.subr.mxu0 %v814_v56  ;;  %24367 = vmatmul.mubr.f32.vlgmr.msra.gmra.mxu0 %v782_v7 }
  0xbe   :  { %24381 = vmatpush3.msra.mxu0 %v814_v56  ;;  %24388 = vmatprep.mubr.f32.mxu0 %v769_v46  ;;  %v838_v14 = vand.u32 4294901760, %v837_v11 }
  0xbf   :  { %24371 = vmatprep.subr.mxu1 %v824_v12  ;;  %24382 = vmatprep.subr.mxu0 %v821_v1 }
  0xc0   :  { %24372 = vmatpush3.msra.mxu1 %v824_v12  ;;  %24383 = vmatpush3.msra.mxu0 %v821_v1 }
  0xc1   :  { %24373 = vmatprep.subr.mxu1 %v831_v13  ;;  %24384 = vmatprep.subr.mxu0 %v828_v57 }
  0xc2   :  { %24374 = vmatpush3.msra.mxu1 %v831_v13  ;;  %24385 = vmatpush3.msra.mxu0 %v828_v57 }
  0xc3   :  { %24375 = vmatprep.subr.mxu1 %v838_v14  ;;  %24386 = vmatprep.subr.mxu0 %v835_v3 }
  0xc4   :  { %24376 = vmatpush3.msra.mxu1 %v838_v14  ;;  %24387 = vmatpush3.msra.mxu0 %v835_v3 }
  0xc5   :  { %24391 = vmatprep.subr.mxu1 %v26673_v52  ;;  %24378 = vmatmul.mubr.f32.vlgmr.msra.gmra.mxu1 %v26666_v45 }
  0xc6   :  { %24392 = vmatpush3.msra.mxu1 %v26673_v52  ;;  %24399 = vmatprep.mubr.f32.mxu1 %v770_v48 }
  0xc7   :  { %24393 = vmatprep.subr.mxu1 %v26682_v59  ;;  %24402 = vmatprep.subr.mxu0 %v815_v61 }
  0xc8   :  { %24394 = vmatpush3.msra.mxu1 %v26682_v59  ;;  %24389 = vmatmul.mubr.f32.vlgmr.msra.gmra.mxu0 %v26671_v47 }
  0xc9   :  { %24395 = vmatprep.subr.mxu1 %v26675_v53  ;;  %24403 = vmatpush3.msra.mxu0 %v815_v61 }
  0xca   :  { %24396 = vmatpush3.msra.mxu1 %v26675_v53  ;;  %24404 = vmatprep.subr.mxu0 %v822_v5 }
  0xcb   :  { %24397 = vmatprep.subr.mxu1 %v26687_v0  ;;  %24405 = vmatpush3.msra.mxu0 %v822_v5 }
  0xcc   :  { %24398 = vmatpush3.msra.mxu1 %v26687_v0  ;;  %24406 = vmatprep.subr.mxu0 %v829_v62 }
  0xcd   :  { %24413 = vmatprep.subr.mxu1 %v26673_v52  ;;  %24400 = vmatmul.mubr.f32.vlgmr.msra.gmra.mxu1 %v780_v54 }
  0xce   :  { %24414 = vmatpush3.msra.mxu1 %v26673_v52  ;;  %24407 = vmatpush3.msra.mxu0 %v829_v62 }
  0xcf   :  { %24415 = vmatprep.subr.mxu1 %v26682_v59  ;;  %24408 = vmatprep.subr.mxu0 %v836_v8 }
  0xd0   :  { %24416 = vmatpush3.msra.mxu1 %v26682_v59  ;;  %24409 = vmatpush3.msra.mxu0 %v836_v8 }
  0xd1   :  { %24417 = vmatprep.subr.mxu1 %v26675_v53  ;;  %24410 = vmatprep.mubr.f32.mxu0 %v26664_v44 }
  0xd2   :  { %24418 = vmatpush3.msra.mxu1 %v26675_v53  ;;  %24411 = vmatmul.mubr.f32.vlgmr.msra.gmra.mxu0 %v26666_v45 }
  0xd3   :  { %24419 = vmatprep.subr.mxu1 %v26687_v0  ;;  %24421 = vmatprep.mubr.f32.mxu1 %v26664_v44 }
  0xd4   :  { %24420 = vmatpush3.msra.mxu1 %v26687_v0  ;;  %24424 = vmatprep.subr.mxu0 %v26489_v30 }
  0xd5   :  { %24422 = vmatmul.mubr.f32.vlgmr.msra.gmra.mxu1 %v26666_v45  ;;  %24429 = vmatprep.subr.mxu1 %v26489_v30 }
  0xd6   :  { %24426 = vmatprep.mubr.msk.f32.mxu0 %vm26490_vm1, %v26489_v30  ;;  %24431 = vmatprep.mubr.msk.f32.mxu1 %vm26490_vm1, %v26489_v30 }
 0x10e   :  { %v24302_v16 = vpop.f32.mrf.mxu0 }
 0x10f   :  { %v232_v20 = vadd.f32 %v24302_v16, %v26721_v17 }
 0x110   :  { %v221_v18 = vpop.f32.mrf.mxu0  ;;  %v24313_v19 = vpop.f32.mrf.mxu1 }
 0x111   :  { %v222_v21 = vadd.f32 %v26721_v17, %v221_v18  ;;  %v329_v24 = vadd.f32 %v24313_v19, %v232_v20 }
 0x112   :  { %v322_v22 = vpop.f32.mrf.mxu1 }
 0x113   :  { %v323_v25 = vadd.f32 %v322_v22, %v222_v21 }
 0x116   :  { %v24324_v23 = vpop.f32.mrf.mxu0 }
 0x117   :  { %v416_v28 = vadd.f32 %v24324_v23, %v329_v24 }
 0x118   :  { %v408_v27 = vpop.f32.mrf.mxu0 }
 0x119   :  { %v409_v31 = vadd.f32 %v408_v27, %v323_v25 }
 0x11b   :  { %v24335_v26 = vpop.f32.mrf.mxu1 }
 0x11c   :  { %v501_v32 = vadd.f32 %v24335_v26, %v416_v28 }
 0x11d   :  { %v492_v29 = vpop.f32.mrf.mxu1 }
 0x11e   :  { %v493_v34 = vadd.f32 %v492_v29, %v409_v31 }
 0x11f   :  { %v24346_v33 = vpop.f32.mrf.mxu0 }
 0x120   :  { %v590_v36 = vadd.f32 %v24346_v33, %v501_v32 }
 0x121   :  { %v583_v35 = vpop.f32.mrf.mxu0 }
 0x122   :  { %v584_v38 = vadd.f32 %v583_v35, %v493_v34 }
 0x125   :  { %v24357_v37 = vpop.f32.mrf.mxu1 }
 0x126   :  { %v26731_v39 = vadd.f32 %v24357_v37, %v590_v36 }
 0x127   :  { %v664_v40 = vpop.f32.mrf.mxu1 }
 0x128   :  { %v26733_v41 = vadd.f32 %v664_v40, %v584_v38  ;;  %1682 = vrot.lane.b32.xlu1 %v26731_v39, %s26491_s28  ;;  %v1684_v46 = vsel %vm1230_vm2, %v26731_v39, 0 }
 0x129   :  { %v1754_v51 = vand.u32 4294901760, %v1684_v46 }
 0x12a   :  { %1228 = vrot.lane.b32.xlu0 %v26733_v41, %s26491_s28  ;;  %v1231_v42 = vsel %vm1230_vm2, %v26733_v41, 0 }
 0x12b   :  { %v1301_v43 = vand.u32 4294901760, %v1231_v42  ;;  %v1755_v56 = vsub.f32 %v1684_v46, %v1754_v51 }
 0x12d   :  { %v1302_v44 = vsub.f32 %v1231_v42, %v1301_v43  ;;  %v1756_v60 = vand.u32 4294901760, %v1755_v56 }
 0x12f   :  { %v1303_v45 = vand.u32 4294901760, %v1302_v44  ;;  %v1757_v63 = vsub.f32 %v1755_v56, %v1756_v60 }
 0x131   :  { %v1304_v50 = vsub.f32 %v1302_v44, %v1303_v45  ;;  %v1758_v1 = vand.u32 4294901760, %v1757_v63 }
 0x133   :  { %v1305_v55 = vand.u32 4294901760, %v1304_v50 }
 0x17d   :  { %v26781_v4 = vpop.f32.mrf.mxu0 }
 0x17f   :  { %v26783_v5 = vpop.f32.mrf.mxu0 }
 0x185   :  { %v26789_v8 = vpop.f32.mrf.mxu1 }
 0x187   :  { %v875_v11 = vpop.f32.mrf.mxu1 }
 0x188   :  { %v26785_v6 = vpop.f32.mrf.mxu0 }
 0x18a   :  { %v26787_v7 = vpop.f32.mrf.mxu0 }
 0x18d   :  { %v26793_v12 = vpop.f32.mrf.mxu1 }
 0x18f   :  { %v26797_v14 = vpop.f32.mrf.mxu1 }
 0x192   :  { %v26791_v9 = vpop.f32.mrf.mxu0 }
 0x194   :  { %v26795_v13 = vpop.f32.mrf.mxu0 }
 0x195   :  { %v26799_v18 = vpop.f32.mrf.mxu1 }
 0x197   :  { %v1217_v21 = vpop.f32.mrf.mxu1 }
 0x19a   :  { %v1683_v47 = vpop.permute.xlu1 %1682 }
 0x19b   :  { %v1686_v53 = vsel %vm1230_vm2, %v1683_v47, 0 }
 0x19c   :  { %v1229_v48 = vpop.permute.xlu0 %1228  ;;  %v1719_v57 = vand.u32 4294901760, %v1686_v53 }
 0x19d   :  { %v1233_v49 = vsel %vm1230_vm2, %v1229_v48, 0 }
 0x19e   :  { %v1266_v52 = vand.u32 4294901760, %v1233_v49  ;;  %v1796_v61 = vsub.f32 %v1686_v53, %v1719_v57 }
 0x1a0   :  { %v1343_v54 = vsub.f32 %v1233_v49, %v1266_v52  ;;  %24425 = vmatpush3.xpose.msra.mxu0 %v1266_v52  ;;  %v1797_v0 = vand.u32 4294901760, %v1796_v61 }
 0x1a1   :  { %24434 = vmatprep.subr.mxu0 %v26489_v30 }
 0x1a2   :  { %v1344_v58 = vand.u32 4294901760, %v1343_v54  ;;  %v1798_v2 = vsub.f32 %v1796_v61, %v1797_v0 }
 0x1a3   :  { %24427 = vmatmul.mubr.f32.vlgmr.msra.gmra.mxu0 %v1305_v55 }
 0x1a4   :  { %v1345_v59 = vsub.f32 %v1343_v54, %v1344_v58  ;;  %24435 = vmatpush3.xpose.msra.mxu0 %v1343_v54  ;;  %24436 = vmatprep.mubr.msk.f32.mxu0 %vm26490_vm1, %v26489_v30  ;;  %v1799_v3 = vand.u32 4294901760, %v1798_v2 }
 0x1a5   :  { %24444 = vmatprep.subr.mxu0 %v26489_v30 }
 0x1a6   :  { %v1346_v62 = vand.u32 4294901760, %v1345_v59 }
 0x1a7   :  { %24437 = vmatmul.mubr.f32.vlgmr.msra.gmra.mxu0 %v1302_v44 }
 0x1a8   :  { %24430 = vmatpush3.xpose.msra.mxu1 %v1346_v62  ;;  %24445 = vmatpush3.xpose.msra.mxu0 %v1344_v58 }
 0x1a9   :  { %24446 = vmatprep.mubr.msk.f32.mxu0 %vm26490_vm1, %v26489_v30  ;;  %24439 = vmatprep.subr.mxu1 %v26489_v30 }
 0x1aa   :  { %24454 = vmatprep.subr.mxu0 %v26489_v30 }
 0x1ab   :  { %24432 = vmatmul.mubr.f32.vlgmr.msra.gmra.mxu1 %v1301_v43  ;;  %24447 = vmatmul.mubr.f32.vlgmr.msra.gmra.mxu0 %v1301_v43 }
 0x1ac   :  { %24440 = vmatpush3.xpose.msra.mxu1 %v1266_v52  ;;  %24455 = vmatpush3.xpose.msra.mxu0 %v1719_v57 }
 0x1ad   :  { %24441 = vmatprep.mubr.msk.f32.mxu1 %vm26490_vm1, %v26489_v30  ;;  %24456 = vmatprep.mubr.msk.f32.mxu0 %vm26490_vm1, %v26489_v30 }
 0x1ae   :  { %24449 = vmatprep.subr.mxu1 %v26489_v30  ;;  %24464 = vmatprep.subr.mxu0 %v26489_v30 }
 0x1af   :  { %24442 = vmatmul.mubr.f32.vlgmr.msra.gmra.mxu1 %v1303_v45  ;;  %24457 = vmatmul.mubr.f32.vlgmr.msra.gmra.mxu0 %v1758_v1 }
 0x1b0   :  { %24450 = vmatpush3.xpose.msra.mxu1 %v1266_v52  ;;  %24465 = vmatpush3.xpose.msra.mxu0 %v1796_v61 }
 0x1b1   :  { %24451 = vmatprep.mubr.msk.f32.mxu1 %vm26490_vm1, %v26489_v30  ;;  %24466 = vmatprep.mubr.msk.f32.mxu0 %vm26490_vm1, %v26489_v30 }
 0x1b2   :  { %24459 = vmatprep.subr.mxu1 %v26489_v30  ;;  %24474 = vmatprep.subr.mxu0 %v26489_v30 }
 0x1b3   :  { %24452 = vmatmul.mubr.f32.vlgmr.msra.gmra.mxu1 %v1301_v43  ;;  %24467 = vmatmul.mubr.f32.vlgmr.msra.gmra.mxu0 %v1755_v56 }
 0x1b4   :  { %24460 = vmatpush3.xpose.msra.mxu1 %v1799_v3  ;;  %24475 = vmatpush3.xpose.msra.mxu0 %v1797_v0 }
 0x1b5   :  { %24461 = vmatprep.mubr.msk.f32.mxu1 %vm26490_vm1, %v26489_v30  ;;  %24476 = vmatprep.mubr.msk.f32.mxu0 %vm26490_vm1, %v26489_v30 }
 0x1b6   :  { %24469 = vmatprep.subr.mxu1 %v26489_v30  ;;  %24484 = vmatprep.subr.mxu0 %v26489_v30 }
 0x1b7   :  { %24462 = vmatmul.mubr.f32.vlgmr.msra.gmra.mxu1 %v1754_v51  ;;  %24477 = vmatmul.mubr.f32.vlgmr.msra.gmra.mxu0 %v1754_v51 }
 0x1b8   :  { %24470 = vmatpush3.xpose.msra.mxu1 %v1719_v57  ;;  %24471 = vmatprep.mubr.msk.f32.mxu1 %vm26490_vm1, %v26489_v30 }
 0x1b9   :  { %24479 = vmatprep.subr.mxu1 %v26489_v30  ;;  %24486 = vmatprep.mubr.msk.f32.mxu0 %vm26490_vm1, %v26489_v30 }
 0x1bb   :  { %24472 = vmatmul.mubr.f32.vlgmr.msra.gmra.mxu1 %v1756_v60 }
 0x1bc   :  { %24480 = vmatpush3.xpose.msra.mxu1 %v1719_v57  ;;  %24481 = vmatprep.mubr.msk.f32.mxu1 %vm26490_vm1, %v26489_v30 }
 0x1bd   :  { %24489 = vmatprep.subr.mxu1 %v26489_v30 }
 0x1bf   :  { %24482 = vmatmul.mubr.f32.vlgmr.msra.gmra.mxu1 %v1754_v51 }
 0x1c0   :  { %24491 = vmatprep.mubr.msk.f32.mxu1 %vm26490_vm1, %v26489_v30 }
 0x263   :  { %v1307_v16 = vpop.f32.mrf.mxu0 }
 0x265   :  { %v24428_v19 = vpop.f32.mrf.mxu0 }
 0x267   :  { %v1457_v20 = vpop.f32.mrf.mxu0 }
 0x269   :  { %v24438_v22 = vpop.f32.mrf.mxu0 }
 0x26b   :  { %v1383_v23 = vpop.f32.mrf.mxu1  ;;  %v1605_v24 = vpop.f32.mrf.mxu0 }
 0x26c   :  { %v1384_v25 = vadd.f32 %v1383_v23, %v1307_v16 }
 0x26d   :  { %v24433_v26 = vpop.f32.mrf.mxu1  ;;  %v24448_v27 = vpop.f32.mrf.mxu0 }
 0x26e   :  { %v1458_v28 = vadd.f32 %v1457_v20, %v1384_v25 }
 0x26f   :  { %v1531_v29 = vpop.f32.mrf.mxu1  ;;  %v1760_v31 = vpop.f32.mrf.mxu0 }
 0x270   :  { %v1532_v32 = vadd.f32 %v1531_v29, %v1458_v28 }
 0x271   :  { %v24443_v33 = vpop.f32.mrf.mxu1  ;;  %v24458_v34 = vpop.f32.mrf.mxu0 }
 0x272   :  { %v1606_v35 = vadd.f32 %v1605_v24, %v1532_v32 }
 0x273   :  { %v1677_v36 = vpop.f32.mrf.mxu1  ;;  %v1910_v37 = vpop.f32.mrf.mxu0 }
 0x274   :  { %v1678_v38 = vadd.f32 %v1677_v36, %v1606_v35 }
 0x275   :  { %v24453_v40 = vpop.f32.mrf.mxu1  ;;  %v24468_v42 = vpop.f32.mrf.mxu0 }
 0x276   :  { %v2134_v43 = vmul.f32 0.35355338, %v1678_v38 }
 0x277   :  { %v1836_v44 = vpop.f32.mrf.mxu1  ;;  %v2058_v45 = vpop.f32.mrf.mxu0 }
 0x278   :  { %v1837_v46 = vadd.f32 %v1836_v44, %v1760_v31  ;;  %v2136_v47 = vsel %vm1230_vm2, %v2134_v43, -inf }
 0x279   :  { %v24463_v48 = vpop.f32.mrf.mxu1  ;;  %2137 = vmax.xlane.f32.xlu0 %v2136_v47  ;;  %v24478_v49 = vpop.f32.mrf.mxu0 }
 0x27a   :  { %v1911_v50 = vadd.f32 %v1910_v37, %v1837_v46 }
 0x27b   :  { %v1984_v51 = vpop.f32.mrf.mxu1 }
 0x27c   :  { %v1985_v52 = vadd.f32 %v1984_v51, %v1911_v50 }
 0x27d   :  { %v24473_v53 = vpop.f32.mrf.mxu1 }
 0x27e   :  { %v2059_v54 = vadd.f32 %v2058_v45, %v1985_v52 }
 0x27f   :  { %v2130_v55 = vpop.f32.mrf.mxu1 }
 0x280   :  { %v2131_v56 = vadd.f32 %v2130_v55, %v2059_v54 }
 0x281   :  { %v24483_v57 = vpop.f32.mrf.mxu1 }
 0x282   :  { %v2135_v58 = vmul.f32 0.35355338, %v2131_v56 }
 0x284   :  { %v2139_v59 = vsel %vm1230_vm2, %v2135_v58, -inf }
 0x285   :  { %2140 = vmax.xlane.f32.xlu1 %v2139_v59 }
 0x296   :  { %690 = vrot.lane.b32.xlu1 %v26721_v17, %s26488_s27 }
 0x29a   :  { %3056 = vrot.lane.b32.xlu1 %v26733_v41, %s26492_s29 }
 0x29e   :  { %3512 = vrot.lane.b32.xlu1 %v26731_v39, %s26493_s30 }
 0x302   :  { %v2138_v60 = vpop.xlane.xlu0 %2137 }
 0x303   :  { %v2142_v61 = vsub.f32 %v2134_v43, %v2138_v60 }
 0x305   :  { %v2144_v62 = vmul.f32 1.442695, %v2142_v61 }
 0x307   :  { %26251 = vpow2.f32 %v2144_v62 }
 0x30e   :  { %v2141_v63 = vpop.xlane.xlu1 %2140 }
 0x30f   :  { %v2143_v0 = vsub.f32 %v2135_v58, %v2141_v63 }
 0x311   :  { %v2146_v1 = vmul.f32 1.442695, %v2143_v0 }
 0x312   :  { %v691_v2 = vpop.permute.xlu1 %690 }
 0x313   :  { %26253 = vpow2.f32 %v2146_v1  ;;  %v775_v3 = vadd.f32 %v26783_v5, %v691_v2 }
 0x314   :  { %v26252_v17 = vpop.eup %26251 }
 0x315   :  { %v876_v16 = vadd.f32 %v875_v11, %v775_v3  ;;  %v2148_v19 = vsel %vm1230_vm2, %v26252_v17, 0.0 }
 0x316   :  { %2149 = vadd.xlane.f32.xlu0 %v2148_v19  ;;  %v3057_v42 = vpop.permute.xlu1 %3056 }
 0x317   :  { %v962_v20 = vadd.f32 %v26787_v7, %v876_v16  ;;  %v3060_v54 = vsel %vm1230_vm2, %v3057_v42, 0 }
 0x318   :  { %v26869_v58 = vand.u32 4294901760, %v3060_v54 }
 0x319   :  { %v1046_v22 = vadd.f32 %v26797_v14, %v962_v20 }
 0x31a   :  { %v3513_v51 = vpop.permute.xlu1 %3512  ;;  %v3131_v63 = vsub.f32 %v3060_v54, %v26869_v58 }
 0x31b   :  { %v1137_v23 = vadd.f32 %v26795_v13, %v1046_v22  ;;  %v785_v13 = vadd.f32 %v26781_v4, %v691_v2  ;;  %v3516_v56 = vsel %vm1230_vm2, %v3513_v51, 0 }
 0x31c   :  { %v26874_v60 = vand.u32 4294901760, %v3516_v56 }
 0x31d   :  { %v26814_v24 = vadd.f32 %v1217_v21, %v1137_v23  ;;  %v882_v21 = vadd.f32 %v26789_v8, %v785_v13 }
 0x31e   :  { %v26887_v1 = vsub.f32 %v3516_v56, %v26874_v60 }
 0x31f   :  { %v2192_v25 = vand.u32 4294901760, %v26814_v24  ;;  %v969_v28 = vadd.f32 %v26785_v6, %v882_v21 }
 0x320   :  { %v26254_v26 = vpop.eup %26253  ;;  %v3627_v16 = vand.u32 4294901760, %v26887_v1 }
 0x321   :  { %24485 = vmatpush3.msra.mxu0 %v2192_v25  ;;  %v2151_v27 = vsel %vm1230_vm2, %v26254_v26, 0.0  ;;  %v26819_v5 = vsub.f32 %v26814_v24, %v2192_v25  ;;  %v1054_v29 = vadd.f32 %v26793_v12, %v969_v28 }
 0x322   :  { %2152 = vadd.xlane.f32.xlu0 %v2151_v27  ;;  %24494 = vmatprep.subr.mxu0 %v26489_v30  ;;  %v3628_v23 = vsub.f32 %v26887_v1, %v3627_v16 }
 0x323   :  { %v2270_v7 = vand.u32 4294901760, %v26819_v5  ;;  %v1143_v32 = vadd.f32 %v26791_v9, %v1054_v29 }
 0x324   :  { %v3629_v27 = vand.u32 4294901760, %v3628_v23 }
 0x325   :  { %v2271_v11 = vsub.f32 %v26819_v5, %v2270_v7  ;;  %v26835_v33 = vadd.f32 %v26799_v18, %v1143_v32 }
 0x327   :  { %v2272_v14 = vand.u32 4294901760, %v2271_v11  ;;  %v2641_v34 = vand.u32 4294901760, %v26835_v33 }
 0x329   :  { %24490 = vmatpush3.msra.mxu1 %v2272_v14  ;;  %v26839_v4 = vsub.f32 %v26835_v33, %v2641_v34 }
 0x32a   :  { %24499 = vmatprep.subr.mxu1 %v26489_v30 }
 0x32b   :  { %v2719_v38 = vand.u32 4294901760, %v26839_v4 }
 0x32d   :  { %v2720_v44 = vsub.f32 %v26839_v4, %v2719_v38 }
 0x32f   :  { %v2721_v49 = vand.u32 4294901760, %v2720_v44 }
 0x338   :  { %3058 = vrot.lane.b32.xlu0 %v26733_v41, %s26493_s30 }
 0x33c   :  { %3510 = vrot.lane.b32.xlu0 %v26731_v39, %s26492_s29 }
 0x39f   :  { %v2150_v31 = vpop.xlane.xlu0 %2149 }
 0x3a0   :  { %26255 = vrcp.f32 %v2150_v31 }
 0x3ab   :  { %v2153_v35 = vpop.xlane.xlu0 %2152 }
 0x3ac   :  { %26257 = vrcp.f32 %v2153_v35 }
 0x3ad   :  { %v26256_v36 = vpop.eup %26255 }
 0x3ae   :  { %v2156_v37 = vmul.f32 %v26256_v36, %v26252_v17  ;;  %v3132_v17 = vand.u32 4294901760, %v3131_v63 }
 0x3af   :  { %v3059_v8 = vpop.permute.xlu0 %3058 }
 0x3b0   :  { %v2159_v6 = vsel %vm1230_vm2, %v2156_v37, 0  ;;  %v3062_v9 = vsel %vm1230_vm2, %v3059_v8, 0  ;;  %v3133_v20 = vsub.f32 %v3131_v63, %v3132_v17 }
 0x3b1   :  { %v2227_v12 = vand.u32 4294901760, %v2159_v6  ;;  %v26847_v43 = vand.u32 4294901760, %v3062_v9 }
 0x3b3   :  { %v2228_v40 = vsub.f32 %v2159_v6, %v2227_v12  ;;  %24492 = vmatmul.mubr.f32.vlgmr.msra.gmra.mxu1 %v2227_v12  ;;  %v26856_v48 = vsub.f32 %v3062_v9, %v26847_v43  ;;  %v3511_v3 = vpop.permute.xlu0 %3510 }
 0x3b4   :  { %24500 = vmatpush3.msra.mxu1 %v2192_v25  ;;  %24501 = vmatprep.mubr.msk.f32.mxu1 %vm26490_vm1, %v26489_v30  ;;  %v3514_v19 = vsel %vm1230_vm2, %v3511_v3, 0 }
 0x3b5   :  { %24509 = vmatprep.subr.mxu1 %v26489_v30  ;;  %v2229_v18 = vand.u32 4294901760, %v2228_v40  ;;  %v3173_v55 = vand.u32 4294901760, %v26856_v48  ;;  %v3584_v22 = vand.u32 4294901760, %v3514_v19 }
 0x3b7   :  { %24502 = vmatmul.mubr.f32.vlgmr.msra.gmra.mxu1 %v2229_v18  ;;  %v2230_v45 = vsub.f32 %v2228_v40, %v2229_v18  ;;  %v3174_v61 = vsub.f32 %v26856_v48, %v3173_v55 }
 0x3b8   :  { %24510 = vmatpush3.msra.mxu1 %v2192_v25  ;;  %24511 = vmatprep.mubr.msk.f32.mxu1 %vm26490_vm1, %v26489_v30  ;;  %v3585_v25 = vsub.f32 %v3514_v19, %v3584_v22 }
 0x3b9   :  { %v26258_v46 = vpop.eup %26257  ;;  %24519 = vmatprep.subr.mxu1 %v26489_v30  ;;  %v2231_v47 = vand.u32 4294901760, %v2230_v45  ;;  %v3175_v2 = vand.u32 4294901760, %v3174_v61 }
 0x3ba   :  { %v2157_v50 = vmul.f32 %v26258_v46, %v26254_v26  ;;  %v3134_v26 = vand.u32 4294901760, %v3133_v20 }
 0x3bb   :  { %24487 = vmatmul.mubr.f32.vlgmr.msra.gmra.mxu0 %v2231_v47  ;;  %24512 = vmatmul.mubr.f32.vlgmr.msra.gmra.mxu1 %v2227_v12 }
 0x3bc   :  { %24495 = vmatpush3.msra.mxu0 %v26819_v5  ;;  %24520 = vmatpush3.msra.mxu1 %v2721_v49  ;;  %v2608_v52 = vsel %vm1230_vm2, %v2157_v50, 0  ;;  %v3586_v5 = vand.u32 4294901760, %v3585_v25 }
 0x3bd   :  { %24496 = vmatprep.mubr.msk.f32.mxu0 %vm26490_vm1, %v26489_v30  ;;  %24504 = vmatprep.subr.mxu0 %v26489_v30  ;;  %v2676_v53 = vand.u32 4294901760, %v2608_v52 }
 0x3be   :  { %24521 = vmatprep.mubr.msk.f32.mxu1 %vm26490_vm1, %v26489_v30  ;;  %24529 = vmatprep.subr.mxu1 %v26489_v30 }
 0x3bf   :  { %24497 = vmatmul.mubr.f32.vlgmr.msra.gmra.mxu0 %v2228_v40  ;;  %v2677_v57 = vsub.f32 %v2608_v52, %v2676_v53  ;;  %24522 = vmatmul.mubr.f32.vlgmr.msra.gmra.mxu1 %v2676_v53 }
 0x3c0   :  { %24505 = vmatpush3.msra.mxu0 %v2270_v7  ;;  %24530 = vmatpush3.msra.mxu1 %v2641_v34  ;;  %v3587_v7 = vsub.f32 %v3585_v25, %v3586_v5 }
 0x3c1   :  { %24506 = vmatprep.mubr.msk.f32.mxu0 %vm26490_vm1, %v26489_v30  ;;  %24514 = vmatprep.subr.mxu0 %v26489_v30  ;;  %v2678_v59 = vand.u32 4294901760, %v2677_v57 }
 0x3c2   :  { %24531 = vmatprep.mubr.msk.f32.mxu1 %vm26490_vm1, %v26489_v30  ;;  %24539 = vmatprep.subr.mxu1 %v26489_v30  ;;  %v3588_v11 = vand.u32 4294901760, %v3587_v7 }
 0x3c3   :  { %24507 = vmatmul.mubr.f32.vlgmr.msra.gmra.mxu0 %v2227_v12  ;;  %24532 = vmatmul.mubr.f32.vlgmr.msra.gmra.mxu1 %v2678_v59  ;;  %v2679_v62 = vsub.f32 %v2677_v57, %v2678_v59 }
 0x3c4   :  { %24515 = vmatpush3.msra.mxu0 %v2641_v34  ;;  %24540 = vmatpush3.msra.mxu1 %v2641_v34 }
 0x3c5   :  { %24516 = vmatprep.mubr.msk.f32.mxu0 %vm26490_vm1, %v26489_v30  ;;  %24524 = vmatprep.subr.mxu0 %v26489_v30  ;;  %v2680_v0 = vand.u32 4294901760, %v2679_v62 }
 0x3c6   :  { %24541 = vmatprep.mubr.msk.f32.mxu1 %vm26490_vm1, %v26489_v30  ;;  %24549 = vmatprep.subr.mxu1 %v26489_v30 }
 0x3c7   :  { %24517 = vmatmul.mubr.f32.vlgmr.msra.gmra.mxu0 %v2680_v0  ;;  %24542 = vmatmul.mubr.f32.vlgmr.msra.gmra.mxu1 %v2676_v53 }
 0x3c8   :  { %24525 = vmatpush3.msra.mxu0 %v26839_v4  ;;  %24550 = vmatpush3.xpose.msra.mxu1 %v3175_v2 }
 0x3c9   :  { %24526 = vmatprep.mubr.msk.f32.mxu0 %vm26490_vm1, %v26489_v30  ;;  %24534 = vmatprep.subr.mxu0 %v26489_v30 }
 0x3ca   :  { %24551 = vmatprep.mubr.msk.f32.mxu1 %vm26490_vm1, %v26489_v30  ;;  %24559 = vmatprep.subr.mxu1 %v26489_v30 }
 0x3cb   :  { %24527 = vmatmul.mubr.f32.vlgmr.msra.gmra.mxu0 %v2677_v57  ;;  %24552 = vmatmul.mubr.f32.vlgmr.msra.gmra.mxu1 %v26869_v58 }
 0x3cc   :  { %24535 = vmatpush3.msra.mxu0 %v2719_v38  ;;  %24560 = vmatpush3.xpose.msra.mxu1 %v26847_v43 }
 0x3cd   :  { %24536 = vmatprep.mubr.msk.f32.mxu0 %vm26490_vm1, %v26489_v30  ;;  %24544 = vmatprep.subr.mxu0 %v26489_v30 }
 0x3ce   :  { %24561 = vmatprep.mubr.msk.f32.mxu1 %vm26490_vm1, %v26489_v30  ;;  %24569 = vmatprep.subr.mxu1 %v26489_v30 }
 0x3cf   :  { %24537 = vmatmul.mubr.f32.vlgmr.msra.gmra.mxu0 %v2676_v53  ;;  %24562 = vmatmul.mubr.f32.vlgmr.msra.gmra.mxu1 %v3132_v17 }
 0x3d0   :  { %24545 = vmatpush3.xpose.msra.mxu0 %v26847_v43  ;;  %24570 = vmatpush3.xpose.msra.mxu1 %v26847_v43 }
 0x3d1   :  { %24546 = vmatprep.mubr.msk.f32.mxu0 %vm26490_vm1, %v26489_v30  ;;  %24554 = vmatprep.subr.mxu0 %v26489_v30 }
 0x3d2   :  { %24571 = vmatprep.mubr.msk.f32.mxu1 %vm26490_vm1, %v26489_v30  ;;  %24579 = vmatprep.subr.mxu1 %v26489_v30 }
 0x3d3   :  { %24547 = vmatmul.mubr.f32.vlgmr.msra.gmra.mxu0 %v3134_v26  ;;  %24572 = vmatmul.mubr.f32.vlgmr.msra.gmra.mxu1 %v26869_v58 }
 0x3d4   :  { %24555 = vmatpush3.xpose.msra.mxu0 %v26856_v48  ;;  %24580 = vmatpush3.xpose.msra.mxu1 %v3629_v27 }
 0x3d5   :  { %24556 = vmatprep.mubr.msk.f32.mxu0 %vm26490_vm1, %v26489_v30  ;;  %24564 = vmatprep.subr.mxu0 %v26489_v30 }
 0x3d6   :  { %24581 = vmatprep.mubr.msk.f32.mxu1 %vm26490_vm1, %v26489_v30  ;;  %24589 = vmatprep.subr.mxu1 %v26489_v30 }
 0x3d7   :  { %24557 = vmatmul.mubr.f32.vlgmr.msra.gmra.mxu0 %v3131_v63  ;;  %24582 = vmatmul.mubr.f32.vlgmr.msra.gmra.mxu1 %v3584_v22 }
 0x3d8   :  { %24565 = vmatpush3.xpose.msra.mxu0 %v3173_v55  ;;  %24590 = vmatpush3.xpose.msra.mxu1 %v26874_v60 }
 0x3d9   :  { %24566 = vmatprep.mubr.msk.f32.mxu0 %vm26490_vm1, %v26489_v30  ;;  %24574 = vmatprep.subr.mxu0 %v26489_v30 }
 0x3da   :  { %24591 = vmatprep.mubr.msk.f32.mxu1 %vm26490_vm1, %v26489_v30  ;;  %24599 = vmatprep.subr.mxu1 %v26489_v30 }
 0x3db   :  { %24567 = vmatmul.mubr.f32.vlgmr.msra.gmra.mxu0 %v26869_v58  ;;  %24592 = vmatmul.mubr.f32.vlgmr.msra.gmra.mxu1 %v3586_v5 }
 0x3dc   :  { %24575 = vmatpush3.xpose.msra.mxu0 %v26874_v60  ;;  %24600 = vmatpush3.xpose.msra.mxu1 %v26874_v60 }
 0x3dd   :  { %24576 = vmatprep.mubr.msk.f32.mxu0 %vm26490_vm1, %v26489_v30  ;;  %24584 = vmatprep.subr.mxu0 %v26489_v30 }
 0x3de   :  { %24601 = vmatprep.mubr.msk.f32.mxu1 %vm26490_vm1, %v26489_v30  ;;  %24609 = vmatprep.subr.mxu1 %v26489_v30 }
 0x3df   :  { %24577 = vmatmul.mubr.f32.vlgmr.msra.gmra.mxu0 %v3588_v11  ;;  %24602 = vmatmul.mubr.f32.vlgmr.msra.gmra.mxu1 %v3584_v22 }
 0x3e0   :  { %24585 = vmatpush3.xpose.msra.mxu0 %v26887_v1  ;;  %24586 = vmatprep.mubr.msk.f32.mxu0 %vm26490_vm1, %v26489_v30 }
 0x3e1   :  { %24594 = vmatprep.subr.mxu0 %v26489_v30  ;;  %24611 = vmatprep.mubr.msk.f32.mxu1 %vm26490_vm1, %v26489_v30 }
 0x3e3   :  { %24587 = vmatmul.mubr.f32.vlgmr.msra.gmra.mxu0 %v3585_v25 }
 0x3e4   :  { %24595 = vmatpush3.xpose.msra.mxu0 %v3627_v16  ;;  %24596 = vmatprep.mubr.msk.f32.mxu0 %vm26490_vm1, %v26489_v30 }
 0x3e5   :  { %24604 = vmatprep.subr.mxu0 %v26489_v30 }
 0x3e7   :  { %24597 = vmatmul.mubr.f32.vlgmr.msra.gmra.mxu0 %v3584_v22 }
 0x3e8   :  { %24606 = vmatprep.mubr.msk.f32.mxu0 %vm26490_vm1, %v26489_v30 }
 0x473   :  { %v2309_v14 = vpop.f32.mrf.mxu1 }
 0x475   :  { %v24493_v13 = vpop.f32.mrf.mxu1 }
 0x477   :  { %v2457_v21 = vpop.f32.mrf.mxu1 }
 0x479   :  { %v24503_v28 = vpop.f32.mrf.mxu1 }
 0x47b   :  { %v2233_v29 = vpop.f32.mrf.mxu0  ;;  %v2603_v31 = vpop.f32.mrf.mxu1 }
 0x47c   :  { %v2310_v32 = vadd.f32 %v2309_v14, %v2233_v29 }
 0x47d   :  { %v24488_v34 = vpop.f32.mrf.mxu0  ;;  %v24513_v35 = vpop.f32.mrf.mxu1 }
 0x47f   :  { %v2383_v36 = vpop.f32.mrf.mxu0  ;;  %v2758_v37 = vpop.f32.mrf.mxu1 }
 0x480   :  { %v2384_v4 = vadd.f32 %v2383_v36, %v2310_v32 }
 0x481   :  { %v24498_v8 = vpop.f32.mrf.mxu0  ;;  %v24523_v6 = vpop.f32.mrf.mxu1 }
 0x482   :  { %v2458_v12 = vadd.f32 %v2457_v21, %v2384_v4 }
 0x483   :  { %v2531_v38 = vpop.f32.mrf.mxu0  ;;  %v2906_v9 = vpop.f32.mrf.mxu1 }
 0x484   :  { %v2532_v40 = vadd.f32 %v2531_v38, %v2458_v12 }
 0x485   :  { %v24508_v18 = vpop.f32.mrf.mxu0  ;;  %v24533_v42 = vpop.f32.mrf.mxu1 }
 0x486   :  { %v26957_v43 = vadd.f32 %v2603_v31, %v2532_v40 }
 0x487   :  { %v2682_v44 = vpop.f32.mrf.mxu0  ;;  %v3052_v45 = vpop.f32.mrf.mxu1 }
 0x488   :  { %v2759_v46 = vadd.f32 %v2758_v37, %v2682_v44 }
 0x489   :  { %v24518_v47 = vpop.f32.mrf.mxu0  ;;  %v24543_v48 = vpop.f32.mrf.mxu1 }
 0x48b   :  { %v2832_v49 = vpop.f32.mrf.mxu0  ;;  %v3212_v50 = vpop.f32.mrf.mxu1 }
 0x48c   :  { %v2833_v51 = vadd.f32 %v2832_v49, %v2759_v46  ;;  %v26335_v49 = vld [vmem:[%s29256_s4] sm:$0xff] }
 0x48d   :  { %v24528_v52 = vpop.f32.mrf.mxu0  ;;  %v24553_v53 = vpop.f32.mrf.mxu1 }
 0x48e   :  { %v2907_v54 = vadd.f32 %v2906_v9, %v2833_v51 }
 0x48f   :  { %v2980_v55 = vpop.f32.mrf.mxu0  ;;  %v3360_v56 = vpop.f32.mrf.mxu1 }
 0x490   :  { %v2981_v57 = vadd.f32 %v2980_v55, %v2907_v54 }
 0x491   :  { %v24538_v58 = vpop.f32.mrf.mxu0  ;;  %v24563_v59 = vpop.f32.mrf.mxu1 }
 0x492   :  { %v26959_v60 = vadd.f32 %v3052_v45, %v2981_v57 }
 0x493   :  { %v3136_v61 = vpop.f32.mrf.mxu0  ;;  %v3506_v62 = vpop.f32.mrf.mxu1 }
 0x494   :  { %v3213_v1 = vadd.f32 %v3212_v50, %v3136_v61  ;;  %v26336_v50 = vld [vmem:[%s29256_s4 + $0x8] sm:$0xff] }
 0x495   :  { %v24548_v63 = vpop.f32.mrf.mxu0  ;;  %v24573_v0 = vpop.f32.mrf.mxu1 }
 0x497   :  { %v3286_v2 = vpop.f32.mrf.mxu0  ;;  %v3666_v3 = vpop.f32.mrf.mxu1 }
 0x498   :  { %v3287_v17 = vadd.f32 %v3286_v2, %v3213_v1 }
 0x499   :  { %v24558_v16 = vpop.f32.mrf.mxu0  ;;  %v24583_v19 = vpop.f32.mrf.mxu1 }
 0x49a   :  { %v3361_v20 = vadd.f32 %v3360_v56, %v3287_v17 }
 0x49b   :  { %v3434_v22 = vpop.f32.mrf.mxu0  ;;  %v3814_v23 = vpop.f32.mrf.mxu1 }
 0x49c   :  { %v3435_v25 = vadd.f32 %v3434_v22, %v3361_v20 }
 0x49d   :  { %v24568_v26 = vpop.f32.mrf.mxu0  ;;  %v24593_v27 = vpop.f32.mrf.mxu1 }
 0x49e   :  { %v3507_v5 = vadd.f32 %v3506_v62, %v3435_v25 }
 0x49f   :  { %v3590_v7 = vpop.f32.mrf.mxu0  ;;  %v3960_v11 = vpop.f32.mrf.mxu1 }
 0x4a0   :  { %v3964_v14 = vmul.f32 0.35355338, %v3507_v5  ;;  %v3667_v28 = vadd.f32 %v3666_v3, %v3590_v7 }
 0x4a1   :  { %v24578_v13 = vpop.f32.mrf.mxu0  ;;  %v24603_v21 = vpop.f32.mrf.mxu1 }
 0x4a2   :  { %v3966_v29 = vsel %vm1230_vm2, %v3964_v14, -inf }
 0x4a3   :  { %3967 = vmax.xlane.f32.xlu1 %v3966_v29  ;;  %v3740_v31 = vpop.f32.mrf.mxu0 }
 0x4a4   :  { %v3741_v32 = vadd.f32 %v3740_v31, %v3667_v28 }
 0x4a5   :  { %v24588_v34 = vpop.f32.mrf.mxu0 }
 0x4a6   :  { %v3815_v35 = vadd.f32 %v3814_v23, %v3741_v32 }
 0x4a7   :  { %v3888_v36 = vpop.f32.mrf.mxu0 }
 0x4a8   :  { %v3889_v37 = vadd.f32 %v3888_v36, %v3815_v35 }
 0x4a9   :  { %v24598_v4 = vpop.f32.mrf.mxu0 }
 0x4aa   :  { %v3961_v8 = vadd.f32 %v3960_v11, %v3889_v37 }
 0x4ac   :  { %v3965_v6 = vmul.f32 0.35355338, %v3961_v8 }
 0x4ae   :  { %v3969_v12 = vsel %vm1230_vm2, %v3965_v6, -inf }
 0x4af   :  { %3970 = vmax.xlane.f32.xlu0 %v3969_v12 }
 0x52c   :  { %v3968_v38 = vpop.xlane.xlu1 %3967 }
 0x52d   :  { %v3972_v9 = vsub.f32 %v3964_v14, %v3968_v38 }
 0x52f   :  { %v3974_v40 = vmul.f32 1.442695, %v3972_v9 }
 0x531   :  { %26259 = vpow2.f32 %v3974_v40 }
 0x538   :  { %v3971_v18 = vpop.xlane.xlu0 %3970 }
 0x539   :  { %v3973_v42 = vsub.f32 %v3965_v6, %v3971_v18 }
 0x53b   :  { %v3976_v44 = vmul.f32 1.442695, %v3973_v42 }
 0x53d   :  { %26261 = vpow2.f32 %v3976_v44 }
 0x53e   :  { %v26260_v45 = vpop.eup %26259 }
 0x53f   :  { %v3978_v46 = vsel %vm1230_vm2, %v26260_v45, 0.0 }
 0x540   :  { %3979 = vadd.xlane.f32.xlu0 %v3978_v46 }
 0x54a   :  { %v26262_v47 = vpop.eup %26261 }
 0x54b   :  { %v3981_v48 = vsel %vm1230_vm2, %v26262_v47, 0.0 }
 0x54c   :  { %3982 = vadd.xlane.f32.xlu1 %v3981_v48 }
 0x556   :  { %3989 = vrot.lane.b32.xlu0 %v26814_v24, %s26492_s29 }
 0x55a   :  { %5392 = vrot.lane.b32.xlu0 %v26335_v49, %s26494_s12 }
 0x55d   :  { %4442 = vrot.lane.b32.xlu1 %v26835_v33, %s26492_s29 }
 0x55e   :  { %5890 = vrot.lane.b32.xlu0 %v26733_v41, %s26495_s5 }
 0x561   :  { %4894 = vrot.lane.b32.xlu1 %v26336_v50, %s26494_s12 }
 0x562   :  { %6344 = vrot.lane.b32.xlu0 %v26731_v39, %s26495_s5 }
 0x565   :  { %5892 = vrot.lane.b32.xlu1 %v26733_v41, %s26496_s15 }
 0x569   :  { %6346 = vrot.lane.b32.xlu1 %v26731_v39, %s26496_s15 }
 0x5c9   :  { %v3980_v51 = vpop.xlane.xlu0 %3979 }
 0x5ca   :  { %26263 = vrcp.f32 %v3980_v51 }
 0x5cd   :  { %v3990_v52 = vpop.permute.xlu0 %3989 }
 0x5ce   :  { %v4026_v53 = vand.u32 4294901760, %v3990_v52 }
 0x5d0   :  { %v4103_v54 = vsub.f32 %v3990_v52, %v4026_v53  ;;  %24605 = vmatpush3.msra.mxu0 %v4026_v53 }
 0x5d1   :  { %24614 = vmatprep.subr.mxu0 %v26489_v30 }
 0x5d2   :  { %v4104_v55 = vand.u32 4294901760, %v4103_v54 }
 0x5d4   :  { %v4105_v56 = vsub.f32 %v4103_v54, %v4104_v55 }
 0x5d5   :  { %v3983_v57 = vpop.xlane.xlu1 %3982 }
 0x5d6   :  { %26265 = vrcp.f32 %v3983_v57  ;;  %v4106_v58 = vand.u32 4294901760, %v4105_v56 }
 0x5d7   :  { %v26264_v59 = vpop.eup %26263 }
 0x5d8   :  { %24610 = vmatpush3.msra.mxu1 %v4106_v58  ;;  %v3986_v61 = vmul.f32 %v26264_v59, %v26260_v45 }
 0x5d9   :  { %v4443_v62 = vpop.permute.xlu1 %4442  ;;  %24619 = vmatprep.subr.mxu1 %v26489_v30 }
 0x5da   :  { %v4479_v63 = vand.u32 4294901760, %v4443_v62  ;;  %v3993_v0 = vsel %vm1230_vm2, %v3986_v61, 0 }
 0x5db   :  { %v4061_v1 = vand.u32 4294901760, %v3993_v0 }
 0x5dc   :  { %v4556_v2 = vsub.f32 %v4443_v62, %v4479_v63 }
 0x5dd   :  { %v4062_v3 = vsub.f32 %v3993_v0, %v4061_v1  ;;  %24612 = vmatmul.mubr.f32.vlgmr.msra.gmra.mxu1 %v4061_v1  ;;  %v4895_v21 = vpop.permute.xlu1 %4894 }
 0x5de   :  { %v4557_v17 = vand.u32 4294901760, %v4556_v2  ;;  %24620 = vmatpush3.msra.mxu1 %v4026_v53  ;;  %24621 = vmatprep.mubr.msk.f32.mxu1 %vm26490_vm1, %v26489_v30  ;;  %v27013_v28 = vand.u32 4294901760, %v4895_v21 }
 0x5df   :  { %24629 = vmatprep.subr.mxu1 %v26489_v30  ;;  %v4063_v16 = vand.u32 4294901760, %v4062_v3 }
 0x5e0   :  { %v4558_v19 = vsub.f32 %v4556_v2, %v4557_v17  ;;  %v27019_v29 = vsub.f32 %v4895_v21, %v27013_v28  ;;  %v5399_v21 = vsel %vm1230_vm2, %v26959_v60, 0 }
 0x5e1   :  { %24622 = vmatmul.mubr.f32.vlgmr.msra.gmra.mxu1 %v4063_v16  ;;  %v4064_v20 = vsub.f32 %v4062_v3, %v4063_v16 }
 0x5e2   :  { %24630 = vmatpush3.msra.mxu1 %v4026_v53  ;;  %24631 = vmatprep.mubr.msk.f32.mxu1 %vm26490_vm1, %v26489_v30  ;;  %v4559_v22 = vand.u32 4294901760, %v4558_v19  ;;  %v27024_v31 = vand.u32 4294901760, %v27019_v29 }
 0x5e3   :  { %v26266_v23 = vpop.eup %26265  ;;  %24639 = vmatprep.subr.mxu1 %v26489_v30  ;;  %v4065_v25 = vand.u32 4294901760, %v4064_v20 }
 0x5e4   :  { %v3987_v26 = vmul.f32 %v26266_v23, %v26262_v47  ;;  %v5023_v32 = vsub.f32 %v27019_v29, %v27024_v31 }
 0x5e5   :  { %24607 = vmatmul.mubr.f32.vlgmr.msra.gmra.mxu0 %v4065_v25  ;;  %24632 = vmatmul.mubr.f32.vlgmr.msra.gmra.mxu1 %v4061_v1 }
 0x5e6   :  { %24615 = vmatpush3.msra.mxu0 %v4103_v54  ;;  %24640 = vmatpush3.msra.mxu1 %v4559_v22  ;;  %v4446_v27 = vsel %vm1230_vm2, %v3987_v26, 0  ;;  %v5024_v34 = vand.u32 4294901760, %v5023_v32 }
 0x5e7   :  { %24616 = vmatprep.mubr.msk.f32.mxu0 %vm26490_vm1, %v26489_v30  ;;  %24624 = vmatprep.subr.mxu0 %v26489_v30  ;;  %v4514_v5 = vand.u32 4294901760, %v4446_v27 }
 0x5e8   :  { %24641 = vmatprep.mubr.msk.f32.mxu1 %vm26490_vm1, %v26489_v30  ;;  %24649 = vmatprep.subr.mxu1 %v26489_v30 }
 0x5e9   :  { %24617 = vmatmul.mubr.f32.vlgmr.msra.gmra.mxu0 %v4062_v3  ;;  %v4515_v7 = vsub.f32 %v4446_v27, %v4514_v5  ;;  %24642 = vmatmul.mubr.f32.vlgmr.msra.gmra.mxu1 %v4514_v5 }
 0x5ea   :  { %24625 = vmatpush3.msra.mxu0 %v4104_v55  ;;  %24650 = vmatpush3.msra.mxu1 %v4479_v63  ;;  %v5393_v55 = vpop.permute.xlu0 %5392 }
 0x5eb   :  { %24626 = vmatprep.mubr.msk.f32.mxu0 %vm26490_vm1, %v26489_v30  ;;  %24634 = vmatprep.subr.mxu0 %v26489_v30  ;;  %v4516_v11 = vand.u32 4294901760, %v4515_v7  ;;  %v27030_v57 = vand.u32 4294901760, %v5393_v55 }
 0x5ec   :  { %24651 = vmatprep.mubr.msk.f32.mxu1 %vm26490_vm1, %v26489_v30  ;;  %24659 = vmatprep.subr.mxu1 %v26489_v30 }
 0x5ed   :  { %24627 = vmatmul.mubr.f32.vlgmr.msra.gmra.mxu0 %v4061_v1  ;;  %24652 = vmatmul.mubr.f32.vlgmr.msra.gmra.mxu1 %v4516_v11  ;;  %v4517_v14 = vsub.f32 %v4515_v7, %v4516_v11 }
 0x5ee   :  { %24635 = vmatpush3.msra.mxu0 %v4479_v63  ;;  %24660 = vmatpush3.msra.mxu1 %v4479_v63 }
 0x5ef   :  { %24636 = vmatprep.mubr.msk.f32.mxu0 %vm26490_vm1, %v26489_v30  ;;  %24644 = vmatprep.subr.mxu0 %v26489_v30  ;;  %v4518_v13 = vand.u32 4294901760, %v4517_v14 }
 0x5f0   :  { %24661 = vmatprep.mubr.msk.f32.mxu1 %vm26490_vm1, %v26489_v30  ;;  %24669 = vmatprep.subr.mxu1 %v5024_v34 }
 0x5f1   :  { %24637 = vmatmul.mubr.f32.vlgmr.msra.gmra.mxu0 %v4518_v13  ;;  %24662 = vmatmul.mubr.f32.vlgmr.msra.gmra.mxu1 %v4514_v5 }
 0x5f2   :  { %24645 = vmatpush3.msra.mxu0 %v4556_v2  ;;  %24646 = vmatprep.mubr.msk.f32.mxu0 %vm26490_vm1, %v26489_v30  ;;  %v27037_v2 = vsub.f32 %v5393_v55, %v27030_v57 }
 0x5f3   :  { %24654 = vmatprep.subr.mxu0 %v26489_v30  ;;  %24670 = vmatpush3.msra.mxu1 %v5024_v34 }
 0x5f4   :  { %24679 = vmatprep.subr.mxu1 %v27013_v28  ;;  %v27040_v26 = vand.u32 4294901760, %v27037_v2 }
 0x5f5   :  { %24647 = vmatmul.mubr.f32.vlgmr.msra.gmra.mxu0 %v4515_v7  ;;  %v5893_v7 = vpop.permute.xlu1 %5892 }
 0x5f6   :  { %24655 = vmatpush3.msra.mxu0 %v4557_v17  ;;  %24656 = vmatprep.mubr.msk.f32.mxu0 %vm26490_vm1, %v26489_v30  ;;  %v5521_v13 = vsub.f32 %v27037_v2, %v27040_v26  ;;  %v5896_v34 = vsel %vm1230_vm2, %v5893_v7, 0 }
 0x5f7   :  { %24664 = vmatprep.subr.mxu0 %v27013_v28 }
 0x5f9   :  { %24657 = vmatmul.mubr.f32.vlgmr.msra.gmra.mxu0 %v4514_v5  ;;  %v5396_v5 = vsel %vm1230_vm2, %v26957_v43, 0  ;;  %v27053_v43 = vand.u32 4294901760, %v5399_v21 }
 0x5fa   :  { %24665 = vmatpush3.msra.mxu0 %v27013_v28  ;;  %v27049_v32 = vand.u32 4294901760, %v5396_v5 }
 0x5fb   :  { %24674 = vmatprep.subr.mxu0 %v27019_v29 }
 0x69d   :  { %v4143_v35 = vpop.f32.mrf.mxu1 }
 0x69f   :  { %v24613_v36 = vpop.f32.mrf.mxu1 }
 0x6a1   :  { %v4291_v37 = vpop.f32.mrf.mxu1 }
 0x6a3   :  { %v24623_v4 = vpop.f32.mrf.mxu1 }
 0x6a4   :  { %v27056_v4 = vand.u32 4294901760, %v5896_v34 }
 0x6a5   :  { %v4067_v8 = vpop.f32.mrf.mxu0  ;;  %v4437_v6 = vpop.f32.mrf.mxu1 }
 0x6a6   :  { %v4144_v9 = vadd.f32 %v4143_v35, %v4067_v8  ;;  %v5468_v8 = vsub.f32 %v5396_v5, %v27049_v32 }
 0x6a7   :  { %v24608_v12 = vpop.f32.mrf.mxu0  ;;  %v24633_v38 = vpop.f32.mrf.mxu1 }
 0x6a8   :  { %v27063_v38 = vsub.f32 %v5896_v34, %v27056_v4 }
 0x6a9   :  { %v4217_v40 = vpop.f32.mrf.mxu0  ;;  %v4596_v18 = vpop.f32.mrf.mxu1 }
 0x6aa   :  { %v4218_v42 = vadd.f32 %v4217_v40, %v4144_v9  ;;  %v5891_v9 = vpop.permute.xlu0 %5890  ;;  %v5469_v40 = vand.u32 4294901760, %v5468_v8 }
 0x6ab   :  { %v24618_v44 = vpop.f32.mrf.mxu0  ;;  %v24643_v45 = vpop.f32.mrf.mxu1 }
 0x6ac   :  { %v4292_v46 = vadd.f32 %v4291_v37, %v4218_v42  ;;  %v5522_v37 = vand.u32 4294901760, %v5521_v13  ;;  %v5894_v42 = vsel %vm1230_vm2, %v5891_v9, 0  ;;  %v6007_v44 = vand.u32 4294901760, %v27063_v38 }
 0x6ad   :  { %v4365_v47 = vpop.f32.mrf.mxu0  ;;  %v4744_v48 = vpop.f32.mrf.mxu1 }
 0x6ae   :  { %v4366_v49 = vadd.f32 %v4365_v47, %v4292_v46  ;;  %v5470_v46 = vsub.f32 %v5468_v8, %v5469_v40 }
 0x6af   :  { %v24628_v50 = vpop.f32.mrf.mxu0  ;;  %v24653_v51 = vpop.f32.mrf.mxu1 }
 0x6b0   :  { %v4438_v52 = vadd.f32 %v4437_v6, %v4366_v49  ;;  %v5478_v6 = vsub.f32 %v5399_v21, %v27053_v43 }
 0x6b1   :  { %v4520_v53 = vpop.f32.mrf.mxu0  ;;  %v4890_v54 = vpop.f32.mrf.mxu1 }
 0x6b2   :  { %v4898_v56 = vsel %vm1230_vm2, %v4438_v52, 0  ;;  %v4597_v62 = vadd.f32 %v4596_v18, %v4520_v53  ;;  %v6347_v18 = vpop.permute.xlu1 %6346 }
 0x6b3   :  { %v27032_v58 = vand.u32 4294901760, %v4898_v56  ;;  %v24638_v59 = vpop.f32.mrf.mxu0  ;;  %v24663_v61 = vpop.f32.mrf.mxu1  ;;  %v6350_v45 = vsel %vm1230_vm2, %v6347_v18, 0 }
 0x6b4   :  { %v27082_v49 = vand.u32 4294901760, %v6350_v45 }
 0x6b5   :  { %v4970_v63 = vsub.f32 %v4898_v56, %v27032_v58  ;;  %v4670_v0 = vpop.f32.mrf.mxu0  ;;  %24671 = vmatprep.mubr.f32.mxu1 %v27032_v58 }
 0x6b6   :  { %v4671_v1 = vadd.f32 %v4670_v0, %v4597_v62  ;;  %v27090_v52 = vsub.f32 %v6350_v45, %v27082_v49 }
 0x6b7   :  { %v24648_v3 = vpop.f32.mrf.mxu0  ;;  %v4971_v17 = vand.u32 4294901760, %v4970_v63 }
 0x6b8   :  { %v4745_v16 = vadd.f32 %v4744_v48, %v4671_v1  ;;  %v6008_v48 = vsub.f32 %v27063_v38, %v6007_v44 }
 0x6b9   :  { %v4818_v19 = vpop.f32.mrf.mxu0  ;;  %v4972_v20 = vsub.f32 %v4970_v63, %v4971_v17 }
 0x6ba   :  { %v4819_v22 = vadd.f32 %v4818_v19, %v4745_v16  ;;  %v6009_v53 = vand.u32 4294901760, %v6008_v48 }
 0x6bb   :  { %v24658_v23 = vpop.f32.mrf.mxu0  ;;  %v4973_v25 = vand.u32 4294901760, %v4972_v20 }
 0x6bc   :  { %v4891_v27 = vadd.f32 %v4890_v54, %v4819_v22  ;;  %v6345_v54 = vpop.permute.xlu0 %6344 }
 0x6bd   :  { %24666 = vmatprep.mubr.f32.mxu0 %v4973_v25  ;;  %v6348_v56 = vsel %vm1230_vm2, %v6345_v54, 0 }
 0x6be   :  { %v4901_v11 = vsel %vm1230_vm2, %v4891_v27, 0  ;;  %v6418_v59 = vand.u32 4294901760, %v6348_v56 }
 0x6bf   :  { %v4979_v14 = vand.u32 4294901760, %v4901_v11 }
 0x6c0   :  { %v6419_v62 = vsub.f32 %v6348_v56, %v6418_v59 }
 0x6c1   :  { %v4980_v35 = vsub.f32 %v4901_v11, %v4979_v14  ;;  %24672 = vmatmul.mubr.f32.vlgmr.msra.gmra.mxu1 %v4979_v14 }
 0x6c2   :  { %24680 = vmatpush3.msra.mxu1 %v27013_v28  ;;  %24681 = vmatprep.mubr.f32.mxu1 %v4971_v17  ;;  %v6420_v1 = vand.u32 4294901760, %v6419_v62 }
 0x6c3   :  { %24689 = vmatprep.subr.mxu1 %v27013_v28  ;;  %v4981_v36 = vand.u32 4294901760, %v4980_v35 }
 0x6c5   :  { %24682 = vmatmul.mubr.f32.vlgmr.msra.gmra.mxu1 %v4981_v36  ;;  %v4982_v60 = vsub.f32 %v4980_v35, %v4981_v36 }
 0x6c6   :  { %24690 = vmatpush3.msra.mxu1 %v27013_v28  ;;  %24691 = vmatprep.mubr.f32.mxu1 %v27032_v58  ;;  %v5479_v28 = vand.u32 4294901760, %v5478_v6 }
 0x6c7   :  { %v4983_v12 = vand.u32 4294901760, %v4982_v60  ;;  %24699 = vmatprep.subr.mxu1 %v5522_v37 }
 0x6c8   :  { %v5480_v47 = vsub.f32 %v5478_v6, %v5479_v28 }
 0x6c9   :  { %24667 = vmatmul.mubr.f32.vlgmr.msra.gmra.mxu0 %v4983_v12  ;;  %24692 = vmatmul.mubr.f32.vlgmr.msra.gmra.mxu1 %v4979_v14 }
 0x6ca   :  { %24675 = vmatpush3.msra.mxu0 %v27019_v29  ;;  %24676 = vmatprep.mubr.f32.mxu0 %v4970_v63  ;;  %v27075_v29 = vand.u32 4294901760, %v5894_v42  ;;  %v5481_v51 = vand.u32 4294901760, %v5480_v47 }
 0x6cb   :  { %24684 = vmatprep.subr.mxu0 %v27024_v31  ;;  %24700 = vmatpush3.msra.mxu1 %v5522_v37 }
 0x6cc   :  { %24701 = vmatprep.mubr.f32.mxu1 %v27049_v32  ;;  %24709 = vmatprep.subr.mxu1 %v27030_v57  ;;  %v5965_v50 = vsub.f32 %v5894_v42, %v27075_v29 }
 0x6cd   :  { %24677 = vmatmul.mubr.f32.vlgmr.msra.gmra.mxu0 %v4980_v35  ;;  %24702 = vmatmul.mubr.f32.vlgmr.msra.gmra.mxu1 %v27053_v43 }
 0x6ce   :  { %24685 = vmatpush3.msra.mxu0 %v27024_v31  ;;  %24710 = vmatpush3.msra.mxu1 %v27030_v57  ;;  %v5471_v31 = vand.u32 4294901760, %v5470_v46  ;;  %v5966_v55 = vand.u32 4294901760, %v5965_v50 }
 0x6cf   :  { %24686 = vmatprep.mubr.f32.mxu0 %v27032_v58  ;;  %24694 = vmatprep.subr.mxu0 %v27030_v57 }
 0x6d0   :  { %24711 = vmatprep.mubr.f32.mxu1 %v5469_v40  ;;  %24719 = vmatprep.subr.mxu1 %v27030_v57  ;;  %v5967_v58 = vsub.f32 %v5965_v50, %v5966_v55 }
 0x6d1   :  { %24687 = vmatmul.mubr.f32.vlgmr.msra.gmra.mxu0 %v4979_v14  ;;  %24712 = vmatmul.mubr.f32.vlgmr.msra.gmra.mxu1 %v5479_v28 }
 0x6d2   :  { %24695 = vmatpush3.msra.mxu0 %v27030_v57  ;;  %24720 = vmatpush3.msra.mxu1 %v27030_v57  ;;  %v6461_v57 = vand.u32 4294901760, %v27090_v52  ;;  %v5968_v63 = vand.u32 4294901760, %v5967_v58 }
 0x6d3   :  { %24696 = vmatprep.mubr.f32.mxu0 %v5471_v31  ;;  %24704 = vmatprep.subr.mxu0 %v27037_v2 }
 0x6d4   :  { %24721 = vmatprep.mubr.f32.mxu1 %v27049_v32  ;;  %24729 = vmatprep.subr.mxu1 %v26489_v30  ;;  %v6462_v61 = vsub.f32 %v27090_v52, %v6461_v57 }
 0x6d5   :  { %24697 = vmatmul.mubr.f32.vlgmr.msra.gmra.mxu0 %v5481_v51  ;;  %24722 = vmatmul.mubr.f32.vlgmr.msra.gmra.mxu1 %v27053_v43 }
 0x6d6   :  { %24705 = vmatpush3.msra.mxu0 %v27037_v2  ;;  %24730 = vmatpush3.xpose.msra.mxu1 %v6009_v53  ;;  %v6463_v0 = vand.u32 4294901760, %v6462_v61  ;;  %v6421_v2 = vsub.f32 %v6419_v62, %v6420_v1 }
 0x6d7   :  { %24706 = vmatprep.mubr.f32.mxu0 %v5468_v8  ;;  %24714 = vmatprep.subr.mxu0 %v27040_v26 }
 0x6d8   :  { %24731 = vmatprep.mubr.msk.f32.mxu1 %vm26490_vm1, %v26489_v30  ;;  %24739 = vmatprep.subr.mxu1 %v26489_v30  ;;  %v6422_v3 = vand.u32 4294901760, %v6421_v2 }
 0x6d9   :  { %24707 = vmatmul.mubr.f32.vlgmr.msra.gmra.mxu0 %v5478_v6  ;;  %24732 = vmatmul.mubr.f32.vlgmr.msra.gmra.mxu1 %v27075_v29 }
 0x6da   :  { %24715 = vmatpush3.msra.mxu0 %v27040_v26  ;;  %24740 = vmatpush3.xpose.msra.mxu1 %v27056_v4 }
 0x6db   :  { %24716 = vmatprep.mubr.f32.mxu0 %v27049_v32  ;;  %24724 = vmatprep.subr.mxu0 %v26489_v30 }
 0x6dc   :  { %24741 = vmatprep.mubr.msk.f32.mxu1 %vm26490_vm1, %v26489_v30  ;;  %24749 = vmatprep.subr.mxu1 %v26489_v30 }
 0x6dd   :  { %24717 = vmatmul.mubr.f32.vlgmr.msra.gmra.mxu0 %v27053_v43  ;;  %24742 = vmatmul.mubr.f32.vlgmr.msra.gmra.mxu1 %v5966_v55 }
 0x6de   :  { %24725 = vmatpush3.xpose.msra.mxu0 %v27056_v4  ;;  %24750 = vmatpush3.xpose.msra.mxu1 %v27056_v4 }
 0x6df   :  { %24726 = vmatprep.mubr.msk.f32.mxu0 %vm26490_vm1, %v26489_v30  ;;  %24734 = vmatprep.subr.mxu0 %v26489_v30 }
 0x6e0   :  { %24751 = vmatprep.mubr.msk.f32.mxu1 %vm26490_vm1, %v26489_v30  ;;  %24759 = vmatprep.subr.mxu1 %v26489_v30 }
 0x6e1   :  { %24727 = vmatmul.mubr.f32.vlgmr.msra.gmra.mxu0 %v5968_v63  ;;  %24752 = vmatmul.mubr.f32.vlgmr.msra.gmra.mxu1 %v27075_v29 }
 0x6e2   :  { %24735 = vmatpush3.xpose.msra.mxu0 %v27063_v38  ;;  %24760 = vmatpush3.xpose.msra.mxu1 %v6463_v0 }
 0x6e3   :  { %24736 = vmatprep.mubr.msk.f32.mxu0 %vm26490_vm1, %v26489_v30  ;;  %24744 = vmatprep.subr.mxu0 %v26489_v30 }
 0x6e4   :  { %24761 = vmatprep.mubr.msk.f32.mxu1 %vm26490_vm1, %v26489_v30  ;;  %24769 = vmatprep.subr.mxu1 %v26489_v30 }
 0x6e5   :  { %24737 = vmatmul.mubr.f32.vlgmr.msra.gmra.mxu0 %v5965_v50  ;;  %24762 = vmatmul.mubr.f32.vlgmr.msra.gmra.mxu1 %v6418_v59 }
 0x6e6   :  { %24745 = vmatpush3.xpose.msra.mxu0 %v6007_v44  ;;  %24770 = vmatpush3.xpose.msra.mxu1 %v27082_v49 }
 0x6e7   :  { %24746 = vmatprep.mubr.msk.f32.mxu0 %vm26490_vm1, %v26489_v30  ;;  %24754 = vmatprep.subr.mxu0 %v26489_v30 }
 0x6e8   :  { %24771 = vmatprep.mubr.msk.f32.mxu1 %vm26490_vm1, %v26489_v30  ;;  %24779 = vmatprep.subr.mxu1 %v26489_v30 }
 0x6e9   :  { %24747 = vmatmul.mubr.f32.vlgmr.msra.gmra.mxu0 %v27075_v29  ;;  %24772 = vmatmul.mubr.f32.vlgmr.msra.gmra.mxu1 %v6420_v1 }
 0x6ea   :  { %24755 = vmatpush3.xpose.msra.mxu0 %v27082_v49  ;;  %24780 = vmatpush3.xpose.msra.mxu1 %v27082_v49 }
 0x6eb   :  { %24756 = vmatprep.mubr.msk.f32.mxu0 %vm26490_vm1, %v26489_v30  ;;  %24764 = vmatprep.subr.mxu0 %v26489_v30 }
 0x6ec   :  { %24781 = vmatprep.mubr.msk.f32.mxu1 %vm26490_vm1, %v26489_v30  ;;  %24789 = vmatprep.subr.mxu1 %v26489_v30 }
 0x6ed   :  { %24757 = vmatmul.mubr.f32.vlgmr.msra.gmra.mxu0 %v6422_v3  ;;  %24782 = vmatmul.mubr.f32.vlgmr.msra.gmra.mxu1 %v6418_v59 }
 0x6ee   :  { %24765 = vmatpush3.xpose.msra.mxu0 %v27090_v52  ;;  %24766 = vmatprep.mubr.msk.f32.mxu0 %vm26490_vm1, %v26489_v30 }
 0x6ef   :  { %24774 = vmatprep.subr.mxu0 %v26489_v30  ;;  %24791 = vmatprep.mubr.msk.f32.mxu1 %vm26490_vm1, %v26489_v30 }
 0x6f1   :  { %24767 = vmatmul.mubr.f32.vlgmr.msra.gmra.mxu0 %v6419_v62 }
 0x6f2   :  { %24775 = vmatpush3.xpose.msra.mxu0 %v6461_v57  ;;  %24776 = vmatprep.mubr.msk.f32.mxu0 %vm26490_vm1, %v26489_v30 }
 0x6f3   :  { %24784 = vmatprep.subr.mxu0 %v26489_v30 }
 0x6f5   :  { %24777 = vmatmul.mubr.f32.vlgmr.msra.gmra.mxu0 %v6418_v59 }
 0x6f6   :  { %24786 = vmatprep.mubr.msk.f32.mxu0 %vm26490_vm1, %v26489_v30 }
 0x781   :  { %v24673_v17 = vpop.f32.mrf.mxu1 }
 0x783   :  { %v27157_v16 = vpop.f32.mrf.mxu1 }
 0x785   :  { %v24683_v19 = vpop.f32.mrf.mxu1 }
 0x787   :  { %v27159_v20 = vpop.f32.mrf.mxu1 }
 0x789   :  { %v24668_v22 = vpop.f32.mrf.mxu0  ;;  %v24693_v23 = vpop.f32.mrf.mxu1 }
 0x78a   :  { %v5068_v25 = vadd.f32 %v24673_v17, %v24668_v22 }
 0x78b   :  { %v27161_v26 = vpop.f32.mrf.mxu0  ;;  %v27163_v27 = vpop.f32.mrf.mxu1 }
 0x78d   :  { %v24678_v5 = vpop.f32.mrf.mxu0  ;;  %v24703_v7 = vpop.f32.mrf.mxu1 }
 0x78e   :  { %v5149_v11 = vadd.f32 %v24678_v5, %v5068_v25 }
 0x78f   :  { %v27165_v14 = vpop.f32.mrf.mxu0  ;;  %v27167_v13 = vpop.f32.mrf.mxu1 }
 0x790   :  { %v5231_v21 = vadd.f32 %v24683_v19, %v5149_v11 }
 0x791   :  { %v24688_v32 = vpop.f32.mrf.mxu0  ;;  %v24713_v34 = vpop.f32.mrf.mxu1 }
 0x792   :  { %v5311_v35 = vadd.f32 %v24688_v32, %v5231_v21 }
 0x793   :  { %v27169_v43 = vpop.f32.mrf.mxu0  ;;  %v27171_v36 = vpop.f32.mrf.mxu1 }
 0x794   :  { %v5389_v37 = vadd.f32 %v24693_v23, %v5311_v35 }
 0x795   :  { %v24698_v4 = vpop.f32.mrf.mxu0  ;;  %v24723_v8 = vpop.f32.mrf.mxu1 }
 0x796   :  { %v5484_v60 = vadd.f32 %v24698_v4, %v5389_v37 }
 0x797   :  { %v27173_v6 = vpop.f32.mrf.mxu0  ;;  %v27175_v12 = vpop.f32.mrf.mxu1 }
 0x798   :  { %v5566_v38 = vadd.f32 %v24703_v7, %v5484_v60 }
 0x799   :  { %v24708_v9 = vpop.f32.mrf.mxu0  ;;  %v6046_v40 = vpop.f32.mrf.mxu1 }
 0x79a   :  { %v5647_v18 = vadd.f32 %v24708_v9, %v5566_v38 }
 0x79b   :  { %v27177_v28 = vpop.f32.mrf.mxu0  ;;  %v24733_v42 = vpop.f32.mrf.mxu1 }
 0x79c   :  { %v5729_v44 = vadd.f32 %v24713_v34, %v5647_v18 }
 0x79d   :  { %v24718_v45 = vpop.f32.mrf.mxu0  ;;  %v6194_v46 = vpop.f32.mrf.mxu1 }
 0x79e   :  { %v5809_v29 = vadd.f32 %v24718_v45, %v5729_v44 }
 0x79f   :  { %v27179_v47 = vpop.f32.mrf.mxu0  ;;  %v24743_v48 = vpop.f32.mrf.mxu1 }
 0x7a0   :  { %v27181_v49 = vadd.f32 %v24723_v8, %v5809_v29 }
 0x7a1   :  { %v5970_v31 = vpop.f32.mrf.mxu0  ;;  %v6340_v50 = vpop.f32.mrf.mxu1 }
 0x7a2   :  { %v6047_v53 = vadd.f32 %v6046_v40, %v5970_v31  ;;  %v26337_v31 = vld [vmem:[%s29256_s4 + $0x10] sm:$0xff] }
 0x7a3   :  { %v24728_v51 = vpop.f32.mrf.mxu0  ;;  %v24753_v52 = vpop.f32.mrf.mxu1 }
 0x7a5   :  { %v6120_v54 = vpop.f32.mrf.mxu0  ;;  %v6500_v55 = vpop.f32.mrf.mxu1 }
 0x7a6   :  { %v6121_v56 = vadd.f32 %v6120_v54, %v6047_v53 }
 0x7a7   :  { %v24738_v57 = vpop.f32.mrf.mxu0  ;;  %v24763_v58 = vpop.f32.mrf.mxu1 }
 0x7a8   :  { %v6195_v59 = vadd.f32 %v6194_v46, %v6121_v56 }
 0x7a9   :  { %v6268_v61 = vpop.f32.mrf.mxu0  ;;  %v6648_v62 = vpop.f32.mrf.mxu1 }
 0x7aa   :  { %v6269_v63 = vadd.f32 %v6268_v61, %v6195_v59 }
 0x7ab   :  { %v24748_v0 = vpop.f32.mrf.mxu0  ;;  %v24773_v1 = vpop.f32.mrf.mxu1 }
 0x7ac   :  { %v6341_v2 = vadd.f32 %v6340_v50, %v6269_v63 }
 0x7ad   :  { %v6424_v3 = vpop.f32.mrf.mxu0  ;;  %v6794_v17 = vpop.f32.mrf.mxu1 }
 0x7ae   :  { %v6798_v19 = vmul.f32 0.35355338, %v6341_v2  ;;  %v6501_v25 = vadd.f32 %v6500_v55, %v6424_v3 }
 0x7af   :  { %v24758_v22 = vpop.f32.mrf.mxu0  ;;  %v24783_v23 = vpop.f32.mrf.mxu1 }
 0x7b0   :  { %v6800_v5 = vsel %vm1230_vm2, %v6798_v19, -inf }
 0x7b1   :  { %6801 = vmax.xlane.f32.xlu1 %v6800_v5  ;;  %v6574_v7 = vpop.f32.mrf.mxu0 }
 0x7b2   :  { %v6575_v11 = vadd.f32 %v6574_v7, %v6501_v25 }
 0x7b3   :  { %v24768_v21 = vpop.f32.mrf.mxu0 }
 0x7b4   :  { %v6649_v32 = vadd.f32 %v6648_v62, %v6575_v11 }
 0x7b5   :  { %v6722_v34 = vpop.f32.mrf.mxu0 }
 0x7b6   :  { %v6723_v35 = vadd.f32 %v6722_v34, %v6649_v32 }
 0x7b7   :  { %v24778_v37 = vpop.f32.mrf.mxu0 }
 0x7b8   :  { %v6795_v4 = vadd.f32 %v6794_v17, %v6723_v35 }
 0x7ba   :  { %v6799_v8 = vmul.f32 0.35355338, %v6795_v4 }
 0x7bc   :  { %v6803_v60 = vsel %vm1230_vm2, %v6799_v8, -inf }
 0x7bd   :  { %6804 = vmax.xlane.f32.xlu0 %v6803_v60 }
 0x83a   :  { %v6802_v38 = vpop.xlane.xlu1 %6801 }
 0x83b   :  { %v6806_v9 = vsub.f32 %v6798_v19, %v6802_v38 }
 0x83d   :  { %v6808_v40 = vmul.f32 1.442695, %v6806_v9 }
 0x83f   :  { %26267 = vpow2.f32 %v6808_v40 }
 0x846   :  { %v6805_v18 = vpop.xlane.xlu0 %6804 }
 0x847   :  { %v6807_v42 = vsub.f32 %v6799_v8, %v6805_v18 }
 0x849   :  { %v6810_v44 = vmul.f32 1.442695, %v6807_v42 }
 0x84b   :  { %26269 = vpow2.f32 %v6810_v44 }
 0x84c   :  { %v26268_v45 = vpop.eup %26267 }
 0x84d   :  { %v6812_v46 = vsel %vm1230_vm2, %v26268_v45, 0.0 }
 0x84e   :  { %6813 = vadd.xlane.f32.xlu0 %v6812_v46 }
 0x858   :  { %v26270_v29 = vpop.eup %26269 }
 0x859   :  { %v6815_v48 = vsel %vm1230_vm2, %v26270_v29, 0.0 }
 0x85a   :  { %6816 = vadd.xlane.f32.xlu1 %v6815_v48 }
 0x864   :  { %6822 = vrot.lane.b32.xlu0 %v26814_v24, %s26495_s5 }
 0x868   :  { %8228 = vrot.lane.b32.xlu0 %v26733_v41, %s26497_s16 }
 0x86b   :  { %7274 = vrot.lane.b32.xlu1 %v26835_v33, %s26495_s5 }
 0x86c   :  { %8682 = vrot.lane.b32.xlu0 %v26731_v39, %s26497_s16 }
 0x86f   :  { %7726 = vrot.lane.b32.xlu1 %v26337_v31, %s26494_s12 }
 0x873   :  { %8226 = vrot.lane.b32.xlu1 %v26733_v41, %s26498_s20 }
 0x877   :  { %8680 = vrot.lane.b32.xlu1 %v26731_v39, %s26498_s20 }
 0x8d7   :  { %v6814_v50 = vpop.xlane.xlu0 %6813 }
 0x8d8   :  { %26271 = vrcp.f32 %v6814_v50 }
 0x8db   :  { %v6823_v51 = vpop.permute.xlu0 %6822 }
 0x8dc   :  { %v6859_v52 = vand.u32 4294901760, %v6823_v51 }
 0x8de   :  { %v6936_v53 = vsub.f32 %v6823_v51, %v6859_v52  ;;  %24785 = vmatpush3.msra.mxu0 %v6859_v52 }
 0x8df   :  { %24794 = vmatprep.subr.mxu0 %v26489_v30 }
 0x8e0   :  { %v6937_v54 = vand.u32 4294901760, %v6936_v53 }
 0x8e2   :  { %v6938_v55 = vsub.f32 %v6936_v53, %v6937_v54 }
 0x8e3   :  { %v6817_v56 = vpop.xlane.xlu1 %6816 }
 0x8e4   :  { %v6939_v57 = vand.u32 4294901760, %v6938_v55  ;;  %26273 = vrcp.f32 %v6817_v56 }
 0x8e5   :  { %v26272_v58 = vpop.eup %26271 }
 0x8e6   :  { %24790 = vmatpush3.msra.mxu1 %v6939_v57  ;;  %v6820_v59 = vmul.f32 %v26272_v58, %v26268_v45 }
 0x8e7   :  { %v7275_v41 = vpop.permute.xlu1 %7274  ;;  %24799 = vmatprep.subr.mxu1 %v26489_v30 }
 0x8e8   :  { %v7311_v39 = vand.u32 4294901760, %v7275_v41  ;;  %v6826_v61 = vsel %vm1230_vm2, %v6820_v59, 0 }
 0x8e9   :  { %v6894_v62 = vand.u32 4294901760, %v6826_v61 }
 0x8ea   :  { %v7388_v63 = vsub.f32 %v7275_v41, %v7311_v39 }
 0x8eb   :  { %v6895_v0 = vsub.f32 %v6826_v61, %v6894_v62  ;;  %24792 = vmatmul.mubr.f32.vlgmr.msra.gmra.mxu1 %v6894_v62  ;;  %v7727_v35 = vpop.permute.xlu1 %7726 }
 0x8ec   :  { %v7389_v1 = vand.u32 4294901760, %v7388_v63  ;;  %24800 = vmatpush3.msra.mxu1 %v6859_v52  ;;  %24801 = vmatprep.mubr.msk.f32.mxu1 %vm26490_vm1, %v26489_v30  ;;  %v27231_v37 = vand.u32 4294901760, %v7727_v35 }
 0x8ed   :  { %24809 = vmatprep.subr.mxu1 %v26489_v30  ;;  %v6896_v2 = vand.u32 4294901760, %v6895_v0 }
 0x8ee   :  { %v7390_v3 = vsub.f32 %v7388_v63, %v7389_v1  ;;  %v27237_v4 = vsub.f32 %v7727_v35, %v27231_v37 }
 0x8ef   :  { %24802 = vmatmul.mubr.f32.vlgmr.msra.gmra.mxu1 %v6896_v2  ;;  %v6897_v17 = vsub.f32 %v6895_v0, %v6896_v2 }
 0x8f0   :  { %24810 = vmatpush3.msra.mxu1 %v6859_v52  ;;  %24811 = vmatprep.mubr.msk.f32.mxu1 %vm26490_vm1, %v26489_v30  ;;  %v7391_v19 = vand.u32 4294901760, %v7390_v3  ;;  %v27242_v8 = vand.u32 4294901760, %v27237_v4 }
 0x8f1   :  { %v26274_v22 = vpop.eup %26273  ;;  %24819 = vmatprep.subr.mxu1 %v26489_v30  ;;  %v6898_v23 = vand.u32 4294901760, %v6897_v17 }
 0x8f2   :  { %v6821_v25 = vmul.f32 %v26274_v22, %v26270_v29  ;;  %v7855_v60 = vsub.f32 %v27237_v4, %v27242_v8 }
 0x8f3   :  { %24787 = vmatmul.mubr.f32.vlgmr.msra.gmra.mxu0 %v6898_v23  ;;  %24812 = vmatmul.mubr.f32.vlgmr.msra.gmra.mxu1 %v6894_v62 }
 0x8f4   :  { %24795 = vmatpush3.msra.mxu0 %v6936_v53  ;;  %24820 = vmatpush3.msra.mxu1 %v7391_v19  ;;  %v7278_v5 = vsel %vm1230_vm2, %v6821_v25, 0  ;;  %v7856_v38 = vand.u32 4294901760, %v7855_v60 }
 0x8f5   :  { %24796 = vmatprep.mubr.msk.f32.mxu0 %vm26490_vm1, %v26489_v30  ;;  %24804 = vmatprep.subr.mxu0 %v26489_v30  ;;  %v7346_v7 = vand.u32 4294901760, %v7278_v5 }
 0x8f6   :  { %24821 = vmatprep.mubr.msk.f32.mxu1 %vm26490_vm1, %v26489_v30  ;;  %24829 = vmatprep.subr.mxu1 %v26489_v30 }
 0x8f7   :  { %24797 = vmatmul.mubr.f32.vlgmr.msra.gmra.mxu0 %v6895_v0  ;;  %v7347_v11 = vsub.f32 %v7278_v5, %v7346_v7  ;;  %24822 = vmatmul.mubr.f32.vlgmr.msra.gmra.mxu1 %v7346_v7 }
 0x8f8   :  { %24805 = vmatpush3.msra.mxu0 %v6937_v54  ;;  %24830 = vmatpush3.msra.mxu1 %v7311_v39 }
 0x8f9   :  { %24806 = vmatprep.mubr.msk.f32.mxu0 %vm26490_vm1, %v26489_v30  ;;  %24814 = vmatprep.subr.mxu0 %v26489_v30  ;;  %v7348_v21 = vand.u32 4294901760, %v7347_v11 }
 0x8fa   :  { %24831 = vmatprep.mubr.msk.f32.mxu1 %vm26490_vm1, %v26489_v30  ;;  %24839 = vmatprep.subr.mxu1 %v26489_v30 }
 0x8fb   :  { %24807 = vmatmul.mubr.f32.vlgmr.msra.gmra.mxu0 %v6894_v62  ;;  %24832 = vmatmul.mubr.f32.vlgmr.msra.gmra.mxu1 %v7348_v21  ;;  %v7349_v32 = vsub.f32 %v7347_v11, %v7348_v21  ;;  %v8229_v62 = vpop.permute.xlu0 %8228 }
 0x8fc   :  { %24815 = vmatpush3.msra.mxu0 %v7311_v39  ;;  %24840 = vmatpush3.msra.mxu1 %v7311_v39  ;;  %v8232_v17 = vsel %vm1230_vm2, %v8229_v62, 0 }
 0x8fd   :  { %24816 = vmatprep.mubr.msk.f32.mxu0 %vm26490_vm1, %v26489_v30  ;;  %24824 = vmatprep.subr.mxu0 %v26489_v30  ;;  %v7350_v34 = vand.u32 4294901760, %v7349_v32 }
 0x8fe   :  { %24841 = vmatprep.mubr.msk.f32.mxu1 %vm26490_vm1, %v26489_v30  ;;  %24849 = vmatprep.subr.mxu1 %v7856_v38 }
 0x8ff   :  { %24817 = vmatmul.mubr.f32.vlgmr.msra.gmra.mxu0 %v7350_v34  ;;  %24842 = vmatmul.mubr.f32.vlgmr.msra.gmra.mxu1 %v7346_v7 }
 0x900   :  { %24825 = vmatpush3.msra.mxu0 %v7388_v63  ;;  %24826 = vmatprep.mubr.msk.f32.mxu0 %vm26490_vm1, %v26489_v30 }
 0x901   :  { %24834 = vmatprep.subr.mxu0 %v26489_v30  ;;  %24850 = vmatpush3.msra.mxu1 %v7856_v38 }
 0x902   :  { %24859 = vmatprep.subr.mxu1 %v27231_v37 }
 0x903   :  { %24827 = vmatmul.mubr.f32.vlgmr.msra.gmra.mxu0 %v7347_v11 }
 0x904   :  { %24835 = vmatpush3.msra.mxu0 %v7389_v1  ;;  %24836 = vmatprep.mubr.msk.f32.mxu0 %vm26490_vm1, %v26489_v30 }
 0x905   :  { %24844 = vmatprep.subr.mxu0 %v27231_v37 }
 0x907   :  { %24837 = vmatmul.mubr.f32.vlgmr.msra.gmra.mxu0 %v7346_v7  ;;  %v8265_v7 = vand.u32 4294901760, %v8232_v17 }
 0x908   :  { %24845 = vmatpush3.msra.mxu0 %v27231_v37 }
 0x909   :  { %24854 = vmatprep.subr.mxu0 %v27237_v4  ;;  %v27253_v38 = vsub.f32 %v8232_v17, %v8265_v7 }
 0x9ab   :  { %v6976_v9 = vpop.f32.mrf.mxu1 }
 0x9ad   :  { %v24793_v40 = vpop.f32.mrf.mxu1 }
 0x9ae   :  { %v8227_v40 = vpop.permute.xlu1 %8226 }
 0x9af   :  { %v7124_v18 = vpop.f32.mrf.mxu1 }
 0x9b1   :  { %v24803_v42 = vpop.f32.mrf.mxu1 }
 0x9b3   :  { %v6900_v44 = vpop.f32.mrf.mxu0  ;;  %v7270_v45 = vpop.f32.mrf.mxu1 }
 0x9b4   :  { %v6977_v48 = vadd.f32 %v6976_v9, %v6900_v44 }
 0x9b5   :  { %v24788_v46 = vpop.f32.mrf.mxu0  ;;  %v24813_v29 = vpop.f32.mrf.mxu1 }
 0x9b6   :  { %v8230_v46 = vsel %vm1230_vm2, %v8227_v40, 0 }
 0x9b7   :  { %v7050_v31 = vpop.f32.mrf.mxu0  ;;  %v7428_v50 = vpop.f32.mrf.mxu1 }
 0x9b8   :  { %v7051_v51 = vadd.f32 %v7050_v31, %v6977_v48  ;;  %v27260_v31 = vand.u32 4294901760, %v8230_v46 }
 0x9b9   :  { %v24798_v52 = vpop.f32.mrf.mxu0  ;;  %v24823_v53 = vpop.f32.mrf.mxu1 }
 0x9ba   :  { %v7125_v54 = vadd.f32 %v7124_v18, %v7051_v51  ;;  %v8683_v18 = vpop.permute.xlu0 %8682 }
 0x9bb   :  { %v7198_v55 = vpop.f32.mrf.mxu0  ;;  %v7576_v56 = vpop.f32.mrf.mxu1  ;;  %v8686_v29 = vsel %vm1230_vm2, %v8683_v18, 0 }
 0x9bc   :  { %v7199_v57 = vadd.f32 %v7198_v55, %v7125_v54  ;;  %v27266_v52 = vand.u32 4294901760, %v8686_v29  ;;  %v8301_v54 = vsub.f32 %v8230_v46, %v27260_v31 }
 0x9bd   :  { %v24808_v58 = vpop.f32.mrf.mxu0  ;;  %v24833_v59 = vpop.f32.mrf.mxu1 }
 0x9be   :  { %v7271_v41 = vadd.f32 %v7270_v45, %v7199_v57  ;;  %v8343_v45 = vand.u32 4294901760, %v27253_v38  ;;  %v27273_v57 = vsub.f32 %v8686_v29, %v27266_v52  ;;  %v8681_v58 = vpop.permute.xlu1 %8680  ;;  %v8302_v59 = vand.u32 4294901760, %v8301_v54 }
 0x9bf   :  { %v7352_v39 = vpop.f32.mrf.mxu0  ;;  %v7722_v61 = vpop.f32.mrf.mxu1 }
 0x9c0   :  { %v7730_v63 = vsel %vm1230_vm2, %v7271_v41, 0  ;;  %v7429_v3 = vadd.f32 %v7428_v50, %v7352_v39  ;;  %v8344_v51 = vsub.f32 %v27253_v38, %v8343_v45  ;;  %v8684_v41 = vsel %vm1230_vm2, %v8681_v58, 0 }
 0x9c1   :  { %v27248_v0 = vand.u32 4294901760, %v7730_v63  ;;  %v24818_v1 = vpop.f32.mrf.mxu0  ;;  %v24843_v2 = vpop.f32.mrf.mxu1  ;;  %v8754_v39 = vand.u32 4294901760, %v8684_v41 }
 0x9c3   :  { %v7802_v19 = vsub.f32 %v7730_v63, %v27248_v0  ;;  %v7502_v22 = vpop.f32.mrf.mxu0  ;;  %24851 = vmatprep.mubr.f32.mxu1 %v27248_v0 }
 0x9c4   :  { %v7503_v23 = vadd.f32 %v7502_v22, %v7429_v3 }
 0x9c5   :  { %v24828_v25 = vpop.f32.mrf.mxu0  ;;  %v7803_v5 = vand.u32 4294901760, %v7802_v19 }
 0x9c6   :  { %v7577_v11 = vadd.f32 %v7576_v56, %v7503_v23  ;;  %v8345_v56 = vand.u32 4294901760, %v8344_v51 }
 0x9c7   :  { %v7650_v21 = vpop.f32.mrf.mxu0  ;;  %v7804_v32 = vsub.f32 %v7802_v19, %v7803_v5 }
 0x9c8   :  { %v7651_v34 = vadd.f32 %v7650_v21, %v7577_v11 }
 0x9c9   :  { %v24838_v35 = vpop.f32.mrf.mxu0  ;;  %v7805_v60 = vand.u32 4294901760, %v7804_v32 }
 0x9ca   :  { %v7723_v9 = vadd.f32 %v7722_v61, %v7651_v34 }
 0x9cb   :  { %24846 = vmatprep.mubr.f32.mxu0 %v7805_v60 }
 0x9cc   :  { %v7733_v42 = vsel %vm1230_vm2, %v7723_v9, 0 }
 0x9cd   :  { %v7811_v44 = vand.u32 4294901760, %v7733_v42 }
 0x9cf   :  { %v7812_v48 = vsub.f32 %v7733_v42, %v7811_v44  ;;  %24852 = vmatmul.mubr.f32.vlgmr.msra.gmra.mxu1 %v7811_v44 }
 0x9d0   :  { %24860 = vmatpush3.msra.mxu1 %v27231_v37  ;;  %24861 = vmatprep.mubr.f32.mxu1 %v7803_v5 }
 0x9d1   :  { %24869 = vmatprep.subr.mxu1 %v27231_v37  ;;  %v7813_v50 = vand.u32 4294901760, %v7812_v48 }
 0x9d3   :  { %24862 = vmatmul.mubr.f32.vlgmr.msra.gmra.mxu1 %v7813_v50  ;;  %v7814_v53 = vsub.f32 %v7812_v48, %v7813_v50 }
 0x9d4   :  { %24870 = vmatpush3.msra.mxu1 %v27231_v37  ;;  %24871 = vmatprep.mubr.f32.mxu1 %v27248_v0  ;;  %v8797_v37 = vand.u32 4294901760, %v27273_v57 }
 0x9d5   :  { %24879 = vmatprep.subr.mxu1 %v26489_v30  ;;  %v7815_v55 = vand.u32 4294901760, %v7814_v53 }
 0x9d6   :  { %v8798_v61 = vsub.f32 %v27273_v57, %v8797_v37 }
 0x9d7   :  { %24847 = vmatmul.mubr.f32.vlgmr.msra.gmra.mxu0 %v7815_v55  ;;  %24872 = vmatmul.mubr.f32.vlgmr.msra.gmra.mxu1 %v7811_v44 }
 0x9d8   :  { %24855 = vmatpush3.msra.mxu0 %v27237_v4  ;;  %24880 = vmatpush3.xpose.msra.mxu1 %v8345_v56  ;;  %v8303_v4 = vsub.f32 %v8301_v54, %v8302_v59  ;;  %v8799_v63 = vand.u32 4294901760, %v8798_v61 }
 0x9d9   :  { %24856 = vmatprep.mubr.f32.mxu0 %v7802_v19  ;;  %24864 = vmatprep.subr.mxu0 %v27242_v8 }
 0x9da   :  { %24881 = vmatprep.mubr.msk.f32.mxu1 %vm26490_vm1, %v26489_v30  ;;  %24889 = vmatprep.subr.mxu1 %v26489_v30  ;;  %v8304_v62 = vand.u32 4294901760, %v8303_v4 }
 0x9db   :  { %24857 = vmatmul.mubr.f32.vlgmr.msra.gmra.mxu0 %v7812_v48  ;;  %24882 = vmatmul.mubr.f32.vlgmr.msra.gmra.mxu1 %v27260_v31 }
 0x9dc   :  { %24865 = vmatpush3.msra.mxu0 %v27242_v8  ;;  %24890 = vmatpush3.xpose.msra.mxu1 %v8265_v7  ;;  %v8755_v8 = vsub.f32 %v8684_v41, %v8754_v39 }
 0x9dd   :  { %24866 = vmatprep.mubr.f32.mxu0 %v27248_v0  ;;  %24874 = vmatprep.subr.mxu0 %v26489_v30 }
 0x9de   :  { %24891 = vmatprep.mubr.msk.f32.mxu1 %vm26490_vm1, %v26489_v30  ;;  %24899 = vmatprep.subr.mxu1 %v26489_v30  ;;  %v8756_v0 = vand.u32 4294901760, %v8755_v8 }
 0x9df   :  { %24867 = vmatmul.mubr.f32.vlgmr.msra.gmra.mxu0 %v7811_v44  ;;  %24892 = vmatmul.mubr.f32.vlgmr.msra.gmra.mxu1 %v8302_v59 }
 0x9e0   :  { %24875 = vmatpush3.xpose.msra.mxu0 %v8265_v7  ;;  %24900 = vmatpush3.xpose.msra.mxu1 %v8265_v7  ;;  %v8757_v1 = vsub.f32 %v8755_v8, %v8756_v0 }
 0x9e1   :  { %24876 = vmatprep.mubr.msk.f32.mxu0 %vm26490_vm1, %v26489_v30  ;;  %24884 = vmatprep.subr.mxu0 %v26489_v30 }
 0x9e2   :  { %24901 = vmatprep.mubr.msk.f32.mxu1 %vm26490_vm1, %v26489_v30  ;;  %24909 = vmatprep.subr.mxu1 %v26489_v30  ;;  %v8758_v2 = vand.u32 4294901760, %v8757_v1 }
 0x9e3   :  { %24877 = vmatmul.mubr.f32.vlgmr.msra.gmra.mxu0 %v8304_v62  ;;  %24902 = vmatmul.mubr.f32.vlgmr.msra.gmra.mxu1 %v27260_v31 }
 0x9e4   :  { %24885 = vmatpush3.xpose.msra.mxu0 %v27253_v38  ;;  %24910 = vmatpush3.xpose.msra.mxu1 %v8799_v63 }
 0x9e5   :  { %24886 = vmatprep.mubr.msk.f32.mxu0 %vm26490_vm1, %v26489_v30  ;;  %24894 = vmatprep.subr.mxu0 %v26489_v30 }
 0x9e6   :  { %24911 = vmatprep.mubr.msk.f32.mxu1 %vm26490_vm1, %v26489_v30  ;;  %24919 = vmatprep.subr.mxu1 %v26489_v30 }
 0x9e7   :  { %24887 = vmatmul.mubr.f32.vlgmr.msra.gmra.mxu0 %v8301_v54  ;;  %24912 = vmatmul.mubr.f32.vlgmr.msra.gmra.mxu1 %v8754_v39 }
 0x9e8   :  { %24895 = vmatpush3.xpose.msra.mxu0 %v8343_v45  ;;  %24920 = vmatpush3.xpose.msra.mxu1 %v27266_v52 }
 0x9e9   :  { %24896 = vmatprep.mubr.msk.f32.mxu0 %vm26490_vm1, %v26489_v30  ;;  %24904 = vmatprep.subr.mxu0 %v26489_v30 }
 0x9ea   :  { %24921 = vmatprep.mubr.msk.f32.mxu1 %vm26490_vm1, %v26489_v30  ;;  %24929 = vmatprep.subr.mxu1 %v26489_v30 }
 0x9eb   :  { %24897 = vmatmul.mubr.f32.vlgmr.msra.gmra.mxu0 %v27260_v31  ;;  %24922 = vmatmul.mubr.f32.vlgmr.msra.gmra.mxu1 %v8756_v0 }
 0x9ec   :  { %24905 = vmatpush3.xpose.msra.mxu0 %v27266_v52  ;;  %24930 = vmatpush3.xpose.msra.mxu1 %v27266_v52 }
 0x9ed   :  { %24906 = vmatprep.mubr.msk.f32.mxu0 %vm26490_vm1, %v26489_v30  ;;  %24914 = vmatprep.subr.mxu0 %v26489_v30 }
 0x9ee   :  { %24931 = vmatprep.mubr.msk.f32.mxu1 %vm26490_vm1, %v26489_v30  ;;  %24939 = vmatprep.subr.mxu1 %v26489_v30 }
 0x9ef   :  { %24907 = vmatmul.mubr.f32.vlgmr.msra.gmra.mxu0 %v8758_v2  ;;  %24932 = vmatmul.mubr.f32.vlgmr.msra.gmra.mxu1 %v8754_v39 }
 0x9f0   :  { %24915 = vmatpush3.xpose.msra.mxu0 %v27273_v57  ;;  %24916 = vmatprep.mubr.msk.f32.mxu0 %vm26490_vm1, %v26489_v30 }
 0x9f1   :  { %24924 = vmatprep.subr.mxu0 %v26489_v30  ;;  %24941 = vmatprep.mubr.msk.f32.mxu1 %vm26490_vm1, %v26489_v30 }
 0x9f3   :  { %24917 = vmatmul.mubr.f32.vlgmr.msra.gmra.mxu0 %v8755_v8 }
 0x9f4   :  { %24925 = vmatpush3.xpose.msra.mxu0 %v8797_v37  ;;  %24926 = vmatprep.mubr.msk.f32.mxu0 %vm26490_vm1, %v26489_v30 }
 0x9f5   :  { %24934 = vmatprep.subr.mxu0 %v26489_v30 }
 0x9f7   :  { %24927 = vmatmul.mubr.f32.vlgmr.msra.gmra.mxu0 %v8754_v39 }
 0x9f8   :  { %24936 = vmatprep.mubr.msk.f32.mxu0 %vm26490_vm1, %v26489_v30 }
 0xa8f   :  { %v24853_v3 = vpop.f32.mrf.mxu1 }
 0xa91   :  { %v27333_v17 = vpop.f32.mrf.mxu1 }
 0xa93   :  { %v24863_v19 = vpop.f32.mrf.mxu1 }
 0xa95   :  { %v27335_v22 = vpop.f32.mrf.mxu1 }
 0xa97   :  { %v24848_v23 = vpop.f32.mrf.mxu0  ;;  %v24873_v25 = vpop.f32.mrf.mxu1 }
 0xa98   :  { %v7900_v5 = vadd.f32 %v24853_v3, %v24848_v23 }
 0xa99   :  { %v27337_v7 = vpop.f32.mrf.mxu0  ;;  %v27339_v11 = vpop.f32.mrf.mxu1 }
 0xa9b   :  { %v24858_v21 = vpop.f32.mrf.mxu0  ;;  %v8382_v32 = vpop.f32.mrf.mxu1 }
 0xa9c   :  { %v7981_v34 = vadd.f32 %v24858_v21, %v7900_v5 }
 0xa9d   :  { %v27341_v35 = vpop.f32.mrf.mxu0  ;;  %v24883_v60 = vpop.f32.mrf.mxu1 }
 0xa9e   :  { %v8063_v38 = vadd.f32 %v24863_v19, %v7981_v34 }
 0xa9f   :  { %v24868_v9 = vpop.f32.mrf.mxu0  ;;  %v8530_v40 = vpop.f32.mrf.mxu1 }
 0xaa0   :  { %v8143_v18 = vadd.f32 %v24868_v9, %v8063_v38  ;;  %v26338_v38 = vld [vmem:[%s29256_s4 + $0x18] sm:$0xff]  ;;  %v26339_v9 = vld [vmem:[#allocation8] ss:$0 sm:$0xff] }
 0xaa1   :  { %v27343_v42 = vpop.f32.mrf.mxu0  ;;  %v24893_v44 = vpop.f32.mrf.mxu1 }
 0xaa2   :  { %v8221_v45 = vadd.f32 %v24873_v25, %v8143_v18 }
 0xaa3   :  { %v8306_v46 = vpop.f32.mrf.mxu0  ;;  %v8676_v29 = vpop.f32.mrf.mxu1 }
 0xaa4   :  { %v27346_v48 = vadd.f32 %v8221_v45, %v27181_v49  ;;  %v8383_v51 = vadd.f32 %v8382_v32, %v8306_v46 }
 0xaa5   :  { %v24878_v31 = vpop.f32.mrf.mxu0  ;;  %v24903_v50 = vpop.f32.mrf.mxu1 }
 0xaa7   :  { %v8456_v52 = vpop.f32.mrf.mxu0  ;;  %v8836_v53 = vpop.f32.mrf.mxu1 }
 0xaa8   :  { %v8457_v54 = vadd.f32 %v8456_v52, %v8383_v51 }
 0xaa9   :  { %v24888_v55 = vpop.f32.mrf.mxu0  ;;  %v24913_v56 = vpop.f32.mrf.mxu1 }
 0xaaa   :  { %v8531_v57 = vadd.f32 %v8530_v40, %v8457_v54 }
 0xaab   :  { %v8604_v58 = vpop.f32.mrf.mxu0  ;;  %v8984_v59 = vpop.f32.mrf.mxu1 }
 0xaac   :  { %v8605_v37 = vadd.f32 %v8604_v58, %v8531_v57 }
 0xaad   :  { %v24898_v41 = vpop.f32.mrf.mxu0  ;;  %v24923_v4 = vpop.f32.mrf.mxu1 }
 0xaae   :  { %v8677_v39 = vadd.f32 %v8676_v29, %v8605_v37 }
 0xaaf   :  { %v8760_v61 = vpop.f32.mrf.mxu0  ;;  %v9130_v62 = vpop.f32.mrf.mxu1 }
 0xab0   :  { %v9134_v8 = vmul.f32 0.35355338, %v8677_v39  ;;  %v8837_v0 = vadd.f32 %v8836_v53, %v8760_v61 }
 0xab1   :  { %v24908_v49 = vpop.f32.mrf.mxu0  ;;  %v24933_v63 = vpop.f32.mrf.mxu1 }
 0xab2   :  { %v9136_v1 = vsel %vm1230_vm2, %v9134_v8, -inf }
 0xab3   :  { %9137 = vmax.xlane.f32.xlu0 %v9136_v1  ;;  %v8910_v2 = vpop.f32.mrf.mxu0 }
 0xab4   :  { %v8911_v3 = vadd.f32 %v8910_v2, %v8837_v0 }
 0xab5   :  { %v24918_v19 = vpop.f32.mrf.mxu0 }
 0xab6   :  { %v8985_v23 = vadd.f32 %v8984_v59, %v8911_v3 }
 0xab7   :  { %v9058_v25 = vpop.f32.mrf.mxu0 }
 0xab8   :  { %v9059_v5 = vadd.f32 %v9058_v25, %v8985_v23 }
 0xab9   :  { %v24928_v21 = vpop.f32.mrf.mxu0 }
 0xaba   :  { %v9131_v32 = vadd.f32 %v9130_v62, %v9059_v5 }
 0xabc   :  { %v9135_v34 = vmul.f32 0.35355338, %v9131_v32 }
 0xabe   :  { %v9139_v60 = vsel %vm1230_vm2, %v9135_v34, -inf }
 0xabf   :  { %9140 = vmax.xlane.f32.xlu1 %v9139_v60 }
 0xad0   :  { %9158 = vrot.lane.b32.xlu1 %v26814_v24, %s26498_s20 }
 0xad4   :  { %10062 = vrot.lane.b32.xlu1 %v26338_v38, %s26494_s12 }
 0xad8   :  { %10562 = vrot.lane.b32.xlu1 %v26339_v9, %s26494_s12 }
 0xb3c   :  { %v9138_v40 = vpop.xlane.xlu0 %9137 }
 0xb3d   :  { %v9142_v18 = vsub.f32 %v9134_v8, %v9138_v40 }
 0xb3f   :  { %v9144_v44 = vmul.f32 1.442695, %v9142_v18 }
 0xb41   :  { %26275 = vpow2.f32 %v9144_v44 }
 0xb48   :  { %v9141_v45 = vpop.xlane.xlu1 %9140 }
 0xb49   :  { %v9143_v46 = vsub.f32 %v9135_v34, %v9141_v45 }
 0xb4b   :  { %v9146_v29 = vmul.f32 1.442695, %v9143_v46 }
 0xb4c   :  { %v9159_v31 = vpop.permute.xlu1 %9158 }
 0xb4d   :  { %26277 = vpow2.f32 %v9146_v29  ;;  %v9195_v50 = vand.u32 4294901760, %v9159_v31 }
 0xb4e   :  { %v26276_v24 = vpop.eup %26275 }
 0xb4f   :  { %v9272_v51 = vsub.f32 %v9159_v31, %v9195_v50  ;;  %24935 = vmatpush3.msra.mxu0 %v9195_v50  ;;  %v9148_v52 = vsel %vm1230_vm2, %v26276_v24, 0.0 }
 0xb50   :  { %9149 = vadd.xlane.f32.xlu0 %v9148_v52  ;;  %24944 = vmatprep.subr.mxu0 %v26489_v30  ;;  %v10063_v38 = vpop.permute.xlu1 %10062 }
 0xb51   :  { %v9273_v53 = vand.u32 4294901760, %v9272_v51  ;;  %v10102_v9 = vand.u32 4294901760, %v10063_v38 }
 0xb53   :  { %v9274_v54 = vsub.f32 %v9272_v51, %v9273_v53  ;;  %v27393_v40 = vsub.f32 %v10063_v38, %v10102_v9 }
 0xb55   :  { %v9275_v55 = vand.u32 4294901760, %v9274_v54  ;;  %v27396_v18 = vand.u32 4294901760, %v27393_v40 }
 0xb57   :  { %24940 = vmatpush3.msra.mxu1 %v9275_v55  ;;  %v10191_v44 = vsub.f32 %v27393_v40, %v27396_v18 }
 0xb58   :  { %24949 = vmatprep.subr.mxu1 %v26489_v30 }
 0xb59   :  { %v10192_v45 = vand.u32 4294901760, %v10191_v44 }
 0xb5a   :  { %v26278_v56 = vpop.eup %26277 }
 0xb5b   :  { %v9151_v57 = vsel %vm1230_vm2, %v26278_v56, 0.0 }
 0xb5c   :  { %9152 = vadd.xlane.f32.xlu0 %v9151_v57 }
 0xb72   :  { %9610 = vrot.lane.b32.xlu0 %v26835_v33, %s26498_s20 }
 0xbd9   :  { %v9150_v58 = vpop.xlane.xlu0 %9149 }
 0xbda   :  { %26279 = vrcp.f32 %v9150_v58 }
 0xbe5   :  { %v9153_v59 = vpop.xlane.xlu0 %9152 }
 0xbe6   :  { %26281 = vrcp.f32 %v9153_v59 }
 0xbe7   :  { %v26280_v37 = vpop.eup %26279 }
 0xbe8   :  { %v9156_v41 = vmul.f32 %v26280_v37, %v26276_v24 }
 0xbe9   :  { %v9611_v4 = vpop.permute.xlu0 %9610 }
 0xbea   :  { %v9647_v39 = vand.u32 4294901760, %v9611_v4  ;;  %v9162_v61 = vsel %vm1230_vm2, %v9156_v41, 0 }
 0xbeb   :  { %v9230_v62 = vand.u32 4294901760, %v9162_v61 }
 0xbec   :  { %v9724_v8 = vsub.f32 %v9611_v4, %v9647_v39 }
 0xbed   :  { %v9231_v49 = vsub.f32 %v9162_v61, %v9230_v62  ;;  %24942 = vmatmul.mubr.f32.vlgmr.msra.gmra.mxu1 %v9230_v62 }
 0xbee   :  { %v9725_v63 = vand.u32 4294901760, %v9724_v8  ;;  %24950 = vmatpush3.msra.mxu1 %v9195_v50  ;;  %24951 = vmatprep.mubr.msk.f32.mxu1 %vm26490_vm1, %v26489_v30 }
 0xbef   :  { %24959 = vmatprep.subr.mxu1 %v26489_v30  ;;  %v9232_v33 = vand.u32 4294901760, %v9231_v49 }
 0xbf0   :  { %v9726_v0 = vsub.f32 %v9724_v8, %v9725_v63 }
 0xbf1   :  { %24952 = vmatmul.mubr.f32.vlgmr.msra.gmra.mxu1 %v9232_v33  ;;  %v9233_v1 = vsub.f32 %v9231_v49, %v9232_v33 }
 0xbf2   :  { %v9727_v2 = vand.u32 4294901760, %v9726_v0  ;;  %24960 = vmatpush3.msra.mxu1 %v9195_v50  ;;  %24961 = vmatprep.mubr.msk.f32.mxu1 %vm26490_vm1, %v26489_v30 }
 0xbf3   :  { %v26282_v3 = vpop.eup %26281  ;;  %24969 = vmatprep.subr.mxu1 %v26489_v30  ;;  %v9234_v19 = vand.u32 4294901760, %v9233_v1 }
 0xbf4   :  { %v9157_v23 = vmul.f32 %v26282_v3, %v26278_v56 }
 0xbf5   :  { %24937 = vmatmul.mubr.f32.vlgmr.msra.gmra.mxu0 %v9234_v19  ;;  %24962 = vmatmul.mubr.f32.vlgmr.msra.gmra.mxu1 %v9230_v62 }
 0xbf6   :  { %24945 = vmatpush3.msra.mxu0 %v9272_v51  ;;  %24970 = vmatpush3.msra.mxu1 %v9727_v2  ;;  %v9614_v25 = vsel %vm1230_vm2, %v9157_v23, 0 }
 0xbf7   :  { %24946 = vmatprep.mubr.msk.f32.mxu0 %vm26490_vm1, %v26489_v30  ;;  %24954 = vmatprep.subr.mxu0 %v26489_v30  ;;  %v9682_v5 = vand.u32 4294901760, %v9614_v25 }
 0xbf8   :  { %24971 = vmatprep.mubr.msk.f32.mxu1 %vm26490_vm1, %v26489_v30  ;;  %24979 = vmatprep.subr.mxu1 %v26489_v30 }
 0xbf9   :  { %24947 = vmatmul.mubr.f32.vlgmr.msra.gmra.mxu0 %v9231_v49  ;;  %v9683_v21 = vsub.f32 %v9614_v25, %v9682_v5  ;;  %24972 = vmatmul.mubr.f32.vlgmr.msra.gmra.mxu1 %v9682_v5 }
 0xbfa   :  { %24955 = vmatpush3.msra.mxu0 %v9273_v53  ;;  %24980 = vmatpush3.msra.mxu1 %v9647_v39 }
 0xbfb   :  { %24956 = vmatprep.mubr.msk.f32.mxu0 %vm26490_vm1, %v26489_v30  ;;  %24964 = vmatprep.subr.mxu0 %v26489_v30  ;;  %v9684_v32 = vand.u32 4294901760, %v9683_v21 }
 0xbfc   :  { %24981 = vmatprep.mubr.msk.f32.mxu1 %vm26490_vm1, %v26489_v30  ;;  %24989 = vmatprep.subr.mxu1 %v26489_v30 }
 0xbfd   :  { %24957 = vmatmul.mubr.f32.vlgmr.msra.gmra.mxu0 %v9230_v62  ;;  %24982 = vmatmul.mubr.f32.vlgmr.msra.gmra.mxu1 %v9684_v32  ;;  %v9685_v34 = vsub.f32 %v9683_v21, %v9684_v32 }
 0xbfe   :  { %24965 = vmatpush3.msra.mxu0 %v9647_v39  ;;  %24990 = vmatpush3.msra.mxu1 %v9647_v39 }
 0xbff   :  { %24966 = vmatprep.mubr.msk.f32.mxu0 %vm26490_vm1, %v26489_v30  ;;  %24974 = vmatprep.subr.mxu0 %v26489_v30  ;;  %v9686_v60 = vand.u32 4294901760, %v9685_v34 }
 0xc00   :  { %24991 = vmatprep.mubr.msk.f32.mxu1 %vm26490_vm1, %v26489_v30  ;;  %24999 = vmatprep.subr.mxu1 %v10192_v45 }
 0xc01   :  { %24967 = vmatmul.mubr.f32.vlgmr.msra.gmra.mxu0 %v9686_v60  ;;  %24992 = vmatmul.mubr.f32.vlgmr.msra.gmra.mxu1 %v9682_v5 }
 0xc02   :  { %24975 = vmatpush3.msra.mxu0 %v9724_v8  ;;  %24976 = vmatprep.mubr.msk.f32.mxu0 %vm26490_vm1, %v26489_v30 }
 0xc03   :  { %24984 = vmatprep.subr.mxu0 %v26489_v30  ;;  %25000 = vmatpush3.msra.mxu1 %v10192_v45 }
 0xc04   :  { %25009 = vmatprep.subr.mxu1 %v10102_v9 }
 0xc05   :  { %24977 = vmatmul.mubr.f32.vlgmr.msra.gmra.mxu0 %v9683_v21 }
 0xc06   :  { %24985 = vmatpush3.msra.mxu0 %v9725_v63  ;;  %24986 = vmatprep.mubr.msk.f32.mxu0 %vm26490_vm1, %v26489_v30 }
 0xc07   :  { %24994 = vmatprep.subr.mxu0 %v10102_v9 }
 0xc09   :  { %24987 = vmatmul.mubr.f32.vlgmr.msra.gmra.mxu0 %v9682_v5 }
 0xc0a   :  { %24995 = vmatpush3.msra.mxu0 %v10102_v9 }
 0xc0b   :  { %25004 = vmatprep.subr.mxu0 %v27393_v40 }
 0xcad   :  { %v9312_v46 = vpop.f32.mrf.mxu1 }
 0xcaf   :  { %v24943_v29 = vpop.f32.mrf.mxu1 }
 0xcb1   :  { %v9460_v31 = vpop.f32.mrf.mxu1 }
 0xcb3   :  { %v24953_v50 = vpop.f32.mrf.mxu1 }
 0xcb5   :  { %v9236_v24 = vpop.f32.mrf.mxu0  ;;  %v9606_v51 = vpop.f32.mrf.mxu1 }
 0xcb6   :  { %v9313_v54 = vadd.f32 %v9312_v46, %v9236_v24 }
 0xcb7   :  { %v24938_v52 = vpop.f32.mrf.mxu0  ;;  %v24963_v53 = vpop.f32.mrf.mxu1 }
 0xcb8   :  { %v5062_v53 = vadd.f32 %v27157_v16, %v27161_v26 }
 0xcb9   :  { %v9386_v55 = vpop.f32.mrf.mxu0  ;;  %v9764_v56 = vpop.f32.mrf.mxu1 }
 0xcba   :  { %v9387_v57 = vadd.f32 %v9386_v55, %v9313_v54  ;;  %v5142_v54 = vadd.f32 %v27165_v14, %v5062_v53  ;;  %v10596_v53 = vlaneseq }
 0xcbb   :  { %v24948_v58 = vpop.f32.mrf.mxu0  ;;  %v24973_v59 = vpop.f32.mrf.mxu1 }
 0xcbc   :  { %v9461_v37 = vadd.f32 %v9460_v31, %v9387_v57 }
 0xcbd   :  { %v9534_v41 = vpop.f32.mrf.mxu0  ;;  %v9912_v4 = vpop.f32.mrf.mxu1 }
 0xcbe   :  { %v9535_v39 = vadd.f32 %v9534_v41, %v9461_v37 }
 0xcbf   :  { %v24958_v61 = vpop.f32.mrf.mxu0  ;;  %v24983_v62 = vpop.f32.mrf.mxu1 }
 0xcc0   :  { %v9607_v8 = vadd.f32 %v9606_v51, %v9535_v39 }
 0xcc1   :  { %v9688_v49 = vpop.f32.mrf.mxu0  ;;  %v10058_v63 = vpop.f32.mrf.mxu1 }
 0xcc2   :  { %v10066_v33 = vsel %vm1230_vm2, %v9607_v8, 0  ;;  %v9765_v3 = vadd.f32 %v9764_v56, %v9688_v49 }
 0xcc3   :  { %v10137_v0 = vand.u32 4294901760, %v10066_v33  ;;  %v24968_v1 = vpop.f32.mrf.mxu0  ;;  %v24993_v2 = vpop.f32.mrf.mxu1 }
 0xcc5   :  { %v10138_v19 = vsub.f32 %v10066_v33, %v10137_v0  ;;  %v9838_v23 = vpop.f32.mrf.mxu0  ;;  %25001 = vmatprep.mubr.f32.mxu1 %v10137_v0 }
 0xcc6   :  { %v9839_v25 = vadd.f32 %v9838_v23, %v9765_v3 }
 0xcc7   :  { %v24978_v5 = vpop.f32.mrf.mxu0  ;;  %v10139_v21 = vand.u32 4294901760, %v10138_v19 }
 0xcc8   :  { %v9913_v32 = vadd.f32 %v9912_v4, %v9839_v25 }
 0xcc9   :  { %v9986_v34 = vpop.f32.mrf.mxu0  ;;  %v10140_v60 = vsub.f32 %v10138_v19, %v10139_v21 }
 0xcca   :  { %v9987_v38 = vadd.f32 %v9986_v34, %v9913_v32 }
 0xccb   :  { %v24988_v44 = vpop.f32.mrf.mxu0  ;;  %v10141_v45 = vand.u32 4294901760, %v10140_v60 }
 0xccc   :  { %v10059_v46 = vadd.f32 %v10058_v63, %v9987_v38 }
 0xccd   :  { %24996 = vmatprep.mubr.f32.mxu0 %v10141_v45 }
 0xcce   :  { %v10069_v29 = vsel %vm1230_vm2, %v10059_v46, 0 }
 0xccf   :  { %v10147_v31 = vand.u32 4294901760, %v10069_v29 }
 0xcd1   :  { %v10148_v50 = vsub.f32 %v10069_v29, %v10147_v31  ;;  %25002 = vmatmul.mubr.f32.vlgmr.msra.gmra.mxu1 %v10147_v31 }
 0xcd2   :  { %25010 = vmatpush3.msra.mxu1 %v10102_v9  ;;  %25011 = vmatprep.mubr.f32.mxu1 %v10139_v21 }
 0xcd3   :  { %v10149_v24 = vand.u32 4294901760, %v10148_v50  ;;  %25019 = vmatprep.subr.mxu1 %v10102_v9 }
 0xcd5   :  { %v10150_v51 = vsub.f32 %v10148_v50, %v10149_v24  ;;  %25012 = vmatmul.mubr.f32.vlgmr.msra.gmra.mxu1 %v10149_v24 }
 0xcd6   :  { %25020 = vmatpush3.msra.mxu1 %v10102_v9  ;;  %25021 = vmatprep.mubr.f32.mxu1 %v10137_v0  ;;  %v5223_v9 = vadd.f32 %v27159_v20, %v5142_v54 }
 0xcd7   :  { %v10151_v52 = vand.u32 4294901760, %v10150_v51 }
 0xcd8   :  { %v5305_v55 = vadd.f32 %v27169_v43, %v5223_v9  ;;  %v27431_v9 = vshrl.u32 %v10596_v53, 7 }
 0xcd9   :  { %24997 = vmatmul.mubr.f32.vlgmr.msra.gmra.mxu0 %v10151_v52  ;;  %25022 = vmatmul.mubr.f32.vlgmr.msra.gmra.mxu1 %v10147_v31 }
 0xcda   :  { %25005 = vmatpush3.msra.mxu0 %v27393_v40  ;;  %25006 = vmatprep.mubr.f32.mxu0 %v10138_v19  ;;  %v5383_v56 = vadd.f32 %v27163_v27, %v5305_v55  ;;  %v10598_v55 = vsub.s32 0, %v27431_v9  ;;  %v10638_v53 = vsub.s32 2, %v27431_v9 }
 0xcdb   :  { %25014 = vmatprep.subr.mxu0 %v27396_v18 }
 0xcdc   :  { %v5474_v40 = vadd.f32 %v27173_v6, %v5383_v56  ;;  %v27437_v56 = vld [vmem:[%s29258_s6] sm:$0xff] }
 0xcdd   :  { %25007 = vmatmul.mubr.f32.vlgmr.msra.gmra.mxu0 %v10148_v50 }
 0xcde   :  { %25015 = vmatpush3.msra.mxu0 %v27396_v18  ;;  %25016 = vmatprep.mubr.f32.mxu0 %v10137_v0  ;;  %v5560_v58 = vadd.f32 %v27167_v13, %v5474_v40  ;;  %v7894_v18 = vadd.f32 %v27333_v17, %v27337_v7  ;;  %v10604_v40 = vsub.s32 1, %v27431_v9 }
 0xce0   :  { %v7974_v37 = vadd.f32 %v27341_v35, %v7894_v18  ;;  %v5640_v16 = vadd.f32 %v27177_v28, %v5560_v58 }
 0xce1   :  { %25017 = vmatmul.mubr.f32.vlgmr.msra.gmra.mxu0 %v10147_v31 }
 0xce2   :  { %v8055_v20 = vadd.f32 %v27335_v22, %v7974_v37  ;;  %v5721_v27 = vadd.f32 %v27171_v36, %v5640_v16 }
 0xce4   :  { %v8137_v13 = vadd.f32 %v27343_v42, %v8055_v20  ;;  %v5803_v7 = vadd.f32 %v27179_v47, %v5721_v27  ;;  %v10563_v42 = vpop.permute.xlu1 %10562  ;;  %v26340_v20 = vld [vmem:[#allocation2] sm:$0xff] }
 0xce6   :  { %v8215_v49 = vadd.f32 %v27339_v11, %v8137_v13  ;;  %v5881_v36 = vadd.f32 %v27175_v12, %v5803_v7  ;;  %v23363_v7 = vld [vmem:[%s29256_s4 + $0x30] sm:$0xff] }
 0xce8   :  { %v8224_v19 = vadd.f32 %v8215_v49, %v5881_v36 }
 0xd91   :  { %v25003_v57 = vpop.f32.mrf.mxu1 }
 0xd93   :  { %v10229_v59 = vpop.f32.mrf.mxu1 }
 0xd95   :  { %v25013_v26 = vpop.f32.mrf.mxu1 }
 0xd97   :  { %v10390_v6 = vpop.f32.mrf.mxu1 }
 0xd99   :  { %v24998_v14 = vpop.f32.mrf.mxu0  ;;  %v25023_v28 = vpop.f32.mrf.mxu1 }
 0xd9a   :  { %v10236_v41 = vadd.f32 %v25003_v57, %v24998_v14  ;;  %v10599_v57 = vrot.slane %v27437_v56, %v10598_v55 }
 0xd9b   :  { %v10143_v43 = vpop.f32.mrf.mxu0  ;;  %v10550_v2 = vpop.f32.mrf.mxu1 }
 0xd9c   :  { %v10230_v39 = vadd.f32 %v10229_v59, %v10143_v43  ;;  %v10605_v59 = vrot.slane %v27437_v56, %v10604_v40 }
 0xd9d   :  { %v25008_v4 = vpop.f32.mrf.mxu0 }
 0xd9e   :  { %v10317_v61 = vadd.f32 %v25008_v4, %v10236_v41  ;;  %v26341_v4 = vld [vmem:[#allocation2 + $0x8] sm:$0xff] }
 0xd9f   :  { %v10309_v17 = vpop.f32.mrf.mxu0 }
 0xda0   :  { %v10310_v35 = vadd.f32 %v10309_v17, %v10230_v39  ;;  %v10399_v62 = vadd.f32 %v25013_v26, %v10317_v61  ;;  %v23364_v61 = vld [vmem:[%s29256_s4 + $0x38] sm:$0xff] }
 0xda1   :  { %v25018_v8 = vpop.f32.mrf.mxu0  ;;  %v27451_v17 = vand.u32 4294901760, %v23364_v61 }
 0xda2   :  { %v10479_v22 = vadd.f32 %v25018_v8, %v10399_v62  ;;  %v10391_v63 = vadd.f32 %v10390_v6, %v10310_v35  ;;  %v27458_v35 = vand.u32 4294901760, %v23363_v7  ;;  %v23362_v62 = vld [vmem:[%s29256_s4 + $0x28] sm:$0xff]  ;;  %v23361_v8 = vld [vmem:[%s29256_s4 + $0x20] sm:$0xff] }
 0xda3   :  { %v10472_v33 = vpop.f32.mrf.mxu0  ;;  %25024 = vmatprep.subr.mxu0 %v27451_v17  ;;  %v27471_v49 = vand.u32 4294901760, %v23361_v8 }
 0xda4   :  { %v10557_v0 = vadd.f32 %v25023_v28, %v10479_v22  ;;  %v10473_v1 = vadd.f32 %v10472_v33, %v10391_v63  ;;  %25025 = vmatpush3.msra.mxu0 %v27451_v17  ;;  %v27463_v28 = vand.u32 4294901760, %v23362_v62  ;;  %v27475_v22 = vsub.f32 %v23364_v61, %v27451_v17 }
 0xda5   :  { %25026 = vmatprep.subr.mxu0 %v27458_v35 }
 0xda6   :  { %v10551_v3 = vadd.f32 %v10550_v2, %v10473_v1  ;;  %v10561_v23 = vadd.f32 %v10557_v0, %v27346_v48  ;;  %25027 = vmatpush3.msra.mxu0 %v27458_v35 }
 0xda7   :  { %25028 = vmatprep.subr.mxu0 %v27463_v28 }
 0xda8   :  { %v10560_v47 = vadd.f32 %v10551_v3, %v8224_v19  ;;  %v10566_v25 = vadd.f32 %v10563_v42, %v10561_v23  ;;  %25029 = vmatpush3.msra.mxu0 %v27463_v28 }
 0xda9   :  { %25030 = vmatprep.subr.mxu0 %v27471_v49 }
 0xdaa   :  { %v10565_v5 = vadd.f32 %v10563_v42, %v10560_v47  ;;  %v10568_v21 = vadd.f32 %v10566_v25, %v26615_v15  ;;  %25031 = vmatpush3.msra.mxu0 %v27471_v49  ;;  %v27487_v47 = vsub.f32 %v23363_v7, %v27458_v35  ;;  %v27491_v25 = vsub.f32 %v23362_v62, %v27463_v28 }
 0xdab   :  { %25046 = vmatprep.subr.mxu0 %v27475_v22 }
 0xdac   :  { %v10572_v11 = vsel %vm139_vm0, %v10568_v21, 0.0  ;;  %v10567_v32 = vadd.f32 %v10565_v5, %v26607_v10  ;;  %v27494_v5 = vand.u32 4294901760, %v27475_v22 }
 0xdad   :  { %10573 = vadd.xlane.f32.xlu1 %v10572_v11 }
 0xdae   :  { %v10569_v12 = vsel %vm139_vm0, %v10567_v32, 0.0  ;;  %v10783_v11 = vsub.f32 %v27475_v22, %v27494_v5 }
 0xdaf   :  { %10570 = vadd.xlane.f32.xlu0 %v10569_v12 }
 0xdb0   :  { %v10784_v12 = vand.u32 4294901760, %v10783_v11 }
 0xdb2   :  { %25035 = vmatprep.subr.mxu1 %v10784_v12 }
 0xdb3   :  { %25036 = vmatpush3.msra.mxu1 %v10784_v12 }
 0xe36   :  { %v10574_v34 = vpop.xlane.xlu1 %10573 }
 0xe37   :  { %v10577_v60 = vmul.f32 0.03125, %v10574_v34 }
 0xe38   :  { %v10571_v38 = vpop.xlane.xlu0 %10570 }
 0xe39   :  { %v10576_v44 = vmul.f32 0.03125, %v10571_v38  ;;  %v10579_v45 = vsub.f32 %v10568_v21, %v10577_v60  ;;  %v27498_v21 = vsub.f32 %v23361_v8, %v27471_v49  ;;  %v27509_v60 = vand.u32 4294901760, %v27491_v25 }
 0xe3b   :  { %v10578_v46 = vsub.f32 %v10567_v32, %v10576_v44  ;;  %v10581_v31 = vmul.f32 %v10579_v45, %v10579_v45  ;;  %v27503_v32 = vand.u32 4294901760, %v27487_v47  ;;  %v10797_v44 = vsub.f32 %v27491_v25, %v27509_v60 }
 0xe3d   :  { %v10580_v48 = vmul.f32 %v10578_v46, %v10578_v46  ;;  %v10585_v15 = vsel %vm139_vm0, %v10581_v31, 0.0  ;;  %v10790_v34 = vsub.f32 %v27487_v47, %v27503_v32  ;;  %v27520_v31 = vld [vmem:[#allocation8 + $0x1] ss:$0 sm:$0xff] }
 0xe3f   :  { %v10582_v29 = vsel %vm139_vm0, %v10580_v48, 0.0  ;;  %v10791_v38 = vand.u32 4294901760, %v10790_v34 }
 0xe40   :  { %10583 = vadd.xlane.f32.xlu0 %v10582_v29 }
 0xe41   :  { %25037 = vmatprep.subr.mxu1 %v10791_v38 }
 0xe42   :  { %25038 = vmatpush3.msra.mxu1 %v10791_v38 }
 0xe44   :  { %10586 = vadd.xlane.f32.xlu0 %v10585_v15 }
 0xec9   :  { %v10584_v50 = vpop.xlane.xlu0 %10583 }
 0xeca   :  { %v10588_v10 = vmul.f32 0.03125, %v10584_v50 }
 0xecc   :  { %v10590_v24 = vadd.f32 1e-05, %v10588_v10 }
 0xecd   :  { %v10587_v51 = vpop.xlane.xlu0 %10586 }
 0xece   :  { %26283 = vrsqrt.f32 %v10590_v24  ;;  %v10589_v52 = vmul.f32 0.03125, %v10587_v51 }
 0xed0   :  { %v10591_v54 = vadd.f32 1e-05, %v10589_v52 }
 0xed2   :  { %26285 = vrsqrt.f32 %v10591_v54  ;;  %v10644_v54 = vsub.s32 3, %v27431_v9 }
 0xedb   :  { %v26284_v58 = vpop.eup %26283 }
 0xedc   :  { %v10594_v18 = vmul.f32 %v26284_v58, %v10578_v46  ;;  %v10798_v46 = vand.u32 4294901760, %v10797_v44 }
 0xede   :  { %v10600_v37 = vmul.f32 %v10599_v57, %v10594_v18  ;;  %25039 = vmatprep.subr.mxu1 %v10798_v46 }
 0xedf   :  { %v26286_v16 = vpop.eup %26285  ;;  %25040 = vmatpush3.msra.mxu1 %v10798_v46 }
 0xee0   :  { %v10606_v26 = vadd.f32 %v10605_v59, %v10600_v37  ;;  %v10595_v14 = vmul.f32 %v26286_v16, %v10579_v45  ;;  %v27515_v45 = vand.u32 4294901760, %v27498_v21 }
 0xee2   :  { %v10608_v43 = vadd.f32 %v26340_v20, %v10606_v26  ;;  %v10601_v27 = vmul.f32 %v10599_v57, %v10595_v14  ;;  %v10804_v48 = vsub.f32 %v27498_v21, %v27515_v45  ;;  %v10639_v57 = vrot.slane %v27437_v56, %v10638_v53 }
 0xee4   :  { %v10610_v41 = vsel %vm139_vm0, %v10608_v43, 0.0  ;;  %v10607_v6 = vadd.f32 %v10605_v59, %v10601_v27  ;;  %v10805_v29 = vand.u32 4294901760, %v10804_v48  ;;  %v10645_v59 = vrot.slane %v27437_v56, %v10644_v54  ;;  %v26342_v27 = vld [vmem:[#allocation7] sm:$0xff] }
 0xee5   :  { %10611 = vadd.xlane.f32.xlu1 %v10610_v41 }
 0xee6   :  { %v10609_v13 = vadd.f32 %v26341_v4, %v10607_v6  ;;  %25041 = vmatprep.subr.mxu1 %v10805_v29 }
 0xee7   :  { %25042 = vmatpush3.msra.mxu1 %v10805_v29  ;;  %v27578_v29 = vld [vmem:[%s29253_s1] sm:$0xff] }
 0xee8   :  { %v10613_v39 = vsel %vm139_vm0, %v10609_v13, 0.0  ;;  %25057 = vmatprep.subr.mxu1 %v27451_v17 }
 0xee9   :  { %10614 = vadd.xlane.f32.xlu0 %v10613_v39  ;;  %v26343_v39 = vld [vmem:[#allocation7 + $0x8] sm:$0xff] }
 0xf6e   :  { %v10612_v63 = vpop.xlane.xlu1 %10611 }
 0xf6f   :  { %v10616_v33 = vmul.f32 0.03125, %v10612_v63 }
 0xf71   :  { %v10618_v36 = vsub.f32 %v10608_v43, %v10616_v33 }
 0xf72   :  { %v10615_v0 = vpop.xlane.xlu0 %10614 }
 0xf73   :  { %v10617_v1 = vmul.f32 0.03125, %v10615_v0  ;;  %v10620_v2 = vmul.f32 %v10618_v36, %v10618_v36 }
 0xf75   :  { %v10619_v42 = vsub.f32 %v10609_v13, %v10617_v1  ;;  %v10622_v3 = vsel %vm139_vm0, %v10620_v2, 0.0 }
 0xf76   :  { %10623 = vadd.xlane.f32.xlu1 %v10622_v3 }
 0xf77   :  { %v10621_v19 = vmul.f32 %v10619_v42, %v10619_v42 }
 0xf79   :  { %v10625_v23 = vsel %vm139_vm0, %v10621_v19, 0.0 }
 0xf7a   :  { %10626 = vadd.xlane.f32.xlu0 %v10625_v23 }
 0xf87   :  { %11204 = vrot.lane.b32.xlu1 %v23364_v61, %s26491_s28 }
 0xf8b   :  { %11200 = vrot.lane.b32.xlu1 %v23362_v62, %s26491_s28 }
 0xf8f   :  { %11198 = vrot.lane.b32.xlu1 %v23361_v8, %s26491_s28 }
 0xf90   :  { %11202 = vrot.lane.b32.xlu0 %v23363_v7, %s26491_s28 }
 0xf93   :  { %11843 = vrot.lane.b32.xlu1 %v23363_v7, %s26488_s27 }
 0xf94   :  { %11845 = vrot.lane.b32.xlu0 %v23364_v61, %s26488_s27 }
 0xf97   :  { %11839 = vrot.lane.b32.xlu1 %v23361_v8, %s26488_s27 }
 0xf98   :  { %11841 = vrot.lane.b32.xlu0 %v23362_v62, %s26488_s27 }
 0xf9c   :  { %11210 = vrot.lane.b32.xlu0 %v27520_v31, %s26491_s28 }
 0xfff   :  { %v10624_v15 = vpop.xlane.xlu1 %10623 }
0x1000   :  { %v10628_v50 = vmul.f32 0.03125, %v10624_v15  ;;  %v110_v15 = vld [vmem:[#allocation5] sm:$0xff] }
0x1002   :  { %v10630_v10 = vadd.f32 1e-05, %v10628_v50  ;;  %v27584_v50 = vld [vmem:[%s29253_s1 + $0x8] sm:$0xff] }
0x1003   :  { %v10627_v24 = vpop.xlane.xlu0 %10626  ;;  %v11205_v20 = vpop.permute.xlu1 %11204 }
0x1004   :  { %26287 = vrsqrt.f32 %v10630_v10  ;;  %v10629_v51 = vmul.f32 0.03125, %v10627_v24  ;;  %v111_v10 = vld [vmem:[#allocation5 + $0x8] sm:$0xff] }
0x1005   :  { %v10651_v54 = vadd.f32 %v111_v10, %v27584_v50 }
0x1006   :  { %v10631_v52 = vadd.f32 1e-05, %v10629_v51 }
0x1007   :  { %v11201_v7 = vpop.permute.xlu1 %11200  ;;  %v11203_v33 = vpop.permute.xlu0 %11202 }
0x1008   :  { %26289 = vrsqrt.f32 %v10631_v52  ;;  %v27549_v2 = vand.u32 4294901760, %v11203_v33  ;;  %v27557_v11 = vand.u32 4294901760, %v11201_v7  ;;  %v10650_v52 = vadd.f32 %v110_v15, %v27578_v29 }
0x100a   :  { %v27563_v34 = vsub.f32 %v11203_v33, %v27549_v2  ;;  %v27569_v46 = vsub.f32 %v11201_v7, %v27557_v11 }
0x100b   :  { %v11199_v19 = vpop.permute.xlu1 %11198 }
0x100c   :  { %v27565_v38 = vand.u32 4294901760, %v11199_v19  ;;  %v27591_v51 = vand.u32 4294901760, %v27563_v34 }
0x100e   :  { %v27588_v24 = vsub.f32 %v11199_v19, %v27565_v38 }
0x1011   :  { %v26288_v58 = vpop.eup %26287 }
0x1012   :  { %v10634_v18 = vmul.f32 %v26288_v58, %v10618_v36  ;;  %v27542_v36 = vand.u32 4294901760, %v11205_v20  ;;  %v11369_v58 = vsub.f32 %v27563_v34, %v27591_v51 }
0x1014   :  { %v10640_v37 = vmul.f32 %v10639_v57, %v10634_v18  ;;  %v27554_v23 = vsub.f32 %v11205_v20, %v27542_v36  ;;  %v27615_v18 = vand.u32 4294901760, %v27588_v24 }
0x1015   :  { %v26290_v16 = vpop.eup %26289 }
0x1016   :  { %v10635_v26 = vmul.f32 %v26290_v16, %v10619_v42  ;;  %v10646_v14 = vadd.f32 %v10645_v59, %v10640_v37  ;;  %v27573_v48 = vand.u32 4294901760, %v27554_v23 }
0x1018   :  { %v10641_v43 = vmul.f32 %v10639_v57, %v10635_v26  ;;  %v27528_v41 = vadd.f32 %v26342_v27, %v10646_v14  ;;  %v11362_v53 = vsub.f32 %v27554_v23, %v27573_v48  ;;  %v112_v57 = vld [vmem:[#allocation5 + $0x10] sm:$0xff]  ;;  %v11217_v26 = vsel %vm139_vm0, %v10651_v54, 0 }
0x1019   :  { %v11370_v14 = vand.u32 4294901760, %v11369_v58  ;;  %v27642_v27 = vand.u32 4294901760, %v11217_v26 }
0x101a   :  { %v10647_v6 = vadd.f32 %v10645_v59, %v10641_v43  ;;  %v10661_v4 = vsel %vm139_vm0, %v27528_v41, 0  ;;  %v27623_v59 = vld [vmem:[%s29253_s1 + $0x18] sm:$0xff]  ;;  %v11363_v37 = vand.u32 4294901760, %v11362_v53 }
0x101b   :  { %v27532_v13 = vand.u32 4294901760, %v10661_v4 }
0x101c   :  { %v27534_v61 = vadd.f32 %v26343_v39, %v10647_v6 }
0x101d   :  { %25043 = vmatprep.mubr.f32.mxu1 %v27532_v13  ;;  %v10736_v56 = vsub.f32 %v10661_v4, %v27532_v13 }
0x101e   :  { %v10664_v62 = vsel %vm139_vm0, %v27534_v61, 0 }
0x101f   :  { %v27540_v8 = vand.u32 4294901760, %v10664_v62  ;;  %v10737_v63 = vand.u32 4294901760, %v10736_v56 }
0x1021   :  { %v27545_v0 = vsub.f32 %v10664_v62, %v27540_v8  ;;  %25044 = vmatmul.mubr.f32.vlgmr.msra.gmra.mxu1 %v27540_v8  ;;  %v10738_v1 = vsub.f32 %v10736_v56, %v10737_v63 }
0x1022   :  { %25058 = vmatpush3.msra.mxu1 %v27451_v17  ;;  %25065 = vmatprep.mubr.f32.mxu1 %v10737_v63 }
0x1023   :  { %25059 = vmatprep.subr.mxu1 %v27458_v35  ;;  %v10739_v42 = vand.u32 4294901760, %v10738_v1  ;;  %v10747_v3 = vand.u32 4294901760, %v27545_v0 }
0x1024   :  { %25060 = vmatpush3.msra.mxu1 %v27458_v35 }
0x1025   :  { %25061 = vmatprep.subr.mxu1 %v27463_v28  ;;  %25032 = vmatprep.mubr.f32.mxu0 %v10739_v42  ;;  %v10748_v12 = vsub.f32 %v27545_v0, %v10747_v3 }
0x1026   :  { %25062 = vmatpush3.msra.mxu1 %v27463_v28 }
0x1027   :  { %25063 = vmatprep.subr.mxu1 %v27471_v49  ;;  %v10749_v44 = vand.u32 4294901760, %v10748_v12 }
0x1028   :  { %25064 = vmatpush3.msra.mxu1 %v27471_v49 }
0x1029   :  { %25066 = vmatmul.mubr.f32.vlgmr.msra.gmra.mxu1 %v10747_v3  ;;  %25079 = vmatprep.subr.mxu1 %v27451_v17 }
0x102a   :  { %25033 = vmatmul.mubr.f32.vlgmr.msra.gmra.mxu0 %v10749_v44  ;;  %25080 = vmatpush3.msra.mxu1 %v27451_v17  ;;  %v27600_v17 = vand.u32 4294901760, %v27569_v46 }
0x102b   :  { %25047 = vmatpush3.msra.mxu0 %v27475_v22  ;;  %25087 = vmatprep.mubr.f32.mxu1 %v27532_v13  ;;  %v27608_v22 = vld [vmem:[%s29253_s1 + $0x10] sm:$0xff] }
0x102c   :  { %25048 = vmatprep.subr.mxu0 %v27487_v47  ;;  %25054 = vmatprep.mubr.f32.mxu0 %v10736_v56  ;;  %v11376_v16 = vsub.f32 %v27569_v46, %v27600_v17 }
0x102d   :  { %25081 = vmatprep.subr.mxu1 %v27458_v35  ;;  %25049 = vmatpush3.msra.mxu0 %v27487_v47  ;;  %v11214_v47 = vsel %vm139_vm0, %v10650_v52, 0 }
0x102e   :  { %25082 = vmatpush3.msra.mxu1 %v27458_v35  ;;  %25050 = vmatprep.subr.mxu0 %v27491_v25  ;;  %v113_v35 = vld [vmem:[#allocation5 + $0x18] sm:$0xff]  ;;  %v27637_v20 = vand.u32 4294901760, %v11214_v47 }
0x102f   :  { %25083 = vmatprep.subr.mxu1 %v27463_v28  ;;  %25051 = vmatpush3.msra.mxu0 %v27491_v25  ;;  %v10652_v25 = vadd.f32 %v112_v57, %v27608_v22  ;;  %v10653_v43 = vadd.f32 %v113_v35, %v27623_v59 }
0x1030   :  { %25084 = vmatpush3.msra.mxu1 %v27463_v28  ;;  %25052 = vmatprep.subr.mxu0 %v27498_v21  ;;  %v11383_v28 = vsub.f32 %v27588_v24, %v27615_v18  ;;  %v27650_v39 = vsub.f32 %v11214_v47, %v27637_v20  ;;  %v11858_v47 = vsel %vm139_vm0, %v27584_v50, 0 }
0x1031   :  { %25085 = vmatprep.subr.mxu1 %v27471_v49  ;;  %25053 = vmatpush3.msra.mxu0 %v27498_v21  ;;  %v11220_v21 = vsel %vm139_vm0, %v10652_v25, 0  ;;  %v11223_v4 = vsel %vm139_vm0, %v10653_v43, 0 }
0x1032   :  { %25086 = vmatpush3.msra.mxu1 %v27471_v49  ;;  %25055 = vmatmul.mubr.f32.vlgmr.msra.gmra.mxu0 %v27545_v0  ;;  %v11377_v49 = vand.u32 4294901760, %v11376_v16  ;;  %v11384_v6 = vand.u32 4294901760, %v11383_v28  ;;  %v27656_v56 = vand.u32 4294901760, %v11220_v21  ;;  %v11296_v7 = vand.u32 4294901760, %v27650_v39 }
0x1033   :  { %25068 = vmatprep.subr.mxu0 %v27494_v5  ;;  %25088 = vmatmul.mubr.f32.vlgmr.msra.gmra.mxu1 %v27540_v8  ;;  %v27777_v28 = vand.u32 4294901760, %v11858_v47 }
0x1034   :  { %25104 = vmatprep.subr.mxu1 %v11363_v37  ;;  %25069 = vmatpush3.msra.mxu0 %v27494_v5  ;;  %v27654_v5 = vsub.f32 %v11217_v26, %v27642_v27  ;;  %v11315_v62 = vsub.f32 %v11220_v21, %v27656_v56 }
0x1035   :  { %25076 = vmatprep.mubr.f32.mxu0 %v27532_v13  ;;  %25105 = vmatpush3.msra.mxu1 %v11363_v37  ;;  %v27660_v13 = vand.u32 4294901760, %v11223_v4  ;;  %v11946_v50 = vsub.f32 %v11858_v47, %v27777_v28 }
0x1036   :  { %25070 = vmatprep.subr.mxu0 %v27503_v32  ;;  %25106 = vmatprep.subr.mxu1 %v11370_v14  ;;  %v11316_v63 = vand.u32 4294901760, %v11315_v62 }
0x1037   :  { %25071 = vmatpush3.msra.mxu0 %v27503_v32  ;;  %25107 = vmatpush3.msra.mxu1 %v11370_v14  ;;  %v11306_v32 = vand.u32 4294901760, %v27654_v5  ;;  %v11947_v21 = vand.u32 4294901760, %v11946_v50 }
0x1038   :  { %25072 = vmatprep.subr.mxu0 %v27509_v60  ;;  %25108 = vmatprep.subr.mxu1 %v11377_v49  ;;  %v11317_v42 = vsub.f32 %v11315_v62, %v11316_v63 }
0x1039   :  { %25073 = vmatpush3.msra.mxu0 %v27509_v60  ;;  %25109 = vmatpush3.msra.mxu1 %v11377_v49  ;;  %v11325_v60 = vsub.f32 %v11223_v4, %v27660_v13  ;;  %v11864_v49 = vsel %vm139_vm0, %v27623_v59, 0 }
0x103a   :  { %25074 = vmatprep.subr.mxu0 %v27515_v45  ;;  %25110 = vmatprep.subr.mxu1 %v11384_v6  ;;  %v11318_v19 = vand.u32 4294901760, %v11317_v42 }
0x103b   :  { %25075 = vmatpush3.msra.mxu0 %v27515_v45  ;;  %25111 = vmatpush3.msra.mxu1 %v11384_v6  ;;  %v11297_v45 = vsub.f32 %v27650_v39, %v11296_v7  ;;  %v11326_v33 = vand.u32 4294901760, %v11325_v60  ;;  %v27787_v6 = vand.u32 4294901760, %v11864_v49 }
0x103c   :  { %25077 = vmatmul.mubr.f32.vlgmr.msra.gmra.mxu0 %v27540_v8  ;;  %25090 = vmatprep.subr.mxu0 %v27542_v36  ;;  %v11307_v8 = vsub.f32 %v27654_v5, %v11306_v32 }
0x103d   :  { %25112 = vmatprep.mubr.f32.mxu1 %v27637_v20  ;;  %25132 = vmatprep.subr.mxu1 %v27542_v36  ;;  %v11298_v0 = vand.u32 4294901760, %v11297_v45  ;;  %v11327_v3 = vsub.f32 %v11325_v60, %v11326_v33 }
0x103e   :  { %25091 = vmatpush3.msra.mxu0 %v27542_v36  ;;  %25113 = vmatmul.mubr.f32.vlgmr.msra.gmra.mxu1 %v27642_v27  ;;  %v11308_v1 = vand.u32 4294901760, %v11307_v8 }
0x103f   :  { %25133 = vmatpush3.msra.mxu1 %v27542_v36  ;;  %25092 = vmatprep.subr.mxu0 %v27549_v2  ;;  %v11328_v12 = vand.u32 4294901760, %v11327_v3 }
0x1040   :  { %25134 = vmatprep.subr.mxu1 %v27549_v2  ;;  %25093 = vmatpush3.msra.mxu0 %v27549_v2 }
0x1041   :  { %25135 = vmatpush3.msra.mxu1 %v27549_v2  ;;  %25094 = vmatprep.subr.mxu0 %v27557_v11 }
0x1042   :  { %25115 = vmatprep.mubr.f32.mxu1 %v27656_v56  ;;  %25136 = vmatprep.subr.mxu1 %v27557_v11 }
0x1043   :  { %25095 = vmatpush3.msra.mxu0 %v27557_v11  ;;  %25116 = vmatmul.mubr.f32.gmra.mxu1 %v27660_v13 }
0x1044   :  { %25137 = vmatpush3.msra.mxu1 %v27557_v11  ;;  %25096 = vmatprep.subr.mxu0 %v27565_v38 }
0x1045   :  { %25138 = vmatprep.subr.mxu1 %v27565_v38  ;;  %25097 = vmatpush3.msra.mxu0 %v27565_v38 }
0x1046   :  { %25098 = vmatprep.mubr.f32.mxu0 %v11298_v0  ;;  %25139 = vmatpush3.msra.mxu1 %v27565_v38 }
0x1047   :  { %25099 = vmatmul.mubr.f32.vlgmr.msra.gmra.mxu0 %v11308_v1  ;;  %25118 = vmatprep.subr.mxu0 %v27554_v23 }
0x1048   :  { %25140 = vmatprep.mubr.f32.mxu1 %v11296_v7  ;;  %25160 = vmatprep.subr.mxu1 %v27542_v36 }
0x1049   :  { %25119 = vmatpush3.msra.mxu0 %v27554_v23  ;;  %25141 = vmatmul.mubr.f32.vlgmr.msra.gmra.mxu1 %v11306_v32 }
0x104a   :  { %25161 = vmatpush3.msra.mxu1 %v27542_v36  ;;  %25120 = vmatprep.subr.mxu0 %v27563_v34  ;;  %v11846_v36 = vpop.permute.xlu0 %11845 }
0x104b   :  { %25162 = vmatprep.subr.mxu1 %v27549_v2  ;;  %25101 = vmatprep.mubr.f32.mxu0 %v11318_v19  ;;  %v27725_v23 = vand.u32 4294901760, %v11846_v36 }
0x104c   :  { %25121 = vmatpush3.msra.mxu0 %v27563_v34  ;;  %25163 = vmatpush3.msra.mxu1 %v27549_v2  ;;  %v11844_v2 = vpop.permute.xlu1 %11843 }
0x104d   :  { %25102 = vmatmul.mubr.f32.gmra.mxu0 %v11328_v12  ;;  %25122 = vmatprep.subr.mxu0 %v27569_v46  ;;  %v27733_v34 = vsub.f32 %v11846_v36, %v27725_v23 }
0x104e   :  { %25164 = vmatprep.subr.mxu1 %v27557_v11  ;;  %25123 = vmatpush3.msra.mxu0 %v27569_v46 }
0x104f   :  { %25165 = vmatpush3.msra.mxu1 %v27557_v11  ;;  %25124 = vmatprep.subr.mxu0 %v27588_v24  ;;  %v27727_v11 = vand.u32 4294901760, %v11844_v2  ;;  %v27742_v15 = vand.u32 4294901760, %v27733_v34 }
0x1050   :  { %25166 = vmatprep.subr.mxu1 %v27565_v38  ;;  %25125 = vmatpush3.msra.mxu0 %v27588_v24  ;;  %v11840_v46 = vpop.permute.xlu1 %11839 }
0x1051   :  { %25126 = vmatprep.mubr.f32.mxu0 %v27650_v39  ;;  %25167 = vmatpush3.msra.mxu1 %v27565_v38  ;;  %v11842_v38 = vpop.permute.xlu0 %11841  ;;  %v12008_v10 = vsub.f32 %v11844_v2, %v27727_v11  ;;  %v12003_v24 = vsub.f32 %v27733_v34, %v27742_v15 }
0x1052   :  { %25127 = vmatmul.mubr.f32.vlgmr.msra.gmra.mxu0 %v27654_v5  ;;  %25146 = vmatprep.subr.mxu0 %v27573_v48  ;;  %v27736_v44 = vand.u32 4294901760, %v11842_v38  ;;  %v11966_v5 = vsub.f32 %v11864_v49, %v27787_v6 }
0x1053   :  { %25147 = vmatpush3.msra.mxu0 %v27573_v48  ;;  %25129 = vmatprep.mubr.f32.mxu0 %v11315_v62  ;;  %v27738_v48 = vand.u32 4294901760, %v11840_v46  ;;  %v12004_v53 = vand.u32 4294901760, %v12003_v24 }
0x1054   :  { %25148 = vmatprep.subr.mxu0 %v27591_v51  ;;  %25143 = vmatprep.mubr.f32.mxu1 %v11316_v63  ;;  %v11967_v7 = vand.u32 4294901760, %v11966_v5 }
0x1055   :  { %25149 = vmatpush3.msra.mxu0 %v27591_v51  ;;  %25144 = vmatmul.mubr.f32.gmra.mxu1 %v11326_v33  ;;  %v27752_v51 = vsub.f32 %v11842_v38, %v27736_v44  ;;  %v27755_v52 = vsub.f32 %v11840_v46, %v27738_v48 }
0x1056   :  { %25130 = vmatmul.mubr.f32.gmra.mxu0 %v11325_v60  ;;  %25150 = vmatprep.subr.mxu0 %v27600_v17  ;;  %v11968_v62 = vsub.f32 %v11966_v5, %v11967_v7 }
0x1057   :  { %25151 = vmatpush3.msra.mxu0 %v27600_v17  ;;  %25154 = vmatprep.mubr.f32.mxu0 %v27637_v20  ;;  %v27757_v17 = vand.u32 4294901760, %v12008_v10  ;;  %v27761_v57 = vand.u32 4294901760, %v27752_v51  ;;  %v27764_v58 = vand.u32 4294901760, %v27755_v52 }
0x1058   :  { %25152 = vmatprep.subr.mxu0 %v27615_v18  ;;  %25168 = vmatprep.mubr.f32.mxu1 %v27637_v20  ;;  %v11861_v20 = vsel %vm139_vm0, %v27608_v22, 0  ;;  %v11948_v22 = vsub.f32 %v11946_v50, %v11947_v21  ;;  %v11969_v45 = vand.u32 4294901760, %v11968_v62 }
0x1059   :  { %25153 = vmatpush3.msra.mxu0 %v27615_v18  ;;  %25169 = vmatmul.mubr.f32.vlgmr.msra.gmra.mxu1 %v27642_v27  ;;  %v12010_v54 = vsub.f32 %v12008_v10, %v27757_v17  ;;  %v11855_v18 = vsel %vm139_vm0, %v27578_v29, 0  ;;  %v12017_v16 = vsub.f32 %v27752_v51, %v27761_v57  ;;  %v12024_v26 = vsub.f32 %v27755_v52, %v27764_v58 }
0x105a   :  { %25155 = vmatmul.mubr.f32.vlgmr.msra.gmra.mxu0 %v27642_v27  ;;  %25171 = vmatprep.mubr.f32.mxu1 %v27656_v56  ;;  %v27770_v35 = vand.u32 4294901760, %v11855_v18  ;;  %v27783_v27 = vand.u32 4294901760, %v11861_v20 }
0x105b   :  { %25157 = vmatprep.mubr.f32.mxu0 %v27656_v56  ;;  %25174 = vmatprep.subr.mxu0 %v27725_v23  ;;  %v12011_v37 = vand.u32 4294901760, %v12010_v54  ;;  %v12018_v25 = vand.u32 4294901760, %v12017_v16  ;;  %v12025_v14 = vand.u32 4294901760, %v12024_v26 }
0x105c   :  { %25175 = vmatpush3.msra.mxu0 %v27725_v23  ;;  %25188 = vmatprep.subr.mxu1 %v12004_v53  ;;  %v11936_v29 = vsub.f32 %v11855_v18, %v27770_v35  ;;  %v11956_v39 = vsub.f32 %v11861_v20, %v27783_v27 }
0x105d   :  { %25172 = vmatmul.mubr.f32.gmra.mxu1 %v27660_v13  ;;  %25176 = vmatprep.subr.mxu0 %v27727_v11 }
0x105e   :  { %25158 = vmatmul.mubr.f32.gmra.mxu0 %v27660_v13  ;;  %25189 = vmatpush3.msra.mxu1 %v12004_v53  ;;  %v11937_v43 = vand.u32 4294901760, %v11936_v29  ;;  %v11957_v59 = vand.u32 4294901760, %v11956_v39  ;;  %v11949_v13 = vand.u32 4294901760, %v11948_v22  ;;  %v11211_v53 = vpop.permute.xlu0 %11210 }
0x105f   :  { %25177 = vmatpush3.msra.mxu0 %v27727_v11  ;;  %25196 = vmatprep.mubr.f32.mxu1 %v27770_v35 }
0x1060   :  { %25178 = vmatprep.subr.mxu0 %v27736_v44  ;;  %25190 = vmatprep.subr.mxu1 %v12011_v37  ;;  %v11938_v4 = vsub.f32 %v11936_v29, %v11937_v43  ;;  %v11958_v32 = vsub.f32 %v11956_v39, %v11957_v59 }
0x1061   :  { %25179 = vmatpush3.msra.mxu0 %v27736_v44  ;;  %25191 = vmatpush3.msra.mxu1 %v12011_v37 }
0x1062   :  { %25180 = vmatprep.subr.mxu0 %v27738_v48  ;;  %25192 = vmatprep.subr.mxu1 %v12018_v25  ;;  %v11939_v56 = vand.u32 4294901760, %v11938_v4  ;;  %v11959_v60 = vand.u32 4294901760, %v11958_v32 }
0x1063   :  { %25181 = vmatpush3.msra.mxu0 %v27738_v48  ;;  %25193 = vmatpush3.msra.mxu1 %v12018_v25 }
0x1064   :  { %25202 = vmatprep.subr.mxu0 %v27733_v34  ;;  %25194 = vmatprep.subr.mxu1 %v12025_v14 }
0x1065   :  { %25195 = vmatpush3.msra.mxu1 %v12025_v14  ;;  %25182 = vmatprep.mubr.f32.mxu0 %v11939_v56 }
0x1066   :  { %25216 = vmatprep.subr.mxu1 %v27725_v23  ;;  %25197 = vmatmul.mubr.f32.vlgmr.msra.gmra.mxu1 %v27777_v28 }
0x1067   :  { %25217 = vmatpush3.msra.mxu1 %v27725_v23  ;;  %25199 = vmatprep.mubr.f32.mxu1 %v27783_v27 }
0x1068   :  { %25218 = vmatprep.subr.mxu1 %v27727_v11  ;;  %25183 = vmatmul.mubr.f32.vlgmr.msra.gmra.mxu0 %v11949_v13 }
0x1069   :  { %25219 = vmatpush3.msra.mxu1 %v27727_v11  ;;  %25203 = vmatpush3.msra.mxu0 %v27733_v34 }
0x106a   :  { %25220 = vmatprep.subr.mxu1 %v27736_v44  ;;  %25200 = vmatmul.mubr.f32.gmra.mxu1 %v27787_v6 }
0x106b   :  { %25204 = vmatprep.subr.mxu0 %v12008_v10  ;;  %25221 = vmatpush3.msra.mxu1 %v27736_v44 }
0x106c   :  { %25205 = vmatpush3.msra.mxu0 %v12008_v10  ;;  %25185 = vmatprep.mubr.f32.mxu0 %v11959_v60 }
0x106d   :  { %25206 = vmatprep.subr.mxu0 %v27752_v51  ;;  %25222 = vmatprep.subr.mxu1 %v27738_v48 }
0x106e   :  { %25186 = vmatmul.mubr.f32.gmra.mxu0 %v11969_v45  ;;  %25223 = vmatpush3.msra.mxu1 %v27738_v48 }
0x106f   :  { %25207 = vmatpush3.msra.mxu0 %v27752_v51  ;;  %25224 = vmatprep.mubr.f32.mxu1 %v11937_v43 }
0x1070   :  { %25208 = vmatprep.subr.mxu0 %v27755_v52  ;;  %25244 = vmatprep.subr.mxu1 %v27725_v23 }
0x1071   :  { %25209 = vmatpush3.msra.mxu0 %v27755_v52  ;;  %25225 = vmatmul.mubr.f32.vlgmr.msra.gmra.mxu1 %v11947_v21 }
0x1072   :  { %25245 = vmatpush3.msra.mxu1 %v27725_v23  ;;  %25210 = vmatprep.mubr.f32.mxu0 %v11936_v29 }
0x1073   :  { %25230 = vmatprep.subr.mxu0 %v27742_v15  ;;  %25246 = vmatprep.subr.mxu1 %v27727_v11 }
0x1074   :  { %25211 = vmatmul.mubr.f32.vlgmr.msra.gmra.mxu0 %v11946_v50  ;;  %25247 = vmatpush3.msra.mxu1 %v27727_v11 }
0x1075   :  { %25231 = vmatpush3.msra.mxu0 %v27742_v15  ;;  %25248 = vmatprep.subr.mxu1 %v27736_v44 }
0x1076   :  { %25232 = vmatprep.subr.mxu0 %v27757_v17  ;;  %25249 = vmatpush3.msra.mxu1 %v27736_v44 }
0x1077   :  { %25233 = vmatpush3.msra.mxu0 %v27757_v17  ;;  %25250 = vmatprep.subr.mxu1 %v27738_v48 }
0x1078   :  { %25234 = vmatprep.subr.mxu0 %v27761_v57  ;;  %25251 = vmatpush3.msra.mxu1 %v27738_v48 }
0x1079   :  { %25235 = vmatpush3.msra.mxu0 %v27761_v57  ;;  %25213 = vmatprep.mubr.f32.mxu0 %v11956_v39 }
0x107a   :  { %25236 = vmatprep.subr.mxu0 %v27764_v58  ;;  %25214 = vmatmul.mubr.f32.gmra.mxu0 %v11966_v5 }
0x107b   :  { %25237 = vmatpush3.msra.mxu0 %v27764_v58  ;;  %25238 = vmatprep.mubr.f32.mxu0 %v27770_v35 }
0x107c   :  { %25258 = vmatprep.subr.mxu0 %v26489_v30  ;;  %25227 = vmatprep.mubr.f32.mxu1 %v11957_v59 }
0x107d   :  { %25228 = vmatmul.mubr.f32.gmra.mxu1 %v11967_v7  ;;  %25265 = vmatprep.subr.mxu1 %v26489_v30 }
0x107e   :  { %25239 = vmatmul.mubr.f32.vlgmr.msra.gmra.mxu0 %v27777_v28  ;;  %25252 = vmatprep.mubr.f32.mxu1 %v27770_v35 }
0x107f   :  { %25241 = vmatprep.mubr.f32.mxu0 %v27783_v27 }
0x1081   :  { %25253 = vmatmul.mubr.f32.vlgmr.msra.gmra.mxu1 %v27777_v28 }
0x1082   :  { %25242 = vmatmul.mubr.f32.gmra.mxu0 %v27787_v6  ;;  %25255 = vmatprep.mubr.f32.mxu1 %v27783_v27 }
0x1083   :  { %25262 = vmatprep.mubr.msk.f32.mxu0 %vm26490_vm1, %v26489_v30 }
0x1085   :  { %25256 = vmatmul.mubr.f32.gmra.mxu1 %v27787_v6 }
0x1086   :  { %25269 = vmatprep.mubr.msk.f32.mxu1 %vm26490_vm1, %v26489_v30 }
0x10e1   :  { %v25045_v8 = vpop.f32.mrf.mxu1 }
0x10e3   :  { %v10842_v63 = vpop.f32.mrf.mxu1 }
0x10e9   :  { %v27837_v33 = vpop.f32.mrf.mxu1 }
0x10ea   :  { %v25034_v0 = vpop.f32.mrf.mxu0 }
0x10eb   :  { %v11012_v1 = vpop.f32.mrf.mxu1  ;;  %v10752_v49 = vadd.f32 %v25034_v0, %v27520_v31 }
0x10ec   :  { %v10741_v3 = vpop.f32.mrf.mxu0 }
0x10ed   :  { %v10742_v23 = vadd.f32 %v27520_v31, %v10741_v3  ;;  %v10849_v13 = vadd.f32 %v25045_v8, %v10752_v49 }
0x10ef   :  { %v10843_v38 = vadd.f32 %v10842_v63, %v10742_v23 }
0x10f2   :  { %v25056_v19 = vpop.f32.mrf.mxu0 }
0x10f3   :  { %v27839_v42 = vpop.f32.mrf.mxu1  ;;  %v10936_v63 = vadd.f32 %v25056_v19, %v10849_v13 }
0x10f4   :  { %v10928_v2 = vpop.f32.mrf.mxu0 }
0x10f5   :  { %v11184_v12 = vpop.f32.mrf.mxu1  ;;  %v10929_v48 = vadd.f32 %v10928_v2, %v10843_v38  ;;  %v11021_v23 = vadd.f32 %v27837_v33, %v10936_v63 }
0x10f7   :  { %v11013_v51 = vadd.f32 %v11012_v1, %v10929_v48 }
0x10fc   :  { %v27842_v11 = vpop.f32.mrf.mxu0 }
0x10fe   :  { %v25114_v36 = vpop.f32.mrf.mxu1  ;;  %v11103_v44 = vpop.f32.mrf.mxu0 }
0x10ff   :  { %v11104_v52 = vadd.f32 %v11103_v44, %v11013_v51 }
0x1100   :  { %v11421_v34 = vpop.f32.mrf.mxu1 }
0x1101   :  { %v27844_v18 = vadd.f32 %v11184_v12, %v11104_v52 }
0x1103   :  { %v25117_v46 = vpop.f32.mrf.mxu1  ;;  %v12481_v26 = vsel %vm1230_vm2, %v27844_v18, 0 }
0x1104   :  { %v27848_v20 = vand.u32 4294901760, %v12481_v26 }
0x1105   :  { %v11433_v24 = vpop.f32.mrf.mxu1 }
0x1106   :  { %v27852_v5 = vsub.f32 %v12481_v26, %v27848_v20 }
0x1107   :  { %v25100_v15 = vpop.f32.mrf.mxu0 }
0x1108   :  { %v11311_v58 = vadd.f32 %v25100_v15, %v11211_v53  ;;  %v12558_v31 = vand.u32 4294901760, %v27852_v5  ;;  %v11110_v15 = vadd.f32 %v27842_v11, %v11021_v23 }
0x1109   :  { %v11300_v10 = vpop.f32.mrf.mxu0  ;;  %v25142_v54 = vpop.f32.mrf.mxu1 }
0x110a   :  { %v11301_v47 = vadd.f32 %v11300_v10, %v11211_v53  ;;  %v11428_v16 = vadd.f32 %v25114_v36, %v11311_v58  ;;  %v12559_v44 = vsub.f32 %v27852_v5, %v12558_v31  ;;  %v27879_v58 = vadd.f32 %v27839_v42, %v11110_v15 }
0x110b   :  { %v11617_v35 = vpop.f32.mrf.mxu1 }
0x110c   :  { %v11422_v14 = vadd.f32 %v11421_v34, %v11301_v47  ;;  %v12949_v26 = vsel %vm1230_vm2, %v27879_v58, 0 }
0x110d   :  { %v25103_v17 = vpop.f32.mrf.mxu0 }
0x110e   :  { %v11331_v6 = vadd.f32 %v25103_v17, %v11211_v53 }
0x110f   :  { %v11320_v57 = vpop.f32.mrf.mxu0 }
0x1110   :  { %v11440_v32 = vadd.f32 %v25117_v46, %v11331_v6  ;;  %v11321_v62 = vadd.f32 %v11320_v57, %v11211_v53  ;;  %v12560_v57 = vand.u32 4294901760, %v12559_v44 }
0x1112   :  { %v25128_v37 = vpop.f32.mrf.mxu0  ;;  %v11434_v2 = vadd.f32 %v11433_v24, %v11321_v62 }
0x1113   :  { %v11527_v28 = vadd.f32 %v25128_v37, %v11428_v16 }
0x1114   :  { %v11519_v25 = vpop.f32.mrf.mxu0 }
0x1115   :  { %v25145_v29 = vpop.f32.mrf.mxu1  ;;  %v11520_v43 = vadd.f32 %v11519_v25, %v11422_v14  ;;  %v11626_v4 = vadd.f32 %v25142_v54, %v11527_v28  ;;  %v27893_v28 = vand.u32 4294901760, %v12949_v26 }
0x1116   :  { %v25131_v50 = vpop.f32.mrf.mxu0 }
0x1117   :  { %v11633_v27 = vpop.f32.mrf.mxu1  ;;  %v11618_v56 = vadd.f32 %v11617_v35, %v11520_v43  ;;  %v11541_v0 = vadd.f32 %v25131_v50, %v11440_v32  ;;  %v13025_v43 = vsub.f32 %v12949_v26, %v27893_v28 }
0x1118   :  { %v11533_v21 = vpop.f32.mrf.mxu0 }
0x1119   :  { %v25170_v22 = vpop.f32.mrf.mxu1  ;;  %v11642_v46 = vadd.f32 %v25145_v29, %v11541_v0  ;;  %v11534_v48 = vadd.f32 %v11533_v21, %v11434_v2  ;;  %v13026_v21 = vand.u32 4294901760, %v13025_v43 }
0x111a   :  { %v25156_v39 = vpop.f32.mrf.mxu0 }
0x111b   :  { %v11731_v59 = vadd.f32 %v25156_v39, %v11626_v4  ;;  %v11817_v1 = vpop.f32.mrf.mxu1  ;;  %v11634_v54 = vadd.f32 %v11633_v27, %v11534_v48  ;;  %v13027_v39 = vsub.f32 %v13025_v43, %v13026_v21 }
0x111c   :  { %v11724_v7 = vpop.f32.mrf.mxu0 }
0x111d   :  { %v27854_v60 = vadd.f32 %v25170_v22, %v11731_v59  ;;  %v11725_v45 = vadd.f32 %v11724_v7, %v11618_v56  ;;  %v25173_v52 = vpop.f32.mrf.mxu1  ;;  %v13028_v56 = vand.u32 4294901760, %v13027_v39 }
0x111e   :  { %v25159_v34 = vpop.f32.mrf.mxu0 }
0x111f   :  { %v27857_v3 = vadd.f32 %v11817_v1, %v11725_v45  ;;  %v12487_v12 = vsel %vm1230_vm2, %v27854_v60, 0  ;;  %v11743_v24 = vadd.f32 %v25159_v34, %v11642_v46  ;;  %v11829_v16 = vpop.f32.mrf.mxu1 }
0x1120   :  { %v27861_v36 = vand.u32 4294901760, %v12487_v12  ;;  %v11736_v51 = vpop.f32.mrf.mxu0 }
0x1121   :  { %v12484_v8 = vsel %vm1230_vm2, %v27857_v3, 0  ;;  %v11737_v11 = vadd.f32 %v11736_v51, %v11634_v54  ;;  %v27881_v37 = vadd.f32 %v25173_v52, %v11743_v24 }
0x1122   :  { %25259 = vmatpush3.xpose.msra.mxu0 %v27861_v36  ;;  %v12596_v19 = vsub.f32 %v12487_v12, %v27861_v36  ;;  %v27868_v38 = vand.u32 4294901760, %v12484_v8 }
0x1123   :  { %25260 = vmatprep.subr.mxu0 %v26489_v30  ;;  %v27889_v42 = vadd.f32 %v11829_v16, %v11737_v11  ;;  %v12955_v14 = vsel %vm1230_vm2, %v27881_v37, 0 }
0x1124   :  { %v12603_v10 = vsub.f32 %v12484_v8, %v27868_v38  ;;  %v12597_v33 = vand.u32 4294901760, %v12596_v19  ;;  %v27897_v29 = vand.u32 4294901760, %v12955_v14 }
0x1125   :  { %v12952_v50 = vsel %vm1230_vm2, %v27889_v42, 0 }
0x1126   :  { %25261 = vmatpush3.xpose.msra.mxu0 %v27868_v38  ;;  %v12598_v53 = vsub.f32 %v12596_v19, %v12597_v33  ;;  %v12604_v17 = vand.u32 4294901760, %v12603_v10  ;;  %v13064_v27 = vsub.f32 %v12955_v14, %v27897_v29  ;;  %v12989_v49 = vand.u32 4294901760, %v12952_v50  ;;  %v27965_v45 = vpop.f32.mrf.mxu1 }
0x1127   :  { %25272 = vmatprep.subr.mxu0 %v26489_v30 }
0x1128   :  { %v12599_v47 = vand.u32 4294901760, %v12598_v53  ;;  %v12605_v35 = vsub.f32 %v12603_v10, %v12604_v17  ;;  %v13071_v6 = vsub.f32 %v12952_v50, %v12989_v49  ;;  %v13065_v4 = vand.u32 4294901760, %v13064_v27  ;;  %v27969_v1 = vpop.f32.mrf.mxu1 }
0x1129   :  { %25263 = vmatmul.mubr.f32.vlgmr.msra.gmra.mxu0 %v12560_v57 }
0x112a   :  { %25266 = vmatpush3.xpose.msra.mxu1 %v12599_v47  ;;  %25273 = vmatpush3.xpose.msra.mxu0 %v12596_v19  ;;  %v12606_v25 = vand.u32 4294901760, %v12605_v35  ;;  %v13066_v22 = vsub.f32 %v13064_v27, %v13065_v4  ;;  %v27973_v0 = vpop.f32.mrf.mxu1 }
0x112b   :  { %25267 = vmatprep.subr.mxu1 %v26489_v30  ;;  %25274 = vmatprep.subr.mxu0 %v26489_v30 }
0x112c   :  { %25276 = vmatprep.mubr.msk.f32.mxu0 %vm26490_vm1, %v26489_v30  ;;  %v13067_v59 = vand.u32 4294901760, %v13066_v22 }
0x112e   :  { %25268 = vmatpush3.xpose.msra.mxu1 %v12606_v25  ;;  %25275 = vmatpush3.xpose.msra.mxu0 %v12603_v10 }
0x112f   :  { %25279 = vmatprep.subr.mxu1 %v26489_v30  ;;  %25286 = vmatprep.subr.mxu0 %v26489_v30 }
0x1131   :  { %25270 = vmatmul.mubr.f32.vlgmr.msra.gmra.mxu1 %v27848_v20  ;;  %25277 = vmatmul.mubr.f32.vlgmr.msra.gmra.mxu0 %v27852_v5  ;;  %v13072_v5 = vand.u32 4294901760, %v13071_v6 }
0x1132   :  { %25280 = vmatpush3.xpose.msra.mxu1 %v27861_v36  ;;  %25287 = vmatpush3.xpose.msra.mxu0 %v12597_v33 }
0x1133   :  { %25281 = vmatprep.subr.mxu1 %v26489_v30  ;;  %25288 = vmatprep.subr.mxu0 %v26489_v30  ;;  %v13073_v13 = vsub.f32 %v13071_v6, %v13072_v5 }
0x1134   :  { %25283 = vmatprep.mubr.msk.f32.mxu1 %vm26490_vm1, %v26489_v30  ;;  %25290 = vmatprep.mubr.msk.f32.mxu0 %vm26490_vm1, %v26489_v30 }
0x1135   :  { %v13074_v7 = vand.u32 4294901760, %v13073_v13 }
0x1136   :  { %25282 = vmatpush3.xpose.msra.mxu1 %v27868_v38  ;;  %25289 = vmatpush3.xpose.msra.mxu0 %v12604_v17 }
0x1137   :  { %25293 = vmatprep.subr.mxu1 %v26489_v30  ;;  %25300 = vmatprep.subr.mxu0 %v26489_v30 }
0x1139   :  { %25284 = vmatmul.mubr.f32.vlgmr.msra.gmra.mxu1 %v12558_v31  ;;  %25291 = vmatmul.mubr.f32.vlgmr.msra.gmra.mxu0 %v27848_v20 }
0x113a   :  { %25294 = vmatpush3.xpose.msra.mxu1 %v27861_v36  ;;  %25301 = vmatpush3.xpose.msra.mxu0 %v27897_v29  ;;  %v27977_v36 = vpop.f32.mrf.mxu1 }
0x113b   :  { %25295 = vmatprep.subr.mxu1 %v26489_v30  ;;  %25302 = vmatprep.subr.mxu0 %v26489_v30 }
0x113c   :  { %25297 = vmatprep.mubr.msk.f32.mxu1 %vm26490_vm1, %v26489_v30  ;;  %25304 = vmatprep.mubr.msk.f32.mxu0 %vm26490_vm1, %v26489_v30  ;;  %v27981_v8 = vpop.f32.mrf.mxu1 }
0x113e   :  { %25296 = vmatpush3.xpose.msra.mxu1 %v27868_v38  ;;  %25303 = vmatpush3.xpose.msra.mxu0 %v12989_v49  ;;  %v27985_v34 = vpop.f32.mrf.mxu1 }
0x113f   :  { %25307 = vmatprep.subr.mxu1 %v26489_v30  ;;  %25314 = vmatprep.subr.mxu0 %v26489_v30 }
0x1140   :  { %v27989_v38 = vpop.f32.mrf.mxu1 }
0x1141   :  { %25298 = vmatmul.mubr.f32.vlgmr.msra.gmra.mxu1 %v27848_v20  ;;  %25305 = vmatmul.mubr.f32.vlgmr.msra.gmra.mxu0 %v13028_v56  ;;  %v27959_v20 = vpop.f32.mrf.mxu0 }
0x1142   :  { %25308 = vmatpush3.xpose.msra.mxu1 %v13067_v59  ;;  %25315 = vmatpush3.xpose.msra.mxu0 %v13064_v27  ;;  %v27993_v46 = vpop.f32.mrf.mxu1 }
0x1143   :  { %25309 = vmatprep.subr.mxu1 %v26489_v30  ;;  %25316 = vmatprep.subr.mxu0 %v26489_v30  ;;  %v27961_v32 = vpop.f32.mrf.mxu0 }
0x1144   :  { %25311 = vmatprep.mubr.msk.f32.mxu1 %vm26490_vm1, %v26489_v30  ;;  %25318 = vmatprep.mubr.msk.f32.mxu0 %vm26490_vm1, %v26489_v30  ;;  %v27997_v15 = vpop.f32.mrf.mxu1 }
0x1145   :  { %v27963_v62 = vpop.f32.mrf.mxu0 }
0x1146   :  { %25310 = vmatpush3.xpose.msra.mxu1 %v13074_v7  ;;  %25317 = vmatpush3.xpose.msra.mxu0 %v13071_v6  ;;  %v28001_v33 = vpop.f32.mrf.mxu1 }
0x1147   :  { %25321 = vmatprep.subr.mxu1 %v26489_v30  ;;  %25328 = vmatprep.subr.mxu0 %v26489_v30  ;;  %v27967_v63 = vpop.f32.mrf.mxu0 }
0x1148   :  { %v28003_v51 = vpop.f32.mrf.mxu1 }
0x1149   :  { %25312 = vmatmul.mubr.f32.vlgmr.msra.gmra.mxu1 %v27893_v28  ;;  %25319 = vmatmul.mubr.f32.vlgmr.msra.gmra.mxu0 %v13025_v43  ;;  %v27971_v31 = vpop.f32.mrf.mxu0 }
0x114a   :  { %25322 = vmatpush3.xpose.msra.mxu1 %v27897_v29  ;;  %25329 = vmatpush3.xpose.msra.mxu0 %v13065_v4  ;;  %v28005_v53 = vpop.f32.mrf.mxu1 }
0x114b   :  { %25323 = vmatprep.subr.mxu1 %v26489_v30  ;;  %25330 = vmatprep.subr.mxu0 %v26489_v30  ;;  %v27975_v12 = vpop.f32.mrf.mxu0 }
0x114c   :  { %25325 = vmatprep.mubr.msk.f32.mxu1 %vm26490_vm1, %v26489_v30  ;;  %25332 = vmatprep.mubr.msk.f32.mxu0 %vm26490_vm1, %v26489_v30 }
0x114d   :  { %v27979_v2 = vpop.f32.mrf.mxu0 }
0x114e   :  { %25324 = vmatpush3.xpose.msra.mxu1 %v12989_v49  ;;  %25331 = vmatpush3.xpose.msra.mxu0 %v13072_v5 }
0x114f   :  { %25335 = vmatprep.subr.mxu1 %v26489_v30  ;;  %25342 = vmatprep.subr.mxu0 %v26489_v30  ;;  %v27983_v23 = vpop.f32.mrf.mxu0 }
0x1151   :  { %25326 = vmatmul.mubr.f32.vlgmr.msra.gmra.mxu1 %v13026_v21  ;;  %25333 = vmatmul.mubr.f32.vlgmr.msra.gmra.mxu0 %v27893_v28  ;;  %v27987_v19 = vpop.f32.mrf.mxu0 }
0x1152   :  { %25336 = vmatpush3.xpose.msra.mxu1 %v27897_v29  ;;  %25339 = vmatprep.mubr.msk.f32.mxu1 %vm26490_vm1, %v26489_v30 }
0x1153   :  { %25337 = vmatprep.subr.mxu1 %v26489_v30  ;;  %25346 = vmatprep.mubr.msk.f32.mxu0 %vm26490_vm1, %v26489_v30  ;;  %v27991_v44 = vpop.f32.mrf.mxu0 }
0x1155   :  { %v27995_v48 = vpop.f32.mrf.mxu0 }
0x1156   :  { %25338 = vmatpush3.xpose.msra.mxu1 %v12989_v49 }
0x1157   :  { %25349 = vmatprep.subr.mxu1 %v26489_v30  ;;  %v27999_v10 = vpop.f32.mrf.mxu0 }
0x1159   :  { %25340 = vmatmul.mubr.f32.vlgmr.msra.gmra.mxu1 %v27893_v28 }
0x115a   :  { %25353 = vmatprep.mubr.msk.f32.mxu1 %vm26490_vm1, %v26489_v30 }
0x11e9   :  { %v12562_v24 = vpop.f32.mrf.mxu0 }
0x11eb   :  { %v25264_v52 = vpop.f32.mrf.mxu0 }
0x11f1   :  { %v12643_v17 = vpop.f32.mrf.mxu1  ;;  %v12719_v54 = vpop.f32.mrf.mxu0 }
0x11f2   :  { %v12644_v35 = vadd.f32 %v12643_v17, %v12562_v24 }
0x11f3   :  { %v25271_v57 = vpop.f32.mrf.mxu1  ;;  %v25278_v47 = vpop.f32.mrf.mxu0 }
0x11f4   :  { %v12720_v26 = vadd.f32 %v12719_v54, %v12644_v35 }
0x11f9   :  { %v12794_v11 = vpop.f32.mrf.mxu1  ;;  %v12871_v16 = vpop.f32.mrf.mxu0 }
0x11fa   :  { %v12795_v28 = vadd.f32 %v12794_v11, %v12720_v26 }
0x11fb   :  { %v25285_v25 = vpop.f32.mrf.mxu1  ;;  %v25292_v14 = vpop.f32.mrf.mxu0 }
0x11fc   :  { %v12872_v29 = vadd.f32 %v12871_v16, %v12795_v28 }
0x1201   :  { %v12944_v50 = vpop.f32.mrf.mxu1  ;;  %v13030_v43 = vpop.f32.mrf.mxu0 }
0x1202   :  { %v12945_v27 = vadd.f32 %v12944_v50, %v12872_v29 }
0x1203   :  { %v25299_v49 = vpop.f32.mrf.mxu1  ;;  %v25306_v21 = vpop.f32.mrf.mxu0 }
0x1204   :  { %v13416_v6 = vmul.f32 0.35355338, %v12945_v27 }
0x1206   :  { %v13419_v4 = vsel %vm13418_vm3, %v13416_v6, -inf }
0x1207   :  { %13420 = vmax.xlane.f32.xlu1 %v13419_v4  ;;  %v26344_v4 = vld [vmem:[#allocation8 + $0x1] ss:$0 sm:$0xff] }
0x1209   :  { %v13111_v39 = vpop.f32.mrf.mxu1  ;;  %v13187_v22 = vpop.f32.mrf.mxu0 }
0x120a   :  { %v13112_v59 = vadd.f32 %v13111_v39, %v13030_v43 }
0x120b   :  { %v25313_v5 = vpop.f32.mrf.mxu1  ;;  %v25320_v56 = vpop.f32.mrf.mxu0 }
0x120c   :  { %v13188_v24 = vadd.f32 %v13187_v22, %v13112_v59 }
0x1211   :  { %v13262_v13 = vpop.f32.mrf.mxu1  ;;  %v13339_v7 = vpop.f32.mrf.mxu0 }
0x1212   :  { %v13263_v54 = vadd.f32 %v13262_v13, %v13188_v24 }
0x1213   :  { %v25327_v52 = vpop.f32.mrf.mxu1  ;;  %v25334_v17 = vpop.f32.mrf.mxu0 }
0x1214   :  { %v13340_v57 = vadd.f32 %v13339_v7, %v13263_v54 }
0x1219   :  { %v13412_v47 = vpop.f32.mrf.mxu1 }
0x121a   :  { %v13413_v35 = vadd.f32 %v13412_v47, %v13340_v57 }
0x121b   :  { %v25341_v11 = vpop.f32.mrf.mxu1 }
0x121c   :  { %v13417_v16 = vmul.f32 0.35355338, %v13413_v35 }
0x121e   :  { %v13422_v26 = vsel %vm13418_vm3, %v13417_v16, -inf }
0x121f   :  { %13423 = vmax.xlane.f32.xlu0 %v13422_v26 }
0x1290   :  { %v13421_v25 = vpop.xlane.xlu1 %13420 }
0x1291   :  { %v13425_v14 = vsub.f32 %v13416_v6, %v13421_v25 }
0x1293   :  { %v13427_v28 = vmul.f32 1.442695, %v13425_v14 }
0x1295   :  { %26291 = vpow2.f32 %v13427_v28 }
0x12a2   :  { %v26292_v29 = vpop.eup %26291 }
0x12a3   :  { %v13431_v50 = vsel %vm13418_vm3, %v26292_v29, 0.0 }
0x12a4   :  { %13432 = vadd.xlane.f32.xlu0 %v13431_v50 }
0x12a8   :  { %v13424_v43 = vpop.xlane.xlu0 %13423 }
0x12a9   :  { %v13426_v27 = vsub.f32 %v13417_v16, %v13424_v43 }
0x12ab   :  { %v13429_v49 = vmul.f32 1.442695, %v13426_v27 }
0x12ad   :  { %26293 = vpow2.f32 %v13429_v49 }
0x12ba   :  { %v28010_v21 = vpop.eup %26293  ;;  %11851 = vrot.lane.b32.xlu0 %v26344_v4, %s26488_s27 }
0x12bb   :  { %v13434_v39 = vsel %vm13418_vm3, %v28010_v21, 0.0 }
0x12bc   :  { %13435 = vadd.xlane.f32.xlu1 %v13434_v39 }
0x12be   :  { %14365 = vrot.lane.b32.xlu0 %v27844_v18, %s26492_s29 }
0x12c2   :  { %14838 = vrot.lane.b32.xlu0 %v27889_v42, %s26492_s29 }
0x12cd   :  { %14369 = vrot.lane.b32.xlu1 %v27854_v60, %s26492_s29 }
0x12d1   :  { %14367 = vrot.lane.b32.xlu1 %v27857_v3, %s26492_s29 }
0x12d5   :  { %14840 = vrot.lane.b32.xlu1 %v27881_v37, %s26492_s29 }
0x12d9   :  { %14836 = vrot.lane.b32.xlu1 %v27879_v58, %s26492_s29 }
0x132d   :  { %v13433_v6 = vpop.xlane.xlu0 %13432 }
0x132e   :  { %26295 = vrcp.f32 %v13433_v6 }
0x1331   :  { %v11852_v22 = vpop.permute.xlu0 %11851 }
0x1332   :  { %v11942_v5 = vadd.f32 %v27961_v32, %v11852_v22  ;;  %v11952_v56 = vadd.f32 %v27959_v20, %v11852_v22  ;;  %v11962_v59 = vadd.f32 %v27967_v63, %v11852_v22  ;;  %v11972_v13 = vadd.f32 %v27963_v62, %v11852_v22 }
0x1334   :  { %v12063_v7 = vadd.f32 %v27969_v1, %v11942_v5  ;;  %v12069_v24 = vadd.f32 %v27965_v45, %v11952_v56  ;;  %v12081_v52 = vadd.f32 %v27973_v0, %v11972_v13  ;;  %v12075_v17 = vadd.f32 %v27977_v36, %v11962_v59 }
0x1336   :  { %v12161_v54 = vadd.f32 %v27975_v12, %v12063_v7  ;;  %v12168_v57 = vadd.f32 %v27971_v31, %v12069_v24  ;;  %v12182_v32 = vadd.f32 %v27979_v2, %v12081_v52  ;;  %v12175_v62 = vadd.f32 %v27983_v23, %v12075_v17 }
0x1338   :  { %v12259_v20 = vadd.f32 %v27985_v34, %v12161_v54  ;;  %v12267_v63 = vadd.f32 %v27981_v8, %v12168_v57  ;;  %v12283_v0 = vadd.f32 %v27989_v38, %v12182_v32  ;;  %v12275_v2 = vadd.f32 %v27993_v46, %v12175_v62 }
0x133a   :  { %v12366_v1 = vadd.f32 %v27991_v44, %v12259_v20  ;;  %v12372_v45 = vadd.f32 %v27987_v19, %v12267_v63  ;;  %v12384_v38 = vadd.f32 %v27995_v48, %v12283_v0 }
0x133b   :  { %v26296_v47 = vpop.eup %26295 }
0x133c   :  { %v13439_v36 = vmul.f32 %v26296_v47, %v26292_v29  ;;  %v28045_v12 = vadd.f32 %v28001_v33, %v12366_v1  ;;  %v28048_v31 = vadd.f32 %v27997_v15, %v12372_v45  ;;  %v12378_v33 = vadd.f32 %v27999_v10, %v12275_v2  ;;  %v14366_v47 = vpop.permute.xlu0 %14365 }
0x133d   :  { %v28067_v16 = vadd.f32 %v28003_v51, %v12384_v38 }
0x133e   :  { %v13442_v8 = vsel %vm13418_vm3, %v13439_v36, 0  ;;  %v13473_v23 = vand.u32 4294901760, %v28048_v31  ;;  %v28054_v34 = vand.u32 4294901760, %v28045_v12  ;;  %v28071_v14 = vadd.f32 %v28005_v53, %v12378_v33 }
0x133f   :  { %v28056_v19 = vand.u32 4294901760, %v13442_v8  ;;  %v28074_v43 = vand.u32 4294901760, %v28067_v16 }
0x1340   :  { %25343 = vmatpush3.msra.mxu0 %v13473_v23  ;;  %v13551_v44 = vsub.f32 %v28048_v31, %v13473_v23  ;;  %v13558_v15 = vsub.f32 %v28045_v12, %v28054_v34  ;;  %v28078_v51 = vand.u32 4294901760, %v28071_v14 }
0x1341   :  { %25344 = vmatprep.subr.mxu0 %v26489_v30  ;;  %v13512_v46 = vsub.f32 %v13442_v8, %v28056_v19  ;;  %v28084_v49 = vsub.f32 %v28067_v16, %v28074_v43 }
0x1342   :  { %25345 = vmatpush3.msra.mxu0 %v28054_v34  ;;  %v13552_v35 = vand.u32 4294901760, %v13551_v44  ;;  %v13559_v11 = vand.u32 4294901760, %v13558_v15  ;;  %v28091_v4 = vsub.f32 %v28071_v14, %v28078_v51 }
0x1343   :  { %25356 = vmatprep.subr.mxu0 %v26489_v30  ;;  %v13513_v48 = vand.u32 4294901760, %v13512_v46  ;;  %v14014_v39 = vand.u32 4294901760, %v28084_v49 }
0x1344   :  { %v13553_v26 = vsub.f32 %v13551_v44, %v13552_v35  ;;  %v13560_v25 = vsub.f32 %v13558_v15, %v13559_v11  ;;  %v14021_v5 = vand.u32 4294901760, %v28091_v4 }
0x1345   :  { %v13436_v10 = vpop.xlane.xlu1 %13435  ;;  %v13514_v28 = vsub.f32 %v13512_v46, %v13513_v48  ;;  %v14015_v13 = vsub.f32 %v28084_v49, %v14014_v39 }
0x1346   :  { %26297 = vrcp.f32 %v13436_v10  ;;  %v13554_v29 = vand.u32 4294901760, %v13553_v26  ;;  %v13561_v27 = vand.u32 4294901760, %v13560_v25  ;;  %v14022_v52 = vsub.f32 %v28091_v4, %v14021_v5 }
0x1347   :  { %v13515_v50 = vand.u32 4294901760, %v13514_v28  ;;  %v14016_v57 = vand.u32 4294901760, %v14015_v13 }
0x1348   :  { %25350 = vmatpush3.msra.mxu1 %v13554_v29  ;;  %v14023_v20 = vand.u32 4294901760, %v14022_v52 }
0x1349   :  { %25347 = vmatmul.mubr.f32.vlgmr.msra.gmra.mxu0 %v13515_v50  ;;  %25351 = vmatprep.subr.mxu1 %v26489_v30  ;;  %v14370_v53 = vpop.permute.xlu1 %14369 }
0x134a   :  { %25357 = vmatpush3.msra.mxu0 %v13551_v44  ;;  %25352 = vmatpush3.msra.mxu1 %v13561_v27  ;;  %v14375_v6 = vsel %vm1230_vm2, %v14370_v53, 0 }
0x134b   :  { %25358 = vmatprep.subr.mxu0 %v26489_v30  ;;  %25354 = vmatmul.mubr.f32.vlgmr.msra.gmra.mxu1 %v28056_v19  ;;  %v28103_v59 = vand.u32 4294901760, %v14375_v6 }
0x134c   :  { %25359 = vmatpush3.msra.mxu0 %v13558_v15  ;;  %25363 = vmatprep.subr.mxu1 %v26489_v30 }
0x134d   :  { %25360 = vmatprep.mubr.msk.f32.mxu0 %vm26490_vm1, %v26489_v30  ;;  %25364 = vmatpush3.msra.mxu1 %v13473_v23  ;;  %v14368_v22 = vpop.permute.xlu1 %14367  ;;  %v28124_v17 = vsub.f32 %v14375_v6, %v28103_v59 }
0x134e   :  { %25370 = vmatprep.subr.mxu0 %v26489_v30  ;;  %25361 = vmatmul.mubr.f32.vlgmr.msra.gmra.mxu0 %v13512_v46  ;;  %v14373_v24 = vsel %vm1230_vm2, %v14368_v22, 0 }
0x134f   :  { %25365 = vmatprep.subr.mxu1 %v26489_v30  ;;  %25371 = vmatpush3.msra.mxu0 %v13552_v35  ;;  %v28126_v54 = vand.u32 4294901760, %v14373_v24  ;;  %v14485_v62 = vand.u32 4294901760, %v28124_v17  ;;  %v14839_v35 = vpop.permute.xlu0 %14838 }
0x1350   :  { %25366 = vmatpush3.msra.mxu1 %v28054_v34  ;;  %25367 = vmatprep.mubr.msk.f32.mxu1 %vm26490_vm1, %v26489_v30  ;;  %v14844_v26 = vsel %vm1230_vm2, %v14839_v35, 0 }
0x1351   :  { %25372 = vmatprep.subr.mxu0 %v26489_v30  ;;  %25368 = vmatmul.mubr.f32.vlgmr.msra.gmra.mxu1 %v13513_v48  ;;  %v28139_v1 = vsub.f32 %v14373_v24, %v28126_v54  ;;  %v14486_v36 = vsub.f32 %v28124_v17, %v14485_v62  ;;  %v14841_v44 = vpop.permute.xlu1 %14840  ;;  %v28192_v10 = vand.u32 4294901760, %v14844_v26 }
0x1352   :  { %25373 = vmatpush3.msra.mxu0 %v13559_v11  ;;  %25377 = vmatprep.subr.mxu1 %v26489_v30  ;;  %v14846_v46 = vsel %vm1230_vm2, %v14841_v44, 0 }
0x1353   :  { %v26298_v56 = vpop.eup %26297  ;;  %25374 = vmatprep.mubr.msk.f32.mxu0 %vm26490_vm1, %v26489_v30  ;;  %25378 = vmatpush3.msra.mxu1 %v13473_v23  ;;  %v14492_v2 = vand.u32 4294901760, %v28139_v1  ;;  %v14371_v23 = vsel %vm1230_vm2, %v14366_v47, 0  ;;  %v28181_v48 = vand.u32 4294901760, %v14846_v46  ;;  %v28206_v50 = vsub.f32 %v14844_v26, %v28192_v10 }
0x1354   :  { %v13440_v7 = vmul.f32 %v26298_v56, %v28010_v21  ;;  %25384 = vmatprep.subr.mxu0 %v26489_v30  ;;  %25375 = vmatmul.mubr.f32.vlgmr.msra.gmra.mxu0 %v28056_v19 }
0x1355   :  { %25379 = vmatprep.subr.mxu1 %v26489_v30  ;;  %25385 = vmatpush3.msra.mxu0 %v28074_v43  ;;  %v14493_v38 = vsub.f32 %v28139_v1, %v14492_v2  ;;  %v28195_v28 = vsub.f32 %v14846_v46, %v28181_v48  ;;  %v14837_v27 = vpop.permute.xlu1 %14836 }
0x1356   :  { %25380 = vmatpush3.msra.mxu1 %v28054_v34  ;;  %25381 = vmatprep.mubr.msk.f32.mxu1 %vm26490_vm1, %v26489_v30  ;;  %v13904_v21 = vsel %vm13418_vm3, %v13440_v7, 0  ;;  %v28158_v34 = vand.u32 4294901760, %v14371_v23 }
0x1357   :  { %25386 = vmatprep.subr.mxu0 %v26489_v30  ;;  %25382 = vmatmul.mubr.f32.vlgmr.msra.gmra.mxu1 %v28056_v19  ;;  %v13973_v32 = vand.u32 4294901760, %v13904_v21  ;;  %v14487_v19 = vand.u32 4294901760, %v14486_v36  ;;  %v14494_v33 = vand.u32 4294901760, %v14493_v38 }
0x1358   :  { %25387 = vmatpush3.msra.mxu0 %v28078_v51  ;;  %25391 = vmatprep.subr.mxu1 %v26489_v30  ;;  %v14445_v15 = vsub.f32 %v14371_v23, %v28158_v34 }
0x1359   :  { %25392 = vmatpush3.msra.mxu1 %v14016_v57  ;;  %25395 = vmatprep.mubr.msk.f32.mxu1 %vm26490_vm1, %v26489_v30  ;;  %v13974_v63 = vsub.f32 %v13904_v21, %v13973_v32 }
0x135a   :  { %25393 = vmatprep.subr.mxu1 %v26489_v30  ;;  %25388 = vmatprep.mubr.msk.f32.mxu0 %vm26490_vm1, %v26489_v30  ;;  %v14446_v11 = vand.u32 4294901760, %v14445_v15 }
0x135b   :  { %25394 = vmatpush3.msra.mxu1 %v14023_v20  ;;  %v13975_v45 = vand.u32 4294901760, %v13974_v63  ;;  %25398 = vmatprep.subr.mxu0 %v26489_v30 }
0x135c   :  { %25405 = vmatprep.subr.mxu1 %v26489_v30  ;;  %25396 = vmatmul.mubr.f32.vlgmr.msra.gmra.mxu1 %v13973_v32  ;;  %v14447_v25 = vsub.f32 %v14445_v15, %v14446_v11 }
0x135d   :  { %25406 = vmatpush3.msra.mxu1 %v28074_v43  ;;  %25409 = vmatprep.mubr.msk.f32.mxu1 %vm26490_vm1, %v26489_v30  ;;  %v13976_v0 = vsub.f32 %v13974_v63, %v13975_v45 }
0x135e   :  { %25407 = vmatprep.subr.mxu1 %v26489_v30  ;;  %v14448_v29 = vand.u32 4294901760, %v14447_v25 }
0x135f   :  { %25408 = vmatpush3.msra.mxu1 %v28078_v51  ;;  %v13977_v8 = vand.u32 4294901760, %v13976_v0 }
0x1360   :  { %25419 = vmatprep.subr.mxu1 %v26489_v30  ;;  %25410 = vmatmul.mubr.f32.vlgmr.msra.gmra.mxu1 %v13975_v45 }
0x1361   :  { %25420 = vmatpush3.msra.mxu1 %v28074_v43  ;;  %25423 = vmatprep.mubr.msk.f32.mxu1 %vm26490_vm1, %v26489_v30  ;;  %v14956_v43 = vand.u32 4294901760, %v28195_v28 }
0x1362   :  { %25421 = vmatprep.subr.mxu1 %v26489_v30  ;;  %25389 = vmatmul.mubr.f32.vlgmr.msra.gmra.mxu0 %v13977_v8 }
0x1363   :  { %25422 = vmatpush3.msra.mxu1 %v28078_v51  ;;  %25399 = vmatpush3.msra.mxu0 %v28084_v49  ;;  %v14963_v51 = vand.u32 4294901760, %v28206_v50  ;;  %v14957_v53 = vsub.f32 %v28195_v28, %v14956_v43  ;;  %v14842_v49 = vsel %vm1230_vm2, %v14837_v27, 0 }
0x1364   :  { %25433 = vmatprep.subr.mxu1 %v26489_v30  ;;  %25424 = vmatmul.mubr.f32.vlgmr.msra.gmra.mxu1 %v13973_v32  ;;  %v14915_v6 = vand.u32 4294901760, %v14842_v49 }
0x1365   :  { %25434 = vmatpush3.xpose.msra.mxu1 %v14487_v19  ;;  %25400 = vmatprep.subr.mxu0 %v26489_v30 }
0x1366   :  { %25401 = vmatpush3.msra.mxu0 %v28091_v4  ;;  %25402 = vmatprep.mubr.msk.f32.mxu0 %vm26490_vm1, %v26489_v30  ;;  %v14964_v4 = vsub.f32 %v28206_v50, %v14963_v51 }
0x1367   :  { %25412 = vmatprep.subr.mxu0 %v26489_v30  ;;  %25435 = vmatprep.subr.mxu1 %v26489_v30 }
0x1368   :  { %25403 = vmatmul.mubr.f32.vlgmr.msra.gmra.mxu0 %v13974_v63  ;;  %25437 = vmatprep.mubr.msk.f32.mxu1 %vm26490_vm1, %v26489_v30  ;;  %v14965_v22 = vand.u32 4294901760, %v14964_v4 }
0x1369   :  { %25413 = vmatpush3.msra.mxu0 %v14014_v39  ;;  %25436 = vmatpush3.xpose.msra.mxu1 %v14494_v33  ;;  %v14958_v39 = vand.u32 4294901760, %v14957_v53 }
0x136a   :  { %25414 = vmatprep.subr.mxu0 %v26489_v30  ;;  %25416 = vmatprep.mubr.msk.f32.mxu0 %vm26490_vm1, %v26489_v30 }
0x136b   :  { %25415 = vmatpush3.msra.mxu0 %v14021_v5  ;;  %25447 = vmatprep.subr.mxu1 %v26489_v30  ;;  %v14916_v5 = vsub.f32 %v14842_v49, %v14915_v6 }
0x136c   :  { %25426 = vmatprep.subr.mxu0 %v26489_v30  ;;  %25438 = vmatmul.mubr.f32.vlgmr.msra.gmra.mxu1 %v28158_v34 }
0x136d   :  { %25417 = vmatmul.mubr.f32.vlgmr.msra.gmra.mxu0 %v13973_v32  ;;  %25448 = vmatpush3.xpose.msra.mxu1 %v28103_v59  ;;  %v14917_v56 = vand.u32 4294901760, %v14916_v5 }
0x136e   :  { %25427 = vmatpush3.xpose.msra.mxu0 %v28103_v59  ;;  %25449 = vmatprep.subr.mxu1 %v26489_v30 }
0x136f   :  { %25428 = vmatprep.subr.mxu0 %v26489_v30  ;;  %25430 = vmatprep.mubr.msk.f32.mxu0 %vm26490_vm1, %v26489_v30 }
0x1370   :  { %25451 = vmatprep.mubr.msk.f32.mxu1 %vm26490_vm1, %v26489_v30 }
0x1371   :  { %25450 = vmatpush3.xpose.msra.mxu1 %v28126_v54 }
0x1372   :  { %25429 = vmatpush3.xpose.msra.mxu0 %v28126_v54  ;;  %25461 = vmatprep.subr.mxu1 %v26489_v30 }
0x1373   :  { %25440 = vmatprep.subr.mxu0 %v26489_v30 }
0x1374   :  { %25452 = vmatmul.mubr.f32.vlgmr.msra.gmra.mxu1 %v14446_v11 }
0x1375   :  { %25431 = vmatmul.mubr.f32.vlgmr.msra.gmra.mxu0 %v14448_v29  ;;  %25462 = vmatpush3.xpose.msra.mxu1 %v28103_v59  ;;  %v14918_v59 = vsub.f32 %v14916_v5, %v14917_v56 }
0x1376   :  { %25441 = vmatpush3.xpose.msra.mxu0 %v28124_v17  ;;  %25463 = vmatprep.subr.mxu1 %v26489_v30 }
0x1377   :  { %25442 = vmatprep.subr.mxu0 %v26489_v30  ;;  %25444 = vmatprep.mubr.msk.f32.mxu0 %vm26490_vm1, %v26489_v30  ;;  %v14919_v13 = vand.u32 4294901760, %v14918_v59 }
0x1378   :  { %25465 = vmatprep.mubr.msk.f32.mxu1 %vm26490_vm1, %v26489_v30 }
0x1379   :  { %25464 = vmatpush3.xpose.msra.mxu1 %v28126_v54 }
0x137a   :  { %25443 = vmatpush3.xpose.msra.mxu0 %v28139_v1  ;;  %25475 = vmatprep.subr.mxu1 %v26489_v30 }
0x137b   :  { %25454 = vmatprep.subr.mxu0 %v26489_v30 }
0x137c   :  { %25466 = vmatmul.mubr.f32.vlgmr.msra.gmra.mxu1 %v28158_v34 }
0x137d   :  { %25445 = vmatmul.mubr.f32.vlgmr.msra.gmra.mxu0 %v14445_v15  ;;  %25476 = vmatpush3.xpose.msra.mxu1 %v14958_v39 }
0x137e   :  { %25455 = vmatpush3.xpose.msra.mxu0 %v14485_v62  ;;  %25477 = vmatprep.subr.mxu1 %v26489_v30 }
0x137f   :  { %25456 = vmatprep.subr.mxu0 %v26489_v30  ;;  %25458 = vmatprep.mubr.msk.f32.mxu0 %vm26490_vm1, %v26489_v30 }
0x1380   :  { %25479 = vmatprep.mubr.msk.f32.mxu1 %vm26490_vm1, %v26489_v30 }
0x1381   :  { %25478 = vmatpush3.xpose.msra.mxu1 %v14965_v22 }
0x1382   :  { %25457 = vmatpush3.xpose.msra.mxu0 %v14492_v2  ;;  %25489 = vmatprep.subr.mxu1 %v26489_v30 }
0x1383   :  { %25468 = vmatprep.subr.mxu0 %v26489_v30 }
0x1384   :  { %25480 = vmatmul.mubr.f32.vlgmr.msra.gmra.mxu1 %v14915_v6 }
0x1385   :  { %25459 = vmatmul.mubr.f32.vlgmr.msra.gmra.mxu0 %v28158_v34  ;;  %25490 = vmatpush3.xpose.msra.mxu1 %v28181_v48 }
0x1386   :  { %25469 = vmatpush3.xpose.msra.mxu0 %v28181_v48  ;;  %25491 = vmatprep.subr.mxu1 %v26489_v30 }
0x1387   :  { %25470 = vmatprep.subr.mxu0 %v26489_v30  ;;  %25472 = vmatprep.mubr.msk.f32.mxu0 %vm26490_vm1, %v26489_v30 }
0x1388   :  { %25493 = vmatprep.mubr.msk.f32.mxu1 %vm26490_vm1, %v26489_v30 }
0x1389   :  { %25492 = vmatpush3.xpose.msra.mxu1 %v28192_v10 }
0x138a   :  { %25471 = vmatpush3.xpose.msra.mxu0 %v28192_v10  ;;  %25503 = vmatprep.subr.mxu1 %v26489_v30 }
0x138b   :  { %25482 = vmatprep.subr.mxu0 %v26489_v30 }
0x138c   :  { %25494 = vmatmul.mubr.f32.vlgmr.msra.gmra.mxu1 %v14917_v56 }
0x138d   :  { %25473 = vmatmul.mubr.f32.vlgmr.msra.gmra.mxu0 %v14919_v13  ;;  %25504 = vmatpush3.xpose.msra.mxu1 %v28181_v48 }
0x138e   :  { %25483 = vmatpush3.xpose.msra.mxu0 %v28195_v28  ;;  %25505 = vmatprep.subr.mxu1 %v26489_v30 }
0x138f   :  { %25484 = vmatprep.subr.mxu0 %v26489_v30  ;;  %25486 = vmatprep.mubr.msk.f32.mxu0 %vm26490_vm1, %v26489_v30 }
0x1390   :  { %25507 = vmatprep.mubr.msk.f32.mxu1 %vm26490_vm1, %v26489_v30 }
0x1391   :  { %25506 = vmatpush3.xpose.msra.mxu1 %v28192_v10 }
0x1392   :  { %25485 = vmatpush3.xpose.msra.mxu0 %v28206_v50  ;;  %25517 = vmatprep.subr.mxu1 %v26489_v30 }
0x1393   :  { %25496 = vmatprep.subr.mxu0 %v26489_v30 }
0x1394   :  { %25508 = vmatmul.mubr.f32.vlgmr.msra.gmra.mxu1 %v14915_v6 }
0x1395   :  { %25487 = vmatmul.mubr.f32.vlgmr.msra.gmra.mxu0 %v14916_v5  ;;  %25521 = vmatprep.mubr.msk.f32.mxu1 %vm26490_vm1, %v26489_v30 }
0x1396   :  { %25497 = vmatpush3.xpose.msra.mxu0 %v14956_v43  ;;  %25500 = vmatprep.mubr.msk.f32.mxu0 %vm26490_vm1, %v26489_v30 }
0x1397   :  { %25498 = vmatprep.subr.mxu0 %v26489_v30 }
0x139a   :  { %25499 = vmatpush3.xpose.msra.mxu0 %v14963_v51 }
0x139b   :  { %25510 = vmatprep.subr.mxu0 %v26489_v30 }
0x139d   :  { %25501 = vmatmul.mubr.f32.vlgmr.msra.gmra.mxu0 %v14915_v6 }
0x139e   :  { %25514 = vmatprep.mubr.msk.f32.mxu0 %vm26490_vm1, %v26489_v30 }
0x1409   :  { %v13517_v7 = vpop.f32.mrf.mxu0 }
0x140b   :  { %v25348_v24 = vpop.f32.mrf.mxu0  ;;  %v13598_v52 = vpop.f32.mrf.mxu1 }
0x140c   :  { %v13599_v21 = vadd.f32 %v13598_v52, %v13517_v7 }
0x140d   :  { %v25355_v17 = vpop.f32.mrf.mxu1 }
0x140e   :  { %v13674_v54 = vpop.f32.mrf.mxu0 }
0x140f   :  { %v13675_v57 = vadd.f32 %v13674_v54, %v13599_v21 }
0x1410   :  { %v25362_v32 = vpop.f32.mrf.mxu0 }
0x1411   :  { %v13749_v20 = vpop.f32.mrf.mxu1 }
0x1412   :  { %v13750_v63 = vadd.f32 %v13749_v20, %v13675_v57 }
0x1413   :  { %v25369_v62 = vpop.f32.mrf.mxu1 }
0x1414   :  { %v13826_v1 = vpop.f32.mrf.mxu0 }
0x1415   :  { %v13827_v45 = vadd.f32 %v13826_v1, %v13750_v63 }
0x1416   :  { %v25376_v47 = vpop.f32.mrf.mxu0 }
0x1417   :  { %v13899_v0 = vpop.f32.mrf.mxu1 }
0x1418   :  { %v28276_v36 = vadd.f32 %v13899_v0, %v13827_v45 }
0x1419   :  { %v25383_v2 = vpop.f32.mrf.mxu1 }
0x141c   :  { %v14060_v8 = vpop.f32.mrf.mxu1 }
0x141e   :  { %v25397_v23 = vpop.f32.mrf.mxu1 }
0x1420   :  { %v14211_v34 = vpop.f32.mrf.mxu1 }
0x1422   :  { %v25411_v19 = vpop.f32.mrf.mxu1  ;;  %v13979_v38 = vpop.f32.mrf.mxu0 }
0x1423   :  { %v14061_v44 = vadd.f32 %v14060_v8, %v13979_v38 }
0x1424   :  { %v14361_v15 = vpop.f32.mrf.mxu1  ;;  %v25390_v33 = vpop.f32.mrf.mxu0 }
0x1426   :  { %v25425_v46 = vpop.f32.mrf.mxu1 }
0x1427   :  { %v26345_v46 = vld [vmem:[%s29256_s4 + $0x20] sm:$0xff] }
0x1428   :  { %v14136_v35 = vpop.f32.mrf.mxu0 }
0x1429   :  { %v14137_v11 = vadd.f32 %v14136_v35, %v14061_v44 }
0x142a   :  { %v25404_v48 = vpop.f32.mrf.mxu0 }
0x142b   :  { %v14212_v26 = vadd.f32 %v14211_v34, %v14137_v11 }
0x142c   :  { %v14531_v25 = vpop.f32.mrf.mxu1 }
0x142d   :  { %v14288_v10 = vpop.f32.mrf.mxu0 }
0x142e   :  { %v14289_v28 = vadd.f32 %v14288_v10, %v14212_v26  ;;  %v25439_v29 = vpop.f32.mrf.mxu1 }
0x142f   :  { %v25418_v50 = vpop.f32.mrf.mxu0 }
0x1430   :  { %v28278_v43 = vadd.f32 %v14361_v15, %v14289_v28 }
0x1434   :  { %v14682_v27 = vpop.f32.mrf.mxu1 }
0x1435   :  { %v14450_v51 = vpop.f32.mrf.mxu0 }
0x1436   :  { %v25453_v53 = vpop.f32.mrf.mxu1  ;;  %v14532_v6 = vadd.f32 %v14531_v25, %v14450_v51 }
0x1437   :  { %v25432_v49 = vpop.f32.mrf.mxu0 }
0x143c   :  { %v14832_v4 = vpop.f32.mrf.mxu1 }
0x143d   :  { %v14607_v39 = vpop.f32.mrf.mxu0 }
0x143e   :  { %v25467_v22 = vpop.f32.mrf.mxu1  ;;  %v14608_v56 = vadd.f32 %v14607_v39, %v14532_v6 }
0x143f   :  { %v25446_v5 = vpop.f32.mrf.mxu0  ;;  %v26346_v22 = vld [vmem:[%s29256_s4 + $0x28] sm:$0xff] }
0x1440   :  { %v14683_v59 = vadd.f32 %v14682_v27, %v14608_v56 }
0x1444   :  { %v15002_v13 = vpop.f32.mrf.mxu1 }
0x1445   :  { %v14759_v7 = vpop.f32.mrf.mxu0 }
0x1446   :  { %v14760_v24 = vadd.f32 %v14759_v7, %v14683_v59  ;;  %v25481_v52 = vpop.f32.mrf.mxu1 }
0x1447   :  { %v25460_v21 = vpop.f32.mrf.mxu0 }
0x1448   :  { %v14833_v17 = vadd.f32 %v14832_v4, %v14760_v24 }
0x144a   :  { %v15307_v54 = vmul.f32 0.35355338, %v14833_v17 }
0x144c   :  { %v15153_v57 = vpop.f32.mrf.mxu1  ;;  %v15309_v32 = vsel %vm13418_vm3, %v15307_v54, -inf }
0x144d   :  { %15310 = vmax.xlane.f32.xlu0 %v15309_v32  ;;  %v14921_v20 = vpop.f32.mrf.mxu0 }
0x144e   :  { %v25495_v63 = vpop.f32.mrf.mxu1  ;;  %v15003_v47 = vadd.f32 %v15002_v13, %v14921_v20 }
0x144f   :  { %v25474_v62 = vpop.f32.mrf.mxu0 }
0x1454   :  { %v15303_v1 = vpop.f32.mrf.mxu1 }
0x1455   :  { %v15078_v45 = vpop.f32.mrf.mxu0 }
0x1456   :  { %v25509_v0 = vpop.f32.mrf.mxu1  ;;  %v15079_v8 = vadd.f32 %v15078_v45, %v15003_v47 }
0x1457   :  { %v25488_v2 = vpop.f32.mrf.mxu0 }
0x1458   :  { %v15154_v23 = vadd.f32 %v15153_v57, %v15079_v8 }
0x145d   :  { %v15230_v34 = vpop.f32.mrf.mxu0 }
0x145e   :  { %v15231_v19 = vadd.f32 %v15230_v34, %v15154_v23 }
0x145f   :  { %v25502_v38 = vpop.f32.mrf.mxu0 }
0x1460   :  { %v15304_v44 = vadd.f32 %v15303_v1, %v15231_v19 }
0x1462   :  { %v15308_v15 = vmul.f32 0.35355338, %v15304_v44 }
0x1464   :  { %v15312_v33 = vsel %vm13418_vm3, %v15308_v15, -inf }
0x1465   :  { %15313 = vmax.xlane.f32.xlu1 %v15312_v33 }
0x1476   :  { %15335 = vrot.lane.b32.xlu1 %v28048_v31, %s26492_s29 }
0x147a   :  { %15805 = vrot.lane.b32.xlu1 %v28067_v16, %s26492_s29 }
0x147e   :  { %15803 = vrot.lane.b32.xlu1 %v28071_v14, %s26492_s29 }
0x1482   :  { %16769 = vrot.lane.b32.xlu1 %v26345_v46, %s26494_s12 }
0x1486   :  { %17269 = vrot.lane.b32.xlu1 %v27857_v3, %s26495_s5 }
0x148a   :  { %17742 = vrot.lane.b32.xlu1 %v27881_v37, %s26495_s5 }
0x148e   :  { %17738 = vrot.lane.b32.xlu1 %v27879_v58, %s26495_s5 }
0x14d6   :  { %v15311_v35 = vpop.xlane.xlu0 %15310 }
0x14d7   :  { %v15315_v11 = vsub.f32 %v15307_v54, %v15311_v35 }
0x14d9   :  { %v15317_v48 = vmul.f32 1.442695, %v15315_v11 }
0x14db   :  { %26299 = vpow2.f32 %v15317_v48 }
0x14e8   :  { %v26300_v26 = vpop.eup %26299 }
0x14e9   :  { %v15321_v25 = vsel %vm13418_vm3, %v26300_v26, 0.0 }
0x14ea   :  { %15322 = vadd.xlane.f32.xlu0 %v15321_v25 }
0x14ee   :  { %v15314_v10 = vpop.xlane.xlu1 %15313 }
0x14ef   :  { %v15316_v28 = vsub.f32 %v15308_v15, %v15314_v10 }
0x14f1   :  { %v15319_v29 = vmul.f32 1.442695, %v15316_v28 }
0x14f2   :  { %v15336_v50 = vpop.permute.xlu1 %15335 }
0x14f3   :  { %26301 = vpow2.f32 %v15319_v29  ;;  %v28299_v27 = vand.u32 4294901760, %v15336_v50 }
0x14f5   :  { %v15449_v51 = vsub.f32 %v15336_v50, %v28299_v27  ;;  %25511 = vmatpush3.msra.mxu0 %v28299_v27 }
0x14f6   :  { %25512 = vmatprep.subr.mxu0 %v26489_v30  ;;  %v15806_v17 = vpop.permute.xlu1 %15805 }
0x14f7   :  { %v15450_v53 = vand.u32 4294901760, %v15449_v51  ;;  %v28323_v1 = vand.u32 4294901760, %v15806_v17 }
0x14f9   :  { %v15451_v49 = vsub.f32 %v15449_v51, %v15450_v53  ;;  %v15919_v2 = vsub.f32 %v15806_v17, %v28323_v1 }
0x14fa   :  { %v15804_v62 = vpop.permute.xlu1 %15803 }
0x14fb   :  { %v15452_v4 = vand.u32 4294901760, %v15451_v49  ;;  %v28328_v47 = vand.u32 4294901760, %v15804_v62  ;;  %v15920_v38 = vand.u32 4294901760, %v15919_v2 }
0x14fd   :  { %25518 = vmatpush3.msra.mxu1 %v15452_v4  ;;  %v15926_v34 = vsub.f32 %v15804_v62, %v28328_v47  ;;  %v15921_v35 = vsub.f32 %v15919_v2, %v15920_v38 }
0x14fe   :  { %25519 = vmatprep.subr.mxu1 %v26489_v30 }
0x14ff   :  { %v15927_v33 = vand.u32 4294901760, %v15926_v34  ;;  %v15922_v25 = vand.u32 4294901760, %v15921_v35 }
0x1500   :  { %v26302_v39 = vpop.eup %26301 }
0x1501   :  { %v15324_v6 = vsel %vm13418_vm3, %v26302_v39, 0.0  ;;  %v15928_v48 = vsub.f32 %v15926_v34, %v15927_v33 }
0x1502   :  { %15325 = vadd.xlane.f32.xlu0 %v15324_v6 }
0x1503   :  { %v15929_v28 = vand.u32 4294901760, %v15928_v48 }
0x1518   :  { %15333 = vrot.lane.b32.xlu0 %v28045_v12, %s26492_s29  ;;  %s23347_s29 = sshll.u32 %s26499_s24, 4  ;;  %s23348_s29 = int_to_ptr.vmem [resolvable:$true] %s23347_s29 }
0x1519   :  { %p26456_p12 = scmp.lt.s32.totalorder %s23348_s29, %s23348_s29 }
0x151c   :  { %16271 = vrot.lane.b32.xlu0 %v26346_v22, %s26494_s12 }
0x1520   :  { %17271 = vrot.lane.b32.xlu0 %v27854_v60, %s26495_s5 }
0x1524   :  { %17267 = vrot.lane.b32.xlu0 %v27844_v18, %s26495_s5 }
0x1528   :  { %17740 = vrot.lane.b32.xlu0 %v27889_v42, %s26495_s5 }
0x1573   :  { %v15323_v5 = vpop.xlane.xlu0 %15322 }
0x1574   :  { %26303 = vrcp.f32 %v15323_v5 }
0x1581   :  { %v26304_v56 = vpop.eup %26303 }
0x1582   :  { %v15329_v59 = vmul.f32 %v26304_v56, %v26300_v26 }
0x1584   :  { %v15340_v13 = vsel %vm13418_vm3, %v15329_v59, 0 }
0x1585   :  { %v28319_v7 = vand.u32 4294901760, %v15340_v13 }
0x1587   :  { %v15410_v24 = vsub.f32 %v15340_v13, %v28319_v7 }
0x1589   :  { %v15411_v52 = vand.u32 4294901760, %v15410_v24 }
0x158b   :  { %v15326_v21 = vpop.xlane.xlu0 %15325  ;;  %v15412_v54 = vsub.f32 %v15410_v24, %v15411_v52 }
0x158c   :  { %26305 = vrcp.f32 %v15326_v21 }
0x158d   :  { %v15413_v20 = vand.u32 4294901760, %v15412_v54 }
0x158f   :  { %v15334_v57 = vpop.permute.xlu0 %15333 }
0x1590   :  { %v15374_v32 = vand.u32 4294901760, %v15334_v57 }
0x1592   :  { %v15456_v63 = vsub.f32 %v15334_v57, %v15374_v32  ;;  %25513 = vmatpush3.msra.mxu0 %v15374_v32 }
0x1593   :  { %25515 = vmatmul.mubr.f32.vlgmr.msra.gmra.mxu0 %v15413_v20  ;;  %25524 = vmatprep.subr.mxu0 %v26489_v30  ;;  %v16272_v29 = vpop.permute.xlu0 %16271 }
0x1594   :  { %v15457_v45 = vand.u32 4294901760, %v15456_v63  ;;  %25525 = vmatpush3.msra.mxu0 %v15449_v51  ;;  %25528 = vmatprep.mubr.msk.f32.mxu0 %vm26490_vm1, %v26489_v30  ;;  %v28372_v50 = vand.u32 4294901760, %v16272_v29 }
0x1595   :  { %25526 = vmatprep.subr.mxu0 %v26489_v30 }
0x1596   :  { %v15458_v0 = vsub.f32 %v15456_v63, %v15457_v45  ;;  %25527 = vmatpush3.msra.mxu0 %v15456_v63 }
0x1597   :  { %25529 = vmatmul.mubr.f32.vlgmr.msra.gmra.mxu0 %v15410_v24  ;;  %25538 = vmatprep.subr.mxu0 %v26489_v30 }
0x1598   :  { %v15459_v8 = vand.u32 4294901760, %v15458_v0  ;;  %25539 = vmatpush3.msra.mxu0 %v15450_v53  ;;  %25542 = vmatprep.mubr.msk.f32.mxu0 %vm26490_vm1, %v26489_v30 }
0x1599   :  { %v26306_v23 = vpop.eup %26305  ;;  %25540 = vmatprep.subr.mxu0 %v26489_v30 }
0x159a   :  { %v15330_v19 = vmul.f32 %v26306_v23, %v26302_v39  ;;  %25520 = vmatpush3.msra.mxu1 %v15459_v8  ;;  %25541 = vmatpush3.msra.mxu0 %v15457_v45  ;;  %v16770_v8 = vpop.permute.xlu1 %16769 }
0x159b   :  { %25522 = vmatmul.mubr.f32.vlgmr.msra.gmra.mxu1 %v28319_v7  ;;  %25531 = vmatprep.subr.mxu1 %v26489_v30  ;;  %v28399_v23 = vand.u32 4294901760, %v16770_v8 }
0x159c   :  { %v15810_v44 = vsel %vm13418_vm3, %v15330_v19, 0  ;;  %25543 = vmatmul.mubr.f32.vlgmr.msra.gmra.mxu0 %v28319_v7  ;;  %25552 = vmatprep.subr.mxu0 %v26489_v30 }
0x159d   :  { %v15879_v15 = vand.u32 4294901760, %v15810_v44  ;;  %25532 = vmatpush3.msra.mxu1 %v28299_v27  ;;  %25553 = vmatpush3.msra.mxu0 %v28323_v1 }
0x159e   :  { %25533 = vmatprep.subr.mxu1 %v26489_v30  ;;  %25554 = vmatprep.subr.mxu0 %v26489_v30 }
0x159f   :  { %25534 = vmatpush3.msra.mxu1 %v15374_v32  ;;  %25535 = vmatprep.mubr.msk.f32.mxu1 %vm26490_vm1, %v26489_v30  ;;  %v15880_v46 = vsub.f32 %v15810_v44, %v15879_v15 }
0x15a0   :  { %25555 = vmatpush3.msra.mxu0 %v28328_v47  ;;  %25536 = vmatmul.mubr.f32.vlgmr.msra.gmra.mxu1 %v15411_v52 }
0x15a1   :  { %25545 = vmatprep.subr.mxu1 %v26489_v30  ;;  %25549 = vmatprep.mubr.msk.f32.mxu1 %vm26490_vm1, %v26489_v30  ;;  %v15881_v11 = vand.u32 4294901760, %v15880_v46 }
0x15a2   :  { %25546 = vmatpush3.msra.mxu1 %v28299_v27  ;;  %25556 = vmatprep.mubr.msk.f32.mxu0 %vm26490_vm1, %v26489_v30  ;;  %v28383_v27 = vsub.f32 %v16272_v29, %v28372_v50 }
0x15a3   :  { %25547 = vmatprep.subr.mxu1 %v26489_v30  ;;  %25566 = vmatprep.subr.mxu0 %v26489_v30  ;;  %v15882_v26 = vsub.f32 %v15880_v46, %v15881_v11 }
0x15a4   :  { %25548 = vmatpush3.msra.mxu1 %v15374_v32  ;;  %v28389_v51 = vand.u32 4294901760, %v28383_v27 }
0x15a5   :  { %25550 = vmatmul.mubr.f32.vlgmr.msra.gmra.mxu1 %v28319_v7  ;;  %25559 = vmatprep.subr.mxu1 %v26489_v30  ;;  %v15883_v10 = vand.u32 4294901760, %v15882_v26 }
0x15a6   :  { %25560 = vmatpush3.msra.mxu1 %v15922_v25  ;;  %25563 = vmatprep.mubr.msk.f32.mxu1 %vm26490_vm1, %v26489_v30  ;;  %v16400_v53 = vsub.f32 %v28383_v27, %v28389_v51 }
0x15a7   :  { %25561 = vmatprep.subr.mxu1 %v26489_v30  ;;  %25557 = vmatmul.mubr.f32.vlgmr.msra.gmra.mxu0 %v15883_v10 }
0x15a8   :  { %25562 = vmatpush3.msra.mxu1 %v15929_v28  ;;  %25567 = vmatpush3.msra.mxu0 %v15919_v2  ;;  %v16401_v49 = vand.u32 4294901760, %v16400_v53 }
0x15a9   :  { %25564 = vmatmul.mubr.f32.vlgmr.msra.gmra.mxu1 %v15879_v15  ;;  %25573 = vmatprep.subr.mxu1 %v26489_v30 }
0x15aa   :  { %25568 = vmatprep.subr.mxu0 %v26489_v30  ;;  %25574 = vmatpush3.msra.mxu1 %v28323_v1 }
0x15ab   :  { %25569 = vmatpush3.msra.mxu0 %v15926_v34  ;;  %25575 = vmatprep.subr.mxu1 %v26489_v30 }
0x15ac   :  { %25570 = vmatprep.mubr.msk.f32.mxu0 %vm26490_vm1, %v26489_v30  ;;  %25576 = vmatpush3.msra.mxu1 %v28328_v47 }
0x15ad   :  { %25577 = vmatprep.mubr.msk.f32.mxu1 %vm26490_vm1, %v26489_v30  ;;  %25580 = vmatprep.subr.mxu0 %v26489_v30 }
0x15ae   :  { %25571 = vmatmul.mubr.f32.vlgmr.msra.gmra.mxu0 %v15880_v46  ;;  %25578 = vmatmul.mubr.f32.vlgmr.msra.gmra.mxu1 %v15881_v11  ;;  %v28402_v11 = vsub.f32 %v16770_v8, %v28399_v23 }
0x15af   :  { %25581 = vmatpush3.msra.mxu0 %v15920_v38  ;;  %25587 = vmatprep.subr.mxu1 %v26489_v30 }
0x15b0   :  { %25582 = vmatprep.subr.mxu0 %v26489_v30  ;;  %25588 = vmatpush3.msra.mxu1 %v28323_v1  ;;  %v28405_v53 = vand.u32 4294901760, %v28402_v11 }
0x15b1   :  { %25583 = vmatpush3.msra.mxu0 %v15927_v33  ;;  %25589 = vmatprep.subr.mxu1 %v26489_v30 }
0x15b2   :  { %25584 = vmatprep.mubr.msk.f32.mxu0 %vm26490_vm1, %v26489_v30  ;;  %25590 = vmatpush3.msra.mxu1 %v28328_v47 }
0x15b3   :  { %25591 = vmatprep.mubr.msk.f32.mxu1 %vm26490_vm1, %v26489_v30  ;;  %25585 = vmatmul.mubr.f32.vlgmr.msra.gmra.mxu0 %v15879_v15 }
0x15b4   :  { %25592 = vmatmul.mubr.f32.vlgmr.msra.gmra.mxu1 %v15879_v15  ;;  %25594 = vmatprep.subr.mxu0 %v28372_v50 }
0x15b5   :  { %25595 = vmatpush3.msra.mxu0 %v28372_v50  ;;  %25599 = vmatprep.subr.mxu1 %v16401_v49 }
0x15b6   :  { %25604 = vmatprep.subr.mxu0 %v28383_v27  ;;  %25600 = vmatpush3.msra.mxu1 %v16401_v49 }
0x15b7   :  { %25609 = vmatprep.subr.mxu1 %v28372_v50 }
0x1653   :  { %v15415_v4 = vpop.f32.mrf.mxu0 }
0x1655   :  { %v25516_v39 = vpop.f32.mrf.mxu0 }
0x1656   :  { %v16773_v39 = vsel %vm1230_vm2, %v28276_v36, 0 }
0x1657   :  { %v15572_v6 = vpop.f32.mrf.mxu0 }
0x1659   :  { %v25530_v22 = vpop.f32.mrf.mxu0 }
0x165b   :  { %v15496_v5 = vpop.f32.mrf.mxu1 }
0x165c   :  { %v15497_v56 = vadd.f32 %v15496_v5, %v15415_v4  ;;  %v15724_v59 = vpop.f32.mrf.mxu0 }
0x165d   :  { %v25523_v13 = vpop.f32.mrf.mxu1 }
0x165e   :  { %v25544_v7 = vpop.f32.mrf.mxu0  ;;  %v15573_v24 = vadd.f32 %v15572_v6, %v15497_v56  ;;  %v17272_v6 = vpop.permute.xlu0 %17271  ;;  %v16898_v56 = vsub.f32 %v28402_v11, %v28405_v53  ;;  %v28414_v13 = vand.u32 4294901760, %v16773_v39 }
0x165f   :  { %v17277_v7 = vsel %vm1230_vm2, %v17272_v6, 0 }
0x1660   :  { %v15647_v52 = vpop.f32.mrf.mxu1 }
0x1661   :  { %v15648_v21 = vadd.f32 %v15647_v52, %v15573_v24  ;;  %v17270_v52 = vpop.permute.xlu1 %17269 }
0x1662   :  { %v25537_v17 = vpop.f32.mrf.mxu1 }
0x1663   :  { %v15725_v54 = vadd.f32 %v15724_v59, %v15648_v21  ;;  %v16776_v59 = vsel %vm1230_vm2, %v28278_v43, 0  ;;  %v16899_v17 = vand.u32 4294901760, %v16898_v56  ;;  %v16845_v43 = vsub.f32 %v16773_v39, %v28414_v13 }
0x1664   :  { %v28418_v36 = vand.u32 4294901760, %v16776_v59 }
0x1665   :  { %v15797_v57 = vpop.f32.mrf.mxu1 }
0x1666   :  { %v15798_v32 = vadd.f32 %v15797_v57, %v15725_v54  ;;  %v28421_v54 = vand.u32 4294901760, %v17277_v7  ;;  %v17275_v57 = vsel %vm1230_vm2, %v17270_v52, 0 }
0x1667   :  { %v25551_v20 = vpop.f32.mrf.mxu1  ;;  %v15885_v63 = vpop.f32.mrf.mxu0 }
0x1668   :  { %v16275_v62 = vsel %vm1230_vm2, %v15798_v32, 0  ;;  %v16855_v20 = vsub.f32 %v16776_v59, %v28418_v36 }
0x1669   :  { %v28395_v1 = vand.u32 4294901760, %v16275_v62  ;;  %v15966_v45 = vpop.f32.mrf.mxu1  ;;  %v25558_v47 = vpop.f32.mrf.mxu0 }
0x166a   :  { %v15967_v34 = vadd.f32 %v15966_v45, %v15885_v63  ;;  %v28431_v45 = vsub.f32 %v17277_v7, %v28421_v54  ;;  %v16846_v47 = vand.u32 4294901760, %v16845_v43 }
0x166b   :  { %v16347_v0 = vsub.f32 %v16275_v62, %v28395_v1  ;;  %v25565_v2 = vpop.f32.mrf.mxu1  ;;  %25601 = vmatprep.mubr.f32.mxu1 %v28395_v1  ;;  %v28428_v62 = vand.u32 4294901760, %v17275_v57 }
0x166c   :  { %v16856_v2 = vand.u32 4294901760, %v16855_v20  ;;  %v17387_v8 = vand.u32 4294901760, %v28431_v45 }
0x166d   :  { %v16348_v19 = vand.u32 4294901760, %v16347_v0 }
0x166e   :  { %v16042_v38 = vpop.f32.mrf.mxu0  ;;  %v16117_v44 = vpop.f32.mrf.mxu1 }
0x166f   :  { %v16043_v15 = vadd.f32 %v16042_v38, %v15967_v34  ;;  %v16349_v33 = vsub.f32 %v16347_v0, %v16348_v19  ;;  %v17268_v34 = vpop.permute.xlu0 %17267  ;;  %v17388_v38 = vsub.f32 %v28431_v45, %v17387_v8 }
0x1670   :  { %v25572_v46 = vpop.f32.mrf.mxu0  ;;  %v25579_v35 = vpop.f32.mrf.mxu1 }
0x1671   :  { %v16118_v48 = vadd.f32 %v16117_v44, %v16043_v15  ;;  %v16350_v26 = vand.u32 4294901760, %v16349_v33  ;;  %v17273_v44 = vsel %vm1230_vm2, %v17268_v34, 0  ;;  %v17389_v46 = vand.u32 4294901760, %v17388_v38  ;;  %v17743_v35 = vpop.permute.xlu1 %17742 }
0x1672   :  { %v28454_v15 = vand.u32 4294901760, %v17273_v44 }
0x1673   :  { %v16194_v25 = vpop.f32.mrf.mxu0  ;;  %25596 = vmatprep.mubr.f32.mxu0 %v16350_v26  ;;  %v17748_v26 = vsel %vm1230_vm2, %v17743_v35, 0 }
0x1674   :  { %v16195_v10 = vadd.f32 %v16194_v25, %v16118_v48  ;;  %v16267_v28 = vpop.f32.mrf.mxu1  ;;  %v17741_v25 = vpop.permute.xlu0 %17740 }
0x1675   :  { %v25586_v29 = vpop.f32.mrf.mxu0 }
0x1676   :  { %v16268_v49 = vadd.f32 %v16267_v28, %v16195_v10  ;;  %v25593_v4 = vpop.f32.mrf.mxu1  ;;  %v28473_v10 = vand.u32 4294901760, %v17748_v26  ;;  %v17746_v28 = vsel %vm1230_vm2, %v17741_v25, 0 }
0x1678   :  { %v16278_v22 = vsel %vm1230_vm2, %v16268_v49, 0  ;;  %v28486_v49 = vand.u32 4294901760, %v17746_v28 }
0x1679   :  { %v16356_v5 = vand.u32 4294901760, %v16278_v22 }
0x167a   :  { %v28498_v6 = vsub.f32 %v17746_v28, %v28486_v49 }
0x167b   :  { %v16357_v24 = vsub.f32 %v16278_v22, %v16356_v5  ;;  %25602 = vmatmul.mubr.f32.vlgmr.msra.gmra.mxu1 %v16356_v5  ;;  %v17739_v22 = vpop.permute.xlu1 %17738 }
0x167c   :  { %25610 = vmatpush3.msra.mxu1 %v28372_v50  ;;  %25611 = vmatprep.mubr.f32.mxu1 %v16348_v19  ;;  %v16847_v19 = vsub.f32 %v16845_v43, %v16846_v47  ;;  %v17744_v56 = vsel %vm1230_vm2, %v17739_v22, 0  ;;  %v17865_v59 = vand.u32 4294901760, %v28498_v6 }
0x167d   :  { %v16358_v21 = vand.u32 4294901760, %v16357_v24  ;;  %25619 = vmatprep.subr.mxu1 %v28372_v50 }
0x167f   :  { %v16359_v32 = vsub.f32 %v16357_v24, %v16358_v21  ;;  %25612 = vmatmul.mubr.f32.vlgmr.msra.gmra.mxu1 %v16358_v21 }
0x1680   :  { %25620 = vmatpush3.msra.mxu1 %v28372_v50  ;;  %25621 = vmatprep.mubr.f32.mxu1 %v28395_v1  ;;  %v28436_v50 = vsub.f32 %v17275_v57, %v28428_v62 }
0x1681   :  { %v16360_v63 = vand.u32 4294901760, %v16359_v32  ;;  %25629 = vmatprep.subr.mxu1 %v16899_v17 }
0x1683   :  { %25597 = vmatmul.mubr.f32.vlgmr.msra.gmra.mxu0 %v16360_v63  ;;  %25622 = vmatmul.mubr.f32.vlgmr.msra.gmra.mxu1 %v16356_v5 }
0x1684   :  { %25605 = vmatpush3.msra.mxu0 %v28383_v27  ;;  %25606 = vmatprep.mubr.f32.mxu0 %v16347_v0  ;;  %v16857_v27 = vsub.f32 %v16855_v20, %v16856_v2  ;;  %v17394_v0 = vand.u32 4294901760, %v28436_v50 }
0x1685   :  { %25614 = vmatprep.subr.mxu0 %v28389_v51  ;;  %25630 = vmatpush3.msra.mxu1 %v16899_v17 }
0x1686   :  { %25631 = vmatprep.mubr.f32.mxu1 %v28414_v13  ;;  %25639 = vmatprep.subr.mxu1 %v28399_v23  ;;  %v17395_v33 = vsub.f32 %v28436_v50, %v17394_v0 }
0x1687   :  { %25607 = vmatmul.mubr.f32.vlgmr.msra.gmra.mxu0 %v16357_v24  ;;  %25632 = vmatmul.mubr.f32.vlgmr.msra.gmra.mxu1 %v28418_v36  ;;  %v17866_v24 = vsub.f32 %v28498_v6, %v17865_v59 }
0x1688   :  { %25615 = vmatpush3.msra.mxu0 %v28389_v51  ;;  %25640 = vmatpush3.msra.mxu1 %v28399_v23  ;;  %v16848_v51 = vand.u32 4294901760, %v16847_v19  ;;  %v17396_v48 = vand.u32 4294901760, %v17395_v33 }
0x1689   :  { %25616 = vmatprep.mubr.f32.mxu0 %v28395_v1  ;;  %25624 = vmatprep.subr.mxu0 %v28399_v23  ;;  %v16858_v1 = vand.u32 4294901760, %v16857_v27 }
0x168a   :  { %25641 = vmatprep.mubr.f32.mxu1 %v16846_v47  ;;  %25649 = vmatprep.subr.mxu1 %v28399_v23 }
0x168b   :  { %25617 = vmatmul.mubr.f32.vlgmr.msra.gmra.mxu0 %v16356_v5  ;;  %25642 = vmatmul.mubr.f32.vlgmr.msra.gmra.mxu1 %v16856_v2 }
0x168c   :  { %25625 = vmatpush3.msra.mxu0 %v28399_v23  ;;  %25650 = vmatpush3.msra.mxu1 %v28399_v23  ;;  %v17347_v23 = vsub.f32 %v17273_v44, %v28454_v15 }
0x168d   :  { %25626 = vmatprep.mubr.f32.mxu0 %v16848_v51  ;;  %25634 = vmatprep.subr.mxu0 %v28402_v11 }
0x168e   :  { %25651 = vmatprep.mubr.f32.mxu1 %v28414_v13  ;;  %25661 = vmatprep.subr.mxu1 %v26489_v30 }
0x168f   :  { %25627 = vmatmul.mubr.f32.vlgmr.msra.gmra.mxu0 %v16858_v1  ;;  %25652 = vmatmul.mubr.f32.vlgmr.msra.gmra.mxu1 %v28418_v36 }
0x1690   :  { %25635 = vmatpush3.msra.mxu0 %v28402_v11  ;;  %25662 = vmatpush3.xpose.msra.mxu1 %v17389_v46  ;;  %v17348_v11 = vand.u32 4294901760, %v17347_v23 }
0x1691   :  { %25636 = vmatprep.mubr.f32.mxu0 %v16845_v43  ;;  %25644 = vmatprep.subr.mxu0 %v28405_v53 }
0x1692   :  { %25663 = vmatprep.subr.mxu1 %v26489_v30  ;;  %25665 = vmatprep.mubr.msk.f32.mxu1 %vm26490_vm1, %v26489_v30  ;;  %v17349_v29 = vsub.f32 %v17347_v23, %v17348_v11 }
0x1693   :  { %25637 = vmatmul.mubr.f32.vlgmr.msra.gmra.mxu0 %v16855_v20 }
0x1694   :  { %25645 = vmatpush3.msra.mxu0 %v28405_v53  ;;  %25664 = vmatpush3.xpose.msra.mxu1 %v17396_v48  ;;  %v28484_v53 = vsub.f32 %v17748_v26, %v28473_v10  ;;  %v17350_v4 = vand.u32 4294901760, %v17349_v29 }
0x1695   :  { %25646 = vmatprep.mubr.f32.mxu0 %v28414_v13  ;;  %25654 = vmatprep.subr.mxu0 %v26489_v30  ;;  %v17817_v13 = vand.u32 4294901760, %v17744_v56 }
0x1696   :  { %25675 = vmatprep.subr.mxu1 %v26489_v30  ;;  %v17858_v39 = vand.u32 4294901760, %v28484_v53 }
0x1697   :  { %25666 = vmatmul.mubr.f32.vlgmr.msra.gmra.mxu1 %v28454_v15  ;;  %25647 = vmatmul.mubr.f32.vlgmr.msra.gmra.mxu0 %v28418_v36  ;;  %v17818_v52 = vsub.f32 %v17744_v56, %v17817_v13  ;;  %v17867_v36 = vand.u32 4294901760, %v17866_v24 }
0x1698   :  { %25655 = vmatpush3.xpose.msra.mxu0 %v28421_v54  ;;  %25676 = vmatpush3.xpose.msra.mxu1 %v28421_v54  ;;  %v17859_v5 = vsub.f32 %v28484_v53, %v17858_v39 }
0x1699   :  { %25656 = vmatprep.subr.mxu0 %v26489_v30  ;;  %25677 = vmatprep.subr.mxu1 %v26489_v30  ;;  %v17819_v21 = vand.u32 4294901760, %v17818_v52 }
0x169a   :  { %25658 = vmatprep.mubr.msk.f32.mxu0 %vm26490_vm1, %v26489_v30  ;;  %25679 = vmatprep.mubr.msk.f32.mxu1 %vm26490_vm1, %v26489_v30  ;;  %v17860_v7 = vand.u32 4294901760, %v17859_v5 }
0x169b   :  { %v17820_v17 = vsub.f32 %v17818_v52, %v17819_v21 }
0x169c   :  { %25657 = vmatpush3.xpose.msra.mxu0 %v28428_v62  ;;  %25678 = vmatpush3.xpose.msra.mxu1 %v28428_v62 }
0x169d   :  { %25668 = vmatprep.subr.mxu0 %v26489_v30  ;;  %25689 = vmatprep.subr.mxu1 %v26489_v30 }
0x169f   :  { %25659 = vmatmul.mubr.f32.vlgmr.msra.gmra.mxu0 %v17350_v4  ;;  %25680 = vmatmul.mubr.f32.vlgmr.msra.gmra.mxu1 %v17348_v11 }
0x16a0   :  { %25669 = vmatpush3.xpose.msra.mxu0 %v28431_v45  ;;  %25690 = vmatpush3.xpose.msra.mxu1 %v28421_v54  ;;  %v17821_v54 = vand.u32 4294901760, %v17820_v17 }
0x16a1   :  { %25670 = vmatprep.subr.mxu0 %v26489_v30  ;;  %25691 = vmatprep.subr.mxu1 %v26489_v30 }
0x16a2   :  { %25672 = vmatprep.mubr.msk.f32.mxu0 %vm26490_vm1, %v26489_v30  ;;  %25693 = vmatprep.mubr.msk.f32.mxu1 %vm26490_vm1, %v26489_v30 }
0x16a4   :  { %25671 = vmatpush3.xpose.msra.mxu0 %v28436_v50  ;;  %25692 = vmatpush3.xpose.msra.mxu1 %v28428_v62 }
0x16a5   :  { %25682 = vmatprep.subr.mxu0 %v26489_v30  ;;  %25703 = vmatprep.subr.mxu1 %v26489_v30 }
0x16a7   :  { %25673 = vmatmul.mubr.f32.vlgmr.msra.gmra.mxu0 %v17347_v23  ;;  %25694 = vmatmul.mubr.f32.vlgmr.msra.gmra.mxu1 %v28454_v15 }
0x16a8   :  { %25683 = vmatpush3.xpose.msra.mxu0 %v17387_v8  ;;  %25704 = vmatpush3.xpose.msra.mxu1 %v17860_v7 }
0x16a9   :  { %25684 = vmatprep.subr.mxu0 %v26489_v30  ;;  %25705 = vmatprep.subr.mxu1 %v26489_v30 }
0x16aa   :  { %25686 = vmatprep.mubr.msk.f32.mxu0 %vm26490_vm1, %v26489_v30  ;;  %25707 = vmatprep.mubr.msk.f32.mxu1 %vm26490_vm1, %v26489_v30 }
0x16ac   :  { %25685 = vmatpush3.xpose.msra.mxu0 %v17394_v0  ;;  %25706 = vmatpush3.xpose.msra.mxu1 %v17867_v36 }
0x16ad   :  { %25696 = vmatprep.subr.mxu0 %v26489_v30  ;;  %25717 = vmatprep.subr.mxu1 %v26489_v30 }
0x16af   :  { %25687 = vmatmul.mubr.f32.vlgmr.msra.gmra.mxu0 %v28454_v15  ;;  %25708 = vmatmul.mubr.f32.vlgmr.msra.gmra.mxu1 %v17817_v13 }
0x16b0   :  { %25697 = vmatpush3.xpose.msra.mxu0 %v28473_v10  ;;  %25718 = vmatpush3.xpose.msra.mxu1 %v28473_v10 }
0x16b1   :  { %25698 = vmatprep.subr.mxu0 %v26489_v30  ;;  %25719 = vmatprep.subr.mxu1 %v26489_v30 }
0x16b2   :  { %25700 = vmatprep.mubr.msk.f32.mxu0 %vm26490_vm1, %v26489_v30  ;;  %25721 = vmatprep.mubr.msk.f32.mxu1 %vm26490_vm1, %v26489_v30 }
0x16b4   :  { %25699 = vmatpush3.xpose.msra.mxu0 %v28486_v49  ;;  %25720 = vmatpush3.xpose.msra.mxu1 %v28486_v49 }
0x16b5   :  { %25710 = vmatprep.subr.mxu0 %v26489_v30  ;;  %25731 = vmatprep.subr.mxu1 %v26489_v30 }
0x16b7   :  { %25701 = vmatmul.mubr.f32.vlgmr.msra.gmra.mxu0 %v17821_v54  ;;  %25722 = vmatmul.mubr.f32.vlgmr.msra.gmra.mxu1 %v17819_v21 }
0x16b8   :  { %25711 = vmatpush3.xpose.msra.mxu0 %v28484_v53  ;;  %25732 = vmatpush3.xpose.msra.mxu1 %v28473_v10 }
0x16b9   :  { %25712 = vmatprep.subr.mxu0 %v26489_v30  ;;  %25733 = vmatprep.subr.mxu1 %v26489_v30 }
0x16ba   :  { %25714 = vmatprep.mubr.msk.f32.mxu0 %vm26490_vm1, %v26489_v30  ;;  %25735 = vmatprep.mubr.msk.f32.mxu1 %vm26490_vm1, %v26489_v30 }
0x16bc   :  { %25713 = vmatpush3.xpose.msra.mxu0 %v28498_v6  ;;  %25734 = vmatpush3.xpose.msra.mxu1 %v28486_v49 }
0x16bd   :  { %25724 = vmatprep.subr.mxu0 %v26489_v30  ;;  %25745 = vmatprep.subr.mxu1 %v26489_v30 }
0x16bf   :  { %25715 = vmatmul.mubr.f32.vlgmr.msra.gmra.mxu0 %v17818_v52  ;;  %25736 = vmatmul.mubr.f32.vlgmr.msra.gmra.mxu1 %v17817_v13 }
0x16c0   :  { %25725 = vmatpush3.xpose.msra.mxu0 %v17858_v39  ;;  %25728 = vmatprep.mubr.msk.f32.mxu0 %vm26490_vm1, %v26489_v30 }
0x16c1   :  { %25726 = vmatprep.subr.mxu0 %v26489_v30  ;;  %25749 = vmatprep.mubr.msk.f32.mxu1 %vm26490_vm1, %v26489_v30 }
0x16c4   :  { %25727 = vmatpush3.xpose.msra.mxu0 %v17865_v59 }
0x16c5   :  { %25738 = vmatprep.subr.mxu0 %v26489_v30 }
0x16c7   :  { %25729 = vmatmul.mubr.f32.vlgmr.msra.gmra.mxu0 %v17817_v13 }
0x16c8   :  { %25742 = vmatprep.mubr.msk.f32.mxu0 %vm26490_vm1, %v26489_v30 }
0x173b   :  { %v25603_v43 = vpop.f32.mrf.mxu1 }
0x173d   :  { %v16438_v57 = vpop.f32.mrf.mxu1 }
0x173f   :  { %v25613_v32 = vpop.f32.mrf.mxu1 }
0x1741   :  { %v16599_v20 = vpop.f32.mrf.mxu1 }
0x1743   :  { %v25598_v63 = vpop.f32.mrf.mxu0  ;;  %v25623_v62 = vpop.f32.mrf.mxu1 }
0x1744   :  { %v16445_v45 = vadd.f32 %v25603_v43, %v25598_v63 }
0x1745   :  { %v16352_v47 = vpop.f32.mrf.mxu0  ;;  %v16759_v2 = vpop.f32.mrf.mxu1 }
0x1746   :  { %v16439_v50 = vadd.f32 %v16438_v57, %v16352_v47 }
0x1747   :  { %v25608_v8 = vpop.f32.mrf.mxu0  ;;  %v25633_v34 = vpop.f32.mrf.mxu1 }
0x1748   :  { %v16526_v19 = vadd.f32 %v25608_v8, %v16445_v45 }
0x1749   :  { %v16518_v27 = vpop.f32.mrf.mxu0  ;;  %v16936_v0 = vpop.f32.mrf.mxu1 }
0x174a   :  { %v16519_v38 = vadd.f32 %v16518_v27, %v16439_v50  ;;  %v16608_v44 = vadd.f32 %v25613_v32, %v16526_v19 }
0x174b   :  { %v25618_v51 = vpop.f32.mrf.mxu0  ;;  %v25643_v1 = vpop.f32.mrf.mxu1 }
0x174c   :  { %v16688_v15 = vadd.f32 %v25618_v51, %v16608_v44  ;;  %v16600_v33 = vadd.f32 %v16599_v20, %v16519_v38 }
0x174d   :  { %v16681_v46 = vpop.f32.mrf.mxu0  ;;  %v17097_v35 = vpop.f32.mrf.mxu1 }
0x174e   :  { %v16682_v23 = vadd.f32 %v16681_v46, %v16600_v33  ;;  %v16766_v48 = vadd.f32 %v25623_v62, %v16688_v15 }
0x174f   :  { %v25628_v26 = vpop.f32.mrf.mxu0  ;;  %v25653_v10 = vpop.f32.mrf.mxu1 }
0x1750   :  { %v16861_v25 = vadd.f32 %v25628_v26, %v16766_v48  ;;  %v16760_v11 = vadd.f32 %v16759_v2, %v16682_v23 }
0x1751   :  { %v16850_v28 = vpop.f32.mrf.mxu0  ;;  %v17257_v6 = vpop.f32.mrf.mxu1 }
0x1752   :  { %v16851_v29 = vadd.f32 %v16850_v28, %v16760_v11  ;;  %v16943_v53 = vadd.f32 %v25633_v34, %v16861_v25 }
0x1753   :  { %v25638_v49 = vpop.f32.mrf.mxu0 }
0x1754   :  { %v17024_v4 = vadd.f32 %v25638_v49, %v16943_v53  ;;  %v16937_v39 = vadd.f32 %v16936_v0, %v16851_v29 }
0x1755   :  { %v17016_v22 = vpop.f32.mrf.mxu0 }
0x1756   :  { %v17017_v5 = vadd.f32 %v17016_v22, %v16937_v39  ;;  %v17106_v56 = vadd.f32 %v25643_v1, %v17024_v4 }
0x1757   :  { %v17433_v59 = vpop.f32.mrf.mxu1  ;;  %v25648_v13 = vpop.f32.mrf.mxu0 }
0x1758   :  { %v17186_v7 = vadd.f32 %v25648_v13, %v17106_v56  ;;  %v17098_v24 = vadd.f32 %v17097_v35, %v17017_v5 }
0x1759   :  { %v25667_v52 = vpop.f32.mrf.mxu1  ;;  %v17179_v36 = vpop.f32.mrf.mxu0 }
0x175a   :  { %v28566_v21 = vadd.f32 %v25653_v10, %v17186_v7  ;;  %v17180_v17 = vadd.f32 %v17179_v36, %v17098_v24 }
0x175c   :  { %v28568_v54 = vadd.f32 %v17257_v6, %v17180_v17 }
0x175f   :  { %v17352_v43 = vpop.f32.mrf.mxu0  ;;  %v17584_v57 = vpop.f32.mrf.mxu1 }
0x1760   :  { %v17434_v45 = vadd.f32 %v17433_v59, %v17352_v43 }
0x1761   :  { %v25660_v32 = vpop.f32.mrf.mxu0  ;;  %v25681_v20 = vpop.f32.mrf.mxu1 }
0x1762   :  { %v26347_v20 = vld [vmem:[%s29256_s4 + $0x30] sm:$0xff] }
0x1767   :  { %v17509_v63 = vpop.f32.mrf.mxu0  ;;  %v17734_v62 = vpop.f32.mrf.mxu1 }
0x1768   :  { %v17510_v50 = vadd.f32 %v17509_v63, %v17434_v45 }
0x1769   :  { %v25674_v47 = vpop.f32.mrf.mxu0  ;;  %v25695_v2 = vpop.f32.mrf.mxu1 }
0x176a   :  { %v17585_v8 = vadd.f32 %v17584_v57, %v17510_v50 }
0x176f   :  { %v17661_v34 = vpop.f32.mrf.mxu0  ;;  %v17904_v19 = vpop.f32.mrf.mxu1 }
0x1770   :  { %v17662_v27 = vadd.f32 %v17661_v34, %v17585_v8 }
0x1771   :  { %v25688_v0 = vpop.f32.mrf.mxu0  ;;  %v25709_v38 = vpop.f32.mrf.mxu1 }
0x1772   :  { %v17735_v44 = vadd.f32 %v17734_v62, %v17662_v27 }
0x1774   :  { %v18209_v51 = vmul.f32 0.35355338, %v17735_v44 }
0x1776   :  { %v18211_v1 = vsel %vm13418_vm3, %v18209_v51, -inf }
0x1777   :  { %v18055_v15 = vpop.f32.mrf.mxu1  ;;  %18212 = vmax.xlane.f32.xlu0 %v18211_v1  ;;  %v17823_v33 = vpop.f32.mrf.mxu0 }
0x1778   :  { %v17905_v26 = vadd.f32 %v17904_v19, %v17823_v33 }
0x1779   :  { %v25702_v46 = vpop.f32.mrf.mxu0  ;;  %v25723_v35 = vpop.f32.mrf.mxu1 }
0x177f   :  { %v17980_v23 = vpop.f32.mrf.mxu0  ;;  %v18205_v48 = vpop.f32.mrf.mxu1 }
0x1780   :  { %v17981_v10 = vadd.f32 %v17980_v23, %v17905_v26 }
0x1781   :  { %v25716_v25 = vpop.f32.mrf.mxu0  ;;  %v25737_v11 = vpop.f32.mrf.mxu1 }
0x1782   :  { %v18056_v28 = vadd.f32 %v18055_v15, %v17981_v10 }
0x1787   :  { %v18132_v29 = vpop.f32.mrf.mxu0 }
0x1788   :  { %v18133_v53 = vadd.f32 %v18132_v29, %v18056_v28 }
0x1789   :  { %v25730_v49 = vpop.f32.mrf.mxu0 }
0x178a   :  { %v18206_v4 = vadd.f32 %v18205_v48, %v18133_v53 }
0x178c   :  { %v18210_v39 = vmul.f32 0.35355338, %v18206_v4 }
0x178e   :  { %v18214_v6 = vsel %vm13418_vm3, %v18210_v39, -inf }
0x178f   :  { %18215 = vmax.xlane.f32.xlu1 %v18214_v6 }
0x17a0   :  { %18235 = vrot.lane.b32.xlu1 %v28048_v31, %s26495_s5 }
0x17a4   :  { %18703 = vrot.lane.b32.xlu1 %v28067_v16, %s26495_s5 }
0x17a8   :  { %18701 = vrot.lane.b32.xlu1 %v28071_v14, %s26495_s5 }
0x17ac   :  { %19673 = vrot.lane.b32.xlu1 %v27854_v60, %s26498_s20 }
0x17b0   :  { %19669 = vrot.lane.b32.xlu1 %v27844_v18, %s26498_s20 }
0x17b4   :  { %20142 = vrot.lane.b32.xlu1 %v27889_v42, %s26498_s20 }
0x1800   :  { %v18213_v22 = vpop.xlane.xlu0 %18212 }
0x1801   :  { %v18217_v5 = vsub.f32 %v18209_v51, %v18213_v22 }
0x1803   :  { %v18219_v56 = vmul.f32 1.442695, %v18217_v5 }
0x1805   :  { %26307 = vpow2.f32 %v18219_v56 }
0x1812   :  { %v26308_v59 = vpop.eup %26307 }
0x1813   :  { %v18223_v13 = vsel %vm13418_vm3, %v26308_v59, 0.0 }
0x1814   :  { %18224 = vadd.xlane.f32.xlu0 %v18223_v13 }
0x1818   :  { %v18216_v7 = vpop.xlane.xlu1 %18215 }
0x1819   :  { %v18218_v24 = vsub.f32 %v18210_v39, %v18216_v7 }
0x181b   :  { %v18221_v52 = vmul.f32 1.442695, %v18218_v24 }
0x181c   :  { %v18236_v36 = vpop.permute.xlu1 %18235 }
0x181d   :  { %26309 = vpow2.f32 %v18221_v52  ;;  %v28585_v60 = vand.u32 4294901760, %v18236_v36 }
0x181f   :  { %v18349_v18 = vsub.f32 %v18236_v36, %v28585_v60  ;;  %25739 = vmatpush3.msra.mxu0 %v28585_v60 }
0x1820   :  { %25740 = vmatprep.subr.mxu0 %v26489_v30 }
0x1821   :  { %v18350_v42 = vand.u32 4294901760, %v18349_v18 }
0x1823   :  { %v18351_v17 = vsub.f32 %v18349_v18, %v18350_v42 }
0x1825   :  { %v18352_v43 = vand.u32 4294901760, %v18351_v17 }
0x1827   :  { %25746 = vmatpush3.msra.mxu1 %v18352_v43 }
0x1828   :  { %25747 = vmatprep.subr.mxu1 %v26489_v30 }
0x182a   :  { %v26310_v57 = vpop.eup %26309 }
0x182b   :  { %v18226_v32 = vsel %vm13418_vm3, %v26310_v57, 0.0 }
0x182c   :  { %18227 = vadd.xlane.f32.xlu0 %v18226_v32 }
0x1842   :  { %18233 = vrot.lane.b32.xlu0 %v28045_v12, %s26495_s5 }
0x1846   :  { %19169 = vrot.lane.b32.xlu0 %v26347_v20, %s26494_s12 }
0x184a   :  { %19671 = vrot.lane.b32.xlu0 %v27857_v3, %s26498_s20  ;;  %v18704_v3 = vpop.permute.xlu1 %18703 }
0x184b   :  { %v28609_v44 = vand.u32 4294901760, %v18704_v3 }
0x184d   :  { %v18817_v33 = vsub.f32 %v18704_v3, %v28609_v44 }
0x184e   :  { %20144 = vrot.lane.b32.xlu0 %v27881_v37, %s26498_s20 }
0x184f   :  { %v18818_v26 = vand.u32 4294901760, %v18817_v33 }
0x1851   :  { %v18819_v29 = vsub.f32 %v18817_v33, %v18818_v26 }
0x1852   :  { %20140 = vrot.lane.b32.xlu0 %v27879_v58, %s26498_s20  ;;  %v18702_v58 = vpop.permute.xlu1 %18701 }
0x1853   :  { %v28614_v1 = vand.u32 4294901760, %v18702_v58  ;;  %v18820_v39 = vand.u32 4294901760, %v18819_v29 }
0x1855   :  { %v18824_v23 = vsub.f32 %v18702_v58, %v28614_v1 }
0x1856   :  { %v19674_v58 = vpop.permute.xlu1 %19673 }
0x1857   :  { %v18825_v10 = vand.u32 4294901760, %v18824_v23 }
0x1859   :  { %v18826_v49 = vsub.f32 %v18824_v23, %v18825_v10 }
0x185b   :  { %v18827_v22 = vand.u32 4294901760, %v18826_v49 }
0x189d   :  { %v18225_v63 = vpop.xlane.xlu0 %18224 }
0x189e   :  { %26311 = vrcp.f32 %v18225_v63 }
0x18ab   :  { %v26312_v62 = vpop.eup %26311 }
0x18ac   :  { %v18231_v45 = vmul.f32 %v26312_v62, %v26308_v59 }
0x18ae   :  { %v18240_v47 = vsel %vm13418_vm3, %v18231_v45, 0 }
0x18af   :  { %v28605_v2 = vand.u32 4294901760, %v18240_v47 }
0x18b1   :  { %v18310_v50 = vsub.f32 %v18240_v47, %v28605_v2 }
0x18b3   :  { %v18311_v8 = vand.u32 4294901760, %v18310_v50 }
0x18b5   :  { %v18228_v34 = vpop.xlane.xlu0 %18227  ;;  %v18312_v19 = vsub.f32 %v18310_v50, %v18311_v8 }
0x18b6   :  { %26313 = vrcp.f32 %v18228_v34 }
0x18b7   :  { %v18313_v0 = vand.u32 4294901760, %v18312_v19 }
0x18b9   :  { %v18234_v27 = vpop.permute.xlu0 %18233 }
0x18ba   :  { %v18274_v37 = vand.u32 4294901760, %v18234_v27 }
0x18bc   :  { %v18356_v38 = vsub.f32 %v18234_v27, %v18274_v37  ;;  %25741 = vmatpush3.msra.mxu0 %v18274_v37 }
0x18bd   :  { %25743 = vmatmul.mubr.f32.vlgmr.msra.gmra.mxu0 %v18313_v0  ;;  %25752 = vmatprep.subr.mxu0 %v26489_v30  ;;  %v19170_v5 = vpop.permute.xlu0 %19169 }
0x18be   :  { %v18357_v51 = vand.u32 4294901760, %v18356_v38  ;;  %25753 = vmatpush3.msra.mxu0 %v18349_v18  ;;  %25756 = vmatprep.mubr.msk.f32.mxu0 %vm26490_vm1, %v26489_v30  ;;  %v28658_v56 = vand.u32 4294901760, %v19170_v5 }
0x18bf   :  { %25754 = vmatprep.subr.mxu0 %v26489_v30 }
0x18c0   :  { %v18358_v15 = vsub.f32 %v18356_v38, %v18357_v51  ;;  %25755 = vmatpush3.msra.mxu0 %v18356_v38  ;;  %v28669_v59 = vsub.f32 %v19170_v5, %v28658_v56 }
0x18c1   :  { %25757 = vmatmul.mubr.f32.vlgmr.msra.gmra.mxu0 %v18310_v50  ;;  %25766 = vmatprep.subr.mxu0 %v26489_v30 }
0x18c2   :  { %v18359_v46 = vand.u32 4294901760, %v18358_v15  ;;  %25767 = vmatpush3.msra.mxu0 %v18350_v42  ;;  %25770 = vmatprep.mubr.msk.f32.mxu0 %vm26490_vm1, %v26489_v30  ;;  %v28675_v13 = vand.u32 4294901760, %v28669_v59 }
0x18c3   :  { %v26314_v35 = vpop.eup %26313  ;;  %25768 = vmatprep.subr.mxu0 %v26489_v30 }
0x18c4   :  { %v18232_v48 = vmul.f32 %v26314_v35, %v26310_v57  ;;  %25748 = vmatpush3.msra.mxu1 %v18359_v46  ;;  %25769 = vmatpush3.msra.mxu0 %v18357_v51  ;;  %v19298_v7 = vsub.f32 %v28669_v59, %v28675_v13  ;;  %v19672_v46 = vpop.permute.xlu0 %19671 }
0x18c5   :  { %25750 = vmatmul.mubr.f32.vlgmr.msra.gmra.mxu1 %v28605_v2  ;;  %25759 = vmatprep.subr.mxu1 %v26489_v30 }
0x18c6   :  { %v18708_v25 = vsel %vm13418_vm3, %v18232_v48, 0  ;;  %25771 = vmatmul.mubr.f32.vlgmr.msra.gmra.mxu0 %v28605_v2  ;;  %25780 = vmatprep.subr.mxu0 %v26489_v30  ;;  %v19299_v24 = vand.u32 4294901760, %v19298_v7 }
0x18c7   :  { %v18777_v11 = vand.u32 4294901760, %v18708_v25  ;;  %25760 = vmatpush3.msra.mxu1 %v28585_v60  ;;  %25781 = vmatpush3.msra.mxu0 %v28609_v44 }
0x18c8   :  { %25761 = vmatprep.subr.mxu1 %v26489_v30  ;;  %25782 = vmatprep.subr.mxu0 %v26489_v30 }
0x18c9   :  { %25762 = vmatpush3.msra.mxu1 %v18274_v37  ;;  %25763 = vmatprep.mubr.msk.f32.mxu1 %vm26490_vm1, %v26489_v30  ;;  %v18778_v28 = vsub.f32 %v18708_v25, %v18777_v11 }
0x18ca   :  { %25783 = vmatpush3.msra.mxu0 %v28614_v1  ;;  %25764 = vmatmul.mubr.f32.vlgmr.msra.gmra.mxu1 %v18311_v8 }
0x18cb   :  { %25773 = vmatprep.subr.mxu1 %v26489_v30  ;;  %25777 = vmatprep.mubr.msk.f32.mxu1 %vm26490_vm1, %v26489_v30  ;;  %v18779_v53 = vand.u32 4294901760, %v18778_v28 }
0x18cc   :  { %25774 = vmatpush3.msra.mxu1 %v28585_v60  ;;  %25784 = vmatprep.mubr.msk.f32.mxu0 %vm26490_vm1, %v26489_v30 }
0x18cd   :  { %25775 = vmatprep.subr.mxu1 %v26489_v30  ;;  %25794 = vmatprep.subr.mxu0 %v26489_v30  ;;  %v18780_v4 = vsub.f32 %v18778_v28, %v18779_v53 }
0x18ce   :  { %25776 = vmatpush3.msra.mxu1 %v18274_v37 }
0x18cf   :  { %25778 = vmatmul.mubr.f32.vlgmr.msra.gmra.mxu1 %v28605_v2  ;;  %25787 = vmatprep.subr.mxu1 %v26489_v30  ;;  %v18781_v6 = vand.u32 4294901760, %v18780_v4 }
0x18d0   :  { %25788 = vmatpush3.msra.mxu1 %v18820_v39  ;;  %25791 = vmatprep.mubr.msk.f32.mxu1 %vm26490_vm1, %v26489_v30 }
0x18d1   :  { %25789 = vmatprep.subr.mxu1 %v26489_v30  ;;  %25785 = vmatmul.mubr.f32.vlgmr.msra.gmra.mxu0 %v18781_v6 }
0x18d2   :  { %25790 = vmatpush3.msra.mxu1 %v18827_v22  ;;  %25795 = vmatpush3.msra.mxu0 %v18817_v33  ;;  %v19679_v33 = vsel %vm1230_vm2, %v19674_v58, 0 }
0x18d3   :  { %25792 = vmatmul.mubr.f32.vlgmr.msra.gmra.mxu1 %v18777_v11  ;;  %25801 = vmatprep.subr.mxu1 %v26489_v30 }
0x18d4   :  { %25796 = vmatprep.subr.mxu0 %v26489_v30  ;;  %25802 = vmatpush3.msra.mxu1 %v28609_v44 }
0x18d5   :  { %25797 = vmatpush3.msra.mxu0 %v18824_v23  ;;  %25803 = vmatprep.subr.mxu1 %v26489_v30 }
0x18d6   :  { %25798 = vmatprep.mubr.msk.f32.mxu0 %vm26490_vm1, %v26489_v30  ;;  %25804 = vmatpush3.msra.mxu1 %v28614_v1 }
0x18d7   :  { %25805 = vmatprep.mubr.msk.f32.mxu1 %vm26490_vm1, %v26489_v30  ;;  %25808 = vmatprep.subr.mxu0 %v26489_v30 }
0x18d8   :  { %25799 = vmatmul.mubr.f32.vlgmr.msra.gmra.mxu0 %v18778_v28  ;;  %25806 = vmatmul.mubr.f32.vlgmr.msra.gmra.mxu1 %v18779_v53  ;;  %v19677_v28 = vsel %vm1230_vm2, %v19672_v46, 0 }
0x18d9   :  { %25809 = vmatpush3.msra.mxu0 %v18818_v26  ;;  %25815 = vmatprep.subr.mxu1 %v26489_v30  ;;  %v28692_v6 = vand.u32 4294901760, %v19677_v28 }
0x18da   :  { %25810 = vmatprep.subr.mxu0 %v26489_v30  ;;  %25816 = vmatpush3.msra.mxu1 %v28609_v44 }
0x18db   :  { %25811 = vmatpush3.msra.mxu0 %v18825_v10  ;;  %25817 = vmatprep.subr.mxu1 %v26489_v30  ;;  %v28686_v10 = vand.u32 4294901760, %v19679_v33 }
0x18dc   :  { %25812 = vmatprep.mubr.msk.f32.mxu0 %vm26490_vm1, %v26489_v30  ;;  %25818 = vmatpush3.msra.mxu1 %v28614_v1 }
0x18dd   :  { %25819 = vmatprep.mubr.msk.f32.mxu1 %vm26490_vm1, %v26489_v30  ;;  %25813 = vmatmul.mubr.f32.vlgmr.msra.gmra.mxu0 %v18777_v11  ;;  %v28690_v39 = vsub.f32 %v19679_v33, %v28686_v10 }
0x18de   :  { %25820 = vmatmul.mubr.f32.vlgmr.msra.gmra.mxu1 %v18777_v11  ;;  %25822 = vmatprep.subr.mxu0 %v28658_v56 }
0x18df   :  { %25823 = vmatpush3.msra.mxu0 %v28658_v56  ;;  %25827 = vmatprep.subr.mxu1 %v19299_v24 }
0x18e0   :  { %25832 = vmatprep.subr.mxu0 %v28669_v59  ;;  %25828 = vmatpush3.msra.mxu1 %v19299_v24 }
0x18e1   :  { %25837 = vmatprep.subr.mxu1 %v28658_v56 }
0x197d   :  { %v18315_v52 = vpop.f32.mrf.mxu0 }
0x197f   :  { %v25744_v36 = vpop.f32.mrf.mxu0 }
0x1980   :  { %v28697_v36 = vsub.f32 %v19677_v28, %v28692_v6 }
0x1981   :  { %v18472_v60 = vpop.f32.mrf.mxu0 }
0x1983   :  { %v25758_v18 = vpop.f32.mrf.mxu0 }
0x1985   :  { %v18396_v42 = vpop.f32.mrf.mxu1 }
0x1986   :  { %v18397_v17 = vadd.f32 %v18396_v42, %v18315_v52  ;;  %v18624_v43 = vpop.f32.mrf.mxu0  ;;  %v19789_v52 = vand.u32 4294901760, %v28690_v39 }
0x1987   :  { %v25751_v57 = vpop.f32.mrf.mxu1 }
0x1988   :  { %v25772_v32 = vpop.f32.mrf.mxu0  ;;  %v18473_v20 = vadd.f32 %v18472_v60, %v18397_v17  ;;  %v19670_v60 = vpop.permute.xlu1 %19669  ;;  %v19790_v17 = vsub.f32 %v28690_v39, %v19789_v52  ;;  %v19796_v57 = vand.u32 4294901760, %v28697_v36 }
0x198a   :  { %v18547_v63 = vpop.f32.mrf.mxu1 }
0x198b   :  { %v18548_v62 = vadd.f32 %v18547_v63, %v18473_v20 }
0x198c   :  { %v25765_v45 = vpop.f32.mrf.mxu1 }
0x198d   :  { %v18625_v47 = vadd.f32 %v18624_v43, %v18548_v62  ;;  %v19675_v43 = vsel %vm1230_vm2, %v19670_v60, 0  ;;  %v19791_v62 = vand.u32 4294901760, %v19790_v17  ;;  %v19797_v45 = vsub.f32 %v28697_v36, %v19796_v57 }
0x198e   :  { %v28708_v20 = vand.u32 4294901760, %v19675_v43 }
0x198f   :  { %v18697_v2 = vpop.f32.mrf.mxu1 }
0x1990   :  { %v18698_v50 = vadd.f32 %v18697_v2, %v18625_v47  ;;  %v20145_v47 = vpop.permute.xlu0 %20144  ;;  %v19798_v2 = vand.u32 4294901760, %v19797_v45 }
0x1991   :  { %v25779_v8 = vpop.f32.mrf.mxu1  ;;  %v18783_v34 = vpop.f32.mrf.mxu0 }
0x1992   :  { %v19173_v3 = vsel %vm1230_vm2, %v18698_v50, 0  ;;  %v20150_v50 = vsel %vm1230_vm2, %v20145_v47, 0  ;;  %v20143_v8 = vpop.permute.xlu1 %20142 }
0x1993   :  { %v28681_v19 = vand.u32 4294901760, %v19173_v3  ;;  %v18864_v27 = vpop.f32.mrf.mxu1  ;;  %v25786_v37 = vpop.f32.mrf.mxu0 }
0x1994   :  { %v18865_v44 = vadd.f32 %v18864_v27, %v18783_v34  ;;  %v28724_v34 = vand.u32 4294901760, %v20150_v50  ;;  %v20141_v58 = vpop.permute.xlu0 %20140 }
0x1995   :  { %v19245_v0 = vsub.f32 %v19173_v3, %v28681_v19  ;;  %v25793_v38 = vpop.f32.mrf.mxu1  ;;  %25829 = vmatprep.mubr.f32.mxu1 %v28681_v19  ;;  %v20148_v3 = vsel %vm1230_vm2, %v20143_v8, 0 }
0x1996   :  { %v28736_v27 = vsub.f32 %v20150_v50, %v28724_v34 }
0x1997   :  { %v19246_v51 = vand.u32 4294901760, %v19245_v0 }
0x1998   :  { %v18940_v1 = vpop.f32.mrf.mxu0  ;;  %v19015_v15 = vpop.f32.mrf.mxu1  ;;  %v20260_v38 = vand.u32 4294901760, %v28736_v27 }
0x1999   :  { %v18941_v35 = vadd.f32 %v18940_v1, %v18865_v44  ;;  %v19247_v23 = vsub.f32 %v19245_v0, %v19246_v51  ;;  %v20146_v1 = vsel %vm1230_vm2, %v20141_v58, 0 }
0x199a   :  { %v25800_v48 = vpop.f32.mrf.mxu0  ;;  %v25807_v26 = vpop.f32.mrf.mxu1 }
0x199b   :  { %v19016_v25 = vadd.f32 %v19015_v15, %v18941_v35  ;;  %v19248_v11 = vand.u32 4294901760, %v19247_v23  ;;  %v20219_v15 = vand.u32 4294901760, %v20146_v1 }
0x199d   :  { %v19092_v29 = vpop.f32.mrf.mxu0  ;;  %25824 = vmatprep.mubr.f32.mxu0 %v19248_v11  ;;  %v20220_v35 = vsub.f32 %v20146_v1, %v20219_v15 }
0x199e   :  { %v19093_v53 = vadd.f32 %v19092_v29, %v19016_v25  ;;  %v19165_v49 = vpop.f32.mrf.mxu1 }
0x199f   :  { %v25814_v4 = vpop.f32.mrf.mxu0  ;;  %v20221_v48 = vand.u32 4294901760, %v20220_v35 }
0x19a0   :  { %v19166_v22 = vadd.f32 %v19165_v49, %v19093_v53  ;;  %v25821_v5 = vpop.f32.mrf.mxu1 }
0x19a1   :  { %v20222_v26 = vsub.f32 %v20220_v35, %v20221_v48 }
0x19a2   :  { %v19176_v7 = vsel %vm1230_vm2, %v19166_v22, 0 }
0x19a3   :  { %v19254_v24 = vand.u32 4294901760, %v19176_v7  ;;  %v20223_v25 = vand.u32 4294901760, %v20222_v26 }
0x19a5   :  { %v19255_v18 = vsub.f32 %v19176_v7, %v19254_v24  ;;  %25830 = vmatmul.mubr.f32.vlgmr.msra.gmra.mxu1 %v19254_v24 }
0x19a6   :  { %25838 = vmatpush3.msra.mxu1 %v28658_v56  ;;  %25839 = vmatprep.mubr.f32.mxu1 %v19246_v51  ;;  %v20261_v51 = vsub.f32 %v28736_v27, %v20260_v38 }
0x19a7   :  { %v19256_v42 = vand.u32 4294901760, %v19255_v18  ;;  %25847 = vmatprep.subr.mxu1 %v28658_v56 }
0x19a8   :  { %v20262_v46 = vand.u32 4294901760, %v20261_v51 }
0x19a9   :  { %v19257_v32 = vsub.f32 %v19255_v18, %v19256_v42  ;;  %25840 = vmatmul.mubr.f32.vlgmr.msra.gmra.mxu1 %v19256_v42 }
0x19aa   :  { %25848 = vmatpush3.msra.mxu1 %v28658_v56  ;;  %25849 = vmatprep.mubr.f32.mxu1 %v28681_v19  ;;  %v19749_v56 = vsub.f32 %v19675_v43, %v28708_v20 }
0x19ab   :  { %v19258_v63 = vand.u32 4294901760, %v19257_v32  ;;  %25859 = vmatprep.subr.mxu1 %v26489_v30 }
0x19ad   :  { %25825 = vmatmul.mubr.f32.vlgmr.msra.gmra.mxu0 %v19258_v63  ;;  %25850 = vmatmul.mubr.f32.vlgmr.msra.gmra.mxu1 %v19254_v24 }
0x19ae   :  { %25833 = vmatpush3.msra.mxu0 %v28669_v59  ;;  %25860 = vmatpush3.xpose.msra.mxu1 %v19791_v62  ;;  %v19750_v59 = vand.u32 4294901760, %v19749_v56 }
0x19af   :  { %25834 = vmatprep.mubr.f32.mxu0 %v19245_v0  ;;  %25842 = vmatprep.subr.mxu0 %v28675_v13 }
0x19b0   :  { %25861 = vmatprep.subr.mxu1 %v26489_v30  ;;  %25863 = vmatprep.mubr.msk.f32.mxu1 %vm26490_vm1, %v26489_v30 }
0x19b1   :  { %25835 = vmatmul.mubr.f32.vlgmr.msra.gmra.mxu0 %v19255_v18 }
0x19b2   :  { %25843 = vmatpush3.msra.mxu0 %v28675_v13  ;;  %25862 = vmatpush3.xpose.msra.mxu1 %v19798_v2  ;;  %v19751_v13 = vsub.f32 %v19749_v56, %v19750_v59 }
0x19b3   :  { %25844 = vmatprep.mubr.f32.mxu0 %v28681_v19  ;;  %25852 = vmatprep.subr.mxu0 %v26489_v30  ;;  %v28733_v19 = vand.u32 4294901760, %v20148_v3 }
0x19b4   :  { %25873 = vmatprep.subr.mxu1 %v26489_v30  ;;  %v19752_v37 = vand.u32 4294901760, %v19751_v13 }
0x19b5   :  { %25864 = vmatmul.mubr.f32.vlgmr.msra.gmra.mxu1 %v28708_v20  ;;  %25845 = vmatmul.mubr.f32.vlgmr.msra.gmra.mxu0 %v19254_v24  ;;  %v28747_v0 = vsub.f32 %v20148_v3, %v28733_v19 }
0x19b6   :  { %25853 = vmatpush3.xpose.msra.mxu0 %v28686_v10  ;;  %25874 = vmatpush3.xpose.msra.mxu1 %v28686_v10 }
0x19b7   :  { %25854 = vmatprep.subr.mxu0 %v26489_v30  ;;  %25875 = vmatprep.subr.mxu1 %v26489_v30  ;;  %v20267_v44 = vand.u32 4294901760, %v28747_v0 }
0x19b8   :  { %25856 = vmatprep.mubr.msk.f32.mxu0 %vm26490_vm1, %v26489_v30  ;;  %25877 = vmatprep.mubr.msk.f32.mxu1 %vm26490_vm1, %v26489_v30 }
0x19b9   :  { %v20268_v33 = vsub.f32 %v28747_v0, %v20267_v44 }
0x19ba   :  { %25855 = vmatpush3.xpose.msra.mxu0 %v28692_v6  ;;  %25876 = vmatpush3.xpose.msra.mxu1 %v28692_v6 }
0x19bb   :  { %25866 = vmatprep.subr.mxu0 %v26489_v30  ;;  %25887 = vmatprep.subr.mxu1 %v26489_v30  ;;  %v20269_v23 = vand.u32 4294901760, %v20268_v33 }
0x19bd   :  { %25857 = vmatmul.mubr.f32.vlgmr.msra.gmra.mxu0 %v19752_v37  ;;  %25878 = vmatmul.mubr.f32.vlgmr.msra.gmra.mxu1 %v19750_v59 }
0x19be   :  { %25867 = vmatpush3.xpose.msra.mxu0 %v28690_v39  ;;  %25888 = vmatpush3.xpose.msra.mxu1 %v28686_v10 }
0x19bf   :  { %25868 = vmatprep.subr.mxu0 %v26489_v30  ;;  %25889 = vmatprep.subr.mxu1 %v26489_v30 }
0x19c0   :  { %25870 = vmatprep.mubr.msk.f32.mxu0 %vm26490_vm1, %v26489_v30  ;;  %25891 = vmatprep.mubr.msk.f32.mxu1 %vm26490_vm1, %v26489_v30 }
0x19c2   :  { %25869 = vmatpush3.xpose.msra.mxu0 %v28697_v36  ;;  %25890 = vmatpush3.xpose.msra.mxu1 %v28692_v6 }
0x19c3   :  { %25880 = vmatprep.subr.mxu0 %v26489_v30  ;;  %25901 = vmatprep.subr.mxu1 %v26489_v30 }
0x19c5   :  { %25871 = vmatmul.mubr.f32.vlgmr.msra.gmra.mxu0 %v19749_v56  ;;  %25892 = vmatmul.mubr.f32.vlgmr.msra.gmra.mxu1 %v28708_v20 }
0x19c6   :  { %25881 = vmatpush3.xpose.msra.mxu0 %v19789_v52  ;;  %25902 = vmatpush3.xpose.msra.mxu1 %v20262_v46 }
0x19c7   :  { %25882 = vmatprep.subr.mxu0 %v26489_v30  ;;  %25903 = vmatprep.subr.mxu1 %v26489_v30 }
0x19c8   :  { %25884 = vmatprep.mubr.msk.f32.mxu0 %vm26490_vm1, %v26489_v30  ;;  %25905 = vmatprep.mubr.msk.f32.mxu1 %vm26490_vm1, %v26489_v30 }
0x19ca   :  { %25883 = vmatpush3.xpose.msra.mxu0 %v19796_v57  ;;  %25904 = vmatpush3.xpose.msra.mxu1 %v20269_v23 }
0x19cb   :  { %25894 = vmatprep.subr.mxu0 %v26489_v30  ;;  %25915 = vmatprep.subr.mxu1 %v26489_v30 }
0x19cd   :  { %25885 = vmatmul.mubr.f32.vlgmr.msra.gmra.mxu0 %v28708_v20  ;;  %25906 = vmatmul.mubr.f32.vlgmr.msra.gmra.mxu1 %v20219_v15 }
0x19ce   :  { %25895 = vmatpush3.xpose.msra.mxu0 %v28724_v34  ;;  %25916 = vmatpush3.xpose.msra.mxu1 %v28724_v34 }
0x19cf   :  { %25896 = vmatprep.subr.mxu0 %v26489_v30  ;;  %25917 = vmatprep.subr.mxu1 %v26489_v30 }
0x19d0   :  { %25898 = vmatprep.mubr.msk.f32.mxu0 %vm26490_vm1, %v26489_v30  ;;  %25919 = vmatprep.mubr.msk.f32.mxu1 %vm26490_vm1, %v26489_v30 }
0x19d2   :  { %25897 = vmatpush3.xpose.msra.mxu0 %v28733_v19  ;;  %25918 = vmatpush3.xpose.msra.mxu1 %v28733_v19 }
0x19d3   :  { %25908 = vmatprep.subr.mxu0 %v26489_v30  ;;  %25929 = vmatprep.subr.mxu1 %v26489_v30 }
0x19d5   :  { %25899 = vmatmul.mubr.f32.vlgmr.msra.gmra.mxu0 %v20223_v25  ;;  %25920 = vmatmul.mubr.f32.vlgmr.msra.gmra.mxu1 %v20221_v48 }
0x19d6   :  { %25909 = vmatpush3.xpose.msra.mxu0 %v28736_v27  ;;  %25930 = vmatpush3.xpose.msra.mxu1 %v28724_v34 }
0x19d7   :  { %25910 = vmatprep.subr.mxu0 %v26489_v30  ;;  %25931 = vmatprep.subr.mxu1 %v26489_v30 }
0x19d8   :  { %25912 = vmatprep.mubr.msk.f32.mxu0 %vm26490_vm1, %v26489_v30  ;;  %25933 = vmatprep.mubr.msk.f32.mxu1 %vm26490_vm1, %v26489_v30 }
0x19da   :  { %25911 = vmatpush3.xpose.msra.mxu0 %v28747_v0  ;;  %25932 = vmatpush3.xpose.msra.mxu1 %v28733_v19 }
0x19db   :  { %25922 = vmatprep.subr.mxu0 %v26489_v30  ;;  %25943 = vmatprep.subr.mxu1 %v26489_v30 }
0x19dd   :  { %25913 = vmatmul.mubr.f32.vlgmr.msra.gmra.mxu0 %v20220_v35  ;;  %25934 = vmatmul.mubr.f32.vlgmr.msra.gmra.mxu1 %v20219_v15 }
0x19de   :  { %25923 = vmatpush3.xpose.msra.mxu0 %v20260_v38  ;;  %25926 = vmatprep.mubr.msk.f32.mxu0 %vm26490_vm1, %v26489_v30 }
0x19df   :  { %25924 = vmatprep.subr.mxu0 %v26489_v30  ;;  %25947 = vmatprep.mubr.msk.f32.mxu1 %vm26490_vm1, %v26489_v30 }
0x19e2   :  { %25925 = vmatpush3.xpose.msra.mxu0 %v20267_v44 }
0x19e3   :  { %25936 = vmatprep.subr.mxu0 %v26489_v30 }
0x19e5   :  { %25927 = vmatmul.mubr.f32.vlgmr.msra.gmra.mxu0 %v20219_v15 }
0x19e6   :  { %25940 = vmatprep.mubr.msk.f32.mxu0 %vm26490_vm1, %v26489_v30 }
0x1a65   :  { %v25831_v11 = vpop.f32.mrf.mxu1 }
0x1a67   :  { %v19336_v10 = vpop.f32.mrf.mxu1 }
0x1a69   :  { %v25841_v28 = vpop.f32.mrf.mxu1 }
0x1a6b   :  { %v19497_v29 = vpop.f32.mrf.mxu1 }
0x1a6d   :  { %v25826_v53 = vpop.f32.mrf.mxu0  ;;  %v25851_v4 = vpop.f32.mrf.mxu1 }
0x1a6e   :  { %v19343_v49 = vadd.f32 %v25831_v11, %v25826_v53 }
0x1a6f   :  { %v19250_v39 = vpop.f32.mrf.mxu0  ;;  %v19657_v7 = vpop.f32.mrf.mxu1 }
0x1a70   :  { %v19337_v6 = vadd.f32 %v19336_v10, %v19250_v39 }
0x1a71   :  { %v25836_v22 = vpop.f32.mrf.mxu0 }
0x1a72   :  { %v19424_v5 = vadd.f32 %v25836_v22, %v19343_v49 }
0x1a73   :  { %v19416_v24 = vpop.f32.mrf.mxu0 }
0x1a74   :  { %v19417_v52 = vadd.f32 %v19416_v24, %v19337_v6  ;;  %v19506_v36 = vadd.f32 %v25841_v28, %v19424_v5 }
0x1a75   :  { %v19835_v60 = vpop.f32.mrf.mxu1  ;;  %v25846_v18 = vpop.f32.mrf.mxu0 }
0x1a76   :  { %v19586_v42 = vadd.f32 %v25846_v18, %v19506_v36  ;;  %v19498_v17 = vadd.f32 %v19497_v29, %v19417_v52 }
0x1a77   :  { %v25865_v43 = vpop.f32.mrf.mxu1  ;;  %v19579_v57 = vpop.f32.mrf.mxu0 }
0x1a78   :  { %v19664_v32 = vadd.f32 %v25851_v4, %v19586_v42  ;;  %v19580_v20 = vadd.f32 %v19579_v57, %v19498_v17  ;;  %v26348_v42 = vld [vmem:[#allocation8 + $0x1] ss:$0 sm:$0xff]  ;;  %v26349_v17 = vld [vmem:[%s29256_s4 + $0x38] sm:$0xff] }
0x1a7a   :  { %v28813_v63 = vadd.f32 %v19664_v32, %v28566_v21  ;;  %v19658_v62 = vadd.f32 %v19657_v7, %v19580_v20 }
0x1a7c   :  { %v28816_v45 = vadd.f32 %v19658_v62, %v28568_v54 }
0x1a7d   :  { %v19754_v47 = vpop.f32.mrf.mxu0  ;;  %v19986_v56 = vpop.f32.mrf.mxu1 }
0x1a7e   :  { %v19836_v34 = vadd.f32 %v19835_v60, %v19754_v47 }
0x1a7f   :  { %v25858_v2 = vpop.f32.mrf.mxu0  ;;  %v25879_v50 = vpop.f32.mrf.mxu1 }
0x1a85   :  { %v19911_v8 = vpop.f32.mrf.mxu0  ;;  %v20136_v59 = vpop.f32.mrf.mxu1 }
0x1a86   :  { %v19912_v19 = vadd.f32 %v19911_v8, %v19836_v34 }
0x1a87   :  { %v25872_v3 = vpop.f32.mrf.mxu0  ;;  %v25893_v13 = vpop.f32.mrf.mxu1 }
0x1a88   :  { %v19987_v27 = vadd.f32 %v19986_v56, %v19912_v19 }
0x1a8d   :  { %v20063_v37 = vpop.f32.mrf.mxu0  ;;  %v20306_v0 = vpop.f32.mrf.mxu1 }
0x1a8e   :  { %v20064_v38 = vadd.f32 %v20063_v37, %v19987_v27 }
0x1a8f   :  { %v25886_v21 = vpop.f32.mrf.mxu0  ;;  %v25907_v58 = vpop.f32.mrf.mxu1 }
0x1a90   :  { %v20137_v44 = vadd.f32 %v20136_v59, %v20064_v38 }
0x1a92   :  { %v20611_v51 = vmul.f32 0.35355338, %v20137_v44 }
0x1a94   :  { %v20613_v54 = vsel %vm13418_vm3, %v20611_v51, -inf }
0x1a95   :  { %v20457_v1 = vpop.f32.mrf.mxu1  ;;  %20614 = vmax.xlane.f32.xlu1 %v20613_v54  ;;  %v20225_v15 = vpop.f32.mrf.mxu0 }
0x1a96   :  { %v20307_v48 = vadd.f32 %v20306_v0, %v20225_v15 }
0x1a97   :  { %v25900_v33 = vpop.f32.mrf.mxu0  ;;  %v25921_v46 = vpop.f32.mrf.mxu1 }
0x1a9d   :  { %v20382_v35 = vpop.f32.mrf.mxu0  ;;  %v20607_v23 = vpop.f32.mrf.mxu1 }
0x1a9e   :  { %v20383_v11 = vadd.f32 %v20382_v35, %v20307_v48 }
0x1a9f   :  { %v25914_v26 = vpop.f32.mrf.mxu0  ;;  %v25935_v25 = vpop.f32.mrf.mxu1 }
0x1aa0   :  { %v20458_v10 = vadd.f32 %v20457_v1, %v20383_v11 }
0x1aa5   :  { %v20534_v28 = vpop.f32.mrf.mxu0 }
0x1aa6   :  { %v20535_v29 = vadd.f32 %v20534_v28, %v20458_v10  ;;  %20635 = vrot.lane.b32.xlu1 %v28045_v12, %s26498_s20 }
0x1aa7   :  { %v25928_v53 = vpop.f32.mrf.mxu0 }
0x1aa8   :  { %v20608_v49 = vadd.f32 %v20607_v23, %v20535_v29 }
0x1aaa   :  { %v20612_v4 = vmul.f32 0.35355338, %v20608_v49 }
0x1aac   :  { %v20616_v39 = vsel %vm13418_vm3, %v20612_v4, -inf }
0x1aad   :  { %20617 = vmax.xlane.f32.xlu0 %v20616_v39 }
0x1b1e   :  { %v20615_v6 = vpop.xlane.xlu1 %20614 }
0x1b1f   :  { %v20619_v22 = vsub.f32 %v20611_v51, %v20615_v6 }
0x1b21   :  { %v20621_v5 = vmul.f32 1.442695, %v20619_v22 }
0x1b23   :  { %26315 = vpow2.f32 %v20621_v5 }
0x1b30   :  { %v26316_v7 = vpop.eup %26315 }
0x1b31   :  { %v20625_v24 = vsel %vm13418_vm3, %v26316_v7, 0.0 }
0x1b32   :  { %20626 = vadd.xlane.f32.xlu0 %v20625_v24 }
0x1b36   :  { %v20618_v52 = vpop.xlane.xlu0 %20617 }
0x1b37   :  { %v20620_v36 = vsub.f32 %v20612_v4, %v20618_v52 }
0x1b39   :  { %v20623_v60 = vmul.f32 1.442695, %v20620_v36 }
0x1b3b   :  { %26317 = vpow2.f32 %v20623_v60 }
0x1b48   :  { %v28823_v18 = vpop.eup %26317  ;;  %20637 = vrot.lane.b32.xlu0 %v28048_v31, %s26498_s20  ;;  %v20636_v31 = vpop.permute.xlu1 %20635 }
0x1b49   :  { %v20628_v12 = vsel %vm13418_vm3, %v28823_v18, 0.0  ;;  %v20676_v43 = vand.u32 4294901760, %v20636_v31 }
0x1b4a   :  { %20629 = vadd.xlane.f32.xlu1 %v20628_v12 }
0x1b4b   :  { %v20758_v32 = vsub.f32 %v20636_v31, %v20676_v43 }
0x1b4c   :  { %21103 = vrot.lane.b32.xlu0 %v28071_v14, %s26498_s20 }
0x1b4d   :  { %v20759_v14 = vand.u32 4294901760, %v20758_v32 }
0x1b50   :  { %22071 = vrot.lane.b32.xlu0 %v26348_v42, %s26494_s12 }
0x1b5b   :  { %21105 = vrot.lane.b32.xlu1 %v28067_v16, %s26498_s20  ;;  %v20760_v16 = vsub.f32 %v20758_v32, %v20759_v14 }
0x1b5d   :  { %v20761_v59 = vand.u32 4294901760, %v20760_v16 }
0x1b5f   :  { %21571 = vrot.lane.b32.xlu1 %v26349_v17, %s26494_s12 }
0x1bbb   :  { %v20627_v57 = vpop.xlane.xlu0 %20626 }
0x1bbc   :  { %26319 = vrcp.f32 %v20627_v57 }
0x1bbf   :  { %v20638_v20 = vpop.permute.xlu0 %20637 }
0x1bc0   :  { %v20673_v62 = vand.u32 4294901760, %v20638_v20 }
0x1bc2   :  { %v20751_v47 = vsub.f32 %v20638_v20, %v20673_v62  ;;  %25937 = vmatpush3.msra.mxu0 %v20673_v62 }
0x1bc3   :  { %25938 = vmatprep.subr.mxu0 %v26489_v30  ;;  %v21104_v19 = vpop.permute.xlu0 %21103 }
0x1bc4   :  { %v20752_v56 = vand.u32 4294901760, %v20751_v47  ;;  %25939 = vmatpush3.msra.mxu0 %v20676_v43  ;;  %v28846_v0 = vand.u32 4294901760, %v21104_v19 }
0x1bc5   :  { %25950 = vmatprep.subr.mxu0 %v26489_v30 }
0x1bc6   :  { %v20753_v2 = vsub.f32 %v20751_v47, %v20752_v56  ;;  %v28853_v44 = vsub.f32 %v21104_v19, %v28846_v0 }
0x1bc8   :  { %v20754_v50 = vand.u32 4294901760, %v20753_v2  ;;  %v21227_v1 = vand.u32 4294901760, %v28853_v44 }
0x1bc9   :  { %v26320_v8 = vpop.eup %26319 }
0x1bca   :  { %v20633_v34 = vmul.f32 %v26320_v8, %v26316_v7  ;;  %25944 = vmatpush3.msra.mxu1 %v20754_v50  ;;  %v21228_v46 = vsub.f32 %v28853_v44, %v21227_v1 }
0x1bcb   :  { %25945 = vmatprep.subr.mxu1 %v26489_v30 }
0x1bcc   :  { %25946 = vmatpush3.msra.mxu1 %v20761_v59  ;;  %v20642_v3 = vsel %vm13418_vm3, %v20633_v34, 0  ;;  %v21229_v26 = vand.u32 4294901760, %v21228_v46 }
0x1bcd   :  { %25957 = vmatprep.subr.mxu1 %v26489_v30  ;;  %v20711_v13 = vand.u32 4294901760, %v20642_v3 }
0x1bcf   :  { %v20712_v27 = vsub.f32 %v20642_v3, %v20711_v13  ;;  %25948 = vmatmul.mubr.f32.vlgmr.msra.gmra.mxu1 %v20711_v13 }
0x1bd0   :  { %25958 = vmatpush3.msra.mxu1 %v20673_v62  ;;  %25961 = vmatprep.mubr.msk.f32.mxu1 %vm26490_vm1, %v26489_v30 }
0x1bd1   :  { %25959 = vmatprep.subr.mxu1 %v26489_v30  ;;  %v20713_v37 = vand.u32 4294901760, %v20712_v27 }
0x1bd2   :  { %25960 = vmatpush3.msra.mxu1 %v20676_v43 }
0x1bd3   :  { %25971 = vmatprep.subr.mxu1 %v26489_v30  ;;  %v20630_v38 = vpop.xlane.xlu1 %20629  ;;  %25962 = vmatmul.mubr.f32.vlgmr.msra.gmra.mxu1 %v20713_v37  ;;  %v20714_v21 = vsub.f32 %v20712_v27, %v20713_v37 }
0x1bd4   :  { %26321 = vrcp.f32 %v20630_v38  ;;  %25972 = vmatpush3.msra.mxu1 %v20673_v62  ;;  %25975 = vmatprep.mubr.msk.f32.mxu1 %vm26490_vm1, %v26489_v30 }
0x1bd5   :  { %25973 = vmatprep.subr.mxu1 %v26489_v30  ;;  %v20715_v58 = vand.u32 4294901760, %v20714_v21 }
0x1bd6   :  { %25974 = vmatpush3.msra.mxu1 %v20676_v43 }
0x1bd7   :  { %v21106_v51 = vpop.permute.xlu1 %21105  ;;  %25941 = vmatmul.mubr.f32.vlgmr.msra.gmra.mxu0 %v20715_v58  ;;  %25976 = vmatmul.mubr.f32.vlgmr.msra.gmra.mxu1 %v20711_v13 }
0x1bd8   :  { %v21141_v54 = vand.u32 4294901760, %v21106_v51  ;;  %25951 = vmatpush3.msra.mxu0 %v20751_v47  ;;  %25954 = vmatprep.mubr.msk.f32.mxu0 %vm26490_vm1, %v26489_v30 }
0x1bd9   :  { %25952 = vmatprep.subr.mxu0 %v26489_v30  ;;  %25985 = vmatprep.subr.mxu1 %v26489_v30 }
0x1bda   :  { %v21219_v15 = vsub.f32 %v21106_v51, %v21141_v54  ;;  %25953 = vmatpush3.msra.mxu0 %v20758_v32  ;;  %25989 = vmatprep.mubr.msk.f32.mxu1 %vm26490_vm1, %v26489_v30 }
0x1bdb   :  { %25964 = vmatprep.subr.mxu0 %v26489_v30  ;;  %25955 = vmatmul.mubr.f32.vlgmr.msra.gmra.mxu0 %v20712_v27  ;;  %v21572_v4 = vpop.permute.xlu1 %21571 }
0x1bdc   :  { %v21220_v33 = vand.u32 4294901760, %v21219_v15  ;;  %25965 = vmatpush3.msra.mxu0 %v20752_v56  ;;  %25968 = vmatprep.mubr.msk.f32.mxu0 %vm26490_vm1, %v26489_v30  ;;  %v21611_v39 = vand.u32 4294901760, %v21572_v4 }
0x1bdd   :  { %25966 = vmatprep.subr.mxu0 %v26489_v30 }
0x1bde   :  { %v21221_v35 = vsub.f32 %v21219_v15, %v21220_v33  ;;  %25967 = vmatpush3.msra.mxu0 %v20759_v14  ;;  %v28894_v6 = vsub.f32 %v21572_v4, %v21611_v39 }
0x1bdf   :  { %25978 = vmatprep.subr.mxu0 %v26489_v30  ;;  %25969 = vmatmul.mubr.f32.vlgmr.msra.gmra.mxu0 %v20711_v13 }
0x1be0   :  { %v21222_v23 = vand.u32 4294901760, %v21221_v35  ;;  %25979 = vmatpush3.msra.mxu0 %v21141_v54  ;;  %25982 = vmatprep.mubr.msk.f32.mxu0 %vm26490_vm1, %v26489_v30  ;;  %v28898_v22 = vand.u32 4294901760, %v28894_v6 }
0x1be1   :  { %v26322_v48 = vpop.eup %26321  ;;  %25980 = vmatprep.subr.mxu0 %v26489_v30 }
0x1be2   :  { %v20634_v25 = vmul.f32 %v26322_v48, %v28823_v18  ;;  %25981 = vmatpush3.msra.mxu0 %v28846_v0  ;;  %25986 = vmatpush3.msra.mxu1 %v21222_v23  ;;  %v21700_v5 = vsub.f32 %v28894_v6, %v28898_v22 }
0x1be3   :  { %25987 = vmatprep.subr.mxu1 %v26489_v30  ;;  %25992 = vmatprep.subr.mxu0 %v26489_v30 }
0x1be4   :  { %25988 = vmatpush3.msra.mxu1 %v21229_v26  ;;  %v21110_v11 = vsel %vm13418_vm3, %v20634_v25, 0  ;;  %v21701_v7 = vand.u32 4294901760, %v21700_v5 }
0x1be5   :  { %25999 = vmatprep.subr.mxu1 %v26489_v30  ;;  %v21179_v10 = vand.u32 4294901760, %v21110_v11 }
0x1be7   :  { %v21180_v28 = vsub.f32 %v21110_v11, %v21179_v10  ;;  %25990 = vmatmul.mubr.f32.vlgmr.msra.gmra.mxu1 %v21179_v10 }
0x1be8   :  { %26000 = vmatpush3.msra.mxu1 %v21141_v54  ;;  %26003 = vmatprep.mubr.msk.f32.mxu1 %vm26490_vm1, %v26489_v30 }
0x1be9   :  { %26001 = vmatprep.subr.mxu1 %v26489_v30  ;;  %v21181_v29 = vand.u32 4294901760, %v21180_v28 }
0x1bea   :  { %26002 = vmatpush3.msra.mxu1 %v28846_v0 }
0x1beb   :  { %26013 = vmatprep.subr.mxu1 %v26489_v30  ;;  %26004 = vmatmul.mubr.f32.vlgmr.msra.gmra.mxu1 %v21181_v29  ;;  %v21182_v53 = vsub.f32 %v21180_v28, %v21181_v29 }
0x1bec   :  { %26014 = vmatpush3.msra.mxu1 %v21141_v54  ;;  %26017 = vmatprep.mubr.msk.f32.mxu1 %vm26490_vm1, %v26489_v30 }
0x1bed   :  { %26015 = vmatprep.subr.mxu1 %v26489_v30  ;;  %v21183_v49 = vand.u32 4294901760, %v21182_v53 }
0x1bee   :  { %26016 = vmatpush3.msra.mxu1 %v28846_v0 }
0x1bef   :  { %25983 = vmatmul.mubr.f32.vlgmr.msra.gmra.mxu0 %v21183_v49  ;;  %26018 = vmatmul.mubr.f32.vlgmr.msra.gmra.mxu1 %v21179_v10 }
0x1bf0   :  { %25993 = vmatpush3.msra.mxu0 %v21219_v15  ;;  %25996 = vmatprep.mubr.msk.f32.mxu0 %vm26490_vm1, %v26489_v30 }
0x1bf1   :  { %25994 = vmatprep.subr.mxu0 %v26489_v30  ;;  %26025 = vmatprep.subr.mxu1 %v21701_v7 }
0x1bf2   :  { %25995 = vmatpush3.msra.mxu0 %v28853_v44  ;;  %26026 = vmatpush3.msra.mxu1 %v21701_v7 }
0x1bf3   :  { %26006 = vmatprep.subr.mxu0 %v26489_v30  ;;  %25997 = vmatmul.mubr.f32.vlgmr.msra.gmra.mxu0 %v21180_v28 }
0x1bf4   :  { %26007 = vmatpush3.msra.mxu0 %v21220_v33  ;;  %26010 = vmatprep.mubr.msk.f32.mxu0 %vm26490_vm1, %v26489_v30 }
0x1bf5   :  { %26008 = vmatprep.subr.mxu0 %v26489_v30  ;;  %26035 = vmatprep.subr.mxu1 %v21611_v39 }
0x1bf6   :  { %26009 = vmatpush3.msra.mxu0 %v21227_v1 }
0x1bf7   :  { %26011 = vmatmul.mubr.f32.vlgmr.msra.gmra.mxu0 %v21179_v10  ;;  %26020 = vmatprep.subr.mxu0 %v21611_v39 }
0x1bf8   :  { %26021 = vmatpush3.msra.mxu0 %v21611_v39 }
0x1bf9   :  { %26030 = vmatprep.subr.mxu0 %v28894_v6 }
0x1c8f   :  { %v20798_v30 = vpop.f32.mrf.mxu1 }
0x1c91   :  { %v25949_v24 = vpop.f32.mrf.mxu1 }
0x1c93   :  { %v20949_v52 = vpop.f32.mrf.mxu1 }
0x1c95   :  { %v25963_v36 = vpop.f32.mrf.mxu1 }
0x1c97   :  { %v20717_v60 = vpop.f32.mrf.mxu0  ;;  %v21099_v18 = vpop.f32.mrf.mxu1 }
0x1c98   :  { %v20799_v17 = vadd.f32 %v20798_v30, %v20717_v60 }
0x1c99   :  { %v25942_v12 = vpop.f32.mrf.mxu0  ;;  %v25977_v42 = vpop.f32.mrf.mxu1 }
0x1c9b   :  { %v20874_v31 = vpop.f32.mrf.mxu0 }
0x1c9c   :  { %v20875_v43 = vadd.f32 %v20874_v31, %v20799_v17 }
0x1c9d   :  { %v25956_v57 = vpop.f32.mrf.mxu0 }
0x1c9e   :  { %v20950_v32 = vadd.f32 %v20949_v52, %v20875_v43  ;;  %v22072_v43 = vpop.permute.xlu0 %22071 }
0x1c9f   :  { %v21026_v20 = vpop.f32.mrf.mxu0 }
0x1ca0   :  { %v21027_v62 = vadd.f32 %v21026_v20, %v20950_v32 }
0x1ca1   :  { %v25970_v14 = vpop.f32.mrf.mxu0 }
0x1ca2   :  { %v21100_v47 = vadd.f32 %v21099_v18, %v21027_v62 }
0x1ca4   :  { %v21575_v56 = vsel %vm1230_vm2, %v21100_v47, 0 }
0x1ca5   :  { %v21646_v16 = vand.u32 4294901760, %v21575_v56 }
0x1ca7   :  { %v21647_v2 = vsub.f32 %v21575_v56, %v21646_v16  ;;  %v21266_v50 = vpop.f32.mrf.mxu1  ;;  %26027 = vmatprep.mubr.f32.mxu1 %v21646_v16 }
0x1ca9   :  { %v25991_v8 = vpop.f32.mrf.mxu1  ;;  %v21648_v59 = vand.u32 4294901760, %v21647_v2 }
0x1cab   :  { %v21417_v34 = vpop.f32.mrf.mxu1  ;;  %v21649_v3 = vsub.f32 %v21647_v2, %v21648_v59 }
0x1cad   :  { %v26005_v13 = vpop.f32.mrf.mxu1  ;;  %v21650_v19 = vand.u32 4294901760, %v21649_v3 }
0x1caf   :  { %v21185_v27 = vpop.f32.mrf.mxu0  ;;  %v21567_v37 = vpop.f32.mrf.mxu1  ;;  %26022 = vmatprep.mubr.f32.mxu0 %v21650_v19 }
0x1cb0   :  { %v21267_v21 = vadd.f32 %v21266_v50, %v21185_v27 }
0x1cb1   :  { %v25984_v0 = vpop.f32.mrf.mxu0  ;;  %v26019_v38 = vpop.f32.mrf.mxu1 }
0x1cb3   :  { %v21342_v58 = vpop.f32.mrf.mxu0 }
0x1cb4   :  { %v21343_v44 = vadd.f32 %v21342_v58, %v21267_v21 }
0x1cb5   :  { %v25998_v51 = vpop.f32.mrf.mxu0 }
0x1cb6   :  { %v21418_v54 = vadd.f32 %v21417_v34, %v21343_v44  ;;  %v22106_v51 = vsub.s32 4, %v27431_v9 }
0x1cb7   :  { %v21494_v1 = vpop.f32.mrf.mxu0 }
0x1cb8   :  { %v21495_v15 = vadd.f32 %v21494_v1, %v21418_v54  ;;  %v22112_v54 = vsub.s32 5, %v27431_v9  ;;  %v28920_v1 = vld [vmem:[%s29258_s6] sm:$0xff] }
0x1cb9   :  { %v26012_v33 = vpop.f32.mrf.mxu0 }
0x1cba   :  { %v21568_v46 = vadd.f32 %v21567_v37, %v21495_v15  ;;  %v22107_v15 = vrot.slane %v28920_v1, %v22106_v51 }
0x1cbc   :  { %v21578_v35 = vsel %vm1230_vm2, %v21568_v46, 0 }
0x1cbd   :  { %v21656_v23 = vand.u32 4294901760, %v21578_v35 }
0x1cbf   :  { %v21657_v48 = vsub.f32 %v21578_v35, %v21656_v23  ;;  %26028 = vmatmul.mubr.f32.vlgmr.msra.gmra.mxu1 %v21656_v23  ;;  %v22113_v35 = vrot.slane %v28920_v1, %v22112_v54 }
0x1cc0   :  { %26036 = vmatpush3.msra.mxu1 %v21611_v39  ;;  %26037 = vmatprep.mubr.f32.mxu1 %v21648_v59 }
0x1cc1   :  { %v21658_v26 = vand.u32 4294901760, %v21657_v48  ;;  %26045 = vmatprep.subr.mxu1 %v21611_v39 }
0x1cc3   :  { %v21659_v25 = vsub.f32 %v21657_v48, %v21658_v26  ;;  %26038 = vmatmul.mubr.f32.vlgmr.msra.gmra.mxu1 %v21658_v26 }
0x1cc4   :  { %26046 = vmatpush3.msra.mxu1 %v21611_v39  ;;  %26047 = vmatprep.mubr.f32.mxu1 %v21646_v16 }
0x1cc5   :  { %v21660_v11 = vand.u32 4294901760, %v21659_v25 }
0x1cc7   :  { %26023 = vmatmul.mubr.f32.vlgmr.msra.gmra.mxu0 %v21660_v11  ;;  %26048 = vmatmul.mubr.f32.vlgmr.msra.gmra.mxu1 %v21656_v23 }
0x1cc8   :  { %26031 = vmatpush3.msra.mxu0 %v28894_v6  ;;  %26032 = vmatprep.mubr.f32.mxu0 %v21647_v2 }
0x1cc9   :  { %26040 = vmatprep.subr.mxu0 %v28898_v22 }
0x1ccb   :  { %26033 = vmatmul.mubr.f32.vlgmr.msra.gmra.mxu0 %v21657_v48 }
0x1ccc   :  { %26041 = vmatpush3.msra.mxu0 %v28898_v22  ;;  %26042 = vmatprep.mubr.f32.mxu0 %v21646_v16 }
0x1ccf   :  { %26043 = vmatmul.mubr.f32.vlgmr.msra.gmra.mxu0 %v21656_v23 }
0x1d7f   :  { %v26029_v10 = vpop.f32.mrf.mxu1 }
0x1d81   :  { %v21738_v28 = vpop.f32.mrf.mxu1 }
0x1d83   :  { %v26039_v29 = vpop.f32.mrf.mxu1 }
0x1d85   :  { %v21899_v39 = vpop.f32.mrf.mxu1 }
0x1d87   :  { %v26024_v53 = vpop.f32.mrf.mxu0  ;;  %v26049_v36 = vpop.f32.mrf.mxu1 }
0x1d88   :  { %v21745_v4 = vadd.f32 %v26029_v10, %v26024_v53 }
0x1d89   :  { %v21652_v49 = vpop.f32.mrf.mxu0  ;;  %v22059_v31 = vpop.f32.mrf.mxu1 }
0x1d8a   :  { %v21739_v7 = vadd.f32 %v21738_v28, %v21652_v49 }
0x1d8b   :  { %v26034_v5 = vpop.f32.mrf.mxu0 }
0x1d8c   :  { %v21826_v30 = vadd.f32 %v26034_v5, %v21745_v4 }
0x1d8d   :  { %v21818_v24 = vpop.f32.mrf.mxu0 }
0x1d8e   :  { %v21819_v6 = vadd.f32 %v21818_v24, %v21739_v7  ;;  %v21908_v52 = vadd.f32 %v26039_v29, %v21826_v30 }
0x1d8f   :  { %v26044_v60 = vpop.f32.mrf.mxu0 }
0x1d90   :  { %v21988_v18 = vadd.f32 %v26044_v60, %v21908_v52  ;;  %v21900_v12 = vadd.f32 %v21899_v39, %v21819_v6 }
0x1d91   :  { %v21981_v22 = vpop.f32.mrf.mxu0 }
0x1d92   :  { %v22066_v42 = vadd.f32 %v26049_v36, %v21988_v18  ;;  %v21982_v17 = vadd.f32 %v21981_v22, %v21900_v12  ;;  %v22159_v36 = vld [vmem:[#allocation10 + $0x18] sm:$0xff]  ;;  %v22158_v18 = vld [vmem:[#allocation10 + $0x10] sm:$0xff] }
0x1d93   :  { %v28938_v60 = vand.u32 4294901760, %v22159_v36  ;;  %v28943_v22 = vand.u32 4294901760, %v22158_v18 }
0x1d94   :  { %v22060_v57 = vadd.f32 %v22059_v31, %v21982_v17  ;;  %v22070_v32 = vadd.f32 %v22066_v42, %v28813_v63  ;;  %v22157_v42 = vld [vmem:[#allocation10 + $0x8] sm:$0xff] }
0x1d95   :  { %v28941_v12 = vsub.f32 %v22159_v36, %v28938_v60  ;;  %26050 = vmatprep.subr.mxu0 %v28938_v60  ;;  %v28951_v31 = vsub.f32 %v22158_v18, %v28943_v22 }
0x1d96   :  { %v22069_v20 = vadd.f32 %v22060_v57, %v28816_v45  ;;  %v22075_v62 = vadd.f32 %v22072_v43, %v22070_v32  ;;  %26051 = vmatpush3.msra.mxu0 %v28938_v60  ;;  %v22156_v57 = vld [vmem:[#allocation10] sm:$0xff] }
0x1d97   :  { %v28948_v17 = vand.u32 4294901760, %v28941_v12  ;;  %26052 = vmatprep.subr.mxu0 %v28943_v22 }
0x1d98   :  { %v22074_v14 = vadd.f32 %v22072_v43, %v22069_v20  ;;  %v22077_v47 = vadd.f32 %v22075_v62, %v27534_v61  ;;  %v28953_v43 = vand.u32 4294901760, %v22157_v42  ;;  %26053 = vmatpush3.msra.mxu0 %v28943_v22  ;;  %v28960_v20 = vand.u32 4294901760, %v28951_v31 }
0x1d99   :  { %v22289_v32 = vsub.f32 %v28941_v12, %v28948_v17 }
0x1d9a   :  { %v22081_v56 = vsel %vm139_vm0, %v22077_v47, 0.0  ;;  %v22076_v16 = vadd.f32 %v22074_v14, %v27528_v41  ;;  %v28963_v62 = vsub.f32 %v22157_v42, %v28953_v43  ;;  %v28965_v14 = vand.u32 4294901760, %v22156_v57  ;;  %26054 = vmatprep.subr.mxu0 %v28953_v43 }
0x1d9b   :  { %22082 = vadd.xlane.f32.xlu0 %v22081_v56  ;;  %26055 = vmatpush3.msra.mxu0 %v28953_v43  ;;  %v22296_v56 = vsub.f32 %v28951_v31, %v28960_v20 }
0x1d9c   :  { %v22078_v2 = vsel %vm139_vm0, %v22076_v16, 0.0  ;;  %26056 = vmatprep.subr.mxu0 %v28965_v14 }
0x1d9d   :  { %22079 = vadd.xlane.f32.xlu1 %v22078_v2  ;;  %v28975_v2 = vsub.f32 %v22156_v57, %v28965_v14  ;;  %26057 = vmatpush3.msra.mxu0 %v28965_v14 }
0x1d9e   :  { %26072 = vmatprep.subr.mxu0 %v28941_v12 }
0x1e24   :  { %v22083_v50 = vpop.xlane.xlu0 %22082 }
0x1e25   :  { %v22085_v8 = vmul.f32 0.03125, %v22083_v50  ;;  %v22297_v50 = vand.u32 4294901760, %v22296_v56 }
0x1e26   :  { %v22080_v59 = vpop.xlane.xlu1 %22079 }
0x1e27   :  { %v22087_v34 = vsub.f32 %v22077_v47, %v22085_v8  ;;  %v22084_v3 = vmul.f32 0.03125, %v22080_v59  ;;  %v22290_v47 = vand.u32 4294901760, %v22289_v32  ;;  %v28982_v59 = vand.u32 4294901760, %v28975_v2 }
0x1e29   :  { %v22086_v63 = vsub.f32 %v22076_v16, %v22084_v3  ;;  %v22089_v13 = vmul.f32 %v22087_v34, %v22087_v34  ;;  %v28972_v16 = vand.u32 4294901760, %v28963_v62  ;;  %26061 = vmatprep.subr.mxu1 %v22290_v47  ;;  %v22310_v3 = vsub.f32 %v28975_v2, %v28982_v59 }
0x1e2a   :  { %26062 = vmatpush3.msra.mxu1 %v22290_v47  ;;  %v22704_v47 = vld [vmem:[%s29260_s8 + $0x10] sm:$0xff] }
0x1e2b   :  { %v22093_v45 = vsel %vm139_vm0, %v22089_v13, 0.0  ;;  %v22088_v19 = vmul.f32 %v22086_v63, %v22086_v63  ;;  %v22303_v8 = vsub.f32 %v28963_v62, %v28972_v16  ;;  %26063 = vmatprep.subr.mxu1 %v22297_v50 }
0x1e2c   :  { %22094 = vadd.xlane.f32.xlu1 %v22093_v45  ;;  %26064 = vmatpush3.msra.mxu1 %v22297_v50  ;;  %v29105_v50 = vand.u32 4294901760, %v22704_v47 }
0x1e2d   :  { %v22090_v27 = vsel %vm139_vm0, %v22088_v19, 0.0 }
0x1e2e   :  { %22091 = vadd.xlane.f32.xlu0 %v22090_v27 }
0x1eb5   :  { %v22095_v37 = vpop.xlane.xlu1 %22094 }
0x1eb6   :  { %v22097_v0 = vmul.f32 0.03125, %v22095_v37 }
0x1eb7   :  { %v22092_v38 = vpop.xlane.xlu0 %22091 }
0x1eb8   :  { %v22099_v21 = vadd.f32 1e-05, %v22097_v0  ;;  %v22096_v58 = vmul.f32 0.03125, %v22092_v38  ;;  %v22146_v38 = vsub.s32 6, %v27431_v9 }
0x1eba   :  { %26323 = vrsqrt.f32 %v22099_v21  ;;  %v22098_v44 = vadd.f32 1e-05, %v22096_v58  ;;  %v22152_v21 = vsub.s32 7, %v27431_v9  ;;  %v22147_v58 = vrot.slane %v28920_v1, %v22146_v38 }
0x1ebc   :  { %26325 = vrsqrt.f32 %v22098_v44  ;;  %v22153_v54 = vrot.slane %v28920_v1, %v22152_v21 }
0x1ec7   :  { %v26324_v33 = vpop.eup %26323 }
0x1ec8   :  { %v22103_v46 = vmul.f32 %v26324_v33, %v22087_v34  ;;  %v22304_v34 = vand.u32 4294901760, %v22303_v8 }
0x1ec9   :  { %v26326_v23 = vpop.eup %26325 }
0x1eca   :  { %v22109_v48 = vmul.f32 %v22107_v15, %v22103_v46  ;;  %v22102_v26 = vmul.f32 %v26326_v23, %v22086_v63  ;;  %26065 = vmatprep.subr.mxu1 %v22304_v34  ;;  %v22311_v63 = vand.u32 4294901760, %v22310_v3 }
0x1ecb   :  { %26066 = vmatpush3.msra.mxu1 %v22304_v34 }
0x1ecc   :  { %v22115_v25 = vadd.f32 %v22113_v35, %v22109_v48  ;;  %v22108_v11 = vmul.f32 %v22107_v15, %v22102_v26  ;;  %26067 = vmatprep.subr.mxu1 %v22311_v63 }
0x1ecd   :  { %26068 = vmatpush3.msra.mxu1 %v22311_v63  ;;  %v29117_v63 = vsub.f32 %v22704_v47, %v29105_v50 }
0x1ece   :  { %v22117_v10 = vadd.f32 %v22115_v25, %v27534_v61  ;;  %v22114_v28 = vadd.f32 %v22113_v35, %v22108_v11  ;;  %26083 = vmatprep.subr.mxu1 %v28938_v60 }
0x1ed0   :  { %v22121_v29 = vsel %vm139_vm0, %v22117_v10, 0.0  ;;  %v22116_v53 = vadd.f32 %v22114_v28, %v27528_v41 }
0x1ed1   :  { %22122 = vadd.xlane.f32.xlu1 %v22121_v29 }
0x1ed2   :  { %v22118_v49 = vsel %vm139_vm0, %v22116_v53, 0.0 }
0x1ed3   :  { %22119 = vadd.xlane.f32.xlu0 %v22118_v49 }
0x1f5a   :  { %v22123_v4 = vpop.xlane.xlu1 %22122 }
0x1f5b   :  { %v22125_v39 = vmul.f32 0.03125, %v22123_v4 }
0x1f5c   :  { %v22120_v5 = vpop.xlane.xlu0 %22119 }
0x1f5d   :  { %v28928_v7 = vsub.f32 %v22117_v10, %v22125_v39  ;;  %v22124_v30 = vmul.f32 0.03125, %v22120_v5 }
0x1f5f   :  { %v28930_v24 = vsub.f32 %v22116_v53, %v22124_v30  ;;  %v22129_v61 = vmul.f32 %v28928_v7, %v28928_v7  ;;  %v22709_v30 = vld [vmem:[%s29260_s8 + $0x38] sm:$0xff] }
0x1f61   :  { %v22133_v6 = vsel %vm139_vm0, %v22129_v61, 0.0  ;;  %v22128_v41 = vmul.f32 %v28930_v24, %v28930_v24  ;;  %v22708_v61 = vld [vmem:[%s29260_s8 + $0x30] sm:$0xff] }
0x1f62   :  { %22134 = vadd.xlane.f32.xlu1 %v22133_v6 }
0x1f63   :  { %v22130_v52 = vsel %vm139_vm0, %v22128_v41, 0.0  ;;  %v29050_v41 = vand.u32 4294901760, %v22708_v61 }
0x1f64   :  { %22131 = vadd.xlane.f32.xlu0 %v22130_v52  ;;  %v22707_v52 = vld [vmem:[%s29260_s8 + $0x28] sm:$0xff] }
0x1f65   :  { %v29063_v18 = vand.u32 4294901760, %v22707_v52 }
0x1feb   :  { %v22135_v13 = vpop.xlane.xlu1 %22134 }
0x1fec   :  { %v22137_v45 = vmul.f32 0.03125, %v22135_v13 }
0x1fed   :  { %v22132_v19 = vpop.xlane.xlu0 %22131 }
0x1fee   :  { %v22139_v27 = vadd.f32 1e-05, %v22137_v45  ;;  %v22136_v37 = vmul.f32 0.03125, %v22132_v19  ;;  %v22702_v19 = vld [vmem:[%s29260_s8] sm:$0xff] }
0x1fef   :  { %v29135_v38 = vand.u32 4294901760, %v22702_v19 }
0x1ff0   :  { %26327 = vrsqrt.f32 %v22139_v27  ;;  %v22138_v0 = vadd.f32 1e-05, %v22136_v37  ;;  %v29130_v37 = vand.u32 4294901760, %v29117_v63 }
0x1ff2   :  { %26329 = vrsqrt.f32 %v22138_v0 }
0x1ffd   :  { %v26328_v44 = vpop.eup %26327 }
0x1ffe   :  { %v22143_v51 = vmul.f32 %v26328_v44, %v28928_v7  ;;  %v29035_v7 = vld [vmem:[%s29261_s9] ss:$0 sm:$0xff] }
0x1fff   :  { %v26330_v15 = vpop.eup %26329  ;;  %22710 = vrot.lane.b32.xlu0 %v29035_v7, %s26488_s27 }
0x2000   :  { %v22142_v33 = vmul.f32 %v26330_v15, %v28930_v24  ;;  %v22149_v46 = vmul.f32 %v22147_v58, %v22143_v51  ;;  %v29042_v24 = vand.u32 4294901760, %v22709_v30  ;;  %v29147_v51 = vsub.f32 %v22702_v19, %v29135_v38 }
0x2002   :  { %v22148_v35 = vmul.f32 %v22147_v58, %v22142_v33  ;;  %v28994_v23 = vadd.f32 %v22153_v54, %v22149_v46  ;;  %v29048_v6 = vsub.f32 %v22709_v30, %v29042_v24  ;;  %v22868_v58 = vsub.f32 %v29117_v63, %v29130_v37 }
0x2003   :  { %v29154_v46 = vand.u32 4294901760, %v29147_v51 }
0x2004   :  { %v28996_v48 = vadd.f32 %v22153_v54, %v22148_v35  ;;  %v22170_v26 = vsel %vm139_vm0, %v28994_v23, 0  ;;  %v29058_v36 = vand.u32 4294901760, %v29048_v6  ;;  %v22869_v15 = vand.u32 4294901760, %v22868_v58 }
0x2005   :  { %v22251_v25 = vand.u32 4294901760, %v22170_v26 }
0x2006   :  { %v22167_v11 = vsel %vm139_vm0, %v28996_v48, 0 }
0x2007   :  { %v22241_v10 = vand.u32 4294901760, %v22167_v11  ;;  %v22252_v28 = vsub.f32 %v22170_v26, %v22251_v25  ;;  %v22882_v26 = vsub.f32 %v29147_v51, %v29154_v46 }
0x2009   :  { %26069 = vmatprep.mubr.f32.mxu1 %v22241_v10  ;;  %v22242_v1 = vsub.f32 %v22167_v11, %v22241_v10  ;;  %v22253_v29 = vand.u32 4294901760, %v22252_v28 }
0x200a   :  { %26070 = vmatmul.mubr.f32.vlgmr.msra.gmra.mxu1 %v22251_v25 }
0x200b   :  { %26084 = vmatpush3.msra.mxu1 %v28938_v60  ;;  %v22243_v53 = vand.u32 4294901760, %v22242_v1  ;;  %v22254_v4 = vsub.f32 %v22252_v28, %v22253_v29 }
0x200c   :  { %26085 = vmatprep.subr.mxu1 %v28943_v22 }
0x200d   :  { %26086 = vmatpush3.msra.mxu1 %v28943_v22  ;;  %26091 = vmatprep.mubr.f32.mxu1 %v22243_v53  ;;  %v22244_v49 = vsub.f32 %v22242_v1, %v22243_v53  ;;  %v22255_v5 = vand.u32 4294901760, %v22254_v4 }
0x200e   :  { %26087 = vmatprep.subr.mxu1 %v28953_v43 }
0x200f   :  { %26088 = vmatpush3.msra.mxu1 %v28953_v43  ;;  %v22245_v39 = vand.u32 4294901760, %v22244_v49 }
0x2010   :  { %26089 = vmatprep.subr.mxu1 %v28965_v14 }
0x2011   :  { %26090 = vmatpush3.msra.mxu1 %v28965_v14  ;;  %26058 = vmatprep.mubr.f32.mxu0 %v22245_v39 }
0x2012   :  { %26092 = vmatmul.mubr.f32.vlgmr.msra.gmra.mxu1 %v22253_v29  ;;  %26105 = vmatprep.subr.mxu1 %v28938_v60 }
0x2013   :  { %26059 = vmatmul.mubr.f32.vlgmr.msra.gmra.mxu0 %v22255_v5  ;;  %26106 = vmatpush3.msra.mxu1 %v28938_v60  ;;  %v29061_v60 = vsub.f32 %v22708_v61, %v29050_v41 }
0x2014   :  { %26073 = vmatpush3.msra.mxu0 %v28941_v12  ;;  %26113 = vmatprep.mubr.f32.mxu1 %v22241_v10  ;;  %v22706_v12 = vld [vmem:[%s29260_s8 + $0x20] sm:$0xff] }
0x2015   :  { %26074 = vmatprep.subr.mxu0 %v28951_v31  ;;  %26080 = vmatprep.mubr.f32.mxu0 %v22242_v1  ;;  %v29073_v42 = vand.u32 4294901760, %v29061_v60 }
0x2016   :  { %26107 = vmatprep.subr.mxu1 %v28943_v22  ;;  %26075 = vmatpush3.msra.mxu0 %v28951_v31  ;;  %v29078_v31 = vand.u32 4294901760, %v22706_v12 }
0x2017   :  { %26108 = vmatpush3.msra.mxu1 %v28943_v22  ;;  %26076 = vmatprep.subr.mxu0 %v28963_v62  ;;  %v22833_v22 = vsub.f32 %v29048_v6, %v29058_v36  ;;  %v22840_v32 = vsub.f32 %v29061_v60, %v29073_v42 }
0x2018   :  { %26109 = vmatprep.subr.mxu1 %v28953_v43  ;;  %26077 = vmatpush3.msra.mxu0 %v28963_v62  ;;  %v29091_v62 = vsub.f32 %v22706_v12, %v29078_v31 }
0x2019   :  { %26110 = vmatpush3.msra.mxu1 %v28953_v43  ;;  %26078 = vmatprep.subr.mxu0 %v28975_v2  ;;  %v22705_v43 = vld [vmem:[%s29260_s8 + $0x18] sm:$0xff]  ;;  %v22834_v57 = vand.u32 4294901760, %v22833_v22  ;;  %v22841_v56 = vand.u32 4294901760, %v22840_v32 }
0x201a   :  { %26111 = vmatprep.subr.mxu1 %v28965_v14  ;;  %26079 = vmatpush3.msra.mxu0 %v28975_v2  ;;  %v29103_v2 = vand.u32 4294901760, %v29091_v62 }
0x201b   :  { %26112 = vmatpush3.msra.mxu1 %v28965_v14  ;;  %26081 = vmatmul.mubr.f32.vlgmr.msra.gmra.mxu0 %v22252_v28  ;;  %v29094_v14 = vand.u32 4294901760, %v22705_v43 }
0x201c   :  { %26094 = vmatprep.subr.mxu0 %v28948_v17  ;;  %26114 = vmatmul.mubr.f32.vlgmr.msra.gmra.mxu1 %v22251_v25  ;;  %v22854_v3 = vsub.f32 %v29091_v62, %v29103_v2 }
0x201d   :  { %26095 = vmatpush3.msra.mxu0 %v28948_v17  ;;  %26102 = vmatprep.mubr.f32.mxu0 %v22241_v10  ;;  %v29076_v17 = vsub.f32 %v22707_v52, %v29063_v18  ;;  %v29108_v8 = vsub.f32 %v22705_v43, %v29094_v14 }
0x201e   :  { %26096 = vmatprep.subr.mxu0 %v28960_v20  ;;  %26135 = vmatprep.subr.mxu1 %v22834_v57  ;;  %v22855_v27 = vand.u32 4294901760, %v22854_v3 }
0x201f   :  { %26097 = vmatpush3.msra.mxu0 %v28960_v20  ;;  %v29088_v20 = vand.u32 4294901760, %v29076_v17  ;;  %26136 = vmatpush3.msra.mxu1 %v22834_v57  ;;  %v29123_v45 = vand.u32 4294901760, %v29108_v8 }
0x2020   :  { %26098 = vmatprep.subr.mxu0 %v28972_v16  ;;  %26137 = vmatprep.subr.mxu1 %v22841_v56 }
0x2021   :  { %26099 = vmatpush3.msra.mxu0 %v28972_v16  ;;  %v22847_v16 = vsub.f32 %v29076_v17, %v29088_v20  ;;  %26138 = vmatpush3.msra.mxu1 %v22841_v56  ;;  %v22861_v21 = vsub.f32 %v29108_v8, %v29123_v45 }
0x2022   :  { %26100 = vmatprep.subr.mxu0 %v28982_v59 }
0x2023   :  { %26101 = vmatpush3.msra.mxu0 %v28982_v59  ;;  %v22703_v59 = vld [vmem:[%s29260_s8 + $0x8] sm:$0xff]  ;;  %v22848_v34 = vand.u32 4294901760, %v22847_v16  ;;  %v22862_v54 = vand.u32 4294901760, %v22861_v21 }
0x2024   :  { %26103 = vmatmul.mubr.f32.vlgmr.msra.gmra.mxu0 %v22251_v25  ;;  %26116 = vmatprep.subr.mxu0 %v29042_v24  ;;  %v29119_v13 = vand.u32 4294901760, %v22703_v59  ;;  %v22883_v25 = vand.u32 4294901760, %v22882_v26 }
0x2025   :  { %26117 = vmatpush3.msra.mxu0 %v29042_v24  ;;  %26139 = vmatprep.subr.mxu1 %v22848_v34 }
0x2026   :  { %26118 = vmatprep.subr.mxu0 %v29050_v41  ;;  %v29133_v0 = vsub.f32 %v22703_v59, %v29119_v13  ;;  %26140 = vmatpush3.msra.mxu1 %v22848_v34 }
0x2027   :  { %26119 = vmatpush3.msra.mxu0 %v29050_v41  ;;  %26141 = vmatprep.subr.mxu1 %v22855_v27 }
0x2028   :  { %26120 = vmatprep.subr.mxu0 %v29063_v18  ;;  %v29144_v44 = vand.u32 4294901760, %v29133_v0  ;;  %26142 = vmatpush3.msra.mxu1 %v22855_v27 }
0x2029   :  { %26121 = vmatpush3.msra.mxu0 %v29063_v18  ;;  %26143 = vmatprep.subr.mxu1 %v22862_v54 }
0x202a   :  { %26122 = vmatprep.subr.mxu0 %v29078_v31  ;;  %v22875_v33 = vsub.f32 %v29133_v0, %v29144_v44  ;;  %26144 = vmatpush3.msra.mxu1 %v22862_v54 }
0x202b   :  { %26123 = vmatpush3.msra.mxu0 %v29078_v31  ;;  %26145 = vmatprep.subr.mxu1 %v22869_v15 }
0x202c   :  { %26124 = vmatprep.subr.mxu0 %v29094_v14  ;;  %v22876_v35 = vand.u32 4294901760, %v22875_v33  ;;  %26146 = vmatpush3.msra.mxu1 %v22869_v15 }
0x202d   :  { %26125 = vmatpush3.msra.mxu0 %v29094_v14 }
0x202e   :  { %26126 = vmatprep.subr.mxu0 %v29105_v50  ;;  %26147 = vmatprep.subr.mxu1 %v22876_v35 }
0x202f   :  { %26127 = vmatpush3.msra.mxu0 %v29105_v50  ;;  %26148 = vmatpush3.msra.mxu1 %v22876_v35 }
0x2030   :  { %26128 = vmatprep.subr.mxu0 %v29119_v13  ;;  %26149 = vmatprep.subr.mxu1 %v22883_v25 }
0x2031   :  { %26129 = vmatpush3.msra.mxu0 %v29119_v13  ;;  %26150 = vmatpush3.msra.mxu1 %v22883_v25 }
0x2032   :  { %26130 = vmatprep.subr.mxu0 %v29135_v38  ;;  %26173 = vmatprep.subr.mxu1 %v29042_v24 }
0x2033   :  { %26131 = vmatpush3.msra.mxu0 %v29135_v38 }
0x2034   :  { %26154 = vmatprep.subr.mxu0 %v29048_v6 }
0x20ca   :  { %v26071_v10 = vpop.f32.mrf.mxu1 }
0x20cc   :  { %v22348_v49 = vpop.f32.mrf.mxu1 }
0x20d2   :  { %v26093_v39 = vpop.f32.mrf.mxu1 }
0x20d3   :  { %v26060_v11 = vpop.f32.mrf.mxu0 }
0x20d4   :  { %v22258_v1 = vadd.f32 %v26060_v11, %v29035_v7  ;;  %v22518_v12 = vpop.f32.mrf.mxu1 }
0x20d5   :  { %v22247_v28 = vpop.f32.mrf.mxu0 }
0x20d6   :  { %v22248_v29 = vadd.f32 %v29035_v7, %v22247_v28  ;;  %v22355_v4 = vadd.f32 %v26071_v10, %v22258_v1 }
0x20d8   :  { %v22349_v61 = vadd.f32 %v22348_v49, %v22248_v29 }
0x20db   :  { %v26082_v53 = vpop.f32.mrf.mxu0 }
0x20dc   :  { %v22442_v30 = vadd.f32 %v26082_v53, %v22355_v4  ;;  %v26115_v43 = vpop.f32.mrf.mxu1 }
0x20dd   :  { %v22434_v5 = vpop.f32.mrf.mxu0 }
0x20de   :  { %v22435_v52 = vadd.f32 %v22434_v5, %v22349_v61  ;;  %v22527_v22 = vadd.f32 %v26093_v39, %v22442_v30  ;;  %v22690_v34 = vpop.f32.mrf.mxu1 }
0x20e0   :  { %v22519_v47 = vadd.f32 %v22518_v12, %v22435_v52 }
0x20e4   :  { %v26104_v57 = vpop.f32.mrf.mxu0 }
0x20e5   :  { %v22616_v32 = vadd.f32 %v26104_v57, %v22527_v22 }
0x20e6   :  { %v22609_v56 = vpop.f32.mrf.mxu0 }
0x20e7   :  { %v22697_v16 = vadd.f32 %v26115_v43, %v22616_v32  ;;  %v22610_v59 = vadd.f32 %v22609_v56, %v22519_v47 }
0x20e9   :  { %v22701_v7 = vmax.f32 %v22697_v16, 0.0  ;;  %v22691_v3 = vadd.f32 %v22690_v34, %v22610_v59  ;;  %v117_v34 = vld [vmem:[%s29258_s6 + $0x8] sm:$0x3]  ;;  %s26451_s6 = scalar_lea.vmem %s23348_s29, 256 }
0x20ea   :  { %p26452_p11 = scmp.ne.s32.totalorder %s23348_s29, %s26451_s6  ;;  %p26457_p13 = scmp.lt.s32.totalorder %s26451_s6, %s26451_s6 }
0x20eb   :  { %v22718_v19 = vsel %vm22713_vm4, %v22701_v7, 0  ;;  %v22700_v27 = vmax.f32 %v22691_v3, 0.0  ;;  %v23331_v7 = vrot.slane %v117_v34, %v10598_v55 }
0x20ec   :  { %v29163_v21 = vand.u32 4294901760, %v22718_v19  ;;  %p26458_p0 = por %p26457_p13, %p26456_p12 }
0x20ed   :  { %v22715_v58 = vsel %vm22713_vm4, %v22700_v27, 0  ;;  %v23337_v27 = vrot.slane %v117_v34, %v10604_v40 }
0x20ee   :  { %v22804_v54 = vsub.f32 %v22718_v19, %v29163_v21  ;;  %v22793_v15 = vand.u32 4294901760, %v22715_v58  ;;  %p26459_p1 = pnand %p26458_p0, %p26452_p11 }
0x20f0   :  { %v22805_v33 = vand.u32 4294901760, %v22804_v54  ;;  %v22794_v35 = vsub.f32 %v22715_v58, %v22793_v15  ;;  %26151 = vmatprep.mubr.f32.mxu1 %v22793_v15 }
0x20f1   :  { %26152 = vmatmul.mubr.f32.vlgmr.msra.gmra.mxu1 %v29163_v21 }
0x20f2   :  { %26174 = vmatpush3.msra.mxu1 %v29042_v24  ;;  %v22795_v26 = vand.u32 4294901760, %v22794_v35  ;;  %v22806_v25 = vsub.f32 %v22804_v54, %v22805_v33 }
0x20f3   :  { %26175 = vmatprep.subr.mxu1 %v29050_v41 }
0x20f4   :  { %26176 = vmatpush3.msra.mxu1 %v29050_v41  ;;  %26189 = vmatprep.mubr.f32.mxu1 %v22795_v26  ;;  %v22796_v11 = vsub.f32 %v22794_v35, %v22795_v26  ;;  %v22807_v28 = vand.u32 4294901760, %v22806_v25 }
0x20f5   :  { %26177 = vmatprep.subr.mxu1 %v29063_v18 }
0x20f6   :  { %26178 = vmatpush3.msra.mxu1 %v29063_v18  ;;  %v22797_v10 = vand.u32 4294901760, %v22796_v11 }
0x20f7   :  { %26179 = vmatprep.subr.mxu1 %v29078_v31 }
0x20f8   :  { %26180 = vmatpush3.msra.mxu1 %v29078_v31  ;;  %26132 = vmatprep.mubr.f32.mxu0 %v22797_v10 }
0x20f9   :  { %26181 = vmatprep.subr.mxu1 %v29094_v14  ;;  %26133 = vmatmul.mubr.f32.vlgmr.msra.gmra.mxu0 %v22807_v28 }
0x20fa   :  { %26155 = vmatpush3.msra.mxu0 %v29048_v6  ;;  %26182 = vmatpush3.msra.mxu1 %v29094_v14  ;;  %v22711_v6 = vpop.permute.xlu0 %22710 }
0x20fb   :  { %26156 = vmatprep.subr.mxu0 %v29061_v60  ;;  %26170 = vmatprep.mubr.f32.mxu0 %v22794_v35 }
0x20fc   :  { %26183 = vmatprep.subr.mxu1 %v29105_v50  ;;  %26157 = vmatpush3.msra.mxu0 %v29061_v60 }
0x20fd   :  { %26184 = vmatpush3.msra.mxu1 %v29105_v50  ;;  %26158 = vmatprep.subr.mxu0 %v29076_v17 }
0x20fe   :  { %26185 = vmatprep.subr.mxu1 %v29119_v13  ;;  %26159 = vmatpush3.msra.mxu0 %v29076_v17 }
0x20ff   :  { %26186 = vmatpush3.msra.mxu1 %v29119_v13  ;;  %26160 = vmatprep.subr.mxu0 %v29091_v62 }
0x2100   :  { %26187 = vmatprep.subr.mxu1 %v29135_v38  ;;  %26161 = vmatpush3.msra.mxu0 %v29091_v62 }
0x2101   :  { %26188 = vmatpush3.msra.mxu1 %v29135_v38  ;;  %26162 = vmatprep.subr.mxu0 %v29108_v8 }
0x2102   :  { %26190 = vmatmul.mubr.f32.vlgmr.msra.gmra.mxu1 %v22805_v33  ;;  %26211 = vmatprep.subr.mxu1 %v29042_v24 }
0x2103   :  { %26163 = vmatpush3.msra.mxu0 %v29108_v8  ;;  %26212 = vmatpush3.msra.mxu1 %v29042_v24 }
0x2104   :  { %26227 = vmatprep.mubr.f32.mxu1 %v22793_v15  ;;  %26164 = vmatprep.subr.mxu0 %v29117_v63 }
0x2105   :  { %26213 = vmatprep.subr.mxu1 %v29050_v41  ;;  %26165 = vmatpush3.msra.mxu0 %v29117_v63 }
0x2106   :  { %26214 = vmatpush3.msra.mxu1 %v29050_v41  ;;  %26166 = vmatprep.subr.mxu0 %v29133_v0 }
0x2107   :  { %26215 = vmatprep.subr.mxu1 %v29063_v18  ;;  %26167 = vmatpush3.msra.mxu0 %v29133_v0 }
0x2108   :  { %26216 = vmatpush3.msra.mxu1 %v29063_v18  ;;  %26168 = vmatprep.subr.mxu0 %v29147_v51 }
0x2109   :  { %26217 = vmatprep.subr.mxu1 %v29078_v31  ;;  %26169 = vmatpush3.msra.mxu0 %v29147_v51 }
0x210a   :  { %26218 = vmatpush3.msra.mxu1 %v29078_v31  ;;  %26171 = vmatmul.mubr.f32.vlgmr.msra.gmra.mxu0 %v22804_v54 }
0x210b   :  { %26192 = vmatprep.subr.mxu0 %v29058_v36  ;;  %26219 = vmatprep.subr.mxu1 %v29094_v14 }
0x210c   :  { %26193 = vmatpush3.msra.mxu0 %v29058_v36  ;;  %26208 = vmatprep.mubr.f32.mxu0 %v22793_v15 }
0x210d   :  { %26220 = vmatpush3.msra.mxu1 %v29094_v14  ;;  %26194 = vmatprep.subr.mxu0 %v29073_v42 }
0x210e   :  { %26221 = vmatprep.subr.mxu1 %v29105_v50  ;;  %26195 = vmatpush3.msra.mxu0 %v29073_v42 }
0x210f   :  { %26222 = vmatpush3.msra.mxu1 %v29105_v50  ;;  %26196 = vmatprep.subr.mxu0 %v29088_v20 }
0x2110   :  { %26223 = vmatprep.subr.mxu1 %v29119_v13  ;;  %26197 = vmatpush3.msra.mxu0 %v29088_v20 }
0x2111   :  { %26224 = vmatpush3.msra.mxu1 %v29119_v13  ;;  %26198 = vmatprep.subr.mxu0 %v29103_v2 }
0x2112   :  { %26225 = vmatprep.subr.mxu1 %v29135_v38  ;;  %26199 = vmatpush3.msra.mxu0 %v29103_v2 }
0x2113   :  { %26226 = vmatpush3.msra.mxu1 %v29135_v38  ;;  %26200 = vmatprep.subr.mxu0 %v29123_v45 }
0x2114   :  { %26228 = vmatmul.mubr.f32.vlgmr.msra.gmra.mxu1 %v29163_v21  ;;  %26201 = vmatpush3.msra.mxu0 %v29123_v45 }
0x2115   :  { %26202 = vmatprep.subr.mxu0 %v29130_v37 }
0x2116   :  { %26203 = vmatpush3.msra.mxu0 %v29130_v37 }
0x2117   :  { %26204 = vmatprep.subr.mxu0 %v29144_v44 }
0x2118   :  { %26205 = vmatpush3.msra.mxu0 %v29144_v44 }
0x2119   :  { %26206 = vmatprep.subr.mxu0 %v29154_v46 }
0x211a   :  { %26207 = vmatpush3.msra.mxu0 %v29154_v46 }
0x211b   :  { %26209 = vmatmul.mubr.f32.vlgmr.msra.gmra.mxu0 %v29163_v21 }
0x21b1   :  { %v26153_v41 = vpop.f32.mrf.mxu1 }
0x21b3   :  { %v22920_v17 = vpop.f32.mrf.mxu1 }
0x21b9   :  { %v26134_v24 = vpop.f32.mrf.mxu0 }
0x21ba   :  { %v22810_v60 = vadd.f32 %v26134_v24, %v22711_v6 }
0x21bb   :  { %v22799_v36 = vpop.f32.mrf.mxu0 }
0x21bc   :  { %v22800_v42 = vadd.f32 %v22799_v36, %v22711_v6  ;;  %v22927_v31 = vadd.f32 %v26153_v41, %v22810_v60 }
0x21be   :  { %v22921_v2 = vadd.f32 %v22920_v17, %v22800_v42 }
0x21c2   :  { %v26191_v20 = vpop.f32.mrf.mxu1 }
0x21c4   :  { %v23102_v8 = vpop.f32.mrf.mxu1 }
0x21ca   :  { %v26172_v18 = vpop.f32.mrf.mxu0 }
0x21cb   :  { %v23022_v14 = vadd.f32 %v26172_v18, %v22927_v31 }
0x21cc   :  { %v23014_v62 = vpop.f32.mrf.mxu0 }
0x21cd   :  { %v23015_v50 = vadd.f32 %v23014_v62, %v22921_v2  ;;  %v23111_v63 = vadd.f32 %v26191_v20, %v23022_v14 }
0x21cf   :  { %v23103_v0 = vadd.f32 %v23102_v8, %v23015_v50 }
0x21d4   :  { %v26229_v13 = vpop.f32.mrf.mxu1 }
0x21d6   :  { %v23290_v51 = vpop.f32.mrf.mxu1 }
0x21db   :  { %v26210_v45 = vpop.f32.mrf.mxu0 }
0x21dc   :  { %v23212_v37 = vadd.f32 %v26210_v45, %v23111_v63 }
0x21dd   :  { %v23205_v38 = vpop.f32.mrf.mxu0 }
0x21de   :  { %v23206_v44 = vadd.f32 %v23205_v38, %v23103_v0  ;;  %v23297_v46 = vadd.f32 %v26229_v13, %v23212_v37 }
0x21e0   :  { %v23291_v1 = vadd.f32 %v23290_v51, %v23206_v44  ;;  %v23301_v49 = vadd.f32 %v23297_v46, %v28994_v23 }
0x21e2   :  { %v23300_v29 = vadd.f32 %v23291_v1, %v28996_v48  ;;  %v23305_v4 = vsel %vm139_vm0, %v23301_v49, 0.0 }
0x21e4   :  { %v23302_v53 = vsel %vm139_vm0, %v23300_v29, 0.0 }
0x21e5   :  { %23303 = vadd.xlane.f32.xlu1 %v23302_v53 }
0x21e9   :  { %23306 = vadd.xlane.f32.xlu1 %v23305_v4 }
0x226e   :  { %v23304_v39 = vpop.xlane.xlu1 %23303 }
0x226f   :  { %v23308_v5 = vmul.f32 0.03125, %v23304_v39 }
0x2271   :  { %v23310_v30 = vsub.f32 %v23300_v29, %v23308_v5 }
0x2272   :  { %v23307_v61 = vpop.xlane.xlu1 %23306 }
0x2273   :  { %v23309_v52 = vmul.f32 0.03125, %v23307_v61  ;;  %v23312_v12 = vmul.f32 %v23310_v30, %v23310_v30 }
0x2275   :  { %v23311_v22 = vsub.f32 %v23301_v49, %v23309_v52  ;;  %v23314_v43 = vsel %vm139_vm0, %v23312_v12, 0.0 }
0x2276   :  { %23315 = vadd.xlane.f32.xlu1 %v23314_v43 }
0x2277   :  { %v23313_v57 = vmul.f32 %v23311_v22, %v23311_v22 }
0x2279   :  { %v23317_v48 = vsel %vm139_vm0, %v23313_v57, 0.0 }
0x227a   :  { %23318 = vadd.xlane.f32.xlu1 %v23317_v48 }
0x22ff   :  { %v23316_v32 = vpop.xlane.xlu1 %23315 }
0x2300   :  { %v23320_v23 = vmul.f32 0.03125, %v23316_v32 }
0x2302   :  { %v23322_v47 = vadd.f32 1e-05, %v23320_v23 }
0x2303   :  { %v23319_v56 = vpop.xlane.xlu1 %23318 }
0x2304   :  { %26331 = vrsqrt.f32 %v23322_v47  ;;  %v23321_v16 = vmul.f32 0.03125, %v23319_v56 }
0x2306   :  { %v23323_v59 = vadd.f32 1e-05, %v23321_v16 }
0x2308   :  { %26333 = vrsqrt.f32 %v23323_v59 }
0x2311   :  { %v26332_v3 = vpop.eup %26331 }
0x2312   :  { %v23326_v19 = vmul.f32 %v26332_v3, %v23310_v30 }
0x2314   :  { %v23332_v21 = vmul.f32 %v23331_v7, %v23326_v19 }
0x2315   :  { %v26334_v58 = vpop.eup %26333 }
0x2316   :  { %v23327_v54 = vmul.f32 %v26334_v58, %v23311_v22  ;;  %v23338_v15 = vadd.f32 %v23337_v27, %v23332_v21 }
0x2318   :  { %v23333_v33 = vmul.f32 %v23331_v7, %v23327_v54  ;;  %23340 = vst.msk [vmem:[#allocation11] sm:$0xff] %vm139_vm0, %v23338_v15 }
0x231a   :  { %v23339_v35 = vadd.f32 %v23337_v27, %v23333_v33 }
0x231c   :  { %23341 = vst.msk [vmem:[#allocation11 + $0x8] sm:$0xff] %vm139_vm0, %v23339_v35 }
0x231d   :  { %26462 = shalt.err (!%p26459_p1)
}
0x231e   :  { %23353 = dma.vmem_to_hbm [thread:$0]  %s23348_s29, 256, %s29262_s10, [#allocation4], %s26481_s18, %s26481_s18, %s26482_s19  }
0x231f   :  { %26477 = dma.done.wait [#allocation4], 256  }
0x2320   :  { %26478 = vsyncadd [#allocation4], 4294967040 }
0x2321   :  { %23357 = vsyncpa [#allocation3], 1 }
0x2322   :  { %23358 = vsyncpa [#allocation6], 1 }
0x2323   :  { %23359 = vsyncpa [#allocation9], 1 }
0x2324   :  { %23360 = vsyncpa [#allocation4], 1 }

</bundles_post_ra>
